<compile_context>
chip_gen: v6e
topology: v6e:2x2x1
jax: 0.10.0
libtpu: 0.0.40
codegen_flags: <defaults>
</compile_context>

<pallas_src>
import jax
import jax.numpy as jnp
from jax.experimental import pallas as pl
from jax.experimental.pallas import tpu as pltpu

d_model = 512
d_ff = 2048
LN_EPS = 1e-5


def _round_up(x, m):
    return (x + m - 1) // m * m


def _pick_row_tile(M, target=1024, overhead_rows=96):
    """Choose the row-tile size tm.

    Cost model: total padded rows (wasted MXU work) + per-grid-step overhead
    expressed in equivalent rows (~0.35 us ~= 96 rows of MXU on v6e/v7x).
    Prefers multiples of 16 (bf16 sublane packing) and >=2 grid steps for
    large M so v7x's two TensorCores can both be used.
    """
    if M <= 8:
        return _round_up(max(M, 1), 8)
    cands = set()
    for steps in range(1, 9):
        t = _round_up(-(-M // steps), 16)
        if 16 <= t <= target:
            cands.add(t)
    cands |= {t for t in (128, 256, 512, target) if t <= _round_up(M, 16)}
    cands = {min(t, target) for t in cands}
    best_tm, best_cost = None, None
    for tm in sorted(cands):
        Mp = _round_up(M, tm)
        steps = Mp // tm
        cost = float(Mp + overhead_rows * steps)
        if steps == 1 and M > 256:
            cost *= 2.0  # a single grid step forfeits one v7x TensorCore
        if best_cost is None or cost < best_cost or (cost == best_cost and tm > best_tm):
            best_tm, best_cost = tm, cost
    return best_tm


def _pick_vmem_limit():
    """3/4 of physical VMEM, capped at 96 MiB (v5e/v6e: 96 MiB, v7x: 48 MiB)."""
    default_cap = 64 * 1024 * 1024
    try:
        info = pltpu.get_tpu_info()
        cap = getattr(info, "vmem_capacity_bytes", default_cap)
    except Exception:
        cap = default_cap
    return int(min(96 * 1024 * 1024, max(32 * 1024 * 1024, (cap * 3) // 4)))


def _ffn_kernel(x_ref, w1_ref, b1_ref, w2_ref, b2_ref, o_ref):
    """One grid step = one tile of tm rows. Weights are resident (constant block)."""
    x = x_ref[...].astype(jnp.float32)                      # (tm, D) f32

    # First 1x1 conv + bias + ReLU: bf16 operands, f32 accumulation; keep only
    # the bf16 intermediate (it is cast to bf16 for the second matmul anyway).
    h = jnp.dot(x.astype(jnp.bfloat16), w1_ref[...],
                preferred_element_type=jnp.float32)
    h = jnp.maximum(h + b1_ref[...], 0.0).astype(jnp.bfloat16)   # (tm, d_ff) bf16

    # Second 1x1 conv: bf16 @ bf16 -> f32, then bias + residual in f32.
    y = jnp.dot(h, w2_ref[...], preferred_element_type=jnp.float32)
    y = y + b2_ref[...] + x

    # LayerNorm (gamma=1, beta=0), two-pass (centered) variance like PyTorch.
    mean = jnp.mean(y, axis=-1, keepdims=True)
    yc = y - mean
    var = jnp.mean(yc * yc, axis=-1, keepdims=True)
    o_ref[...] = (yc * jax.lax.rsqrt(var + LN_EPS)).astype(o_ref.dtype)


def _make_in_specs(tm, single_buffer_weights):
    if single_buffer_weights:
        resident = dict(pipeline_mode=pl.Buffered(1))
    else:
        resident = {}
    return [
        pl.BlockSpec((tm, d_model), lambda i: (i, 0)),               # x tile
        pl.BlockSpec((d_model, d_ff), lambda i: (0, 0), **resident),  # W1 (resident)
        pl.BlockSpec((1, d_ff), lambda i: (0, 0), **resident),        # b1 (resident)
        pl.BlockSpec((d_ff, d_model), lambda i: (0, 0), **resident),  # W2 (resident)
        pl.BlockSpec((1, d_model), lambda i: (0, 0), **resident),     # b2 (resident)
    ]


def _build_call(tm, Mp, out_dtype, vmem_limit, single_buffer_weights):
    return pl.pallas_call(
        _ffn_kernel,
        out_shape=jax.ShapeDtypeStruct((Mp, d_model), out_dtype),
        grid_spec=pltpu.PrefetchScalarGridSpec(
            num_scalar_prefetch=0,
            grid=(Mp // tm,),
            in_specs=_make_in_specs(tm, single_buffer_weights),
            out_specs=pl.BlockSpec((tm, d_model), lambda i: (i, 0)),
        ),
        compiler_params=pltpu.CompilerParams(
            dimension_semantics=("parallel",),
            vmem_limit_bytes=vmem_limit,
        ),
    )


def positionwise_ffnn(x, w1, b1, w2, b2, *, tm_target=1024):
    """x: (batch, seq, d_model) float32. w1/w2 ideally pre-cast to bf16. Returns same shape/dtype as x."""
    B, S, D = x.shape
    assert D == d_model
    M = B * S
    x2 = x.reshape(M, D).astype(jnp.float32)

    tm = _pick_row_tile(M, target=tm_target)
    Mp = _round_up(M, tm)
    if Mp != M:
        x2 = jnp.pad(x2, ((0, Mp - M), (0, 0)))

    # bf16 weights: native MXU input dtype (cast only if the caller didn't).
    w1_bf = w1 if w1.dtype == jnp.bfloat16 else w1.astype(jnp.bfloat16)
    w2_bf = w2 if w2.dtype == jnp.bfloat16 else w2.astype(jnp.bfloat16)
    b1_2d = b1.reshape(1, d_ff).astype(jnp.float32)
    b2_2d = b2.reshape(1, d_model).astype(jnp.float32)

    vmem_limit = _pick_vmem_limit()
    args = (x2, w1_bf, b1_2d, w2_bf, b2_2d)
    try:
        out = _build_call(tm, Mp, x.dtype, vmem_limit, True)(*args)
    except Exception:
        # This jax build rejects single-buffered pallas_call operands; the
        # constant index_map already avoids re-DMA, so just use the default.
        out = _build_call(tm, Mp, x.dtype, vmem_limit, False)(*args)

    if Mp != M:
        out = out[:M]
    return out.reshape(B, S, D)


# ----------------------------- references -----------------------------------

def _layernorm(y):
    mean = jnp.mean(y, axis=-1, keepdims=True)
    var = jnp.mean((y - mean) ** 2, axis=-1, keepdims=True)
    return (y - mean) * jax.lax.rsqrt(var + LN_EPS)


def _reference_f32(x, w1, b1, w2, b2):
    h = jnp.maximum(jnp.einsum("bsd,df->bsf", x, w1) + b1, 0.0)
    y = jnp.einsum("bsf,fd->bsd", h, w2) + b2 + x
    return _layernorm(y)


def _reference_bf16(x, w1, b1, w2, b2):
    # Same numeric recipe as the kernel: bf16 dot operands, f32 accumulation.
    w1_bf = w1.astype(jnp.bfloat16)
    w2_bf = w2.astype(jnp.bfloat16)
    h = jnp.einsum("bsd,df->bsf", x.astype(jnp.bfloat16), w1_bf,
                   preferred_element_type=jnp.float32)
    h = jnp.maximum(h + b1, 0.0).astype(jnp.bfloat16)
    y = jnp.einsum("bsf,fd->bsd", h, w2_bf,
                   preferred_element_type=jnp.float32)
    y = y + b2 + x
    return _layernorm(y)


if __name__ == "__main__":
    key = jax.random.PRNGKey(0)
    k_x, k_w1, k_b1, k_w2, k_b2, k_x2 = jax.random.split(key, 6)

    # Deterministic parameters (shapes match Conv1d(d_model, d_ff, 1) and
    # Conv1d(d_ff, d_model, 1); stored transposed, scaled like PyTorch default).
    w1 = jax.random.uniform(k_w1, (d_model, d_ff), jnp.float32,
                            -1.0, 1.0) * (1.0 / jnp.sqrt(d_model))
    b1 = jax.random.uniform(k_b1, (d_ff,), jnp.float32,
                            -1.0, 1.0) * (1.0 / jnp.sqrt(d_model))
    w2 = jax.random.uniform(k_w2, (d_ff, d_model), jnp.float32,
                            -1.0, 1.0) * (1.0 / jnp.sqrt(d_ff))
    b2 = jax.random.uniform(k_b2, (d_model,), jnp.float32,
                            -1.0, 1.0) * (1.0 / jnp.sqrt(d_ff))

    # Pre-convert the weights to bf16 ONCE (kernel-native dtype); per review,
    # this removes a per-call HBM convert that can't be hidden by the kernel.
    w1_bf = w1.astype(jnp.bfloat16)
    w2_bf = w2.astype(jnp.bfloat16)

    # --- Test 1: small shape (batch=2, seq=8) ---
    batch, seq = 2, 8
    x = jax.random.normal(k_x, (batch, seq, d_model), dtype=jnp.float32)
    out = jax.block_until_ready(positionwise_ffnn(x, w1_bf, b1, w2_bf, b2))
    assert out.shape == (batch, seq, d_model)

    ref_bf = _reference_bf16(x, w1, b1, w2, b2)
    assert jnp.allclose(out, ref_bf, atol=2e-4, rtol=2e-4), "mismatch vs bf16 reference"
    ref_f32 = _reference_f32(x, w1, b1, w2, b2)
    assert jnp.allclose(out, ref_f32, atol=5e-2, rtol=5e-2), "mismatch vs f32 reference"

    # --- Test 2: non-multiple row count exercises adaptive tiling + padding ---
    batch2, seq2 = 2, 300   # M = 600 -> tm = 304, grid = 2, 8 padded rows
    x2 = jax.random.normal(k_x2, (batch2, seq2, d_model), dtype=jnp.float32)
    out2 = jax.block_until_ready(positionwise_ffnn(x2, w1_bf, b1, w2_bf, b2))
    assert out2.shape == (batch2, seq2, d_model)
    ref2 = _reference_bf16(x2, w1, b1, w2, b2)
    assert jnp.allclose(out2, ref2, atol=2e-4, rtol=2e-4), "mismatch vs bf16 reference (tiled)"

    print("KERNEL_OK")
</pallas_src>

<mosaic_0001>
module attributes {stable_mosaic.version = 11 : i64} {
  func.func @_ffn_kernel(%arg0: i32, %arg1: memref<16x512xf32, #tpu.memory_space<vmem>>, %arg2: memref<512x2048xbf16, #tpu.memory_space<vmem>>, %arg3: memref<1x2048xf32, #tpu.memory_space<vmem>>, %arg4: memref<2048x512xbf16, #tpu.memory_space<vmem>>, %arg5: memref<1x512xf32, #tpu.memory_space<vmem>>, %arg6: memref<16x512xf32, #tpu.memory_space<vmem>>) attributes {dimension_semantics = [#tpu.dimension_semantics<parallel>], iteration_bounds = array<i64: 1>, scalar_prefetch = 0 : i64, scratch_operands = 0 : i64, tpu.core_type = #tpu.core_type<tc>, window_params = [{transform_indices = @transform_0, window_bounds = array<i64: 16, 512>}, {pipeline_mode = #tpu.pipeline_mode<synchronous>, transform_indices = @transform_1, window_bounds = array<i64: 512, 2048>}, {pipeline_mode = #tpu.pipeline_mode<synchronous>, transform_indices = @transform_2, window_bounds = array<i64: 1, 2048>}, {pipeline_mode = #tpu.pipeline_mode<synchronous>, transform_indices = @transform_3, window_bounds = array<i64: 2048, 512>}, {pipeline_mode = #tpu.pipeline_mode<synchronous>, transform_indices = @transform_4, window_bounds = array<i64: 1, 512>}, {transform_indices = @transform_5, window_bounds = array<i64: 16, 512>}]} {
    %c0 = arith.constant 0 : index
    %c0_0 = arith.constant 0 : index
    %0 = vector.load %arg1[%c0, %c0_0] : memref<16x512xf32, #tpu.memory_space<vmem>>, vector<16x512xf32>
    %1 = arith.truncf %0 : vector<16x512xf32> to vector<16x512xbf16>
    %c0_1 = arith.constant 0 : index
    %c0_2 = arith.constant 0 : index
    %2 = vector.load %arg2[%c0_1, %c0_2] : memref<512x2048xbf16, #tpu.memory_space<vmem>>, vector<512x2048xbf16>
    %cst = arith.constant dense<0.000000e+00> : vector<16x2048xf32>
    %3 = tpu.matmul %1, %2, %cst {dimension_numbers = #tpu.dot_dimension_numbers<[1], [0], [0], [1], [0, 0, 1, 1], [], []>} : vector<16x512xbf16>, vector<512x2048xbf16>, vector<16x2048xf32> -> vector<16x2048xf32>
    %c0_3 = arith.constant 0 : index
    %c0_4 = arith.constant 0 : index
    %4 = vector.load %arg3[%c0_3, %c0_4] : memref<1x2048xf32, #tpu.memory_space<vmem>>, vector<1x2048xf32>
    %5 = vector.broadcast %4 : vector<1x2048xf32> to vector<16x2048xf32>
    %6 = arith.addf %3, %5 : vector<16x2048xf32>
    %cst_5 = arith.constant 0.000000e+00 : f32
    %7 = vector.broadcast %cst_5 : f32 to vector<16x2048xf32>
    %8 = arith.maximumf %6, %7 : vector<16x2048xf32>
    %9 = arith.truncf %8 : vector<16x2048xf32> to vector<16x2048xbf16>
    %c0_6 = arith.constant 0 : index
    %c0_7 = arith.constant 0 : index
    %10 = vector.load %arg4[%c0_6, %c0_7] : memref<2048x512xbf16, #tpu.memory_space<vmem>>, vector<2048x512xbf16>
    %cst_8 = arith.constant dense<0.000000e+00> : vector<16x512xf32>
    %11 = tpu.matmul %9, %10, %cst_8 {dimension_numbers = #tpu.dot_dimension_numbers<[1], [0], [0], [1], [0, 0, 1, 1], [], []>} : vector<16x2048xbf16>, vector<2048x512xbf16>, vector<16x512xf32> -> vector<16x512xf32>
    %c0_9 = arith.constant 0 : index
    %c0_10 = arith.constant 0 : index
    %12 = vector.load %arg5[%c0_9, %c0_10] : memref<1x512xf32, #tpu.memory_space<vmem>>, vector<1x512xf32>
    %13 = vector.broadcast %12 : vector<1x512xf32> to vector<16x512xf32>
    %14 = arith.addf %11, %13 : vector<16x512xf32>
    %15 = arith.addf %14, %0 : vector<16x512xf32>
    %cst_11 = arith.constant dense<0.000000e+00> : vector<16xf32>
    %16 = vector.multi_reduction <add>, %15, %cst_11 [1] : vector<16x512xf32> to vector<16xf32>
    %17 = vector.shape_cast %16 : vector<16xf32> to vector<16x1xf32>
    %cst_12 = arith.constant 5.120000e+02 : f32
    %18 = vector.broadcast %cst_12 : f32 to vector<16x1xf32>
    %19 = arith.divf %17, %18 : vector<16x1xf32>
    %20 = vector.broadcast %19 : vector<16x1xf32> to vector<16x512xf32>
    %21 = arith.subf %15, %20 : vector<16x512xf32>
    %22 = arith.mulf %21, %21 : vector<16x512xf32>
    %cst_13 = arith.constant dense<0.000000e+00> : vector<16xf32>
    %23 = vector.multi_reduction <add>, %22, %cst_13 [1] : vector<16x512xf32> to vector<16xf32>
    %24 = vector.shape_cast %23 : vector<16xf32> to vector<16x1xf32>
    %cst_14 = arith.constant 5.120000e+02 : f32
    %25 = vector.broadcast %cst_14 : f32 to vector<16x1xf32>
    %26 = arith.divf %24, %25 : vector<16x1xf32>
    %cst_15 = arith.constant 9.99999974E-6 : f32
    %27 = vector.broadcast %cst_15 : f32 to vector<16x1xf32>
    %28 = arith.addf %26, %27 : vector<16x1xf32>
    %29 = math.rsqrt %28 : vector<16x1xf32>
    %30 = vector.broadcast %29 : vector<16x1xf32> to vector<16x512xf32>
    %31 = arith.mulf %21, %30 : vector<16x512xf32>
    %c0_16 = arith.constant 0 : index
    %c0_17 = arith.constant 0 : index
    %32 = vector.load %arg6[%c0_16, %c0_17] : memref<16x512xf32, #tpu.memory_space<vmem>>, vector<16x512xf32>
    tpu.vector_store %arg6[%c0_16, %c0_17], %31 {strides = array<i32>} : memref<16x512xf32, #tpu.memory_space<vmem>>, vector<16x512xf32>,
    return
  }
  func.func @transform_0(%arg0: i32) -> (i32, i32) {
    %c0_i32 = arith.constant 0 : i32
    %c0_i32_0 = arith.constant 0 : i32
    return %arg0, %c0_i32 : i32, i32
  }
  func.func @transform_1(%arg0: i32) -> (i32, i32) {
    %c0_i32 = arith.constant 0 : i32
    %c0_i32_0 = arith.constant 0 : i32
    %c0_i32_1 = arith.constant 0 : i32
    return %c0_i32, %c0_i32_0 : i32, i32
  }
  func.func @transform_2(%arg0: i32) -> (i32, i32) {
    %c0_i32 = arith.constant 0 : i32
    %c0_i32_0 = arith.constant 0 : i32
    %c0_i32_1 = arith.constant 0 : i32
    return %c0_i32, %c0_i32_0 : i32, i32
  }
  func.func @transform_3(%arg0: i32) -> (i32, i32) {
    %c0_i32 = arith.constant 0 : i32
    %c0_i32_0 = arith.constant 0 : i32
    %c0_i32_1 = arith.constant 0 : i32
    return %c0_i32, %c0_i32_0 : i32, i32
  }
  func.func @transform_4(%arg0: i32) -> (i32, i32) {
    %c0_i32 = arith.constant 0 : i32
    %c0_i32_0 = arith.constant 0 : i32
    %c0_i32_1 = arith.constant 0 : i32
    return %c0_i32, %c0_i32_0 : i32, i32
  }
  func.func @transform_5(%arg0: i32) -> (i32, i32) {
    %c0_i32 = arith.constant 0 : i32
    %c0_i32_0 = arith.constant 0 : i32
    return %arg0, %c0_i32 : i32, i32
  }
}

module attributes {stable_mosaic.version = 11 : i64} {
  func.func @_ffn_kernel(%arg0: i32, %arg1: memref<16x512xf32, #tpu.memory_space<vmem>>, %arg2: memref<512x2048xbf16, #tpu.memory_space<vmem>>, %arg3: memref<1x2048xf32, #tpu.memory_space<vmem>>, %arg4: memref<2048x512xbf16, #tpu.memory_space<vmem>>, %arg5: memref<1x512xf32, #tpu.memory_space<vmem>>, %arg6: memref<16x512xf32, #tpu.memory_space<vmem>>) attributes {dimension_semantics = [#tpu.dimension_semantics<parallel>], iteration_bounds = array<i64: 1>, scalar_prefetch = 0 : i64, scratch_operands = 0 : i64, tpu.core_type = #tpu.core_type<tc>, window_params = [{transform_indices = @transform_0, window_bounds = array<i64: 16, 512>}, {pipeline_mode = #tpu.pipeline_mode<synchronous>, transform_indices = @transform_1, window_bounds = array<i64: 512, 2048>}, {pipeline_mode = #tpu.pipeline_mode<synchronous>, transform_indices = @transform_2, window_bounds = array<i64: 1, 2048>}, {pipeline_mode = #tpu.pipeline_mode<synchronous>, transform_indices = @transform_3, window_bounds = array<i64: 2048, 512>}, {pipeline_mode = #tpu.pipeline_mode<synchronous>, transform_indices = @transform_4, window_bounds = array<i64: 1, 512>}, {transform_indices = @transform_5, window_bounds = array<i64: 16, 512>}]} {
    %c0 = arith.constant 0 : index
    %c0_0 = arith.constant 0 : index
    %0 = vector.load %arg1[%c0, %c0_0] : memref<16x512xf32, #tpu.memory_space<vmem>>, vector<16x512xf32>
    %1 = arith.truncf %0 : vector<16x512xf32> to vector<16x512xbf16>
    %c0_1 = arith.constant 0 : index
    %c0_2 = arith.constant 0 : index
    %2 = vector.load %arg2[%c0_1, %c0_2] : memref<512x2048xbf16, #tpu.memory_space<vmem>>, vector<512x2048xbf16>
    %cst = arith.constant dense<0.000000e+00> : vector<16x2048xf32>
    %3 = tpu.matmul %1, %2, %cst {dimension_numbers = #tpu.dot_dimension_numbers<[1], [0], [0], [1], [0, 0, 1, 1], [], []>} : vector<16x512xbf16>, vector<512x2048xbf16>, vector<16x2048xf32> -> vector<16x2048xf32>
    %c0_3 = arith.constant 0 : index
    %c0_4 = arith.constant 0 : index
    %4 = vector.load %arg3[%c0_3, %c0_4] : memref<1x2048xf32, #tpu.memory_space<vmem>>, vector<1x2048xf32>
    %5 = vector.broadcast %4 : vector<1x2048xf32> to vector<16x2048xf32>
    %6 = arith.addf %3, %5 : vector<16x2048xf32>
    %cst_5 = arith.constant 0.000000e+00 : f32
    %7 = vector.broadcast %cst_5 : f32 to vector<16x2048xf32>
    %8 = arith.maximumf %6, %7 : vector<16x2048xf32>
    %9 = arith.truncf %8 : vector<16x2048xf32> to vector<16x2048xbf16>
    %c0_6 = arith.constant 0 : index
    %c0_7 = arith.constant 0 : index
    %10 = vector.load %arg4[%c0_6, %c0_7] : memref<2048x512xbf16, #tpu.memory_space<vmem>>, vector<2048x512xbf16>
    %cst_8 = arith.constant dense<0.000000e+00> : vector<16x512xf32>
    %11 = tpu.matmul %9, %10, %cst_8 {dimension_numbers = #tpu.dot_dimension_numbers<[1], [0], [0], [1], [0, 0, 1, 1], [], []>} : vector<16x2048xbf16>, vector<2048x512xbf16>, vector<16x512xf32> -> vector<16x512xf32>
    %c0_9 = arith.constant 0 : index
    %c0_10 = arith.constant 0 : index
    %12 = vector.load %arg5[%c0_9, %c0_10] : memref<1x512xf32, #tpu.memory_space<vmem>>, vector<1x512xf32>
    %13 = vector.broadcast %12 : vector<1x512xf32> to vector<16x512xf32>
    %14 = arith.addf %11, %13 : vector<16x512xf32>
    %15 = arith.addf %14, %0 : vector<16x512xf32>
    %cst_11 = arith.constant dense<0.000000e+00> : vector<16xf32>
    %16 = vector.multi_reduction <add>, %15, %cst_11 [1] : vector<16x512xf32> to vector<16xf32>
    %17 = vector.shape_cast %16 : vector<16xf32> to vector<16x1xf32>
    %cst_12 = arith.constant 5.120000e+02 : f32
    %18 = vector.broadcast %cst_12 : f32 to vector<16x1xf32>
    %19 = arith.divf %17, %18 : vector<16x1xf32>
    %20 = vector.broadcast %19 : vector<16x1xf32> to vector<16x512xf32>
    %21 = arith.subf %15, %20 : vector<16x512xf32>
    %22 = arith.mulf %21, %21 : vector<16x512xf32>
    %cst_13 = arith.constant dense<0.000000e+00> : vector<16xf32>
    %23 = vector.multi_reduction <add>, %22, %cst_13 [1] : vector<16x512xf32> to vector<16xf32>
    %24 = vector.shape_cast %23 : vector<16xf32> to vector<16x1xf32>
    %cst_14 = arith.constant 5.120000e+02 : f32
    %25 = vector.broadcast %cst_14 : f32 to vector<16x1xf32>
    %26 = arith.divf %24, %25 : vector<16x1xf32>
    %cst_15 = arith.constant 9.99999974E-6 : f32
    %27 = vector.broadcast %cst_15 : f32 to vector<16x1xf32>
    %28 = arith.addf %26, %27 : vector<16x1xf32>
    %29 = math.rsqrt %28 : vector<16x1xf32>
    %30 = vector.broadcast %29 : vector<16x1xf32> to vector<16x512xf32>
    %31 = arith.mulf %21, %30 : vector<16x512xf32>
    %c0_16 = arith.constant 0 : index
    %c0_17 = arith.constant 0 : index
    %32 = vector.load %arg6[%c0_16, %c0_17] : memref<16x512xf32, #tpu.memory_space<vmem>>, vector<16x512xf32>
    tpu.vector_store %arg6[%c0_16, %c0_17], %31 {strides = array<i32>} : memref<16x512xf32, #tpu.memory_space<vmem>>, vector<16x512xf32>,
    return
  }
  func.func @transform_0(%arg0: i32) -> (i32, i32) {
    %c0_i32 = arith.constant 0 : i32
    %c0_i32_0 = arith.constant 0 : i32
    return %arg0, %c0_i32 : i32, i32
  }
  func.func @transform_1(%arg0: i32) -> (i32, i32) {
    %c0_i32 = arith.constant 0 : i32
    %c0_i32_0 = arith.constant 0 : i32
    %c0_i32_1 = arith.constant 0 : i32
    return %c0_i32, %c0_i32_0 : i32, i32
  }
  func.func @transform_2(%arg0: i32) -> (i32, i32) {
    %c0_i32 = arith.constant 0 : i32
    %c0_i32_0 = arith.constant 0 : i32
    %c0_i32_1 = arith.constant 0 : i32
    return %c0_i32, %c0_i32_0 : i32, i32
  }
  func.func @transform_3(%arg0: i32) -> (i32, i32) {
    %c0_i32 = arith.constant 0 : i32
    %c0_i32_0 = arith.constant 0 : i32
    %c0_i32_1 = arith.constant 0 : i32
    return %c0_i32, %c0_i32_0 : i32, i32
  }
  func.func @transform_4(%arg0: i32) -> (i32, i32) {
    %c0_i32 = arith.constant 0 : i32
    %c0_i32_0 = arith.constant 0 : i32
    %c0_i32_1 = arith.constant 0 : i32
    return %c0_i32, %c0_i32_0 : i32, i32
  }
  func.func @transform_5(%arg0: i32) -> (i32, i32) {
    %c0_i32 = arith.constant 0 : i32
    %c0_i32_0 = arith.constant 0 : i32
    return %arg0, %c0_i32 : i32, i32
  }
}

</mosaic_0001>

<bundles_post_ra>
// kernel: tpu_custom_call.1
= control target key start
LH: loop header
LB: loop body
LE: loop exit
PB: predicated region body
PF: predicated region fallthrough
CT: control target
= control target key end

     0   :  { %10 = vsyncpa [#allocation3], 0  ;;  %s10161_s0 = inlined_call_operand.hbm [shape: f32[16,512], index: 0, kind: input, shape index: {}]   ;;  %s10162_s1 = inlined_call_operand.hbm [shape: bf16[512,2048], index: 1, kind: input, shape index: {}]   ;;  %s10163_s2 = inlined_call_operand.hbm [shape: f32[1,2048], index: 2, kind: input, shape index: {}]   ;;  %s10164_s3 = inlined_call_operand.hbm [shape: bf16[2048,512], index: 3, kind: input, shape index: {}]   ;;  %s10165_s4 = inlined_call_operand.hbm [shape: f32[1,512], index: 4, kind: input, shape index: {}]   ;;  %s10166_s5 = inlined_call_operand.hbm [shape: f32[16,512], index: 5, kind: output, shape index: {}]  }
   0x1   :  { %11 = vsyncpa [#allocation6], 0 }
   0x2   :  { %12 = vsyncpa [#allocation9], 0 }
   0x3   :  { %13 = vsyncpa [#allocation4], 0  ;;  %s9806_s18 = smov [#allocation5]  }
   0x4   :  { %s31_s19 = sshll.u32 %s9806_s18, 4  ;;  %s32_s19 = int_to_ptr.vmem [resolvable:$true] %s31_s19 }
   0x5   :  { %s9686_s20 = scalar_lea.vmem %s32_s19, 65536  ;;  %p9691_p1 = scmp.lt.s32.totalorder %s32_s19, %s32_s19 }
   0x6   :  { %p9687_p0 = scmp.ne.s32.totalorder %s32_s19, %s9686_s20  ;;  %p9692_p2 = scmp.lt.s32.totalorder %s9686_s20, %s9686_s20 }
   0x8   :  { %p9693_p3 = por %p9692_p2, %p9691_p1 }
   0xa   :  { %p9694_p4 = pnand %p9693_p3, %p9687_p0 }
   0xc   :  { %9697 = shalt.err (!%p9694_p4)
}
   0xd   :  { %s9807_s21 = smov 1024   ;;  %s9808_s22 = smov 64  }
   0xe   :  { %37 = dma.hbm_to_vmem [thread:$0]  %s10162_s1, 65536, %s32_s19, [#allocation6], %s9807_s21, %s9807_s21, %s9808_s22  }
   0xf   :  { %s9809_s25 = smov [#allocation8]  }
  0x10   :  { %s53_s26 = sshll.u32 %s9809_s25, 4  ;;  %s54_s26 = int_to_ptr.vmem [resolvable:$true] %s53_s26 }
  0x11   :  { %s9706_s27 = scalar_lea.vmem %s54_s26, 65536  ;;  %p9711_p6 = scmp.lt.s32.totalorder %s54_s26, %s54_s26 }
  0x12   :  { %p9707_p5 = scmp.ne.s32.totalorder %s54_s26, %s9706_s27  ;;  %p9712_p7 = scmp.lt.s32.totalorder %s9706_s27, %s9706_s27 }
  0x14   :  { %p9713_p8 = por %p9712_p7, %p9711_p6 }
  0x16   :  { %p9714_p9 = pnand %p9713_p8, %p9707_p5 }
  0x18   :  { %9717 = shalt.err (!%p9714_p9)
}
  0x19   :  { %s9810_s28 = smov 256   ;;  %s9811_s29 = smov 16  }
  0x1a   :  { %59 = dma.hbm_to_vmem [thread:$0]  %s10164_s3, 65536, %s54_s26, [#allocation9], %s9810_s28, %s9810_s28, %s9811_s29  }
  0x1b   :  { %s9812_s7 = smov [#allocation2]  }
  0x1c   :  { %s19_s8 = sshll.u32 %s9812_s7, 4  ;;  %s20_s8 = int_to_ptr.vmem [resolvable:$true] %s19_s8 }
  0x1d   :  { %s9726_s1 = scalar_lea.vmem %s20_s8, 1024  ;;  %p9731_p11 = scmp.lt.s32.totalorder %s20_s8, %s20_s8 }
  0x1e   :  { %p9727_p10 = scmp.ne.s32.totalorder %s20_s8, %s9726_s1  ;;  %p9732_p12 = scmp.lt.s32.totalorder %s9726_s1, %s9726_s1 }
  0x20   :  { %p9733_p13 = por %p9732_p12, %p9731_p11 }
  0x22   :  { %p9734_p0 = pnand %p9733_p13, %p9727_p10 }
  0x24   :  { %9737 = shalt.err (!%p9734_p0)
}
  0x25   :  { %s9813_s9 = smov 512   ;;  %s9814_s10 = smov 32  }
  0x26   :  { %25 = dma.hbm_to_vmem [thread:$0]  %s10161_s0, 1024, %s20_s8, [#allocation3], %s9813_s9, %s9813_s9, %s9814_s10  }
  0x27   :  { %s9815_s3 = smov [#allocation7]   ;;  %s9816_s14 = smov [#allocation10]  }
  0x28   :  { %s44_s13 = sshll.u32 %s9815_s3, 4  ;;  %s66_s15 = sshll.u32 %s9816_s14, 4  ;;  %s45_s13 = int_to_ptr.vmem [resolvable:$true] %s44_s13  ;;  %s67_s15 = int_to_ptr.vmem [resolvable:$true] %s66_s15 }
  0x29   :  { %s9746_s16 = scalar_lea.vmem %s45_s13, 256  ;;  %p9751_p2 = scmp.lt.s32.totalorder %s45_s13, %s45_s13 }
  0x2a   :  { %p9747_p1 = scmp.ne.s32.totalorder %s45_s13, %s9746_s16  ;;  %p9752_p3 = scmp.lt.s32.totalorder %s9746_s16, %s9746_s16 }
  0x2c   :  { %p9753_p4 = por %p9752_p3, %p9751_p2 }
  0x2e   :  { %p9754_p5 = pnand %p9753_p4, %p9747_p1 }
  0x30   :  { %9757 = shalt.err (!%p9754_p5)
}
  0x31   :  { %47 = dma.hbm_to_vmem [thread:$0]  %s10163_s2, 256, %s45_s13, [#allocation6]  }
  0x32   :  { %s9766_s19 = scalar_lea.vmem %s67_s15, 64  ;;  %p9771_p7 = scmp.lt.s32.totalorder %s67_s15, %s67_s15 }
  0x33   :  { %p9767_p6 = scmp.ne.s32.totalorder %s67_s15, %s9766_s19  ;;  %p9772_p8 = scmp.lt.s32.totalorder %s9766_s19, %s9766_s19 }
  0x35   :  { %p9773_p9 = por %p9772_p8, %p9771_p7 }
  0x37   :  { %p9774_p10 = pnand %p9773_p9, %p9767_p6 }
  0x39   :  { %9777 = shalt.err (!%p9774_p10)
}
  0x3a   :  { %69 = dma.hbm_to_vmem [thread:$0]  %s10165_s4, 64, %s67_s15, [#allocation9]  }
  0x3b   :  { %9798 = dma.done.wait [#allocation3], 1024  }
  0x3c   :  { %9799 = vsyncadd [#allocation3], 4294966272 }
  0x3d   :  { %9800 = dma.done.wait [#allocation6], 65792  }
  0x3e   :  { %9801 = vsyncadd [#allocation6], 4294901504 }
  0x3f   :  { %9802 = dma.done.wait [#allocation9], 65600  }
  0x40   :  { %9803 = vsyncadd [#allocation9], 4294901696  ;;  %v209_v0 = vld [vmem:[#allocation5 + $0x380] sm:$0xff]  ;;  %v86_v54 = vld [vmem:[#allocation2 + $0x8] sm:$0xff]  ;;  %s9817_s2 = smov [#allocation11]  }
  0x41   :  { %v217_v1 = vld [vmem:[#allocation5 + $0x3c0] sm:$0xff]  ;;  %v90_v55 = vld [vmem:[#allocation2 + $0x28] sm:$0xff]  ;;  %v88_v59 = vld [vmem:[#allocation2 + $0x18] sm:$0xff]  ;;  %s7845_s4 = sshll.u32 %s9817_s2, 4  ;;  %s7846_s4 = int_to_ptr.vmem [resolvable:$true] %s7845_s4 }
  0x42   :  { %v465_v2 = vld [vmem:[#allocation5 + $0xb80] sm:$0xff]  ;;  %v7972_v3 = vcombine.high %v209_v0, %v217_v1  ;;  %v7971_v5 = vcombine.low %v209_v0, %v217_v1  ;;  %v9866_v58 = vpack.c.bf16 %v90_v55, %v86_v54  ;;  %v92_v60 = vld [vmem:[#allocation2 + $0x38] sm:$0xff]  ;;  %s9778_s21 = scalar_lea.vmem %s7846_s4, 1024  ;;  %p9783_p12 = scmp.lt.s32.totalorder %s7846_s4, %s7846_s4 }
  0x43   :  { %v473_v4 = vld [vmem:[#allocation5 + $0xbc0] sm:$0xff]  ;;  %v9868_v63 = vpack.c.bf16 %v92_v60, %v88_v59  ;;  %p9779_p11 = scmp.ne.s32.totalorder %s7846_s4, %s9778_s21  ;;  %p9784_p13 = scmp.lt.s32.totalorder %s9778_s21, %s9778_s21 }
  0x44   :  { %v193_v6 = vld [vmem:[#allocation5 + $0x300] sm:$0xff]  ;;  %v8228_v8 = vcombine.high %v465_v2, %v473_v4  ;;  %v8227_v9 = vcombine.low %v465_v2, %v473_v4  ;;  %3253 = vmatprep.subr.bf16.mxu0 %v7972_v3  ;;  %3285 = vmatprep.mubr.bf16.mxu0 %v9866_v58 }
  0x45   :  { %v201_v7 = vld [vmem:[#allocation5 + $0x340] sm:$0xff]  ;;  %3254 = vmatpush1.bf16.msra.mxu0 %v7971_v5  ;;  %3328 = vmatprep.mubr.bf16.mxu1 %v9868_v63  ;;  %p9785_p0 = por %p9784_p13, %p9783_p12 }
  0x46   :  { %v7956_v10 = vcombine.high %v193_v6, %v201_v7  ;;  %v449_v11 = vld [vmem:[#allocation5 + $0xb00] sm:$0xff]  ;;  %3296 = vmatprep.subr.bf16.mxu1 %v8228_v8  ;;  %v7955_v18 = vcombine.low %v193_v6, %v201_v7 }
  0x47   :  { %v457_v12 = vld [vmem:[#allocation5 + $0xb40] sm:$0xff]  ;;  %3297 = vmatpush1.bf16.msra.mxu1 %v8227_v9  ;;  %p9786_p1 = pnand %p9785_p0, %p9779_p11 }
  0x48   :  { %v177_v13 = vld [vmem:[#allocation5 + $0x280] sm:$0xff]  ;;  %v8212_v14 = vcombine.high %v449_v11, %v457_v12  ;;  %3255 = vmatprep.subr.bf16.mxu0 %v7956_v10  ;;  %v8211_v19 = vcombine.low %v449_v11, %v457_v12 }
  0x49   :  { %v185_v15 = vld [vmem:[#allocation5 + $0x2c0] sm:$0xff]  ;;  %3256 = vmatpush1.bf16.msra.mxu0 %v7955_v18 }
  0x4a   :  { %v433_v16 = vld [vmem:[#allocation5 + $0xa80] sm:$0xff]  ;;  %v7940_v20 = vcombine.high %v177_v13, %v185_v15  ;;  %3298 = vmatprep.subr.bf16.mxu1 %v8212_v14  ;;  %v7939_v26 = vcombine.low %v177_v13, %v185_v15 }
  0x4b   :  { %v441_v17 = vld [vmem:[#allocation5 + $0xac0] sm:$0xff]  ;;  %3299 = vmatpush1.bf16.msra.mxu1 %v8211_v19 }
  0x4c   :  { %v8196_v21 = vcombine.high %v433_v16, %v441_v17  ;;  %v161_v22 = vld [vmem:[#allocation5 + $0x200] sm:$0xff]  ;;  %3257 = vmatprep.subr.bf16.mxu0 %v7940_v20  ;;  %v8195_v27 = vcombine.low %v433_v16, %v441_v17 }
  0x4d   :  { %v169_v23 = vld [vmem:[#allocation5 + $0x240] sm:$0xff]  ;;  %3258 = vmatpush1.bf16.msra.mxu0 %v7939_v26 }
  0x4e   :  { %v417_v24 = vld [vmem:[#allocation5 + $0xa00] sm:$0xff]  ;;  %v7924_v28 = vcombine.high %v161_v22, %v169_v23  ;;  %3300 = vmatprep.subr.bf16.mxu1 %v8196_v21  ;;  %v7923_v34 = vcombine.low %v161_v22, %v169_v23 }
  0x4f   :  { %v425_v25 = vld [vmem:[#allocation5 + $0xa40] sm:$0xff]  ;;  %3301 = vmatpush1.bf16.msra.mxu1 %v8195_v27 }
  0x50   :  { %v8180_v29 = vcombine.high %v417_v24, %v425_v25  ;;  %v145_v30 = vld [vmem:[#allocation5 + $0x180] sm:$0xff]  ;;  %3259 = vmatprep.subr.bf16.mxu0 %v7924_v28  ;;  %v8179_v35 = vcombine.low %v417_v24, %v425_v25 }
  0x51   :  { %v153_v31 = vld [vmem:[#allocation5 + $0x1c0] sm:$0xff]  ;;  %3260 = vmatpush1.bf16.msra.mxu0 %v7923_v34 }
  0x52   :  { %v401_v32 = vld [vmem:[#allocation5 + $0x980] sm:$0xff]  ;;  %v7908_v36 = vcombine.high %v145_v30, %v153_v31  ;;  %3302 = vmatprep.subr.bf16.mxu1 %v8180_v29  ;;  %v7907_v42 = vcombine.low %v145_v30, %v153_v31 }
  0x53   :  { %v409_v33 = vld [vmem:[#allocation5 + $0x9c0] sm:$0xff]  ;;  %3303 = vmatpush1.bf16.msra.mxu1 %v8179_v35 }
  0x54   :  { %v8164_v37 = vcombine.high %v401_v32, %v409_v33  ;;  %v129_v38 = vld [vmem:[#allocation5 + $0x100] sm:$0xff]  ;;  %3261 = vmatprep.subr.bf16.mxu0 %v7908_v36  ;;  %v8163_v43 = vcombine.low %v401_v32, %v409_v33 }
  0x55   :  { %v137_v39 = vld [vmem:[#allocation5 + $0x140] sm:$0xff]  ;;  %3262 = vmatpush1.bf16.msra.mxu0 %v7907_v42 }
  0x56   :  { %v385_v40 = vld [vmem:[#allocation5 + $0x900] sm:$0xff]  ;;  %v7892_v44 = vcombine.high %v129_v38, %v137_v39  ;;  %3304 = vmatprep.subr.bf16.mxu1 %v8164_v37  ;;  %v7891_v50 = vcombine.low %v129_v38, %v137_v39 }
  0x57   :  { %v393_v41 = vld [vmem:[#allocation5 + $0x940] sm:$0xff]  ;;  %3305 = vmatpush1.bf16.msra.mxu1 %v8163_v43 }
  0x58   :  { %v8148_v45 = vcombine.high %v385_v40, %v393_v41  ;;  %v113_v46 = vld [vmem:[#allocation5 + $0x80] sm:$0xff]  ;;  %3263 = vmatprep.subr.bf16.mxu0 %v7892_v44  ;;  %v8147_v51 = vcombine.low %v385_v40, %v393_v41 }
  0x59   :  { %v121_v47 = vld [vmem:[#allocation5 + $0xc0] sm:$0xff]  ;;  %3264 = vmatpush1.bf16.msra.mxu0 %v7891_v50 }
  0x5a   :  { %v369_v48 = vld [vmem:[#allocation5 + $0x880] sm:$0xff]  ;;  %v7876_v52 = vcombine.high %v113_v46, %v121_v47  ;;  %3306 = vmatprep.subr.bf16.mxu1 %v8148_v45  ;;  %v7875_v0 = vcombine.low %v113_v46, %v121_v47 }
  0x5b   :  { %v377_v49 = vld [vmem:[#allocation5 + $0x8c0] sm:$0xff]  ;;  %3307 = vmatpush1.bf16.msra.mxu1 %v8147_v51 }
  0x5c   :  { %v97_v53 = vld [vmem:[#allocation5] sm:$0xff]  ;;  %v8132_v56 = vcombine.high %v369_v48, %v377_v49  ;;  %3265 = vmatprep.subr.bf16.mxu0 %v7876_v52  ;;  %v8131_v1 = vcombine.low %v369_v48, %v377_v49 }
  0x5d   :  { %v105_v57 = vld [vmem:[#allocation5 + $0x40] sm:$0xff]  ;;  %3266 = vmatpush1.bf16.msra.mxu0 %v7875_v0 }
  0x5e   :  { %v353_v61 = vld [vmem:[#allocation5 + $0x800] sm:$0xff]  ;;  %v7860_v2 = vcombine.high %v97_v53, %v105_v57  ;;  %3308 = vmatprep.subr.bf16.mxu1 %v8132_v56  ;;  %v7859_v8 = vcombine.low %v97_v53, %v105_v57 }
  0x5f   :  { %v361_v62 = vld [vmem:[#allocation5 + $0x840] sm:$0xff]  ;;  %3309 = vmatpush1.bf16.msra.mxu1 %v8131_v1 }
  0x60   :  { %v8116_v3 = vcombine.high %v353_v61, %v361_v62  ;;  %v337_v4 = vld [vmem:[#allocation5 + $0x780] sm:$0xff]  ;;  %3267 = vmatprep.subr.bf16.mxu0 %v7860_v2  ;;  %v8115_v9 = vcombine.low %v353_v61, %v361_v62 }
  0x61   :  { %v345_v5 = vld [vmem:[#allocation5 + $0x7c0] sm:$0xff]  ;;  %3268 = vmatpush1.bf16.msra.mxu0 %v7859_v8  ;;  %v466_v8 = vld [vmem:[#allocation5 + $0xb88] sm:$0xff] }
  0x62   :  { %v593_v6 = vld [vmem:[#allocation5 + $0xf80] sm:$0xff]  ;;  %v8100_v10 = vcombine.high %v337_v4, %v345_v5  ;;  %3310 = vmatprep.subr.bf16.mxu1 %v8116_v3  ;;  %v8099_v16 = vcombine.low %v337_v4, %v345_v5 }
  0x63   :  { %v601_v7 = vld [vmem:[#allocation5 + $0xfc0] sm:$0xff]  ;;  %3311 = vmatpush1.bf16.msra.mxu1 %v8115_v9  ;;  %v474_v9 = vld [vmem:[#allocation5 + $0xbc8] sm:$0xff] }
  0x64   :  { %v8356_v11 = vcombine.high %v593_v6, %v601_v7  ;;  %v321_v12 = vld [vmem:[#allocation5 + $0x700] sm:$0xff]  ;;  %3269 = vmatprep.subr.bf16.mxu0 %v8100_v10  ;;  %v8355_v17 = vcombine.low %v593_v6, %v601_v7  ;;  %v210_v6 = vld [vmem:[#allocation5 + $0x388] sm:$0xff] }
  0x65   :  { %v329_v13 = vld [vmem:[#allocation5 + $0x740] sm:$0xff]  ;;  %3270 = vmatpush2.bf16.msra.mxu0 %v8099_v16  ;;  %v218_v7 = vld [vmem:[#allocation5 + $0x3c8] sm:$0xff] }
  0x66   :  { %v577_v14 = vld [vmem:[#allocation5 + $0xf00] sm:$0xff]  ;;  %v8084_v18 = vcombine.high %v321_v12, %v329_v13  ;;  %3312 = vmatprep.subr.bf16.mxu1 %v8356_v11  ;;  %v8083_v24 = vcombine.low %v321_v12, %v329_v13  ;;  %v7974_v16 = vcombine.high %v210_v6, %v218_v7 }
  0x67   :  { %v585_v15 = vld [vmem:[#allocation5 + $0xf40] sm:$0xff]  ;;  %3313 = vmatpush2.bf16.msra.mxu1 %v8355_v17  ;;  %v8230_v17 = vcombine.high %v466_v8, %v474_v9 }
  0x68   :  { %v8340_v19 = vcombine.high %v577_v14, %v585_v15  ;;  %v305_v20 = vld [vmem:[#allocation5 + $0x680] sm:$0xff]  ;;  %3271 = vmatprep.subr.bf16.mxu0 %v8084_v18  ;;  %v8339_v25 = vcombine.low %v577_v14, %v585_v15  ;;  %v87_v14 = vld [vmem:[#allocation2 + $0x10] sm:$0xff]  ;;  %v194_v18 = vld [vmem:[#allocation5 + $0x308] sm:$0xff] }
  0x69   :  { %v313_v21 = vld [vmem:[#allocation5 + $0x6c0] sm:$0xff]  ;;  %3272 = vmatpush2.bf16.msra.mxu0 %v8083_v24  ;;  %v91_v15 = vld [vmem:[#allocation2 + $0x30] sm:$0xff]  ;;  %v7973_v24 = vcombine.low %v210_v6, %v218_v7  ;;  %v106_v6 = vld [vmem:[#allocation5 + $0x48] sm:$0xff] }
  0x6a   :  { %v561_v22 = vld [vmem:[#allocation5 + $0xe80] sm:$0xff]  ;;  %v8068_v26 = vcombine.high %v305_v20, %v313_v21  ;;  %3314 = vmatprep.subr.bf16.mxu1 %v8340_v19  ;;  %v8067_v32 = vcombine.low %v305_v20, %v313_v21  ;;  %v202_v19 = vld [vmem:[#allocation5 + $0x348] sm:$0xff] }
  0x6b   :  { %v569_v23 = vld [vmem:[#allocation5 + $0xec0] sm:$0xff]  ;;  %3315 = vmatpush2.bf16.msra.mxu1 %v8339_v25  ;;  %v450_v21 = vld [vmem:[#allocation5 + $0xb08] sm:$0xff]  ;;  %v8229_v25 = vcombine.low %v466_v8, %v474_v9 }
  0x6c   :  { %v8324_v27 = vcombine.high %v561_v22, %v569_v23  ;;  %v289_v28 = vld [vmem:[#allocation5 + $0x600] sm:$0xff]  ;;  %3273 = vmatprep.subr.bf16.mxu0 %v8068_v26  ;;  %v8323_v33 = vcombine.low %v561_v22, %v569_v23  ;;  %v458_v22 = vld [vmem:[#allocation5 + $0xb48] sm:$0xff]  ;;  %v9874_v23 = vpack.c.bf16 %v91_v15, %v87_v14  ;;  %v7958_v26 = vcombine.high %v194_v18, %v202_v19 }
  0x6d   :  { %v297_v29 = vld [vmem:[#allocation5 + $0x640] sm:$0xff]  ;;  %3274 = vmatpush2.bf16.msra.mxu0 %v8067_v32  ;;  %v7957_v32 = vcombine.low %v194_v18, %v202_v19  ;;  %v354_v7 = vld [vmem:[#allocation5 + $0x808] sm:$0xff] }
  0x6e   :  { %v545_v30 = vld [vmem:[#allocation5 + $0xe00] sm:$0xff]  ;;  %v8052_v34 = vcombine.high %v289_v28, %v297_v29  ;;  %3316 = vmatprep.subr.bf16.mxu1 %v8324_v27  ;;  %v8051_v40 = vcombine.low %v289_v28, %v297_v29  ;;  %v8214_v27 = vcombine.high %v450_v21, %v458_v22  ;;  %v178_v28 = vld [vmem:[#allocation5 + $0x288] sm:$0xff] }
  0x6f   :  { %v553_v31 = vld [vmem:[#allocation5 + $0xe40] sm:$0xff]  ;;  %3317 = vmatpush2.bf16.msra.mxu1 %v8323_v33  ;;  %v186_v29 = vld [vmem:[#allocation5 + $0x2c8] sm:$0xff]  ;;  %v8213_v33 = vcombine.low %v450_v21, %v458_v22 }
  0x70   :  { %v8308_v35 = vcombine.high %v545_v30, %v553_v31  ;;  %v273_v36 = vld [vmem:[#allocation5 + $0x580] sm:$0xff]  ;;  %3275 = vmatprep.subr.bf16.mxu0 %v8052_v34  ;;  %v8307_v41 = vcombine.low %v545_v30, %v553_v31  ;;  %v434_v30 = vld [vmem:[#allocation5 + $0xa88] sm:$0xff]  ;;  %v7942_v34 = vcombine.high %v178_v28, %v186_v29 }
  0x71   :  { %v281_v37 = vld [vmem:[#allocation5 + $0x5c0] sm:$0xff]  ;;  %3276 = vmatpush2.bf16.msra.mxu0 %v8051_v40  ;;  %v442_v31 = vld [vmem:[#allocation5 + $0xac8] sm:$0xff]  ;;  %v7941_v40 = vcombine.low %v178_v28, %v186_v29 }
  0x72   :  { %v529_v38 = vld [vmem:[#allocation5 + $0xd80] sm:$0xff]  ;;  %v8036_v42 = vcombine.high %v273_v36, %v281_v37  ;;  %3318 = vmatprep.subr.bf16.mxu1 %v8308_v35  ;;  %v8035_v48 = vcombine.low %v273_v36, %v281_v37  ;;  %v162_v35 = vld [vmem:[#allocation5 + $0x208] sm:$0xff] }
  0x73   :  { %v537_v39 = vld [vmem:[#allocation5 + $0xdc0] sm:$0xff]  ;;  %3319 = vmatpush2.bf16.msra.mxu1 %v8307_v41  ;;  %v170_v36 = vld [vmem:[#allocation5 + $0x248] sm:$0xff]  ;;  %v8197_v41 = vcombine.low %v434_v30, %v442_v31 }
  0x74   :  { %v8292_v43 = vcombine.high %v529_v38, %v537_v39  ;;  %v257_v44 = vld [vmem:[#allocation5 + $0x500] sm:$0xff]  ;;  %3277 = vmatprep.subr.bf16.mxu0 %v8036_v42  ;;  %v8291_v49 = vcombine.low %v529_v38, %v537_v39  ;;  %v418_v37 = vld [vmem:[#allocation5 + $0xa08] sm:$0xff]  ;;  %v8198_v38 = vcombine.high %v434_v30, %v442_v31  ;;  %v7926_v42 = vcombine.high %v162_v35, %v170_v36 }
  0x75   :  { %v265_v45 = vld [vmem:[#allocation5 + $0x540] sm:$0xff]  ;;  %3278 = vmatpush2.bf16.msra.mxu0 %v8035_v48  ;;  %v426_v39 = vld [vmem:[#allocation5 + $0xa48] sm:$0xff]  ;;  %v7925_v48 = vcombine.low %v162_v35, %v170_v36 }
  0x76   :  { %v513_v46 = vld [vmem:[#allocation5 + $0xd00] sm:$0xff]  ;;  %v8020_v50 = vcombine.high %v257_v44, %v265_v45  ;;  %3320 = vmatprep.subr.bf16.mxu1 %v8292_v43  ;;  %v8019_v56 = vcombine.low %v257_v44, %v265_v45  ;;  %v146_v43 = vld [vmem:[#allocation5 + $0x188] sm:$0xff] }
  0x77   :  { %v521_v47 = vld [vmem:[#allocation5 + $0xd40] sm:$0xff]  ;;  %3321 = vmatpush2.bf16.msra.mxu1 %v8291_v49  ;;  %v154_v44 = vld [vmem:[#allocation5 + $0x1c8] sm:$0xff]  ;;  %v8181_v49 = vcombine.low %v418_v37, %v426_v39 }
  0x78   :  { %v8276_v51 = vcombine.high %v513_v46, %v521_v47  ;;  %v241_v52 = vld [vmem:[#allocation5 + $0x480] sm:$0xff]  ;;  %3279 = vmatprep.subr.bf16.mxu0 %v8020_v50  ;;  %v8275_v57 = vcombine.low %v513_v46, %v521_v47  ;;  %v402_v45 = vld [vmem:[#allocation5 + $0x988] sm:$0xff]  ;;  %v8182_v46 = vcombine.high %v418_v37, %v426_v39  ;;  %v7910_v50 = vcombine.high %v146_v43, %v154_v44 }
  0x79   :  { %v249_v53 = vld [vmem:[#allocation5 + $0x4c0] sm:$0xff]  ;;  %3280 = vmatpush2.bf16.msra.mxu0 %v8019_v56  ;;  %v410_v47 = vld [vmem:[#allocation5 + $0x9c8] sm:$0xff]  ;;  %v7909_v56 = vcombine.low %v146_v43, %v154_v44 }
  0x7a   :  { %v497_v54 = vld [vmem:[#allocation5 + $0xc80] sm:$0xff]  ;;  %v8004_v59 = vcombine.high %v241_v52, %v249_v53  ;;  %3322 = vmatprep.subr.bf16.mxu1 %v8276_v51  ;;  %v8003_v2 = vcombine.low %v241_v52, %v249_v53  ;;  %v130_v51 = vld [vmem:[#allocation5 + $0x108] sm:$0xff] }
  0x7b   :  { %v505_v55 = vld [vmem:[#allocation5 + $0xcc0] sm:$0xff]  ;;  %3323 = vmatpush2.bf16.msra.mxu1 %v8275_v57  ;;  %v138_v52 = vld [vmem:[#allocation5 + $0x148] sm:$0xff]  ;;  %v8165_v57 = vcombine.low %v402_v45, %v410_v47 }
  0x7c   :  { %v8260_v60 = vcombine.high %v497_v54, %v505_v55  ;;  %v225_v61 = vld [vmem:[#allocation5 + $0x400] sm:$0xff]  ;;  %3281 = vmatprep.subr.bf16.mxu0 %v8004_v59  ;;  %v8259_v3 = vcombine.low %v497_v54, %v505_v55  ;;  %v386_v53 = vld [vmem:[#allocation5 + $0x908] sm:$0xff]  ;;  %v8166_v54 = vcombine.high %v402_v45, %v410_v47  ;;  %v7894_v59 = vcombine.high %v130_v51, %v138_v52 }
  0x7d   :  { %v233_v62 = vld [vmem:[#allocation5 + $0x440] sm:$0xff]  ;;  %3282 = vmatpush2.bf16.msra.mxu0 %v8003_v2  ;;  %v394_v55 = vld [vmem:[#allocation5 + $0x948] sm:$0xff]  ;;  %v7893_v2 = vcombine.low %v130_v51, %v138_v52 }
  0x7e   :  { %v481_v0 = vld [vmem:[#allocation5 + $0xc00] sm:$0xff]  ;;  %v7988_v4 = vcombine.high %v225_v61, %v233_v62  ;;  %3324 = vmatprep.subr.bf16.mxu1 %v8260_v60  ;;  %v7987_v10 = vcombine.low %v225_v61, %v233_v62  ;;  %v114_v60 = vld [vmem:[#allocation5 + $0x88] sm:$0xff] }
  0x7f   :  { %v489_v1 = vld [vmem:[#allocation5 + $0xc40] sm:$0xff]  ;;  %3325 = vmatpush2.bf16.msra.mxu1 %v8259_v3  ;;  %v122_v61 = vld [vmem:[#allocation5 + $0xc8] sm:$0xff]  ;;  %v8149_v3 = vcombine.low %v386_v53, %v394_v55 }
  0x80   :  { %v8244_v5 = vcombine.high %v481_v0, %v489_v1  ;;  %v85_v11 = vld [vmem:[#allocation2] sm:$0xff]  ;;  %3283 = vmatprep.subr.bf16.mxu0 %v7988_v4  ;;  %v8243_v13 = vcombine.low %v481_v0, %v489_v1  ;;  %v370_v62 = vld [vmem:[#allocation5 + $0x888] sm:$0xff]  ;;  %v8150_v0 = vcombine.high %v386_v53, %v394_v55  ;;  %v7878_v4 = vcombine.high %v114_v60, %v122_v61 }
  0x81   :  { %v89_v12 = vld [vmem:[#allocation2 + $0x20] sm:$0xff]  ;;  %3284 = vmatpush2.bf16.msra.mxu0 %v7987_v10  ;;  %v378_v1 = vld [vmem:[#allocation5 + $0x8c8] sm:$0xff]  ;;  %v7877_v10 = vcombine.low %v114_v60, %v122_v61 }
  0x82   :  { %3326 = vmatprep.subr.bf16.mxu1 %v8244_v5  ;;  %v9872_v20 = vpack.c.bf16 %v89_v12, %v85_v11  ;;  %3339 = vmatprep.subr.bf16.mxu0 %v7974_v16  ;;  %v98_v5 = vld [vmem:[#allocation5 + $0x8] sm:$0xff]  ;;  %v8134_v8 = vcombine.high %v370_v62, %v378_v1  ;;  %v8133_v11 = vcombine.low %v370_v62, %v378_v1 }
  0x83   :  { %3327 = vmatpush2.bf16.msra.mxu1 %v8243_v13  ;;  %v362_v9 = vld [vmem:[#allocation5 + $0x848] sm:$0xff]  ;;  %v7862_v12 = vcombine.high %v98_v5, %v106_v6  ;;  %v7861_v18 = vcombine.low %v98_v5, %v106_v6 }
  0x84   :  { %3382 = vmatprep.subr.bf16.mxu1 %v8230_v17  ;;  %3286 = vmatmul.mubr.bf16.vlgmr.msra.gmra.mxu0 %v9872_v20  ;;  %v338_v13 = vld [vmem:[#allocation5 + $0x788] sm:$0xff]  ;;  %v8118_v16 = vcombine.high %v354_v7, %v362_v9  ;;  %v8117_v19 = vcombine.low %v354_v7, %v362_v9 }
  0x85   :  { %3340 = vmatpush1.bf16.msra.mxu0 %v7973_v24  ;;  %3371 = vmatprep.mubr.bf16.mxu0 %v9866_v58  ;;  %v346_v14 = vld [vmem:[#allocation5 + $0x7c8] sm:$0xff] }
  0x86   :  { %3329 = vmatmul.mubr.bf16.vlgmr.msra.gmra.mxu1 %v9874_v23  ;;  %3341 = vmatprep.subr.bf16.mxu0 %v7958_v26  ;;  %v594_v15 = vld [vmem:[#allocation5 + $0xf88] sm:$0xff]  ;;  %v8102_v21 = vcombine.high %v338_v13, %v346_v14  ;;  %v8101_v28 = vcombine.low %v338_v13, %v346_v14 }
  0x87   :  { %3383 = vmatpush1.bf16.msra.mxu1 %v8229_v25  ;;  %3414 = vmatprep.mubr.bf16.mxu1 %v9868_v63  ;;  %v602_v17 = vld [vmem:[#allocation5 + $0xfc8] sm:$0xff] }
  0x88   :  { %3384 = vmatprep.subr.bf16.mxu1 %v8214_v27  ;;  %v322_v22 = vld [vmem:[#allocation5 + $0x708] sm:$0xff]  ;;  %v8358_v26 = vcombine.high %v594_v15, %v602_v17  ;;  %v8357_v29 = vcombine.low %v594_v15, %v602_v17  ;;  %v211_v17 = vld [vmem:[#allocation5 + $0x390] sm:$0xff] }
  0x89   :  { %3342 = vmatpush1.bf16.msra.mxu0 %v7957_v32  ;;  %v330_v24 = vld [vmem:[#allocation5 + $0x748] sm:$0xff] }
  0x8a   :  { %3343 = vmatprep.subr.bf16.mxu0 %v7942_v34  ;;  %v578_v25 = vld [vmem:[#allocation5 + $0xf08] sm:$0xff]  ;;  %v8086_v30 = vcombine.high %v322_v22, %v330_v24  ;;  %v8085_v36 = vcombine.low %v322_v22, %v330_v24  ;;  %v475_v22 = vld [vmem:[#allocation5 + $0xbd0] sm:$0xff] }
  0x8b   :  { %3385 = vmatpush1.bf16.msra.mxu1 %v8213_v33  ;;  %v586_v27 = vld [vmem:[#allocation5 + $0xf48] sm:$0xff] }
  0x8c   :  { %3386 = vmatprep.subr.bf16.mxu1 %v8198_v38  ;;  %v306_v31 = vld [vmem:[#allocation5 + $0x688] sm:$0xff]  ;;  %v8342_v34 = vcombine.high %v578_v25, %v586_v27  ;;  %v8341_v37 = vcombine.low %v578_v25, %v586_v27  ;;  %v195_v27 = vld [vmem:[#allocation5 + $0x310] sm:$0xff] }
  0x8d   :  { %3344 = vmatpush1.bf16.msra.mxu0 %v7941_v40  ;;  %v314_v32 = vld [vmem:[#allocation5 + $0x6c8] sm:$0xff] }
  0x8e   :  { %3345 = vmatprep.subr.bf16.mxu0 %v7926_v42  ;;  %v562_v33 = vld [vmem:[#allocation5 + $0xe88] sm:$0xff]  ;;  %v8070_v38 = vcombine.high %v306_v31, %v314_v32  ;;  %v8069_v44 = vcombine.low %v306_v31, %v314_v32  ;;  %v459_v31 = vld [vmem:[#allocation5 + $0xb50] sm:$0xff] }
  0x8f   :  { %3387 = vmatpush1.bf16.msra.mxu1 %v8197_v41  ;;  %v570_v35 = vld [vmem:[#allocation5 + $0xec8] sm:$0xff] }
  0x90   :  { %3388 = vmatprep.subr.bf16.mxu1 %v8182_v46  ;;  %v290_v39 = vld [vmem:[#allocation5 + $0x608] sm:$0xff]  ;;  %v8326_v42 = vcombine.high %v562_v33, %v570_v35  ;;  %v8325_v45 = vcombine.low %v562_v33, %v570_v35  ;;  %v179_v35 = vld [vmem:[#allocation5 + $0x290] sm:$0xff] }
  0x91   :  { %3346 = vmatpush1.bf16.msra.mxu0 %v7925_v48  ;;  %v298_v40 = vld [vmem:[#allocation5 + $0x648] sm:$0xff] }
  0x92   :  { %3347 = vmatprep.subr.bf16.mxu0 %v7910_v50  ;;  %v546_v41 = vld [vmem:[#allocation5 + $0xe08] sm:$0xff]  ;;  %v8054_v46 = vcombine.high %v290_v39, %v298_v40  ;;  %v8053_v52 = vcombine.low %v290_v39, %v298_v40  ;;  %v443_v39 = vld [vmem:[#allocation5 + $0xad0] sm:$0xff] }
  0x93   :  { %3389 = vmatpush1.bf16.msra.mxu1 %v8181_v49  ;;  %v554_v43 = vld [vmem:[#allocation5 + $0xe48] sm:$0xff] }
  0x94   :  { %3390 = vmatprep.subr.bf16.mxu1 %v8166_v54  ;;  %v274_v47 = vld [vmem:[#allocation5 + $0x588] sm:$0xff]  ;;  %v8310_v50 = vcombine.high %v546_v41, %v554_v43  ;;  %v8309_v53 = vcombine.low %v546_v41, %v554_v43  ;;  %v163_v43 = vld [vmem:[#allocation5 + $0x210] sm:$0xff] }
  0x95   :  { %3348 = vmatpush1.bf16.msra.mxu0 %v7909_v56  ;;  %v282_v48 = vld [vmem:[#allocation5 + $0x5c8] sm:$0xff] }
  0x96   :  { %3349 = vmatprep.subr.bf16.mxu0 %v7894_v59  ;;  %v530_v49 = vld [vmem:[#allocation5 + $0xd88] sm:$0xff]  ;;  %v8038_v54 = vcombine.high %v274_v47, %v282_v48  ;;  %v8037_v61 = vcombine.low %v274_v47, %v282_v48  ;;  %v427_v47 = vld [vmem:[#allocation5 + $0xa50] sm:$0xff] }
  0x97   :  { %3391 = vmatpush1.bf16.msra.mxu1 %v8165_v57  ;;  %v538_v51 = vld [vmem:[#allocation5 + $0xdc8] sm:$0xff] }
  0x98   :  { %3392 = vmatprep.subr.bf16.mxu1 %v8150_v0  ;;  %v258_v55 = vld [vmem:[#allocation5 + $0x508] sm:$0xff]  ;;  %v8294_v59 = vcombine.high %v530_v49, %v538_v51  ;;  %v8293_v62 = vcombine.low %v530_v49, %v538_v51  ;;  %v147_v51 = vld [vmem:[#allocation5 + $0x190] sm:$0xff] }
  0x99   :  { %3350 = vmatpush1.bf16.msra.mxu0 %v7893_v2  ;;  %v266_v56 = vld [vmem:[#allocation5 + $0x548] sm:$0xff] }
  0x9a   :  { %3351 = vmatprep.subr.bf16.mxu0 %v7878_v4  ;;  %v514_v57 = vld [vmem:[#allocation5 + $0xd08] sm:$0xff]  ;;  %v8022_v0 = vcombine.high %v258_v55, %v266_v56  ;;  %v8021_v6 = vcombine.low %v258_v55, %v266_v56  ;;  %v411_v55 = vld [vmem:[#allocation5 + $0x9d0] sm:$0xff] }
  0x9b   :  { %3393 = vmatpush1.bf16.msra.mxu1 %v8149_v3  ;;  %v522_v60 = vld [vmem:[#allocation5 + $0xd48] sm:$0xff] }
  0x9c   :  { %3394 = vmatprep.subr.bf16.mxu1 %v8134_v8  ;;  %v242_v1 = vld [vmem:[#allocation5 + $0x488] sm:$0xff]  ;;  %v8278_v4 = vcombine.high %v514_v57, %v522_v60  ;;  %v8277_v7 = vcombine.low %v514_v57, %v522_v60  ;;  %v131_v60 = vld [vmem:[#allocation5 + $0x110] sm:$0xff] }
  0x9d   :  { %3352 = vmatpush1.bf16.msra.mxu0 %v7877_v10  ;;  %v250_v2 = vld [vmem:[#allocation5 + $0x4c8] sm:$0xff] }
  0x9e   :  { %3353 = vmatprep.subr.bf16.mxu0 %v7862_v12  ;;  %v498_v3 = vld [vmem:[#allocation5 + $0xc88] sm:$0xff]  ;;  %v8006_v8 = vcombine.high %v242_v1, %v250_v2  ;;  %v8005_v14 = vcombine.low %v242_v1, %v250_v2  ;;  %v395_v1 = vld [vmem:[#allocation5 + $0x950] sm:$0xff] }
  0x9f   :  { %3395 = vmatpush1.bf16.msra.mxu1 %v8133_v11  ;;  %v506_v5 = vld [vmem:[#allocation5 + $0xcc8] sm:$0xff] }
  0xa0   :  { %3396 = vmatprep.subr.bf16.mxu1 %v8118_v16  ;;  %v226_v9 = vld [vmem:[#allocation5 + $0x408] sm:$0xff]  ;;  %v8262_v12 = vcombine.high %v498_v3, %v506_v5  ;;  %v8261_v15 = vcombine.low %v498_v3, %v506_v5  ;;  %v115_v5 = vld [vmem:[#allocation5 + $0x90] sm:$0xff] }
  0xa1   :  { %3354 = vmatpush1.bf16.msra.mxu0 %v7861_v18  ;;  %v234_v10 = vld [vmem:[#allocation5 + $0x448] sm:$0xff]  ;;  %v219_v18 = vld [vmem:[#allocation5 + $0x3d0] sm:$0xff] }
  0xa2   :  { %3355 = vmatprep.subr.bf16.mxu0 %v8102_v21  ;;  %v482_v11 = vld [vmem:[#allocation5 + $0xc08] sm:$0xff]  ;;  %v7990_v16 = vcombine.high %v226_v9, %v234_v10  ;;  %v7989_v24 = vcombine.low %v226_v9, %v234_v10  ;;  %v7975_v32 = vcombine.low %v211_v17, %v219_v18  ;;  %v379_v9 = vld [vmem:[#allocation5 + $0x8d0] sm:$0xff] }
  0xa3   :  { %3397 = vmatpush1.bf16.msra.mxu1 %v8117_v19  ;;  %v490_v13 = vld [vmem:[#allocation5 + $0xc48] sm:$0xff]  ;;  %v467_v19 = vld [vmem:[#allocation5 + $0xb90] sm:$0xff] }
  0xa4   :  { %3398 = vmatprep.subr.bf16.mxu1 %v8358_v26  ;;  %v8246_v21 = vcombine.high %v482_v11, %v490_v13  ;;  %v8245_v25 = vcombine.low %v482_v11, %v490_v13  ;;  %v7976_v26 = vcombine.high %v211_v17, %v219_v18  ;;  %v8231_v33 = vcombine.low %v467_v19, %v475_v22  ;;  %v99_v13 = vld [vmem:[#allocation5 + $0x10] sm:$0xff] }
  0xa5   :  { %3356 = vmatpush2.bf16.msra.mxu0 %v8101_v28  ;;  %v203_v28 = vld [vmem:[#allocation5 + $0x350] sm:$0xff] }
  0xa6   :  { %3357 = vmatprep.subr.bf16.mxu0 %v8086_v30  ;;  %v8232_v30 = vcombine.high %v467_v19, %v475_v22  ;;  %v7959_v40 = vcombine.low %v195_v27, %v203_v28  ;;  %v363_v17 = vld [vmem:[#allocation5 + $0x850] sm:$0xff] }
  0xa7   :  { %3399 = vmatpush2.bf16.msra.mxu1 %v8357_v29  ;;  %v451_v29 = vld [vmem:[#allocation5 + $0xb10] sm:$0xff] }
  0xa8   :  { %3400 = vmatprep.subr.bf16.mxu1 %v8342_v34  ;;  %v7960_v34 = vcombine.high %v195_v27, %v203_v28  ;;  %v8215_v41 = vcombine.low %v451_v29, %v459_v31  ;;  %v339_v22 = vld [vmem:[#allocation5 + $0x790] sm:$0xff] }
  0xa9   :  { %3358 = vmatpush2.bf16.msra.mxu0 %v8085_v36  ;;  %v187_v36 = vld [vmem:[#allocation5 + $0x2d0] sm:$0xff] }
  0xaa   :  { %3359 = vmatprep.subr.bf16.mxu0 %v8070_v38  ;;  %v435_v38 = vld [vmem:[#allocation5 + $0xa90] sm:$0xff]  ;;  %v7943_v48 = vcombine.low %v179_v35, %v187_v36 }
  0xab   :  { %3401 = vmatpush2.bf16.msra.mxu1 %v8341_v37  ;;  %v8216_v37 = vcombine.high %v451_v29, %v459_v31  ;;  %v8199_v49 = vcombine.low %v435_v38, %v443_v39  ;;  %v603_v27 = vld [vmem:[#allocation5 + $0xfd0] sm:$0xff] }
  0xac   :  { %3402 = vmatprep.subr.bf16.mxu1 %v8326_v42  ;;  %v7944_v42 = vcombine.high %v179_v35, %v187_v36  ;;  %v323_v31 = vld [vmem:[#allocation5 + $0x710] sm:$0xff] }
  0xad   :  { %3360 = vmatpush2.bf16.msra.mxu0 %v8069_v44  ;;  %v171_v44 = vld [vmem:[#allocation5 + $0x250] sm:$0xff] }
  0xae   :  { %3361 = vmatprep.subr.bf16.mxu0 %v8054_v46  ;;  %v8200_v46 = vcombine.high %v435_v38, %v443_v39  ;;  %v7927_v56 = vcombine.low %v163_v43, %v171_v44  ;;  %v587_v35 = vld [vmem:[#allocation5 + $0xf50] sm:$0xff] }
  0xaf   :  { %3403 = vmatpush2.bf16.msra.mxu1 %v8325_v45  ;;  %v419_v45 = vld [vmem:[#allocation5 + $0xa10] sm:$0xff] }
  0xb0   :  { %3404 = vmatprep.subr.bf16.mxu1 %v8310_v50  ;;  %v7928_v50 = vcombine.high %v163_v43, %v171_v44  ;;  %v8183_v57 = vcombine.low %v419_v45, %v427_v47  ;;  %v307_v39 = vld [vmem:[#allocation5 + $0x690] sm:$0xff] }
  0xb1   :  { %3362 = vmatpush2.bf16.msra.mxu0 %v8053_v52  ;;  %v155_v52 = vld [vmem:[#allocation5 + $0x1d0] sm:$0xff] }
  0xb2   :  { %3363 = vmatprep.subr.bf16.mxu0 %v8038_v54  ;;  %v8184_v54 = vcombine.high %v419_v45, %v427_v47  ;;  %v7911_v2 = vcombine.low %v147_v51, %v155_v52  ;;  %v571_v43 = vld [vmem:[#allocation5 + $0xed0] sm:$0xff] }
  0xb3   :  { %3405 = vmatpush2.bf16.msra.mxu1 %v8309_v53  ;;  %v403_v53 = vld [vmem:[#allocation5 + $0x990] sm:$0xff] }
  0xb4   :  { %3406 = vmatprep.subr.bf16.mxu1 %v8294_v59  ;;  %v7912_v59 = vcombine.high %v147_v51, %v155_v52  ;;  %v8167_v3 = vcombine.low %v403_v53, %v411_v55  ;;  %v291_v47 = vld [vmem:[#allocation5 + $0x610] sm:$0xff] }
  0xb5   :  { %3364 = vmatpush2.bf16.msra.mxu0 %v8037_v61  ;;  %v139_v61 = vld [vmem:[#allocation5 + $0x150] sm:$0xff] }
  0xb6   :  { %3365 = vmatprep.subr.bf16.mxu0 %v8022_v0  ;;  %v8168_v0 = vcombine.high %v403_v53, %v411_v55  ;;  %v7895_v10 = vcombine.low %v131_v60, %v139_v61  ;;  %v555_v51 = vld [vmem:[#allocation5 + $0xe50] sm:$0xff] }
  0xb7   :  { %3407 = vmatpush2.bf16.msra.mxu1 %v8293_v62  ;;  %v387_v62 = vld [vmem:[#allocation5 + $0x910] sm:$0xff] }
  0xb8   :  { %3408 = vmatprep.subr.bf16.mxu1 %v8278_v4  ;;  %v7896_v4 = vcombine.high %v131_v60, %v139_v61  ;;  %v8151_v11 = vcombine.low %v387_v62, %v395_v1  ;;  %v275_v55 = vld [vmem:[#allocation5 + $0x590] sm:$0xff] }
  0xb9   :  { %3366 = vmatpush2.bf16.msra.mxu0 %v8021_v6  ;;  %v123_v6 = vld [vmem:[#allocation5 + $0xd0] sm:$0xff] }
  0xba   :  { %3367 = vmatprep.subr.bf16.mxu0 %v8006_v8  ;;  %v8152_v8 = vcombine.high %v387_v62, %v395_v1  ;;  %v7879_v18 = vcombine.low %v115_v5, %v123_v6  ;;  %v539_v60 = vld [vmem:[#allocation5 + $0xdd0] sm:$0xff] }
  0xbb   :  { %3409 = vmatpush2.bf16.msra.mxu1 %v8277_v7  ;;  %v371_v7 = vld [vmem:[#allocation5 + $0x890] sm:$0xff] }
  0xbc   :  { %3410 = vmatprep.subr.bf16.mxu1 %v8262_v12  ;;  %v7880_v12 = vcombine.high %v115_v5, %v123_v6  ;;  %v8135_v19 = vcombine.low %v371_v7, %v379_v9  ;;  %v259_v1 = vld [vmem:[#allocation5 + $0x510] sm:$0xff] }
  0xbd   :  { %3368 = vmatpush2.bf16.msra.mxu0 %v8005_v14  ;;  %v107_v14 = vld [vmem:[#allocation5 + $0x50] sm:$0xff] }
  0xbe   :  { %3369 = vmatprep.subr.bf16.mxu0 %v7990_v16  ;;  %v8136_v16 = vcombine.high %v371_v7, %v379_v9  ;;  %v7863_v28 = vcombine.low %v99_v13, %v107_v14  ;;  %v523_v5 = vld [vmem:[#allocation5 + $0xd50] sm:$0xff] }
  0xbf   :  { %3411 = vmatpush2.bf16.msra.mxu1 %v8261_v15  ;;  %v355_v15 = vld [vmem:[#allocation5 + $0x810] sm:$0xff] }
  0xc0   :  { %3412 = vmatprep.subr.bf16.mxu1 %v8246_v21  ;;  %v7864_v21 = vcombine.high %v99_v13, %v107_v14  ;;  %v8119_v29 = vcombine.low %v355_v15, %v363_v17  ;;  %v243_v9 = vld [vmem:[#allocation5 + $0x490] sm:$0xff] }
  0xc1   :  { %3370 = vmatpush2.bf16.msra.mxu0 %v7989_v24  ;;  %v347_v24 = vld [vmem:[#allocation5 + $0x7d0] sm:$0xff] }
  0xc2   :  { %3425 = vmatprep.subr.bf16.mxu0 %v7976_v26  ;;  %v8120_v26 = vcombine.high %v355_v15, %v363_v17  ;;  %v8103_v36 = vcombine.low %v339_v22, %v347_v24  ;;  %v507_v13 = vld [vmem:[#allocation5 + $0xcd0] sm:$0xff] }
  0xc3   :  { %3413 = vmatpush2.bf16.msra.mxu1 %v8245_v25  ;;  %v595_v25 = vld [vmem:[#allocation5 + $0xf90] sm:$0xff] }
  0xc4   :  { %3468 = vmatprep.subr.bf16.mxu1 %v8232_v30  ;;  %3372 = vmatmul.mubr.bf16.vlgmr.msra.gmra.mxu0 %v9872_v20  ;;  %v8104_v30 = vcombine.high %v339_v22, %v347_v24  ;;  %v227_v17 = vld [vmem:[#allocation5 + $0x410] sm:$0xff] }
  0xc5   :  { %3426 = vmatpush1.bf16.msra.mxu0 %v7975_v32  ;;  %3457 = vmatprep.mubr.bf16.mxu0 %v9866_v58  ;;  %v331_v32 = vld [vmem:[#allocation5 + $0x750] sm:$0xff] }
  0xc6   :  { %3415 = vmatmul.mubr.bf16.vlgmr.msra.gmra.mxu1 %v9874_v23  ;;  %3427 = vmatprep.subr.bf16.mxu0 %v7960_v34  ;;  %v8360_v34 = vcombine.high %v595_v25, %v603_v27  ;;  %v8088_v38 = vcombine.high %v323_v31, %v331_v32  ;;  %v8087_v44 = vcombine.low %v323_v31, %v331_v32  ;;  %v491_v22 = vld [vmem:[#allocation5 + $0xc50] sm:$0xff]  ;;  %v476_v31 = vld [vmem:[#allocation5 + $0xbd8] sm:$0xff] }
  0xc7   :  { %3469 = vmatpush1.bf16.msra.mxu1 %v8231_v33  ;;  %3500 = vmatprep.mubr.bf16.mxu1 %v9868_v63  ;;  %v579_v33 = vld [vmem:[#allocation5 + $0xf10] sm:$0xff] }
  0xc8   :  { %3470 = vmatprep.subr.bf16.mxu1 %v8216_v37  ;;  %v8359_v37 = vcombine.low %v595_v25, %v603_v27  ;;  %v8343_v45 = vcombine.low %v579_v33, %v587_v35  ;;  %v212_v27 = vld [vmem:[#allocation5 + $0x398] sm:$0xff] }
  0xc9   :  { %3428 = vmatpush1.bf16.msra.mxu0 %v7959_v40  ;;  %v315_v40 = vld [vmem:[#allocation5 + $0x6d0] sm:$0xff] }
  0xca   :  { %3429 = vmatprep.subr.bf16.mxu0 %v7944_v42  ;;  %v8344_v42 = vcombine.high %v579_v33, %v587_v35  ;;  %v8071_v52 = vcombine.low %v307_v39, %v315_v40  ;;  %v196_v35 = vld [vmem:[#allocation5 + $0x318] sm:$0xff] }
  0xcb   :  { %3471 = vmatpush1.bf16.msra.mxu1 %v8215_v41  ;;  %v563_v41 = vld [vmem:[#allocation5 + $0xe90] sm:$0xff] }
  0xcc   :  { %3472 = vmatprep.subr.bf16.mxu1 %v8200_v46  ;;  %v8072_v46 = vcombine.high %v307_v39, %v315_v40  ;;  %v8327_v53 = vcombine.low %v563_v41, %v571_v43  ;;  %v460_v39 = vld [vmem:[#allocation5 + $0xb58] sm:$0xff] }
  0xcd   :  { %3430 = vmatpush1.bf16.msra.mxu0 %v7943_v48  ;;  %v299_v48 = vld [vmem:[#allocation5 + $0x650] sm:$0xff] }
  0xce   :  { %3431 = vmatprep.subr.bf16.mxu0 %v7928_v50  ;;  %v8328_v50 = vcombine.high %v563_v41, %v571_v43  ;;  %v8055_v61 = vcombine.low %v291_v47, %v299_v48  ;;  %v180_v43 = vld [vmem:[#allocation5 + $0x298] sm:$0xff] }
  0xcf   :  { %3473 = vmatpush1.bf16.msra.mxu1 %v8199_v49  ;;  %v547_v49 = vld [vmem:[#allocation5 + $0xe10] sm:$0xff] }
  0xd0   :  { %3474 = vmatprep.subr.bf16.mxu1 %v8184_v54  ;;  %v8056_v54 = vcombine.high %v291_v47, %v299_v48  ;;  %v8311_v62 = vcombine.low %v547_v49, %v555_v51  ;;  %v444_v47 = vld [vmem:[#allocation5 + $0xad8] sm:$0xff] }
  0xd1   :  { %3432 = vmatpush1.bf16.msra.mxu0 %v7927_v56  ;;  %v283_v56 = vld [vmem:[#allocation5 + $0x5d0] sm:$0xff] }
  0xd2   :  { %3433 = vmatprep.subr.bf16.mxu0 %v7912_v59  ;;  %v8312_v59 = vcombine.high %v547_v49, %v555_v51  ;;  %v8039_v6 = vcombine.low %v275_v55, %v283_v56  ;;  %v164_v51 = vld [vmem:[#allocation5 + $0x218] sm:$0xff] }
  0xd3   :  { %3475 = vmatpush1.bf16.msra.mxu1 %v8183_v57  ;;  %v531_v57 = vld [vmem:[#allocation5 + $0xd90] sm:$0xff] }
  0xd4   :  { %3476 = vmatprep.subr.bf16.mxu1 %v8168_v0  ;;  %v8040_v0 = vcombine.high %v275_v55, %v283_v56  ;;  %v8295_v7 = vcombine.low %v531_v57, %v539_v60  ;;  %v428_v55 = vld [vmem:[#allocation5 + $0xa58] sm:$0xff] }
  0xd5   :  { %3434 = vmatpush1.bf16.msra.mxu0 %v7911_v2  ;;  %v267_v2 = vld [vmem:[#allocation5 + $0x550] sm:$0xff] }
  0xd6   :  { %3435 = vmatprep.subr.bf16.mxu0 %v7896_v4  ;;  %v8296_v4 = vcombine.high %v531_v57, %v539_v60  ;;  %v8023_v14 = vcombine.low %v259_v1, %v267_v2  ;;  %v148_v60 = vld [vmem:[#allocation5 + $0x198] sm:$0xff] }
  0xd7   :  { %3477 = vmatpush1.bf16.msra.mxu1 %v8167_v3  ;;  %v515_v3 = vld [vmem:[#allocation5 + $0xd10] sm:$0xff] }
  0xd8   :  { %3478 = vmatprep.subr.bf16.mxu1 %v8152_v8  ;;  %v8024_v8 = vcombine.high %v259_v1, %v267_v2  ;;  %v8279_v15 = vcombine.low %v515_v3, %v523_v5  ;;  %v412_v1 = vld [vmem:[#allocation5 + $0x9d8] sm:$0xff] }
  0xd9   :  { %3436 = vmatpush1.bf16.msra.mxu0 %v7895_v10  ;;  %v251_v10 = vld [vmem:[#allocation5 + $0x4d0] sm:$0xff] }
  0xda   :  { %3437 = vmatprep.subr.bf16.mxu0 %v7880_v12  ;;  %v8280_v12 = vcombine.high %v515_v3, %v523_v5  ;;  %v8007_v24 = vcombine.low %v243_v9, %v251_v10  ;;  %v132_v5 = vld [vmem:[#allocation5 + $0x118] sm:$0xff] }
  0xdb   :  { %3479 = vmatpush1.bf16.msra.mxu1 %v8151_v11  ;;  %v499_v11 = vld [vmem:[#allocation5 + $0xc90] sm:$0xff] }
  0xdc   :  { %3480 = vmatprep.subr.bf16.mxu1 %v8136_v16  ;;  %v8008_v16 = vcombine.high %v243_v9, %v251_v10  ;;  %v8263_v25 = vcombine.low %v499_v11, %v507_v13  ;;  %v396_v9 = vld [vmem:[#allocation5 + $0x958] sm:$0xff] }
  0xdd   :  { %3438 = vmatpush1.bf16.msra.mxu0 %v7879_v18  ;;  %v235_v18 = vld [vmem:[#allocation5 + $0x450] sm:$0xff] }
  0xde   :  { %3439 = vmatprep.subr.bf16.mxu0 %v7864_v21  ;;  %v8264_v21 = vcombine.high %v499_v11, %v507_v13  ;;  %v7991_v32 = vcombine.low %v227_v17, %v235_v18  ;;  %v116_v13 = vld [vmem:[#allocation5 + $0x98] sm:$0xff] }
  0xdf   :  { %3481 = vmatpush1.bf16.msra.mxu1 %v8135_v19  ;;  %v483_v19 = vld [vmem:[#allocation5 + $0xc10] sm:$0xff] }
  0xe0   :  { %3482 = vmatprep.subr.bf16.mxu1 %v8120_v26  ;;  %v7992_v26 = vcombine.high %v227_v17, %v235_v18  ;;  %v8247_v33 = vcombine.low %v483_v19, %v491_v22  ;;  %v380_v17 = vld [vmem:[#allocation5 + $0x8d8] sm:$0xff] }
  0xe1   :  { %3440 = vmatpush1.bf16.msra.mxu0 %v7863_v28  ;;  %v220_v28 = vld [vmem:[#allocation5 + $0x3d8] sm:$0xff] }
  0xe2   :  { %3441 = vmatprep.subr.bf16.mxu0 %v8104_v30  ;;  %v8248_v30 = vcombine.high %v483_v19, %v491_v22  ;;  %v7977_v40 = vcombine.low %v212_v27, %v220_v28  ;;  %v100_v22 = vld [vmem:[#allocation5 + $0x18] sm:$0xff] }
  0xe3   :  { %3483 = vmatpush1.bf16.msra.mxu1 %v8119_v29  ;;  %v468_v29 = vld [vmem:[#allocation5 + $0xb98] sm:$0xff] }
  0xe4   :  { %3484 = vmatprep.subr.bf16.mxu1 %v8360_v34  ;;  %v7978_v34 = vcombine.high %v212_v27, %v220_v28  ;;  %v8233_v41 = vcombine.low %v468_v29, %v476_v31  ;;  %v364_v27 = vld [vmem:[#allocation5 + $0x858] sm:$0xff] }
  0xe5   :  { %3442 = vmatpush2.bf16.msra.mxu0 %v8103_v36  ;;  %v204_v36 = vld [vmem:[#allocation5 + $0x358] sm:$0xff] }
  0xe6   :  { %3443 = vmatprep.subr.bf16.mxu0 %v8088_v38  ;;  %v8234_v38 = vcombine.high %v468_v29, %v476_v31  ;;  %v7961_v48 = vcombine.low %v196_v35, %v204_v36  ;;  %v340_v31 = vld [vmem:[#allocation5 + $0x798] sm:$0xff] }
  0xe7   :  { %3485 = vmatpush2.bf16.msra.mxu1 %v8359_v37  ;;  %v452_v37 = vld [vmem:[#allocation5 + $0xb18] sm:$0xff] }
  0xe8   :  { %3486 = vmatprep.subr.bf16.mxu1 %v8344_v42  ;;  %v7962_v42 = vcombine.high %v196_v35, %v204_v36  ;;  %v8217_v49 = vcombine.low %v452_v37, %v460_v39  ;;  %v604_v35 = vld [vmem:[#allocation5 + $0xfd8] sm:$0xff] }
  0xe9   :  { %3444 = vmatpush2.bf16.msra.mxu0 %v8087_v44  ;;  %v188_v44 = vld [vmem:[#allocation5 + $0x2d8] sm:$0xff] }
  0xea   :  { %3445 = vmatprep.subr.bf16.mxu0 %v8072_v46  ;;  %v8218_v46 = vcombine.high %v452_v37, %v460_v39  ;;  %v7945_v56 = vcombine.low %v180_v43, %v188_v44  ;;  %v324_v39 = vld [vmem:[#allocation5 + $0x718] sm:$0xff] }
  0xeb   :  { %3487 = vmatpush2.bf16.msra.mxu1 %v8343_v45  ;;  %v436_v45 = vld [vmem:[#allocation5 + $0xa98] sm:$0xff] }
  0xec   :  { %3488 = vmatprep.subr.bf16.mxu1 %v8328_v50  ;;  %v7946_v50 = vcombine.high %v180_v43, %v188_v44  ;;  %v8201_v57 = vcombine.low %v436_v45, %v444_v47  ;;  %v588_v43 = vld [vmem:[#allocation5 + $0xf58] sm:$0xff] }
  0xed   :  { %3446 = vmatpush2.bf16.msra.mxu0 %v8071_v52  ;;  %v172_v52 = vld [vmem:[#allocation5 + $0x258] sm:$0xff] }
  0xee   :  { %3447 = vmatprep.subr.bf16.mxu0 %v8056_v54  ;;  %v8202_v54 = vcombine.high %v436_v45, %v444_v47  ;;  %v7929_v2 = vcombine.low %v164_v51, %v172_v52  ;;  %v308_v47 = vld [vmem:[#allocation5 + $0x698] sm:$0xff] }
  0xef   :  { %3489 = vmatpush2.bf16.msra.mxu1 %v8327_v53  ;;  %v420_v53 = vld [vmem:[#allocation5 + $0xa18] sm:$0xff] }
  0xf0   :  { %3490 = vmatprep.subr.bf16.mxu1 %v8312_v59  ;;  %v7930_v59 = vcombine.high %v164_v51, %v172_v52  ;;  %v8185_v3 = vcombine.low %v420_v53, %v428_v55  ;;  %v572_v51 = vld [vmem:[#allocation5 + $0xed8] sm:$0xff] }
  0xf1   :  { %3448 = vmatpush2.bf16.msra.mxu0 %v8055_v61  ;;  %v156_v61 = vld [vmem:[#allocation5 + $0x1d8] sm:$0xff] }
  0xf2   :  { %3449 = vmatprep.subr.bf16.mxu0 %v8040_v0  ;;  %v8186_v0 = vcombine.high %v420_v53, %v428_v55  ;;  %v7913_v10 = vcombine.low %v148_v60, %v156_v61  ;;  %v292_v55 = vld [vmem:[#allocation5 + $0x618] sm:$0xff] }
  0xf3   :  { %3491 = vmatpush2.bf16.msra.mxu1 %v8311_v62  ;;  %v404_v62 = vld [vmem:[#allocation5 + $0x998] sm:$0xff] }
  0xf4   :  { %3492 = vmatprep.subr.bf16.mxu1 %v8296_v4  ;;  %v7914_v4 = vcombine.high %v148_v60, %v156_v61  ;;  %v8169_v11 = vcombine.low %v404_v62, %v412_v1  ;;  %v556_v60 = vld [vmem:[#allocation5 + $0xe58] sm:$0xff] }
  0xf5   :  { %3450 = vmatpush2.bf16.msra.mxu0 %v8039_v6  ;;  %v140_v6 = vld [vmem:[#allocation5 + $0x158] sm:$0xff] }
  0xf6   :  { %3451 = vmatprep.subr.bf16.mxu0 %v8024_v8  ;;  %v8170_v8 = vcombine.high %v404_v62, %v412_v1  ;;  %v7897_v18 = vcombine.low %v132_v5, %v140_v6  ;;  %v276_v1 = vld [vmem:[#allocation5 + $0x598] sm:$0xff] }
  0xf7   :  { %3493 = vmatpush2.bf16.msra.mxu1 %v8295_v7  ;;  %v388_v7 = vld [vmem:[#allocation5 + $0x918] sm:$0xff] }
  0xf8   :  { %3494 = vmatprep.subr.bf16.mxu1 %v8280_v12  ;;  %v7898_v12 = vcombine.high %v132_v5, %v140_v6  ;;  %v8153_v19 = vcombine.low %v388_v7, %v396_v9  ;;  %v540_v5 = vld [vmem:[#allocation5 + $0xdd8] sm:$0xff] }
  0xf9   :  { %3452 = vmatpush2.bf16.msra.mxu0 %v8023_v14  ;;  %v124_v14 = vld [vmem:[#allocation5 + $0xd8] sm:$0xff] }
  0xfa   :  { %3453 = vmatprep.subr.bf16.mxu0 %v8008_v16  ;;  %v8154_v16 = vcombine.high %v388_v7, %v396_v9  ;;  %v7881_v28 = vcombine.low %v116_v13, %v124_v14  ;;  %v260_v9 = vld [vmem:[#allocation5 + $0x518] sm:$0xff] }
  0xfb   :  { %3495 = vmatpush2.bf16.msra.mxu1 %v8279_v15  ;;  %v372_v15 = vld [vmem:[#allocation5 + $0x898] sm:$0xff] }
  0xfc   :  { %3496 = vmatprep.subr.bf16.mxu1 %v8264_v21  ;;  %v7882_v21 = vcombine.high %v116_v13, %v124_v14  ;;  %v8137_v29 = vcombine.low %v372_v15, %v380_v17  ;;  %v524_v13 = vld [vmem:[#allocation5 + $0xd58] sm:$0xff] }
  0xfd   :  { %3454 = vmatpush2.bf16.msra.mxu0 %v8007_v24  ;;  %v108_v24 = vld [vmem:[#allocation5 + $0x58] sm:$0xff] }
  0xfe   :  { %3455 = vmatprep.subr.bf16.mxu0 %v7992_v26  ;;  %v8138_v26 = vcombine.high %v372_v15, %v380_v17  ;;  %v7865_v36 = vcombine.low %v100_v22, %v108_v24  ;;  %v244_v17 = vld [vmem:[#allocation5 + $0x498] sm:$0xff] }
  0xff   :  { %3497 = vmatpush2.bf16.msra.mxu1 %v8263_v25  ;;  %v356_v25 = vld [vmem:[#allocation5 + $0x818] sm:$0xff] }
 0x100   :  { %3498 = vmatprep.subr.bf16.mxu1 %v8248_v30  ;;  %v7866_v30 = vcombine.high %v100_v22, %v108_v24  ;;  %v8121_v37 = vcombine.low %v356_v25, %v364_v27  ;;  %v508_v22 = vld [vmem:[#allocation5 + $0xcd8] sm:$0xff] }
 0x101   :  { %3456 = vmatpush2.bf16.msra.mxu0 %v7991_v32  ;;  %v348_v32 = vld [vmem:[#allocation5 + $0x7d8] sm:$0xff] }
 0x102   :  { %3511 = vmatprep.subr.bf16.mxu0 %v7978_v34  ;;  %v8122_v34 = vcombine.high %v356_v25, %v364_v27  ;;  %v8105_v44 = vcombine.low %v340_v31, %v348_v32  ;;  %v613_v25 = vlaneseq }
 0x103   :  { %3499 = vmatpush2.bf16.msra.mxu1 %v8247_v33  ;;  %v596_v33 = vld [vmem:[#allocation5 + $0xf98] sm:$0xff] }
 0x104   :  { %3554 = vmatprep.subr.bf16.mxu1 %v8234_v38  ;;  %3458 = vmatmul.mubr.bf16.vlgmr.msra.gmra.mxu0 %v9872_v20  ;;  %v8106_v38 = vcombine.high %v340_v31, %v348_v32  ;;  %v8361_v45 = vcombine.low %v596_v33, %v604_v35  ;;  %v492_v32 = vld [vmem:[#allocation5 + $0xc58] sm:$0xff] }
 0x105   :  { %3512 = vmatpush1.bf16.msra.mxu0 %v7977_v40  ;;  %3543 = vmatprep.mubr.bf16.mxu0 %v9866_v58  ;;  %v332_v40 = vld [vmem:[#allocation5 + $0x758] sm:$0xff] }
 0x106   :  { %3501 = vmatmul.mubr.bf16.vlgmr.msra.gmra.mxu1 %v9874_v23  ;;  %3513 = vmatprep.subr.bf16.mxu0 %v7962_v42  ;;  %v8362_v42 = vcombine.high %v596_v33, %v604_v35  ;;  %v8089_v52 = vcombine.low %v324_v39, %v332_v40 }
 0x107   :  { %3555 = vmatpush1.bf16.msra.mxu1 %v8233_v41  ;;  %3586 = vmatprep.mubr.bf16.mxu1 %v9868_v63  ;;  %v580_v41 = vld [vmem:[#allocation5 + $0xf18] sm:$0xff] }
 0x108   :  { %3556 = vmatprep.subr.bf16.mxu1 %v8218_v46  ;;  %v8090_v46 = vcombine.high %v324_v39, %v332_v40  ;;  %v8345_v53 = vcombine.low %v580_v41, %v588_v43  ;;  %v469_v39 = vld [vmem:[#allocation5 + $0xba0] sm:$0xff] }
 0x109   :  { %3514 = vmatpush1.bf16.msra.mxu0 %v7961_v48  ;;  %v316_v48 = vld [vmem:[#allocation5 + $0x6d8] sm:$0xff] }
 0x10a   :  { %3515 = vmatprep.subr.bf16.mxu0 %v7946_v50  ;;  %v8346_v50 = vcombine.high %v580_v41, %v588_v43  ;;  %v8073_v61 = vcombine.low %v308_v47, %v316_v48  ;;  %v477_v41 = vld [vmem:[#allocation5 + $0xbe0] sm:$0xff] }
 0x10b   :  { %3557 = vmatpush1.bf16.msra.mxu1 %v8217_v49  ;;  %v564_v49 = vld [vmem:[#allocation5 + $0xe98] sm:$0xff] }
 0x10c   :  { %3558 = vmatprep.subr.bf16.mxu1 %v8202_v54  ;;  %v8074_v54 = vcombine.high %v308_v47, %v316_v48  ;;  %v8329_v62 = vcombine.low %v564_v49, %v572_v51  ;;  %v197_v47 = vld [vmem:[#allocation5 + $0x320] sm:$0xff] }
 0x10d   :  { %3516 = vmatpush1.bf16.msra.mxu0 %v7945_v56  ;;  %v300_v56 = vld [vmem:[#allocation5 + $0x658] sm:$0xff]  ;;  %v205_v48 = vld [vmem:[#allocation5 + $0x360] sm:$0xff] }
 0x10e   :  { %3517 = vmatprep.subr.bf16.mxu0 %v7930_v59  ;;  %v8330_v59 = vcombine.high %v564_v49, %v572_v51  ;;  %v8057_v6 = vcombine.low %v292_v55, %v300_v56  ;;  %v453_v49 = vld [vmem:[#allocation5 + $0xb20] sm:$0xff] }
 0x10f   :  { %3559 = vmatpush1.bf16.msra.mxu1 %v8201_v57  ;;  %v548_v57 = vld [vmem:[#allocation5 + $0xe18] sm:$0xff]  ;;  %v461_v51 = vld [vmem:[#allocation5 + $0xb60] sm:$0xff] }
 0x110   :  { %3560 = vmatprep.subr.bf16.mxu1 %v8186_v0  ;;  %v8058_v0 = vcombine.high %v292_v55, %v300_v56  ;;  %v8313_v7 = vcombine.low %v548_v57, %v556_v60  ;;  %v7964_v55 = vcombine.high %v197_v47, %v205_v48  ;;  %v181_v56 = vld [vmem:[#allocation5 + $0x2a0] sm:$0xff] }
 0x111   :  { %3518 = vmatpush1.bf16.msra.mxu0 %v7929_v2  ;;  %v284_v2 = vld [vmem:[#allocation5 + $0x5d8] sm:$0xff] }
 0x112   :  { %3519 = vmatprep.subr.bf16.mxu0 %v7914_v4  ;;  %v8314_v4 = vcombine.high %v548_v57, %v556_v60  ;;  %v8041_v14 = vcombine.low %v276_v1, %v284_v2  ;;  %v189_v57 = vld [vmem:[#allocation5 + $0x2e0] sm:$0xff]  ;;  %v8220_v60 = vcombine.high %v453_v49, %v461_v51 }
 0x113   :  { %3561 = vmatpush1.bf16.msra.mxu1 %v8185_v3  ;;  %v532_v3 = vld [vmem:[#allocation5 + $0xd98] sm:$0xff] }
 0x114   :  { %3562 = vmatprep.subr.bf16.mxu1 %v8170_v8  ;;  %v8042_v8 = vcombine.high %v276_v1, %v284_v2  ;;  %v8297_v15 = vcombine.low %v532_v3, %v540_v5  ;;  %v7963_v2 = vcombine.low %v197_v47, %v205_v48  ;;  %v381_v48 = vld [vmem:[#allocation5 + $0x8e0] sm:$0xff] }
 0x115   :  { %3520 = vmatpush1.bf16.msra.mxu0 %v7913_v10  ;;  %v268_v10 = vld [vmem:[#allocation5 + $0x558] sm:$0xff] }
 0x116   :  { %3521 = vmatprep.subr.bf16.mxu0 %v7898_v12  ;;  %v8298_v12 = vcombine.high %v532_v3, %v540_v5  ;;  %v8025_v24 = vcombine.low %v260_v9, %v268_v10  ;;  %v7948_v5 = vcombine.high %v181_v56, %v189_v57 }
 0x117   :  { %3563 = vmatpush1.bf16.msra.mxu1 %v8169_v11  ;;  %v516_v11 = vld [vmem:[#allocation5 + $0xd18] sm:$0xff] }
 0x118   :  { %3564 = vmatprep.subr.bf16.mxu1 %v8154_v16  ;;  %v8026_v16 = vcombine.high %v260_v9, %v268_v10 }
 0x119   :  { %3522 = vmatpush1.bf16.msra.mxu0 %v7897_v18  ;;  %v252_v18 = vld [vmem:[#allocation5 + $0x4d8] sm:$0xff] }
 0x11a   :  { %3523 = vmatprep.subr.bf16.mxu0 %v7882_v21  ;;  %v8282_v21 = vcombine.high %v516_v11, %v524_v13  ;;  %v8010_v27 = vcombine.high %v244_v17, %v252_v18  ;;  %v8009_v33 = vcombine.low %v244_v17, %v252_v18 }
 0x11b   :  { %3565 = vmatpush1.bf16.msra.mxu1 %v8153_v19  ;;  %v500_v19 = vld [vmem:[#allocation5 + $0xc98] sm:$0xff] }
 0x11c   :  { %3566 = vmatprep.subr.bf16.mxu1 %v8138_v26  ;;  %v8281_v26 = vcombine.low %v516_v11, %v524_v13  ;;  %v8266_v31 = vcombine.high %v500_v19, %v508_v22  ;;  %v8265_v35 = vcombine.low %v500_v19, %v508_v22  ;;  %v149_v19 = vld [vmem:[#allocation5 + $0x1a0] sm:$0xff] }
 0x11d   :  { %3524 = vmatpush1.bf16.msra.mxu0 %v7881_v28  ;;  %v228_v28 = vld [vmem:[#allocation5 + $0x418] sm:$0xff]  ;;  %v405_v22 = vld [vmem:[#allocation5 + $0x9a0] sm:$0xff] }
 0x11e   :  { %3525 = vmatprep.subr.bf16.mxu0 %v7866_v30  ;;  %v484_v30 = vld [vmem:[#allocation5 + $0xc18] sm:$0xff] }
 0x11f   :  { %3567 = vmatpush1.bf16.msra.mxu1 %v8137_v29  ;;  %v236_v29 = vld [vmem:[#allocation5 + $0x458] sm:$0xff]  ;;  %v8250_v40 = vcombine.high %v484_v30, %v492_v32 }
 0x120   :  { %3568 = vmatprep.subr.bf16.mxu1 %v8122_v34  ;;  %v9888_v34 = vshrl.u32 %v613_v25, 7  ;;  %v7993_v43 = vcombine.low %v228_v28, %v236_v29 }
 0x121   :  { %3526 = vmatpush1.bf16.msra.mxu0 %v7865_v36  ;;  %v7994_v36 = vcombine.high %v228_v28, %v236_v29 }
 0x122   :  { %3527 = vmatprep.subr.bf16.mxu0 %v8106_v38  ;;  %v221_v38 = vld [vmem:[#allocation5 + $0x3e0] sm:$0xff] }
 0x123   :  { %3569 = vmatpush1.bf16.msra.mxu1 %v8121_v37  ;;  %v213_v37 = vld [vmem:[#allocation5 + $0x3a0] sm:$0xff] }
 0x124   :  { %3570 = vmatprep.subr.bf16.mxu1 %v8362_v42  ;;  %v9890_v42 = vld [vmem:[#allocation7] sm:$0xff] }
 0x125   :  { %3528 = vmatpush2.bf16.msra.mxu0 %v8105_v44  ;;  %v9893_v44 = vsub.s32 0, %v9888_v34 }
 0x126   :  { %3529 = vmatprep.subr.bf16.mxu0 %v8090_v46  ;;  %v7980_v46 = vcombine.high %v213_v37, %v221_v38 }
 0x127   :  { %3571 = vmatpush2.bf16.msra.mxu1 %v8361_v45  ;;  %v8249_v45 = vcombine.low %v484_v30, %v492_v32  ;;  %v133_v32 = vld [vmem:[#allocation5 + $0x120] sm:$0xff] }
 0x128   :  { %3572 = vmatprep.subr.bf16.mxu1 %v8346_v50  ;;  %v8236_v50 = vcombine.high %v469_v39, %v477_v41 }
 0x129   :  { %3530 = vmatpush2.bf16.msra.mxu0 %v8089_v52  ;;  %v616_v52 = vrot.slane %v9890_v42, %v9893_v44 }
 0x12a   :  { %3531 = vmatprep.subr.bf16.mxu0 %v8074_v54  ;;  %v8235_v54 = vcombine.low %v469_v39, %v477_v41 }
 0x12b   :  { %3573 = vmatpush2.bf16.msra.mxu1 %v8345_v53  ;;  %v7979_v53 = vcombine.low %v213_v37, %v221_v38  ;;  %v397_v38 = vld [vmem:[#allocation5 + $0x960] sm:$0xff] }
 0x12c   :  { %3574 = vmatprep.subr.bf16.mxu1 %v8330_v59  ;;  %v437_v59 = vld [vmem:[#allocation5 + $0xaa0] sm:$0xff] }
 0x12d   :  { %3532 = vmatpush2.bf16.msra.mxu0 %v8073_v61  ;;  %v445_v61 = vld [vmem:[#allocation5 + $0xae0] sm:$0xff] }
 0x12e   :  { %3533 = vmatprep.subr.bf16.mxu0 %v8058_v0  ;;  %v8204_v11 = vcombine.high %v437_v59, %v445_v61  ;;  %v8203_v17 = vcombine.low %v437_v59, %v445_v61  ;;  %v341_v61 = vld [vmem:[#allocation5 + $0x7a0] sm:$0xff] }
 0x12f   :  { %3575 = vmatpush2.bf16.msra.mxu1 %v8329_v62 }
 0x130   :  { %3576 = vmatprep.subr.bf16.mxu1 %v8314_v4  ;;  %v8219_v4 = vcombine.low %v453_v49, %v461_v51 }
 0x131   :  { %3534 = vmatpush2.bf16.msra.mxu0 %v8057_v6  ;;  %v165_v6 = vld [vmem:[#allocation5 + $0x220] sm:$0xff] }
 0x132   :  { %3535 = vmatprep.subr.bf16.mxu0 %v8042_v8  ;;  %v421_v8 = vld [vmem:[#allocation5 + $0xa20] sm:$0xff] }
 0x133   :  { %3577 = vmatpush2.bf16.msra.mxu1 %v8313_v7  ;;  %v173_v7 = vld [vmem:[#allocation5 + $0x260] sm:$0xff] }
 0x134   :  { %3578 = vmatprep.subr.bf16.mxu1 %v8298_v12  ;;  %v429_v12 = vld [vmem:[#allocation5 + $0xa60] sm:$0xff]  ;;  %v7932_v18 = vcombine.high %v165_v6, %v173_v7  ;;  %v7931_v29 = vcombine.low %v165_v6, %v173_v7 }
 0x135   :  { %3536 = vmatpush2.bf16.msra.mxu0 %v8041_v14  ;;  %v8188_v25 = vcombine.high %v421_v8, %v429_v12  ;;  %v8187_v30 = vcombine.low %v421_v8, %v429_v12  ;;  %v325_v7 = vld [vmem:[#allocation5 + $0x720] sm:$0xff] }
 0x136   :  { %3537 = vmatprep.subr.bf16.mxu0 %v8026_v16  ;;  %v333_v8 = vld [vmem:[#allocation5 + $0x760] sm:$0xff] }
 0x137   :  { %3579 = vmatpush2.bf16.msra.mxu1 %v8297_v15  ;;  %v7947_v15 = vcombine.low %v181_v56, %v189_v57  ;;  %v365_v56 = vld [vmem:[#allocation5 + $0x860] sm:$0xff] }
 0x138   :  { %3580 = vmatprep.subr.bf16.mxu1 %v8282_v21  ;;  %v157_v21 = vld [vmem:[#allocation5 + $0x1e0] sm:$0xff] }
 0x139   :  { %3538 = vmatpush2.bf16.msra.mxu0 %v8025_v24  ;;  %v7915_v39 = vcombine.low %v149_v19, %v157_v21  ;;  %v589_v12 = vld [vmem:[#allocation5 + $0xf60] sm:$0xff] }
 0x13a   :  { %3539 = vmatprep.subr.bf16.mxu0 %v8010_v27 }
 0x13b   :  { %3581 = vmatpush2.bf16.msra.mxu1 %v8281_v26  ;;  %v413_v26 = vld [vmem:[#allocation5 + $0x9e0] sm:$0xff] }
 0x13c   :  { %3582 = vmatprep.subr.bf16.mxu1 %v8266_v31  ;;  %v7916_v31 = vcombine.high %v149_v19, %v157_v21  ;;  %v8172_v37 = vcombine.high %v405_v22, %v413_v26  ;;  %v573_v21 = vld [vmem:[#allocation5 + $0xee0] sm:$0xff] }
 0x13d   :  { %3540 = vmatpush2.bf16.msra.mxu0 %v8009_v33  ;;  %v141_v33 = vld [vmem:[#allocation5 + $0x160] sm:$0xff] }
 0x13e   :  { %3541 = vmatprep.subr.bf16.mxu0 %v7994_v36  ;;  %v7900_v41 = vcombine.high %v133_v32, %v141_v33  ;;  %v7899_v49 = vcombine.low %v133_v32, %v141_v33 }
 0x13f   :  { %3583 = vmatpush2.bf16.msra.mxu1 %v8265_v35  ;;  %v389_v35 = vld [vmem:[#allocation5 + $0x920] sm:$0xff] }
 0x140   :  { %3584 = vmatprep.subr.bf16.mxu1 %v8250_v40  ;;  %v8171_v40 = vcombine.low %v405_v22, %v413_v26  ;;  %v8156_v47 = vcombine.high %v389_v35, %v397_v38  ;;  %v8091_v22 = vcombine.low %v325_v7, %v333_v8  ;;  %v293_v26 = vld [vmem:[#allocation5 + $0x620] sm:$0xff] }
 0x141   :  { %3542 = vmatpush2.bf16.msra.mxu0 %v7993_v43  ;;  %v117_v43 = vld [vmem:[#allocation5 + $0xa0] sm:$0xff] }
 0x142   :  { %3597 = vmatprep.subr.bf16.mxu0 %v7980_v46  ;;  %v373_v46 = vld [vmem:[#allocation5 + $0x8a0] sm:$0xff] }
 0x143   :  { %3585 = vmatpush2.bf16.msra.mxu1 %v8249_v45  ;;  %v125_v45 = vld [vmem:[#allocation5 + $0xe0] sm:$0xff]  ;;  %v8139_v59 = vcombine.low %v373_v46, %v381_v48 }
 0x144   :  { %3640 = vmatprep.subr.bf16.mxu1 %v8236_v50  ;;  %v3287_v62 = vpop.f32.mrf.mxu0  ;;  %3544 = vmatmul.mubr.bf16.vlgmr.msra.gmra.mxu0 %v9872_v20  ;;  %v8155_v50 = vcombine.low %v389_v35, %v397_v38  ;;  %v7884_v51 = vcombine.high %v117_v43, %v125_v45  ;;  %v7883_v57 = vcombine.low %v117_v43, %v125_v45  ;;  %v277_v35 = vld [vmem:[#allocation5 + $0x5a0] sm:$0xff] }
 0x145   :  { %v3288_v0 = vadd.f32 %v3287_v62, %v616_v52  ;;  %3598 = vmatpush1.bf16.msra.mxu0 %v7979_v53  ;;  %3629 = vmatprep.mubr.bf16.mxu0 %v9866_v58  ;;  %v109_v53 = vld [vmem:[#allocation5 + $0x60] sm:$0xff] }
 0x146   :  { %v3330_v1 = vpop.f32.mrf.mxu1  ;;  %3587 = vmatmul.mubr.bf16.vlgmr.msra.gmra.mxu1 %v9874_v23  ;;  %v9899_v3 = vpop.f32.mrf.mxu0  ;;  %3599 = vmatprep.subr.bf16.mxu0 %v7964_v55  ;;  %v8140_v55 = vcombine.high %v373_v46, %v381_v48  ;;  %v349_v62 = vld [vmem:[#allocation5 + $0x7e0] sm:$0xff] }
 0x147   :  { %3641 = vmatpush1.bf16.msra.mxu1 %v8235_v54  ;;  %v3331_v9 = vadd.f32 %v3330_v1, %v3288_v0  ;;  %3672 = vmatprep.mubr.bf16.mxu1 %v9868_v63  ;;  %v357_v54 = vld [vmem:[#allocation5 + $0x820] sm:$0xff]  ;;  %v8108_v6 = vcombine.high %v341_v61, %v349_v62 }
 0x148   :  { %v9901_v10 = vpop.f32.mrf.mxu1  ;;  %3642 = vmatprep.subr.bf16.mxu1 %v8220_v60  ;;  %v3291_v13 = vpop.f32.mrf.mxu0  ;;  %v597_v0 = vld [vmem:[#allocation5 + $0xfa0] sm:$0xff]  ;;  %v8124_v1 = vcombine.high %v357_v54, %v365_v56 }
 0x149   :  { %v3292_v14 = vadd.f32 %v3291_v13, %v616_v52  ;;  %3600 = vmatpush1.bf16.msra.mxu0 %v7963_v2  ;;  %v3941_v27 = vmax.f32 %v3331_v9, 0.0  ;;  %v101_v52 = vld [vmem:[#allocation5 + $0x20] sm:$0xff]  ;;  %v8107_v13 = vcombine.low %v341_v61, %v349_v62 }
 0x14a   :  { %v3334_v16 = vpop.f32.mrf.mxu1  ;;  %3601 = vmatprep.subr.bf16.mxu0 %v7948_v5  ;;  %v7868_v60 = vcombine.high %v101_v52, %v109_v53  ;;  %v605_v2 = vld [vmem:[#allocation5 + $0xfe0] sm:$0xff]  ;;  %v8123_v5 = vcombine.low %v357_v54, %v365_v56 }
 0x14b   :  { %3643 = vmatpush1.bf16.msra.mxu1 %v8219_v4  ;;  %v3335_v24 = vadd.f32 %v3334_v16, %v3292_v14  ;;  %v7867_v4 = vcombine.low %v101_v52, %v109_v53  ;;  %v581_v9 = vld [vmem:[#allocation5 + $0xf20] sm:$0xff]  ;;  %v8363_v14 = vcombine.low %v597_v0, %v605_v2 }
 0x14c   :  { %3644 = vmatprep.subr.bf16.mxu1 %v8204_v11  ;;  %v8364_v11 = vcombine.high %v597_v0, %v605_v2  ;;  %v309_v16 = vld [vmem:[#allocation5 + $0x6a0] sm:$0xff]  ;;  %v8348_v19 = vcombine.high %v581_v9, %v589_v12 }
 0x14d   :  { %v3957_v28 = vmax.f32 %v3335_v24, 0.0  ;;  %3602 = vmatpush1.bf16.msra.mxu0 %v7947_v15  ;;  %v8092_v15 = vcombine.high %v325_v7, %v333_v8  ;;  %v8347_v24 = vcombine.low %v581_v9, %v589_v12  ;;  %v533_v38 = vld [vmem:[#allocation5 + $0xda0] sm:$0xff]  ;;  %v214_v9 = vld [vmem:[#allocation5 + $0x3a8] sm:$0xff] }
 0x14e   :  { %3603 = vmatprep.subr.bf16.mxu0 %v7932_v18  ;;  %v565_v18 = vld [vmem:[#allocation5 + $0xea0] sm:$0xff]  ;;  %v470_v12 = vld [vmem:[#allocation5 + $0xba8] sm:$0xff] }
 0x14f   :  { %3645 = vmatpush1.bf16.msra.mxu1 %v8203_v17  ;;  %v9905_v36 = vpack.c.bf16 %v3957_v28, %v3941_v27  ;;  %v317_v17 = vld [vmem:[#allocation5 + $0x6e0] sm:$0xff]  ;;  %v8331_v32 = vcombine.low %v565_v18, %v573_v21 }
 0x150   :  { %3646 = vmatprep.subr.bf16.mxu1 %v8188_v25  ;;  %v8076_v25 = vcombine.high %v309_v16, %v317_v17  ;;  %v301_v27 = vld [vmem:[#allocation5 + $0x660] sm:$0xff] }
 0x151   :  { %3604 = vmatpush1.bf16.msra.mxu0 %v7931_v29  ;;  %v549_v28 = vld [vmem:[#allocation5 + $0xe20] sm:$0xff]  ;;  %v8332_v29 = vcombine.high %v565_v18, %v573_v21  ;;  %v8060_v33 = vcombine.high %v293_v26, %v301_v27  ;;  %v206_v21 = vld [vmem:[#allocation5 + $0x368] sm:$0xff] }
 0x152   :  { %3605 = vmatprep.subr.bf16.mxu0 %v7916_v31  ;;  %v8075_v31 = vcombine.low %v309_v16, %v317_v17  ;;  %v261_v46 = vld [vmem:[#allocation5 + $0x520] sm:$0xff]  ;;  %v9908_v16 = vsub.s32 2, %v9888_v34 }
 0x153   :  { %3647 = vmatpush1.bf16.msra.mxu1 %v8187_v30  ;;  %v557_v30 = vld [vmem:[#allocation5 + $0xe60] sm:$0xff] }
 0x154   :  { %3648 = vmatprep.subr.bf16.mxu1 %v8172_v37  ;;  %v285_v37 = vld [vmem:[#allocation5 + $0x5e0] sm:$0xff]  ;;  %v8315_v43 = vcombine.low %v549_v28, %v557_v30 }
 0x155   :  { %3606 = vmatpush1.bf16.msra.mxu0 %v7915_v39  ;;  %v8316_v39 = vcombine.high %v549_v28, %v557_v30  ;;  %v8044_v45 = vcombine.high %v277_v35, %v285_v37  ;;  %v517_v48 = vld [vmem:[#allocation5 + $0xd20] sm:$0xff]  ;;  %v9912_v28 = vpop.f32.mrf.mxu0 }
 0x156   :  { %3607 = vmatprep.subr.bf16.mxu0 %v7900_v41  ;;  %v8059_v41 = vcombine.low %v293_v26, %v301_v27  ;;  %v245_v54 = vld [vmem:[#allocation5 + $0x4a0] sm:$0xff]  ;;  %v624_v26 = vrot.slane %v9890_v42, %v9908_v16 }
 0x157   :  { %3649 = vmatpush1.bf16.msra.mxu1 %v8171_v40  ;;  %v541_v40 = vld [vmem:[#allocation5 + $0xde0] sm:$0xff] }
 0x158   :  { %3650 = vmatprep.subr.bf16.mxu1 %v8156_v47  ;;  %v269_v47 = vld [vmem:[#allocation5 + $0x560] sm:$0xff]  ;;  %v8299_v52 = vcombine.low %v533_v38, %v541_v40 }
 0x159   :  { %3608 = vmatpush1.bf16.msra.mxu0 %v7899_v49  ;;  %v8300_v49 = vcombine.high %v533_v38, %v541_v40  ;;  %v8028_v53 = vcombine.high %v261_v46, %v269_v47  ;;  %v501_v56 = vld [vmem:[#allocation5 + $0xca0] sm:$0xff]  ;;  %v446_v38 = vld [vmem:[#allocation5 + $0xae8] sm:$0xff] }
 0x15a   :  { %3609 = vmatprep.subr.bf16.mxu0 %v7884_v51  ;;  %v8043_v51 = vcombine.low %v277_v35, %v285_v37  ;;  %v229_v0 = vld [vmem:[#allocation5 + $0x420] sm:$0xff]  ;;  %v9914_v35 = vpop.f32.mrf.mxu1 }
 0x15b   :  { %3651 = vmatpush1.bf16.msra.mxu1 %v8155_v50  ;;  %v525_v50 = vld [vmem:[#allocation5 + $0xd60] sm:$0xff] }
 0x15c   :  { %3652 = vmatprep.subr.bf16.mxu1 %v8140_v55  ;;  %v253_v55 = vld [vmem:[#allocation5 + $0x4e0] sm:$0xff]  ;;  %v8283_v61 = vcombine.low %v517_v48, %v525_v50 }
 0x15d   :  { %3610 = vmatpush1.bf16.msra.mxu0 %v7883_v57  ;;  %v8284_v57 = vcombine.high %v517_v48, %v525_v50  ;;  %v8012_v62 = vcombine.high %v245_v54, %v253_v55  ;;  %v485_v2 = vld [vmem:[#allocation5 + $0xc20] sm:$0xff]  ;;  %v166_v50 = vld [vmem:[#allocation5 + $0x228] sm:$0xff] }
 0x15e   :  { %3611 = vmatprep.subr.bf16.mxu0 %v7868_v60  ;;  %v8027_v60 = vcombine.low %v261_v46, %v269_v47 }
 0x15f   :  { %3653 = vmatpush1.bf16.msra.mxu1 %v8139_v59  ;;  %v509_v59 = vld [vmem:[#allocation5 + $0xce0] sm:$0xff] }
 0x160   :  { %3654 = vmatprep.subr.bf16.mxu1 %v8124_v1  ;;  %v237_v1 = vld [vmem:[#allocation5 + $0x460] sm:$0xff]  ;;  %v8267_v7 = vcombine.low %v501_v56, %v509_v59 }
 0x161   :  { %3612 = vmatpush1.bf16.msra.mxu0 %v7867_v4  ;;  %v8268_v4 = vcombine.high %v501_v56, %v509_v59  ;;  %v7996_v8 = vcombine.high %v229_v0, %v237_v1 }
 0x162   :  { %3613 = vmatprep.subr.bf16.mxu0 %v8108_v6  ;;  %v8011_v6 = vcombine.low %v245_v54, %v253_v55  ;;  %v430_v54 = vld [vmem:[#allocation5 + $0xa68] sm:$0xff] }
 0x163   :  { %3655 = vmatpush1.bf16.msra.mxu1 %v8123_v5  ;;  %v493_v5 = vld [vmem:[#allocation5 + $0xc60] sm:$0xff] }
 0x164   :  { %3656 = vmatprep.subr.bf16.mxu1 %v8364_v11  ;;  %v222_v11 = vld [vmem:[#allocation5 + $0x3e8] sm:$0xff]  ;;  %v8251_v17 = vcombine.low %v485_v2, %v493_v5 }
 0x165   :  { %3614 = vmatpush2.bf16.msra.mxu0 %v8107_v13  ;;  %v8252_v13 = vcombine.high %v485_v2, %v493_v5  ;;  %v7982_v18 = vcombine.high %v214_v9, %v222_v11  ;;  %v7981_v27 = vcombine.low %v214_v9, %v222_v11  ;;  %v406_v2 = vld [vmem:[#allocation5 + $0x9a8] sm:$0xff] }
 0x166   :  { %3615 = vmatprep.subr.bf16.mxu0 %v8092_v15  ;;  %v7995_v15 = vcombine.low %v229_v0, %v237_v1  ;;  %v150_v0 = vld [vmem:[#allocation5 + $0x1a8] sm:$0xff] }
 0x167   :  { %3657 = vmatpush2.bf16.msra.mxu1 %v8363_v14  ;;  %v478_v14 = vld [vmem:[#allocation5 + $0xbe8] sm:$0xff] }
 0x168   :  { %3658 = vmatprep.subr.bf16.mxu1 %v8348_v19  ;;  %v198_v19 = vld [vmem:[#allocation5 + $0x328] sm:$0xff] }
 0x169   :  { %3616 = vmatpush2.bf16.msra.mxu0 %v8091_v22  ;;  %v454_v22 = vld [vmem:[#allocation5 + $0xb28] sm:$0xff]  ;;  %v7966_v30 = vcombine.high %v198_v19, %v206_v21 }
 0x16a   :  { %3617 = vmatprep.subr.bf16.mxu0 %v8076_v25  ;;  %v462_v25 = vld [vmem:[#allocation5 + $0xb68] sm:$0xff] }
 0x16b   :  { %3659 = vmatpush2.bf16.msra.mxu1 %v8347_v24  ;;  %v8238_v24 = vcombine.high %v470_v12, %v478_v14  ;;  %v8222_v37 = vcombine.high %v454_v22, %v462_v25  ;;  %v158_v1 = vld [vmem:[#allocation5 + $0x1e8] sm:$0xff] }
 0x16c   :  { %3660 = vmatprep.subr.bf16.mxu1 %v8332_v29  ;;  %v8237_v29 = vcombine.low %v470_v12, %v478_v14  ;;  %v7918_v9 = vcombine.high %v150_v0, %v158_v1  ;;  %v142_v14 = vld [vmem:[#allocation5 + $0x168] sm:$0xff] }
 0x16d   :  { %3618 = vmatpush2.bf16.msra.mxu0 %v8075_v31  ;;  %v182_v31 = vld [vmem:[#allocation5 + $0x2a8] sm:$0xff] }
 0x16e   :  { %3619 = vmatprep.subr.bf16.mxu0 %v8060_v33  ;;  %v438_v33 = vld [vmem:[#allocation5 + $0xaa8] sm:$0xff] }
 0x16f   :  { %3661 = vmatpush2.bf16.msra.mxu1 %v8331_v32  ;;  %v190_v32 = vld [vmem:[#allocation5 + $0x2e8] sm:$0xff]  ;;  %v8205_v59 = vcombine.low %v438_v33, %v446_v38 }
 0x170   :  { %3662 = vmatprep.subr.bf16.mxu1 %v8316_v39  ;;  %v7950_v46 = vcombine.high %v182_v31, %v190_v32  ;;  %v7949_v56 = vcombine.low %v182_v31, %v190_v32 }
 0x171   :  { %3620 = vmatpush2.bf16.msra.mxu0 %v8059_v41  ;;  %v7965_v41 = vcombine.low %v198_v19, %v206_v21 }
 0x172   :  { %3621 = vmatprep.subr.bf16.mxu0 %v8044_v45  ;;  %v8221_v45 = vcombine.low %v454_v22, %v462_v25  ;;  %v126_v25 = vld [vmem:[#allocation5 + $0xe8] sm:$0xff] }
 0x173   :  { %3663 = vmatpush2.bf16.msra.mxu1 %v8315_v43 }
 0x174   :  { %3664 = vmatprep.subr.bf16.mxu1 %v8300_v49  ;;  %v8206_v49 = vcombine.high %v438_v33, %v446_v38  ;;  %v102_v33 = vld [vmem:[#allocation5 + $0x28] sm:$0xff] }
 0x175   :  { %3622 = vmatpush2.bf16.msra.mxu0 %v8043_v51  ;;  %v174_v51 = vld [vmem:[#allocation5 + $0x268] sm:$0xff] }
 0x176   :  { %3623 = vmatprep.subr.bf16.mxu0 %v8028_v53  ;;  %v422_v53 = vld [vmem:[#allocation5 + $0xa28] sm:$0xff] }
 0x177   :  { %3665 = vmatpush2.bf16.msra.mxu1 %v8299_v52  ;;  %v358_v38 = vld [vmem:[#allocation5 + $0x828] sm:$0xff] }
 0x178   :  { %3666 = vmatprep.subr.bf16.mxu1 %v8284_v57 }
 0x179   :  { %3624 = vmatpush2.bf16.msra.mxu0 %v8027_v60  ;;  %v7934_v60 = vcombine.high %v166_v50, %v174_v51 }
 0x17a   :  { %3625 = vmatprep.subr.bf16.mxu0 %v8012_v62  ;;  %v8190_v62 = vcombine.high %v422_v53, %v430_v54 }
 0x17b   :  { %3667 = vmatpush2.bf16.msra.mxu1 %v8283_v61 }
 0x17c   :  { %3668 = vmatprep.subr.bf16.mxu1 %v8268_v4  ;;  %v414_v4 = vld [vmem:[#allocation5 + $0x9e8] sm:$0xff] }
 0x17d   :  { %3626 = vmatpush2.bf16.msra.mxu0 %v8011_v6  ;;  %v8174_v12 = vcombine.high %v406_v2, %v414_v4  ;;  %v8173_v19 = vcombine.low %v406_v2, %v414_v4  ;;  %v318_v2 = vld [vmem:[#allocation5 + $0x6e8] sm:$0xff] }
 0x17e   :  { %3627 = vmatprep.subr.bf16.mxu0 %v7996_v8  ;;  %v8189_v8 = vcombine.low %v422_v53, %v430_v54  ;;  %v566_v4 = vld [vmem:[#allocation5 + $0xea8] sm:$0xff] }
 0x17f   :  { %3669 = vmatpush2.bf16.msra.mxu1 %v8267_v7  ;;  %v7933_v7 = vcombine.low %v166_v50, %v174_v51  ;;  %v606_v50 = vld [vmem:[#allocation5 + $0xfe8] sm:$0xff] }
 0x180   :  { %3670 = vmatprep.subr.bf16.mxu1 %v8252_v13  ;;  %v134_v13 = vld [vmem:[#allocation5 + $0x128] sm:$0xff] }
 0x181   :  { %3628 = vmatpush2.bf16.msra.mxu0 %v7995_v15  ;;  %v390_v15 = vld [vmem:[#allocation5 + $0x928] sm:$0xff]  ;;  %v7902_v21 = vcombine.high %v134_v13, %v142_v14 }
 0x182   :  { %3683 = vmatprep.subr.bf16.mxu0 %v7982_v18  ;;  %v7917_v18 = vcombine.low %v150_v0, %v158_v1  ;;  %v310_v1 = vld [vmem:[#allocation5 + $0x6a8] sm:$0xff] }
 0x183   :  { %3671 = vmatpush2.bf16.msra.mxu1 %v8251_v17  ;;  %v398_v17 = vld [vmem:[#allocation5 + $0x968] sm:$0xff] }
 0x184   :  { %3726 = vmatprep.subr.bf16.mxu1 %v8238_v24  ;;  %v3373_v39 = vpop.f32.mrf.mxu0  ;;  %3630 = vmatmul.mubr.bf16.vlgmr.msra.gmra.mxu0 %v9872_v20  ;;  %v8158_v22 = vcombine.high %v390_v15, %v398_v17  ;;  %v118_v24 = vld [vmem:[#allocation5 + $0xa8] sm:$0xff] }
 0x185   :  { %v3374_v40 = vadd.f32 %v3373_v39, %v624_v26  ;;  %3684 = vmatpush1.bf16.msra.mxu0 %v7981_v27  ;;  %3715 = vmatprep.mubr.bf16.mxu0 %v9866_v58  ;;  %v382_v27 = vld [vmem:[#allocation5 + $0x8e8] sm:$0xff]  ;;  %v7886_v31 = vcombine.high %v118_v24, %v126_v25 }
 0x186   :  { %v3416_v42 = vpop.f32.mrf.mxu1  ;;  %3673 = vmatmul.mubr.bf16.vlgmr.msra.gmra.mxu1 %v9874_v23  ;;  %v9918_v43 = vpop.f32.mrf.mxu0  ;;  %3685 = vmatprep.subr.bf16.mxu0 %v7966_v30  ;;  %v8157_v30 = vcombine.low %v390_v15, %v398_v17  ;;  %v366_v39 = vld [vmem:[#allocation5 + $0x868] sm:$0xff]  ;;  %v8077_v17 = vcombine.low %v310_v1, %v318_v2 }
 0x187   :  { %3727 = vmatpush1.bf16.msra.mxu1 %v8237_v29  ;;  %v3417_v47 = vadd.f32 %v3416_v42, %v3374_v40  ;;  %3758 = vmatprep.mubr.bf16.mxu1 %v9868_v63  ;;  %v7901_v29 = vcombine.low %v134_v13, %v142_v14  ;;  %v7885_v40 = vcombine.low %v118_v24, %v126_v25  ;;  %v302_v13 = vld [vmem:[#allocation5 + $0x668] sm:$0xff] }
 0x188   :  { %v9920_v48 = vpop.f32.mrf.mxu1  ;;  %3728 = vmatprep.subr.bf16.mxu1 %v8222_v37  ;;  %v3377_v52 = vpop.f32.mrf.mxu0  ;;  %v110_v37 = vld [vmem:[#allocation5 + $0x68] sm:$0xff] }
 0x189   :  { %v3378_v55 = vadd.f32 %v3377_v52, %v624_v26  ;;  %3686 = vmatpush1.bf16.msra.mxu0 %v7965_v41  ;;  %v3943_v5 = vmax.f32 %v3417_v47, 0.0  ;;  %v374_v26 = vld [vmem:[#allocation5 + $0x8a8] sm:$0xff]  ;;  %v7870_v41 = vcombine.high %v102_v33, %v110_v37  ;;  %v7869_v51 = vcombine.low %v102_v33, %v110_v37 }
 0x18a   :  { %v3420_v57 = vpop.f32.mrf.mxu1  ;;  %3687 = vmatprep.subr.bf16.mxu0 %v7950_v46  ;;  %v8142_v32 = vcombine.high %v374_v26, %v382_v27  ;;  %v8141_v42 = vcombine.low %v374_v26, %v382_v27  ;;  %v342_v46 = vld [vmem:[#allocation5 + $0x7a8] sm:$0xff]  ;;  %v8125_v52 = vcombine.low %v358_v38, %v366_v39 }
 0x18b   :  { %3729 = vmatpush1.bf16.msra.mxu1 %v8221_v45  ;;  %v3421_v61 = vadd.f32 %v3420_v57, %v3378_v55  ;;  %v8126_v45 = vcombine.high %v358_v38, %v366_v39  ;;  %v350_v47 = vld [vmem:[#allocation5 + $0x7e8] sm:$0xff] }
 0x18c   :  { %3730 = vmatprep.subr.bf16.mxu1 %v8206_v49  ;;  %v598_v49 = vld [vmem:[#allocation5 + $0xfa8] sm:$0xff]  ;;  %v8110_v53 = vcombine.high %v342_v46, %v350_v47 }
 0x18d   :  { %v3959_v6 = vmax.f32 %v3421_v61, 0.0  ;;  %3688 = vmatpush1.bf16.msra.mxu0 %v7949_v56  ;;  %v8366_v54 = vcombine.high %v598_v49, %v606_v50  ;;  %v326_v55 = vld [vmem:[#allocation5 + $0x728] sm:$0xff]  ;;  %v8365_v61 = vcombine.low %v598_v49, %v606_v50 }
 0x18e   :  { %3689 = vmatprep.subr.bf16.mxu0 %v7934_v60  ;;  %v334_v56 = vld [vmem:[#allocation5 + $0x768] sm:$0xff]  ;;  %v8109_v60 = vcombine.low %v342_v46, %v350_v47 }
 0x18f   :  { %3731 = vmatpush1.bf16.msra.mxu1 %v8205_v59  ;;  %v9924_v11 = vpack.c.bf16 %v3959_v6, %v3943_v5  ;;  %v582_v57 = vld [vmem:[#allocation5 + $0xf28] sm:$0xff]  ;;  %v8093_v6 = vcombine.low %v326_v55, %v334_v56 }
 0x190   :  { %3732 = vmatprep.subr.bf16.mxu1 %v8190_v62  ;;  %v590_v59 = vld [vmem:[#allocation5 + $0xf68] sm:$0xff]  ;;  %v8094_v62 = vcombine.high %v326_v55, %v334_v56 }
 0x191   :  { %3690 = vmatpush1.bf16.msra.mxu0 %v7933_v7  ;;  %v8350_v0 = vcombine.high %v582_v57, %v590_v59  ;;  %v574_v5 = vld [vmem:[#allocation5 + $0xee8] sm:$0xff]  ;;  %v8349_v7 = vcombine.low %v582_v57, %v590_v59 }
 0x192   :  { %3691 = vmatprep.subr.bf16.mxu0 %v7918_v9  ;;  %v8334_v9 = vcombine.high %v566_v4, %v574_v5  ;;  %v550_v14 = vld [vmem:[#allocation5 + $0xe28] sm:$0xff] }
 0x193   :  { %3733 = vmatpush1.bf16.msra.mxu1 %v8189_v8  ;;  %v8078_v8 = vcombine.high %v310_v1, %v318_v2  ;;  %v558_v15 = vld [vmem:[#allocation5 + $0xe68] sm:$0xff]  ;;  %v223_v1 = vld [vmem:[#allocation5 + $0x3f0] sm:$0xff] }
 0x194   :  { %3734 = vmatprep.subr.bf16.mxu1 %v8174_v12  ;;  %v294_v12 = vld [vmem:[#allocation5 + $0x628] sm:$0xff]  ;;  %v471_v2 = vld [vmem:[#allocation5 + $0xbb0] sm:$0xff] }
 0x195   :  { %3692 = vmatpush1.bf16.msra.mxu0 %v7917_v18  ;;  %v8333_v18 = vcombine.low %v566_v4, %v574_v5  ;;  %v286_v24 = vld [vmem:[#allocation5 + $0x5e8] sm:$0xff]  ;;  %v8061_v27 = vcombine.low %v294_v12, %v302_v13  ;;  %v479_v4 = vld [vmem:[#allocation5 + $0xbf0] sm:$0xff] }
 0x196   :  { %3693 = vmatprep.subr.bf16.mxu0 %v7902_v21  ;;  %v8318_v21 = vcombine.high %v550_v14, %v558_v15  ;;  %v534_v25 = vld [vmem:[#allocation5 + $0xda8] sm:$0xff] }
 0x197   :  { %3735 = vmatpush1.bf16.msra.mxu1 %v8173_v19  ;;  %v8062_v19 = vcombine.high %v294_v12, %v302_v13  ;;  %v542_v26 = vld [vmem:[#allocation5 + $0xde8] sm:$0xff]  ;;  %v199_v12 = vld [vmem:[#allocation5 + $0x330] sm:$0xff] }
 0x198   :  { %3736 = vmatprep.subr.bf16.mxu1 %v8158_v22  ;;  %v278_v22 = vld [vmem:[#allocation5 + $0x5a8] sm:$0xff]  ;;  %v207_v13 = vld [vmem:[#allocation5 + $0x370] sm:$0xff] }
 0x199   :  { %3694 = vmatpush1.bf16.msra.mxu0 %v7901_v29  ;;  %v8317_v29 = vcombine.low %v550_v14, %v558_v15  ;;  %v270_v33 = vld [vmem:[#allocation5 + $0x568] sm:$0xff]  ;;  %v8045_v39 = vcombine.low %v278_v22, %v286_v24  ;;  %v455_v14 = vld [vmem:[#allocation5 + $0xb30] sm:$0xff] }
 0x19a   :  { %3695 = vmatprep.subr.bf16.mxu0 %v7886_v31  ;;  %v8302_v31 = vcombine.high %v534_v25, %v542_v26  ;;  %v518_v37 = vld [vmem:[#allocation5 + $0xd28] sm:$0xff]  ;;  %v463_v15 = vld [vmem:[#allocation5 + $0xb70] sm:$0xff] }
 0x19b   :  { %3737 = vmatpush1.bf16.msra.mxu1 %v8157_v30  ;;  %v8046_v30 = vcombine.high %v278_v22, %v286_v24  ;;  %v526_v38 = vld [vmem:[#allocation5 + $0xd68] sm:$0xff]  ;;  %v8239_v22 = vcombine.low %v471_v2, %v479_v4  ;;  %v7968_v24 = vcombine.high %v199_v12, %v207_v13 }
 0x19c   :  { %3738 = vmatprep.subr.bf16.mxu1 %v8142_v32  ;;  %v262_v32 = vld [vmem:[#allocation5 + $0x528] sm:$0xff] }
 0x19d   :  { %3696 = vmatpush1.bf16.msra.mxu0 %v7885_v40  ;;  %v8301_v40 = vcombine.low %v534_v25, %v542_v26  ;;  %v254_v46 = vld [vmem:[#allocation5 + $0x4e8] sm:$0xff]  ;;  %v8029_v50 = vcombine.low %v262_v32, %v270_v33  ;;  %v9934_v25 = vpop.f32.mrf.mxu1  ;;  %v8224_v26 = vcombine.high %v455_v14, %v463_v15 }
 0x19e   :  { %3697 = vmatprep.subr.bf16.mxu0 %v7870_v41  ;;  %v8286_v41 = vcombine.high %v518_v37, %v526_v38  ;;  %v502_v47 = vld [vmem:[#allocation5 + $0xca8] sm:$0xff] }
 0x19f   :  { %3739 = vmatpush1.bf16.msra.mxu1 %v8141_v42  ;;  %v8030_v42 = vcombine.high %v262_v32, %v270_v33  ;;  %v510_v49 = vld [vmem:[#allocation5 + $0xce8] sm:$0xff]  ;;  %v447_v32 = vld [vmem:[#allocation5 + $0xaf0] sm:$0xff] }
 0x1a0   :  { %3740 = vmatprep.subr.bf16.mxu1 %v8126_v45  ;;  %v246_v45 = vld [vmem:[#allocation5 + $0x4a8] sm:$0xff] }
 0x1a1   :  { %3698 = vmatpush1.bf16.msra.mxu0 %v7869_v51  ;;  %v8285_v51 = vcombine.low %v518_v37, %v526_v38  ;;  %v238_v55 = vld [vmem:[#allocation5 + $0x468] sm:$0xff]  ;;  %v8013_v59 = vcombine.low %v246_v45, %v254_v46  ;;  %v7967_v38 = vcombine.low %v199_v12, %v207_v13  ;;  %v135_v13 = vld [vmem:[#allocation5 + $0x130] sm:$0xff] }
 0x1a2   :  { %3699 = vmatprep.subr.bf16.mxu0 %v8110_v53  ;;  %v8270_v53 = vcombine.high %v502_v47, %v510_v49  ;;  %v486_v56 = vld [vmem:[#allocation5 + $0xc28] sm:$0xff] }
 0x1a3   :  { %3741 = vmatpush1.bf16.msra.mxu1 %v8125_v52  ;;  %v8014_v52 = vcombine.high %v246_v45, %v254_v46  ;;  %v494_v57 = vld [vmem:[#allocation5 + $0xc68] sm:$0xff] }
 0x1a4   :  { %3742 = vmatprep.subr.bf16.mxu1 %v8366_v54  ;;  %v230_v54 = vld [vmem:[#allocation5 + $0x428] sm:$0xff] }
 0x1a5   :  { %3700 = vmatpush2.bf16.msra.mxu0 %v8109_v60  ;;  %v8269_v60 = vcombine.low %v502_v47, %v510_v49  ;;  %v7997_v5 = vcombine.low %v230_v54, %v238_v55  ;;  %v167_v47 = vld [vmem:[#allocation5 + $0x230] sm:$0xff] }
 0x1a6   :  { %3701 = vmatprep.subr.bf16.mxu0 %v8094_v62  ;;  %v8254_v62 = vcombine.high %v486_v56, %v494_v57  ;;  %v175_v49 = vld [vmem:[#allocation5 + $0x270] sm:$0xff] }
 0x1a7   :  { %3743 = vmatpush2.bf16.msra.mxu1 %v8365_v61  ;;  %v7998_v61 = vcombine.high %v230_v54, %v238_v55 }
 0x1a8   :  { %3744 = vmatprep.subr.bf16.mxu1 %v8350_v0  ;;  %v215_v0 = vld [vmem:[#allocation5 + $0x3b0] sm:$0xff] }
 0x1a9   :  { %3702 = vmatpush2.bf16.msra.mxu0 %v8093_v6  ;;  %v631_v6 = vsub.s32 4, %v9888_v34 }
 0x1aa   :  { %3703 = vmatprep.subr.bf16.mxu0 %v8078_v8  ;;  %v7984_v8 = vcombine.high %v215_v0, %v223_v1 }
 0x1ab   :  { %3745 = vmatpush2.bf16.msra.mxu1 %v8349_v7  ;;  %v8253_v7 = vcombine.low %v486_v56, %v494_v57  ;;  %v7936_v57 = vcombine.high %v167_v47, %v175_v49 }
 0x1ac   :  { %3746 = vmatprep.subr.bf16.mxu1 %v8334_v9  ;;  %v8240_v9 = vcombine.high %v471_v2, %v479_v4 }
 0x1ad   :  { %3704 = vmatpush2.bf16.msra.mxu0 %v8077_v17  ;;  %v9927_v17 = vld [vmem:[#allocation7] sm:$0xff] }
 0x1ae   :  { %3705 = vmatprep.subr.bf16.mxu0 %v8062_v19  ;;  %v7983_v19 = vcombine.low %v215_v0, %v223_v1  ;;  %v407_v0 = vld [vmem:[#allocation5 + $0x9b0] sm:$0xff] }
 0x1af   :  { %3747 = vmatpush2.bf16.msra.mxu1 %v8333_v18  ;;  %v632_v18 = vrot.slane %v9927_v17, %v631_v6  ;;  %v415_v1 = vld [vmem:[#allocation5 + $0x9f0] sm:$0xff] }
 0x1b0   :  { %3748 = vmatprep.subr.bf16.mxu1 %v8318_v21  ;;  %v9932_v21 = vpop.f32.mrf.mxu0  ;;  %v8176_v12 = vcombine.high %v407_v0, %v415_v1 }
 0x1b1   :  { %3706 = vmatpush2.bf16.msra.mxu0 %v8061_v27  ;;  %v183_v27 = vld [vmem:[#allocation5 + $0x2b0] sm:$0xff] }
 0x1b2   :  { %3707 = vmatprep.subr.bf16.mxu0 %v8046_v30 }
 0x1b3   :  { %3749 = vmatpush2.bf16.msra.mxu1 %v8317_v29  ;;  %v191_v29 = vld [vmem:[#allocation5 + $0x2f0] sm:$0xff] }
 0x1b4   :  { %3750 = vmatprep.subr.bf16.mxu1 %v8302_v31  ;;  %v439_v31 = vld [vmem:[#allocation5 + $0xab0] sm:$0xff]  ;;  %v7951_v54 = vcombine.low %v183_v27, %v191_v29 }
 0x1b5   :  { %3708 = vmatpush2.bf16.msra.mxu0 %v8045_v39  ;;  %v8208_v46 = vcombine.high %v439_v31, %v447_v32  ;;  %v8207_v56 = vcombine.low %v439_v31, %v447_v32  ;;  %v383_v31 = vld [vmem:[#allocation5 + $0x8f0] sm:$0xff] }
 0x1b6   :  { %3709 = vmatprep.subr.bf16.mxu0 %v8030_v42  ;;  %v7952_v42 = vcombine.high %v183_v27, %v191_v29  ;;  %v119_v27 = vld [vmem:[#allocation5 + $0xb0] sm:$0xff] }
 0x1b7   :  { %3751 = vmatpush2.bf16.msra.mxu1 %v8301_v40  ;;  %v8223_v40 = vcombine.low %v455_v14, %v463_v15  ;;  %v143_v14 = vld [vmem:[#allocation5 + $0x170] sm:$0xff] }
 0x1b8   :  { %3752 = vmatprep.subr.bf16.mxu1 %v8286_v41  ;;  %v391_v15 = vld [vmem:[#allocation5 + $0x930] sm:$0xff]  ;;  %v7903_v32 = vcombine.low %v135_v13, %v143_v14 }
 0x1b9   :  { %3710 = vmatpush2.bf16.msra.mxu0 %v8029_v50  ;;  %v127_v29 = vld [vmem:[#allocation5 + $0xf0] sm:$0xff] }
 0x1ba   :  { %3711 = vmatprep.subr.bf16.mxu0 %v8014_v52  ;;  %v431_v52 = vld [vmem:[#allocation5 + $0xa70] sm:$0xff] }
 0x1bb   :  { %3753 = vmatpush2.bf16.msra.mxu1 %v8285_v51  ;;  %v423_v51 = vld [vmem:[#allocation5 + $0xa30] sm:$0xff] }
 0x1bc   :  { %3754 = vmatprep.subr.bf16.mxu1 %v8270_v53 }
 0x1bd   :  { %3712 = vmatpush2.bf16.msra.mxu0 %v8013_v59 }
 0x1be   :  { %3713 = vmatprep.subr.bf16.mxu0 %v7998_v61  ;;  %v151_v61 = vld [vmem:[#allocation5 + $0x1b0] sm:$0xff] }
 0x1bf   :  { %3755 = vmatpush2.bf16.msra.mxu1 %v8269_v60  ;;  %v8192_v60 = vcombine.high %v423_v51, %v431_v52 }
 0x1c0   :  { %3756 = vmatprep.subr.bf16.mxu1 %v8254_v62  ;;  %v159_v62 = vld [vmem:[#allocation5 + $0x1f0] sm:$0xff] }
 0x1c1   :  { %3714 = vmatpush2.bf16.msra.mxu0 %v7997_v5  ;;  %v7935_v5 = vcombine.low %v167_v47, %v175_v49  ;;  %v7887_v47 = vcombine.low %v119_v27, %v127_v29 }
 0x1c2   :  { %3769 = vmatprep.subr.bf16.mxu0 %v7984_v8  ;;  %v7920_v8 = vcombine.high %v151_v61, %v159_v62 }
 0x1c3   :  { %3757 = vmatpush2.bf16.msra.mxu1 %v8253_v7  ;;  %v8191_v7 = vcombine.low %v423_v51, %v431_v52  ;;  %v343_v52 = vld [vmem:[#allocation5 + $0x7b0] sm:$0xff] }
 0x1c4   :  { %3812 = vmatprep.subr.bf16.mxu1 %v8240_v9  ;;  %v3459_v30 = vpop.f32.mrf.mxu0  ;;  %3716 = vmatmul.mubr.bf16.vlgmr.msra.gmra.mxu0 %v9872_v20 }
 0x1c5   :  { %v3460_v33 = vadd.f32 %v3459_v30, %v632_v18  ;;  %3770 = vmatpush1.bf16.msra.mxu0 %v7983_v19  ;;  %3801 = vmatprep.mubr.bf16.mxu0 %v9866_v58  ;;  %v7919_v19 = vcombine.low %v151_v61, %v159_v62  ;;  %v375_v30 = vld [vmem:[#allocation5 + $0x8b0] sm:$0xff] }
 0x1c6   :  { %v3502_v37 = vpop.f32.mrf.mxu1  ;;  %3759 = vmatmul.mubr.bf16.vlgmr.msra.gmra.mxu1 %v9874_v23  ;;  %v9938_v39 = vpop.f32.mrf.mxu0  ;;  %3771 = vmatprep.subr.bf16.mxu0 %v7968_v24  ;;  %v7904_v24 = vcombine.high %v135_v13, %v143_v14  ;;  %v8143_v49 = vcombine.low %v375_v30, %v383_v31  ;;  %v327_v61 = vld [vmem:[#allocation5 + $0x730] sm:$0xff] }
 0x1c7   :  { %3813 = vmatpush1.bf16.msra.mxu1 %v8239_v22  ;;  %v3503_v41 = vadd.f32 %v3502_v37, %v3460_v33  ;;  %3844 = vmatprep.mubr.bf16.mxu1 %v9868_v63  ;;  %v8175_v22 = vcombine.low %v407_v0, %v415_v1  ;;  %v7888_v37 = vcombine.high %v119_v27, %v127_v29  ;;  %v335_v62 = vld [vmem:[#allocation5 + $0x770] sm:$0xff] }
 0x1c8   :  { %v9940_v45 = vpop.f32.mrf.mxu1  ;;  %3814 = vmatprep.subr.bf16.mxu1 %v8224_v26  ;;  %v3463_v50 = vpop.f32.mrf.mxu0  ;;  %v583_v0 = vld [vmem:[#allocation5 + $0xf30] sm:$0xff] }
 0x1c9   :  { %v3464_v53 = vadd.f32 %v3463_v50, %v632_v18  ;;  %3772 = vmatpush1.bf16.msra.mxu0 %v7967_v38  ;;  %v3945_v2 = vmax.f32 %v3503_v41, 0.0  ;;  %v399_v18 = vld [vmem:[#allocation5 + $0x970] sm:$0xff]  ;;  %v8144_v38 = vcombine.high %v375_v30, %v383_v31 }
 0x1ca   :  { %v3506_v55 = vpop.f32.mrf.mxu1  ;;  %3773 = vmatprep.subr.bf16.mxu0 %v7952_v42  ;;  %v8160_v26 = vcombine.high %v391_v15, %v399_v18  ;;  %v8159_v33 = vcombine.low %v391_v15, %v399_v18  ;;  %v111_v42 = vld [vmem:[#allocation5 + $0x70] sm:$0xff]  ;;  %v8095_v15 = vcombine.low %v327_v61, %v335_v62 }
 0x1cb   :  { %3815 = vmatpush1.bf16.msra.mxu1 %v8223_v40  ;;  %v3507_v59 = vadd.f32 %v3506_v55, %v3464_v53  ;;  %v103_v40 = vld [vmem:[#allocation5 + $0x30] sm:$0xff] }
 0x1cc   :  { %3816 = vmatprep.subr.bf16.mxu1 %v8208_v46  ;;  %v359_v41 = vld [vmem:[#allocation5 + $0x830] sm:$0xff]  ;;  %v7872_v50 = vcombine.high %v103_v40, %v111_v42 }
 0x1cd   :  { %v3961_v4 = vmax.f32 %v3507_v59, 0.0  ;;  %3774 = vmatpush1.bf16.msra.mxu0 %v7951_v54  ;;  %v367_v46 = vld [vmem:[#allocation5 + $0x870] sm:$0xff] }
 0x1ce   :  { %3775 = vmatprep.subr.bf16.mxu0 %v7936_v57  ;;  %v8128_v51 = vcombine.high %v359_v41, %v367_v46  ;;  %v351_v53 = vld [vmem:[#allocation5 + $0x7f0] sm:$0xff]  ;;  %v8127_v57 = vcombine.low %v359_v41, %v367_v46 }
 0x1cf   :  { %3817 = vmatpush1.bf16.msra.mxu1 %v8207_v56  ;;  %v9944_v9 = vpack.c.bf16 %v3961_v4, %v3945_v2  ;;  %v599_v54 = vld [vmem:[#allocation5 + $0xfb0] sm:$0xff]  ;;  %v7871_v56 = vcombine.low %v103_v40, %v111_v42  ;;  %v8112_v59 = vcombine.high %v343_v52, %v351_v53  ;;  %v8111_v2 = vcombine.low %v343_v52, %v351_v53 }
 0x1d0   :  { %3818 = vmatprep.subr.bf16.mxu1 %v8192_v60  ;;  %v607_v55 = vld [vmem:[#allocation5 + $0xff0] sm:$0xff] }
 0x1d1   :  { %3776 = vmatpush1.bf16.msra.mxu0 %v7935_v5  ;;  %v8368_v60 = vcombine.high %v599_v54, %v607_v55  ;;  %v591_v1 = vld [vmem:[#allocation5 + $0xf70] sm:$0xff]  ;;  %v8367_v4 = vcombine.low %v599_v54, %v607_v55  ;;  %v8096_v5 = vcombine.high %v327_v61, %v335_v62 }
 0x1d2   :  { %3777 = vmatprep.subr.bf16.mxu0 %v7920_v8  ;;  %v311_v8 = vld [vmem:[#allocation5 + $0x6b0] sm:$0xff]  ;;  %v8351_v18 = vcombine.low %v583_v0, %v591_v1 }
 0x1d3   :  { %3819 = vmatpush1.bf16.msra.mxu1 %v8191_v7  ;;  %v8352_v7 = vcombine.high %v583_v0, %v591_v1  ;;  %v567_v13 = vld [vmem:[#allocation5 + $0xeb0] sm:$0xff] }
 0x1d4   :  { %3820 = vmatprep.subr.bf16.mxu1 %v8176_v12  ;;  %v319_v12 = vld [vmem:[#allocation5 + $0x6f0] sm:$0xff] }
 0x1d5   :  { %3778 = vmatpush1.bf16.msra.mxu0 %v7919_v19  ;;  %v575_v14 = vld [vmem:[#allocation5 + $0xef0] sm:$0xff]  ;;  %v8080_v19 = vcombine.high %v311_v8, %v319_v12  ;;  %v8079_v30 = vcombine.low %v311_v8, %v319_v12 }
 0x1d6   :  { %3779 = vmatprep.subr.bf16.mxu0 %v7904_v24  ;;  %v295_v24 = vld [vmem:[#allocation5 + $0x630] sm:$0xff]  ;;  %v8335_v31 = vcombine.low %v567_v13, %v575_v14 }
 0x1d7   :  { %3821 = vmatpush1.bf16.msra.mxu1 %v8175_v22  ;;  %v8336_v22 = vcombine.high %v567_v13, %v575_v14  ;;  %v551_v27 = vld [vmem:[#allocation5 + $0xe30] sm:$0xff] }
 0x1d8   :  { %3822 = vmatprep.subr.bf16.mxu1 %v8160_v26  ;;  %v303_v26 = vld [vmem:[#allocation5 + $0x670] sm:$0xff] }
 0x1d9   :  { %3780 = vmatpush1.bf16.msra.mxu0 %v7903_v32  ;;  %v559_v29 = vld [vmem:[#allocation5 + $0xe70] sm:$0xff]  ;;  %v8064_v32 = vcombine.high %v295_v24, %v303_v26  ;;  %v8063_v41 = vcombine.low %v295_v24, %v303_v26  ;;  %v472_v24 = vld [vmem:[#allocation5 + $0xbb8] sm:$0xff] }
 0x1da   :  { %3781 = vmatprep.subr.bf16.mxu0 %v7888_v37  ;;  %v279_v37 = vld [vmem:[#allocation5 + $0x5b0] sm:$0xff]  ;;  %v8319_v46 = vcombine.low %v551_v27, %v559_v29  ;;  %v480_v26 = vld [vmem:[#allocation5 + $0xbf8] sm:$0xff] }
 0x1db   :  { %3823 = vmatpush1.bf16.msra.mxu1 %v8159_v33  ;;  %v8320_v33 = vcombine.high %v551_v27, %v559_v29  ;;  %v535_v40 = vld [vmem:[#allocation5 + $0xdb0] sm:$0xff]  ;;  %v639_v29 = vsub.s32 6, %v9888_v34 }
 0x1dc   :  { %3824 = vmatprep.subr.bf16.mxu1 %v8144_v38  ;;  %v287_v38 = vld [vmem:[#allocation5 + $0x5f0] sm:$0xff] }
 0x1dd   :  { %3782 = vmatpush1.bf16.msra.mxu0 %v7887_v47  ;;  %v543_v42 = vld [vmem:[#allocation5 + $0xdf0] sm:$0xff]  ;;  %v8048_v47 = vcombine.high %v279_v37, %v287_v38  ;;  %v8047_v54 = vcombine.low %v279_v37, %v287_v38  ;;  %v208_v37 = vld [vmem:[#allocation5 + $0x378] sm:$0xff] }
 0x1de   :  { %3783 = vmatprep.subr.bf16.mxu0 %v7872_v50  ;;  %v263_v50 = vld [vmem:[#allocation5 + $0x530] sm:$0xff]  ;;  %v8303_v55 = vcombine.low %v535_v40, %v543_v42  ;;  %v456_v38 = vld [vmem:[#allocation5 + $0xb38] sm:$0xff] }
 0x1df   :  { %3825 = vmatpush1.bf16.msra.mxu1 %v8143_v49  ;;  %v8304_v49 = vcombine.high %v535_v40, %v543_v42  ;;  %v519_v52 = vld [vmem:[#allocation5 + $0xd30] sm:$0xff]  ;;  %v464_v40 = vld [vmem:[#allocation5 + $0xb78] sm:$0xff]  ;;  %v640_v42 = vrot.slane %v9927_v17, %v639_v29 }
 0x1e0   :  { %3826 = vmatprep.subr.bf16.mxu1 %v8128_v51  ;;  %v271_v51 = vld [vmem:[#allocation5 + $0x570] sm:$0xff] }
 0x1e1   :  { %3784 = vmatpush1.bf16.msra.mxu0 %v7871_v56  ;;  %v527_v53 = vld [vmem:[#allocation5 + $0xd70] sm:$0xff]  ;;  %v8032_v56 = vcombine.high %v263_v50, %v271_v51  ;;  %v8031_v0 = vcombine.low %v263_v50, %v271_v51  ;;  %v9952_v50 = vpop.f32.mrf.mxu1  ;;  %v8226_v51 = vcombine.high %v456_v38, %v464_v40 }
 0x1e2   :  { %3785 = vmatprep.subr.bf16.mxu0 %v8112_v59  ;;  %v247_v59 = vld [vmem:[#allocation5 + $0x4b0] sm:$0xff]  ;;  %v8287_v1 = vcombine.low %v519_v52, %v527_v53 }
 0x1e3   :  { %3827 = vmatpush1.bf16.msra.mxu1 %v8127_v57  ;;  %v8288_v57 = vcombine.high %v519_v52, %v527_v53  ;;  %v503_v61 = vld [vmem:[#allocation5 + $0xcb0] sm:$0xff]  ;;  %v184_v52 = vld [vmem:[#allocation5 + $0x2b8] sm:$0xff] }
 0x1e4   :  { %3828 = vmatprep.subr.bf16.mxu1 %v8368_v60  ;;  %v255_v60 = vld [vmem:[#allocation5 + $0x4f0] sm:$0xff]  ;;  %v192_v53 = vld [vmem:[#allocation5 + $0x2f8] sm:$0xff] }
 0x1e5   :  { %3786 = vmatpush2.bf16.msra.mxu0 %v8111_v2  ;;  %v511_v62 = vld [vmem:[#allocation5 + $0xcf0] sm:$0xff]  ;;  %v8016_v2 = vcombine.high %v247_v59, %v255_v60  ;;  %v8015_v13 = vcombine.low %v247_v59, %v255_v60 }
 0x1e6   :  { %3787 = vmatprep.subr.bf16.mxu0 %v8096_v5  ;;  %v231_v5 = vld [vmem:[#allocation5 + $0x430] sm:$0xff]  ;;  %v8271_v14 = vcombine.low %v503_v61, %v511_v62 }
 0x1e7   :  { %3829 = vmatpush2.bf16.msra.mxu1 %v8367_v4  ;;  %v8272_v4 = vcombine.high %v503_v61, %v511_v62  ;;  %v487_v8 = vld [vmem:[#allocation5 + $0xc30] sm:$0xff]  ;;  %v8225_v62 = vcombine.low %v456_v38, %v464_v40 }
 0x1e8   :  { %3830 = vmatprep.subr.bf16.mxu1 %v8352_v7  ;;  %v239_v7 = vld [vmem:[#allocation5 + $0x470] sm:$0xff] }
 0x1e9   :  { %3788 = vmatpush2.bf16.msra.mxu0 %v8095_v15  ;;  %v495_v12 = vld [vmem:[#allocation5 + $0xc70] sm:$0xff]  ;;  %v8000_v15 = vcombine.high %v231_v5, %v239_v7  ;;  %v7999_v27 = vcombine.low %v231_v5, %v239_v7  ;;  %v168_v5 = vld [vmem:[#allocation5 + $0x238] sm:$0xff] }
 0x1ea   :  { %3789 = vmatprep.subr.bf16.mxu0 %v8080_v19  ;;  %v216_v19 = vld [vmem:[#allocation5 + $0x3b8] sm:$0xff] }
 0x1eb   :  { %3831 = vmatpush2.bf16.msra.mxu1 %v8351_v18  ;;  %v8256_v18 = vcombine.high %v487_v8, %v495_v12  ;;  %v176_v7 = vld [vmem:[#allocation5 + $0x278] sm:$0xff] }
 0x1ec   :  { %3832 = vmatprep.subr.bf16.mxu1 %v8336_v22  ;;  %v224_v22 = vld [vmem:[#allocation5 + $0x3f8] sm:$0xff] }
 0x1ed   :  { %3790 = vmatpush2.bf16.msra.mxu0 %v8079_v30  ;;  %v8255_v30 = vcombine.low %v487_v8, %v495_v12  ;;  %v424_v12 = vld [vmem:[#allocation5 + $0xa38] sm:$0xff] }
 0x1ee   :  { %3791 = vmatprep.subr.bf16.mxu0 %v8064_v32  ;;  %v8242_v32 = vcombine.high %v472_v24, %v480_v26 }
 0x1ef   :  { %3833 = vmatpush2.bf16.msra.mxu1 %v8335_v31  ;;  %v7986_v31 = vcombine.high %v216_v19, %v224_v22 }
 0x1f0   :  { %3834 = vmatprep.subr.bf16.mxu1 %v8320_v33  ;;  %v200_v33 = vld [vmem:[#allocation5 + $0x338] sm:$0xff] }
 0x1f1   :  { %3792 = vmatpush2.bf16.msra.mxu0 %v8063_v41  ;;  %v7985_v41 = vcombine.low %v216_v19, %v224_v22  ;;  %v7969_v60 = vcombine.low %v200_v33, %v208_v37  ;;  %v7938_v22 = vcombine.high %v168_v5, %v176_v7 }
 0x1f2   :  { %3793 = vmatprep.subr.bf16.mxu0 %v8048_v47  ;;  %v8241_v47 = vcombine.low %v472_v24, %v480_v26 }
 0x1f3   :  { %3835 = vmatpush2.bf16.msra.mxu1 %v8319_v46  ;;  %v9950_v46 = vpop.f32.mrf.mxu0 }
 0x1f4   :  { %3836 = vmatprep.subr.bf16.mxu1 %v8304_v49  ;;  %v7970_v49 = vcombine.high %v200_v33, %v208_v37  ;;  %v7937_v37 = vcombine.low %v168_v5, %v176_v7  ;;  %v104_v5 = vld [vmem:[#allocation5 + $0x38] sm:$0xff] }
 0x1f5   :  { %3794 = vmatpush2.bf16.msra.mxu0 %v8047_v54  ;;  %v112_v7 = vld [vmem:[#allocation5 + $0x78] sm:$0xff] }
 0x1f6   :  { %3795 = vmatprep.subr.bf16.mxu0 %v8032_v56  ;;  %v448_v56 = vld [vmem:[#allocation5 + $0xaf8] sm:$0xff] }
 0x1f7   :  { %3837 = vmatpush2.bf16.msra.mxu1 %v8303_v55  ;;  %v440_v55 = vld [vmem:[#allocation5 + $0xab8] sm:$0xff] }
 0x1f8   :  { %3838 = vmatprep.subr.bf16.mxu1 %v8288_v57  ;;  %v8209_v19 = vcombine.low %v440_v55, %v448_v56 }
 0x1f9   :  { %3796 = vmatpush2.bf16.msra.mxu0 %v8031_v0  ;;  %v7954_v0 = vcombine.high %v184_v52, %v192_v53 }
 0x1fa   :  { %3797 = vmatprep.subr.bf16.mxu0 %v8016_v2 }
 0x1fb   :  { %3839 = vmatpush2.bf16.msra.mxu1 %v8287_v1 }
 0x1fc   :  { %3840 = vmatprep.subr.bf16.mxu1 %v8272_v4  ;;  %v8210_v4 = vcombine.high %v440_v55, %v448_v56  ;;  %v120_v56 = vld [vmem:[#allocation5 + $0xb8] sm:$0xff] }
 0x1fd   :  { %3798 = vmatpush2.bf16.msra.mxu0 %v8015_v13  ;;  %v432_v13 = vld [vmem:[#allocation5 + $0xa78] sm:$0xff] }
 0x1fe   :  { %3799 = vmatprep.subr.bf16.mxu0 %v8000_v15  ;;  %v7953_v15 = vcombine.low %v184_v52, %v192_v53  ;;  %v8194_v26 = vcombine.high %v424_v12, %v432_v13 }
 0x1ff   :  { %3841 = vmatpush2.bf16.msra.mxu1 %v8271_v14 }
 0x200   :  { %3842 = vmatprep.subr.bf16.mxu1 %v8256_v18 }
 0x201   :  { %3800 = vmatpush2.bf16.msra.mxu0 %v7999_v27  ;;  %v152_v27 = vld [vmem:[#allocation5 + $0x1b8] sm:$0xff] }
 0x202   :  { %3855 = vmatprep.subr.bf16.mxu0 %v7986_v31  ;;  %v408_v31 = vld [vmem:[#allocation5 + $0x9b8] sm:$0xff] }
 0x203   :  { %3843 = vmatpush2.bf16.msra.mxu1 %v8255_v30  ;;  %v160_v30 = vld [vmem:[#allocation5 + $0x1f8] sm:$0xff] }
 0x204   :  { %3898 = vmatprep.subr.bf16.mxu1 %v8242_v32  ;;  %v3545_v54 = vpop.f32.mrf.mxu0  ;;  %3802 = vmatmul.mubr.bf16.vlgmr.msra.gmra.mxu0 %v9872_v20  ;;  %v7922_v38 = vcombine.high %v152_v27, %v160_v30  ;;  %v7921_v52 = vcombine.low %v152_v27, %v160_v30  ;;  %v7873_v27 = vcombine.low %v104_v5, %v112_v7 }
 0x205   :  { %v3546_v57 = vadd.f32 %v3545_v54, %v640_v42  ;;  %3856 = vmatpush1.bf16.msra.mxu0 %v7985_v41  ;;  %3887 = vmatprep.mubr.bf16.mxu0 %v9866_v58  ;;  %v416_v58 = vld [vmem:[#allocation5 + $0x9f8] sm:$0xff] }
 0x206   :  { %v3588_v59 = vpop.f32.mrf.mxu1  ;;  %3845 = vmatmul.mubr.bf16.vlgmr.msra.gmra.mxu1 %v9874_v23  ;;  %v9956_v61 = vpop.f32.mrf.mxu0  ;;  %3857 = vmatprep.subr.bf16.mxu0 %v7970_v49  ;;  %v136_v41 = vld [vmem:[#allocation5 + $0x138] sm:$0xff]  ;;  %v8177_v53 = vcombine.low %v408_v31, %v416_v58 }
 0x207   :  { %3899 = vmatpush1.bf16.msra.mxu1 %v8241_v47  ;;  %v3589_v1 = vadd.f32 %v3588_v59, %v3546_v57  ;;  %3930 = vmatprep.mubr.bf16.mxu1 %v9868_v63  ;;  %v8193_v63 = vcombine.low %v424_v12, %v432_v13  ;;  %v144_v47 = vld [vmem:[#allocation5 + $0x178] sm:$0xff] }
 0x208   :  { %v9958_v2 = vpop.f32.mrf.mxu1  ;;  %3900 = vmatprep.subr.bf16.mxu1 %v8226_v51  ;;  %v3549_v8 = vpop.f32.mrf.mxu0  ;;  %v392_v49 = vld [vmem:[#allocation5 + $0x938] sm:$0xff]  ;;  %v7906_v54 = vcombine.high %v136_v41, %v144_v47 }
 0x209   :  { %v3550_v14 = vadd.f32 %v3549_v8, %v640_v42  ;;  %3858 = vmatpush1.bf16.msra.mxu0 %v7969_v60  ;;  %v3947_v32 = vmax.f32 %v3589_v1, 0.0  ;;  %v8178_v42 = vcombine.high %v408_v31, %v416_v58  ;;  %v400_v51 = vld [vmem:[#allocation5 + $0x978] sm:$0xff] }
 0x20a   :  { %v3592_v18 = vpop.f32.mrf.mxu1  ;;  %3859 = vmatprep.subr.bf16.mxu0 %v7954_v0  ;;  %v8162_v55 = vcombine.high %v392_v49, %v400_v51  ;;  %v128_v57 = vld [vmem:[#allocation5 + $0xf8] sm:$0xff]  ;;  %v8161_v0 = vcombine.low %v392_v49, %v400_v51 }
 0x20b   :  { %3901 = vmatpush1.bf16.msra.mxu1 %v8225_v62  ;;  %v3593_v24 = vadd.f32 %v3592_v18, %v3550_v14  ;;  %v376_v59 = vld [vmem:[#allocation5 + $0x8b8] sm:$0xff]  ;;  %v7905_v62 = vcombine.low %v136_v41, %v144_v47  ;;  %v7890_v1 = vcombine.high %v120_v56, %v128_v57  ;;  %v7889_v13 = vcombine.low %v120_v56, %v128_v57 }
 0x20c   :  { %3902 = vmatprep.subr.bf16.mxu1 %v8210_v4  ;;  %v384_v60 = vld [vmem:[#allocation5 + $0x8f8] sm:$0xff] }
 0x20d   :  { %v3963_v33 = vmax.f32 %v3593_v24, 0.0  ;;  %3860 = vmatpush1.bf16.msra.mxu0 %v7953_v15  ;;  %v8146_v4 = vcombine.high %v376_v59, %v384_v60  ;;  %v360_v8 = vld [vmem:[#allocation5 + $0x838] sm:$0xff]  ;;  %v8145_v14 = vcombine.low %v376_v59, %v384_v60  ;;  %v7874_v15 = vcombine.high %v104_v5, %v112_v7 }
 0x20e   :  { %3861 = vmatprep.subr.bf16.mxu0 %v7938_v22  ;;  %v368_v12 = vld [vmem:[#allocation5 + $0x878] sm:$0xff] }
 0x20f   :  { %3903 = vmatpush1.bf16.msra.mxu1 %v8209_v19  ;;  %v9962_v40 = vpack.c.bf16 %v3963_v33, %v3947_v32  ;;  %v8130_v18 = vcombine.high %v360_v8, %v368_v12  ;;  %v344_v19 = vld [vmem:[#allocation5 + $0x7b8] sm:$0xff]  ;;  %v8129_v30 = vcombine.low %v360_v8, %v368_v12 }
 0x210   :  { %3904 = vmatprep.subr.bf16.mxu1 %v8194_v26  ;;  %v352_v22 = vld [vmem:[#allocation5 + $0x7f8] sm:$0xff] }
 0x211   :  { %3862 = vmatpush1.bf16.msra.mxu0 %v7937_v37  ;;  %v600_v24 = vld [vmem:[#allocation5 + $0xfb8] sm:$0xff]  ;;  %v8114_v31 = vcombine.high %v344_v19, %v352_v22 }
 0x212   :  { %3863 = vmatprep.subr.bf16.mxu0 %v7922_v38  ;;  %v608_v26 = vld [vmem:[#allocation5 + $0xff8] sm:$0xff]  ;;  %v8113_v38 = vcombine.low %v344_v19, %v352_v22 }
 0x213   :  { %3905 = vmatpush1.bf16.msra.mxu1 %v8193_v63  ;;  %v8370_v58 = vcombine.high %v600_v24, %v608_v26  ;;  %v328_v32 = vld [vmem:[#allocation5 + $0x738] sm:$0xff] }
 0x214   :  { %3906 = vmatprep.subr.bf16.mxu1 %v8178_v42  ;;  %v336_v33 = vld [vmem:[#allocation5 + $0x778] sm:$0xff]  ;;  %v8369_v42 = vcombine.low %v600_v24, %v608_v26 }
 0x215   :  { %3864 = vmatpush1.bf16.msra.mxu0 %v7921_v52  ;;  %v584_v37 = vld [vmem:[#allocation5 + $0xf38] sm:$0xff]  ;;  %v8098_v41 = vcombine.high %v328_v32, %v336_v33 }
 0x216   :  { %3865 = vmatprep.subr.bf16.mxu0 %v7906_v54  ;;  %v592_v63 = vld [vmem:[#allocation5 + $0xf78] sm:$0xff]  ;;  %v8097_v54 = vcombine.low %v328_v32, %v336_v33 }
 0x217   :  { %3907 = vmatpush1.bf16.msra.mxu1 %v8177_v53  ;;  %v8354_v47 = vcombine.high %v584_v37, %v592_v63  ;;  %v312_v49 = vld [vmem:[#allocation5 + $0x6b8] sm:$0xff] }
 0x218   :  { %3908 = vmatprep.subr.bf16.mxu1 %v8162_v55  ;;  %v320_v51 = vld [vmem:[#allocation5 + $0x6f8] sm:$0xff]  ;;  %v8353_v55 = vcombine.low %v584_v37, %v592_v63  ;;  %v9968_v37 = vsub.s32 3, %v9888_v34 }
 0x219   :  { %3866 = vmatpush1.bf16.msra.mxu0 %v7905_v62  ;;  %v568_v52 = vld [vmem:[#allocation5 + $0xeb8] sm:$0xff]  ;;  %v8082_v56 = vcombine.high %v312_v49, %v320_v51 }
 0x21a   :  { %3867 = vmatprep.subr.bf16.mxu0 %v7890_v1  ;;  %v576_v53 = vld [vmem:[#allocation5 + $0xef8] sm:$0xff]  ;;  %v8081_v1 = vcombine.low %v312_v49, %v320_v51 }
 0x21b   :  { %3909 = vmatpush1.bf16.msra.mxu1 %v8161_v0  ;;  %v8338_v57 = vcombine.high %v568_v52, %v576_v53  ;;  %v296_v59 = vld [vmem:[#allocation5 + $0x638] sm:$0xff] }
 0x21c   :  { %3910 = vmatprep.subr.bf16.mxu1 %v8146_v4  ;;  %v304_v60 = vld [vmem:[#allocation5 + $0x678] sm:$0xff]  ;;  %v8337_v4 = vcombine.low %v568_v52, %v576_v53 }
 0x21d   :  { %3868 = vmatpush1.bf16.msra.mxu0 %v7889_v13  ;;  %v552_v62 = vld [vmem:[#allocation5 + $0xe38] sm:$0xff]  ;;  %v8066_v5 = vcombine.high %v296_v59, %v304_v60 }
 0x21e   :  { %3869 = vmatprep.subr.bf16.mxu0 %v7874_v15  ;;  %v560_v0 = vld [vmem:[#allocation5 + $0xe78] sm:$0xff]  ;;  %v8065_v15 = vcombine.low %v296_v59, %v304_v60 }
 0x21f   :  { %3911 = vmatpush1.bf16.msra.mxu1 %v8145_v14  ;;  %v8322_v7 = vcombine.high %v552_v62, %v560_v0  ;;  %v280_v8 = vld [vmem:[#allocation5 + $0x5b8] sm:$0xff] }
 0x220   :  { %3912 = vmatprep.subr.bf16.mxu1 %v8130_v18  ;;  %v288_v12 = vld [vmem:[#allocation5 + $0x5f8] sm:$0xff]  ;;  %v8321_v18 = vcombine.low %v552_v62, %v560_v0 }
 0x221   :  { %3870 = vmatpush1.bf16.msra.mxu0 %v7873_v27  ;;  %v536_v13 = vld [vmem:[#allocation5 + $0xdb8] sm:$0xff]  ;;  %v8050_v19 = vcombine.high %v280_v8, %v288_v12 }
 0x222   :  { %3871 = vmatprep.subr.bf16.mxu0 %v8114_v31  ;;  %v544_v14 = vld [vmem:[#allocation5 + $0xdf8] sm:$0xff]  ;;  %v8049_v31 = vcombine.low %v280_v8, %v288_v12 }
 0x223   :  { %3913 = vmatpush1.bf16.msra.mxu1 %v8129_v30  ;;  %v8306_v22 = vcombine.high %v536_v13, %v544_v14  ;;  %v264_v24 = vld [vmem:[#allocation5 + $0x538] sm:$0xff]  ;;  %v8305_v32 = vcombine.low %v536_v13, %v544_v14 }
 0x224   :  { %3914 = vmatprep.subr.bf16.mxu1 %v8370_v58  ;;  %v272_v26 = vld [vmem:[#allocation5 + $0x578] sm:$0xff]  ;;  %v9965_v58 = vsub.s32 1, %v9888_v34 }
 0x225   :  { %3872 = vmatpush2.bf16.msra.mxu0 %v8113_v38  ;;  %v520_v27 = vld [vmem:[#allocation5 + $0xd38] sm:$0xff]  ;;  %v8034_v33 = vcombine.high %v264_v24, %v272_v26  ;;  %v8033_v49 = vcombine.low %v264_v24, %v272_v26  ;;  %v9986_v26 = vpop.f32.mrf.mxu0 }
 0x226   :  { %3873 = vmatprep.subr.bf16.mxu0 %v8098_v41  ;;  %v528_v30 = vld [vmem:[#allocation5 + $0xd78] sm:$0xff]  ;;  %v620_v51 = vrot.slane %v9927_v17, %v9965_v58 }
 0x227   :  { %3915 = vmatpush2.bf16.msra.mxu1 %v8369_v42  ;;  %v8290_v63 = vcombine.high %v520_v27, %v528_v30  ;;  %v248_v38 = vld [vmem:[#allocation5 + $0x4b8] sm:$0xff]  ;;  %v8289_v52 = vcombine.low %v520_v27, %v528_v30  ;;  %v9988_v30 = vpop.f32.mrf.mxu1 }
 0x228   :  { %3916 = vmatprep.subr.bf16.mxu1 %v8354_v47  ;;  %v256_v42 = vld [vmem:[#allocation5 + $0x4f8] sm:$0xff]  ;;  %v3294_v59 = vadd.f32 %v9912_v28, %v620_v51 }
 0x229   :  { %3874 = vmatpush2.bf16.msra.mxu0 %v8097_v54  ;;  %v504_v41 = vld [vmem:[#allocation5 + $0xcb8] sm:$0xff]  ;;  %v8018_v53 = vcombine.high %v248_v38, %v256_v42  ;;  %v628_v54 = vrot.slane %v9927_v17, %v9968_v37 }
 0x22a   :  { %3875 = vmatprep.subr.bf16.mxu0 %v8082_v56  ;;  %v512_v47 = vld [vmem:[#allocation5 + $0xcf8] sm:$0xff]  ;;  %v3337_v12 = vadd.f32 %v9914_v35, %v3294_v59  ;;  %v8915_v59 = vld [vmem:[#allocation8 + $0x84] ss:$16 sps:$4 sm:$0xff]  }
 0x22b   :  { %3917 = vmatpush2.bf16.msra.mxu1 %v8353_v55  ;;  %v8274_v55 = vcombine.high %v504_v41, %v512_v47  ;;  %v232_v56 = vld [vmem:[#allocation5 + $0x438] sm:$0xff]  ;;  %v3380_v0 = vadd.f32 %v9932_v21, %v628_v54  ;;  %v3376_v17 = vadd.f32 %v9918_v43, %v628_v54  ;;  %v8900_v43 = vld [vmem:[#allocation8 + $0x2e4] ss:$16 sps:$4 sm:$0xff]  }
 0x22c   :  { %3918 = vmatprep.subr.bf16.mxu1 %v8338_v57  ;;  %v240_v57 = vld [vmem:[#allocation5 + $0x478] sm:$0xff] }
 0x22d   :  { %3876 = vmatpush2.bf16.msra.mxu0 %v8081_v1  ;;  %v488_v60 = vld [vmem:[#allocation5 + $0xc38] sm:$0xff]  ;;  %v8017_v1 = vcombine.low %v248_v38, %v256_v42  ;;  %v3423_v28 = vadd.f32 %v9934_v25, %v3380_v0  ;;  %v8001_v13 = vcombine.low %v232_v56, %v240_v57  ;;  %v8895_v25 = vld [vmem:[#allocation8 + $0xe0] ss:$16 sps:$4 sm:$0xff]  }
 0x22e   :  { %3877 = vmatprep.subr.bf16.mxu0 %v8066_v5  ;;  %v496_v62 = vld [vmem:[#allocation5 + $0xc78] sm:$0xff]  ;;  %v8273_v5 = vcombine.low %v504_v41, %v512_v47  ;;  %v8901_v41 = vld [vmem:[#allocation8 + $0xc0] ss:$16 sps:$4 sm:$0xff]  }
 0x22f   :  { %3919 = vmatpush2.bf16.msra.mxu1 %v8337_v4  ;;  %v3290_v4 = vadd.f32 %v9899_v3, %v620_v51  ;;  %v8258_v8 = vcombine.high %v488_v60, %v496_v62  ;;  %v8257_v14 = vcombine.low %v488_v60, %v496_v62  ;;  %v9981_v3 = vld [vmem:[#allocation7 + $0x8] sm:$0xff]  ;;  %v8909_v51 = vld [vmem:[#allocation8 + $0xa4] ss:$16 sps:$4 sm:$0xff]  }
 0x230   :  { %3920 = vmatprep.subr.bf16.mxu1 %v8322_v7  ;;  %v8002_v7 = vcombine.high %v232_v56, %v240_v57  ;;  %v648_v35 = vrot.slane %v9981_v3, %v9893_v44  ;;  %v8910_v57 = vld [vmem:[#allocation8 + $0x2a0] ss:$16 sps:$4 sm:$0xff]   ;;  %v8918_v62 = vld [vmem:[#allocation8 + $0x284] ss:$16 sps:$4 sm:$0xff]  }
 0x231   :  { %3878 = vmatpush2.bf16.msra.mxu0 %v8065_v15  ;;  %v3333_v21 = vadd.f32 %v9901_v10, %v3290_v4  ;;  %v8897_v15 = vld [vmem:[#allocation8 + $0xe4] ss:$16 sps:$4 sm:$0xff]   ;;  %v8898_v10 = vld [vmem:[#allocation8 + $0x2e0] ss:$16 sps:$4 sm:$0xff]  }
 0x232   :  { %3879 = vmatprep.subr.bf16.mxu0 %v8050_v19  ;;  %v3958_v19 = vmax.f32 %v3337_v12, 0.0  ;;  %v8913_v4 = vld [vmem:[#allocation8 + $0x80] ss:$16 sps:$4 sm:$0xff]  }
 0x233   :  { %3921 = vmatpush2.bf16.msra.mxu1 %v8321_v18  ;;  %v3419_v18 = vadd.f32 %v9920_v48, %v3376_v17  ;;  %v3942_v24 = vmax.f32 %v3333_v21, 0.0  ;;  %v8903_v48 = vld [vmem:[#allocation8 + $0xc4] ss:$16 sps:$4 sm:$0xff]   ;;  %v8919_v12 = vld [vmem:[#allocation8 + $0x60] ss:$16 sps:$4 sm:$0xff]  }
 0x234   :  { %3922 = vmatprep.subr.bf16.mxu1 %v8306_v22  ;;  %v3960_v22 = vmax.f32 %v3423_v28, 0.0  ;;  %v8922_v28 = vld [vmem:[#allocation8 + $0x260] ss:$16 sps:$4 sm:$0xff]   ;;  %v8930_v21 = vld [vmem:[#allocation8 + $0x244] ss:$16 sps:$4 sm:$0xff]  }
 0x235   :  { %3880 = vmatpush2.bf16.msra.mxu0 %v8049_v31  ;;  %v3944_v27 = vmax.f32 %v3419_v18, 0.0  ;;  %v9990_v31 = vpack.c.bf16 %v3958_v19, %v3942_v24  ;;  %v8933_v18 = vld [vmem:[#allocation8 + $0x24] ss:$16 sps:$4 sm:$0xff]   ;;  %v8931_v19 = vld [vmem:[#allocation8 + $0x20] ss:$16 sps:$4 sm:$0xff]  }
 0x236   :  { %3881 = vmatprep.subr.bf16.mxu0 %v8034_v33  ;;  %v8906_v33 = vld [vmem:[#allocation8 + $0x2c4] ss:$16 sps:$4 sm:$0xff]   ;;  %v8937_v24 = vld [vmem:[#allocation8] ss:$16 sps:$4 sm:$0xff]  }
 0x237   :  { %3923 = vmatpush2.bf16.msra.mxu1 %v8305_v32 }
 0x238   :  { %3924 = vmatprep.subr.bf16.mxu1 %v8290_v63  ;;  %v9993_v63 = vpack.c.bf16 %v3960_v22, %v3944_v27  ;;  %v8934_v22 = vld [vmem:[#allocation8 + $0x220] ss:$16 sps:$4 sm:$0xff]   ;;  %v8945_v27 = vld [vmem:[#allocation8 + $0x1e4] ss:$16 sps:$4 sm:$0xff]  }
 0x239   :  { %3882 = vmatpush2.bf16.msra.mxu0 %v8033_v49  ;;  %v8904_v49 = vld [vmem:[#allocation8 + $0x2c0] ss:$16 sps:$4 sm:$0xff]  }
 0x23a   :  { %3883 = vmatprep.subr.bf16.mxu0 %v8018_v53  ;;  %v8912_v53 = vld [vmem:[#allocation8 + $0x2a4] ss:$16 sps:$4 sm:$0xff]  }
 0x23b   :  { %3925 = vmatpush2.bf16.msra.mxu1 %v8289_v52 }
 0x23c   :  { %3926 = vmatprep.subr.bf16.mxu1 %v8274_v55 }
 0x23d   :  { %3884 = vmatpush2.bf16.msra.mxu0 %v8017_v1 }
 0x23e   :  { %3885 = vmatprep.subr.bf16.mxu0 %v8002_v7  ;;  %v8921_v7 = vld [vmem:[#allocation8 + $0x64] ss:$16 sps:$4 sm:$0xff]  }
 0x23f   :  { %3927 = vmatpush2.bf16.msra.mxu1 %v8273_v5  ;;  %v8916_v5 = vld [vmem:[#allocation8 + $0x280] ss:$16 sps:$4 sm:$0xff]  }
 0x240   :  { %3928 = vmatprep.subr.bf16.mxu1 %v8258_v8  ;;  %v8924_v8 = vld [vmem:[#allocation8 + $0x264] ss:$16 sps:$4 sm:$0xff]  }
 0x241   :  { %3886 = vmatpush2.bf16.msra.mxu0 %v8001_v13  ;;  %v8927_v13 = vld [vmem:[#allocation8 + $0x44] ss:$16 sps:$4 sm:$0xff]  }
 0x242   :  { %7083 = vmatprep.subr.bf16.mxu0 %v8897_v15  ;;  %v8928_v15 = vld [vmem:[#allocation8 + $0x240] ss:$16 sps:$4 sm:$0xff]  }
 0x243   :  { %3929 = vmatpush2.bf16.msra.mxu1 %v8257_v14  ;;  %v8925_v14 = vld [vmem:[#allocation8 + $0x40] ss:$16 sps:$4 sm:$0xff]  }
 0x244   :  { %7126 = vmatprep.subr.bf16.mxu1 %v8900_v43  ;;  %v3631_v32 = vpop.f32.mrf.mxu0  ;;  %3888 = vmatmul.mubr.bf16.vlgmr.msra.gmra.mxu0 %v9872_v20  ;;  %v8936_v43 = vld [vmem:[#allocation8 + $0x224] ss:$16 sps:$4 sm:$0xff]  }
 0x245   :  { %v3632_v38 = vadd.f32 %v3631_v32, %v648_v35  ;;  %7084 = vmatpush1.bf16.msra.mxu0 %v8895_v25  ;;  %7115 = vmatprep.mubr.bf16.mxu0 %v9990_v31  ;;  %v8942_v25 = vld [vmem:[#allocation8 + $0x204] ss:$16 sps:$4 sm:$0xff]   ;;  %v8943_v32 = vld [vmem:[#allocation8 + $0x1e0] ss:$16 sps:$4 sm:$0xff]  }
 0x246   :  { %v3674_v42 = vpop.f32.mrf.mxu1  ;;  %3931 = vmatmul.mubr.bf16.vlgmr.msra.gmra.mxu1 %v9874_v23  ;;  %v9997_v47 = vpop.f32.mrf.mxu0  ;;  %7085 = vmatprep.subr.bf16.mxu0 %v8903_v48  ;;  %v8907_v23 = vld [vmem:[#allocation8 + $0xa0] ss:$16 sps:$4 sm:$0xff]   ;;  %v8948_v48 = vld [vmem:[#allocation8 + $0x3e4] ss:$16 sps:$4 sm:$0xff]  }
 0x247   :  { %7127 = vmatpush1.bf16.msra.mxu1 %v8898_v10  ;;  %v3675_v52 = vadd.f32 %v3674_v42, %v3632_v38  ;;  %7158 = vmatprep.mubr.bf16.mxu1 %v9993_v63  ;;  %v8940_v10 = vld [vmem:[#allocation8 + $0x200] ss:$16 sps:$4 sm:$0xff]   ;;  %v8951_v38 = vld [vmem:[#allocation8 + $0x1c4] ss:$16 sps:$4 sm:$0xff]  }
 0x248   :  { %v10000_v20 = vpop.f32.mrf.mxu1  ;;  %v3635_v54 = vpop.f32.mrf.mxu0  ;;  %7128 = vmatprep.subr.bf16.mxu1 %v8906_v33  ;;  %v8946_v33 = vld [vmem:[#allocation8 + $0x3e0] ss:$16 sps:$4 sm:$0xff]   ;;  %v8954_v42 = vld [vmem:[#allocation8 + $0x3c4] ss:$16 sps:$4 sm:$0xff]  }
 0x249   :  { %v3636_v55 = vadd.f32 %v3635_v54, %v648_v35  ;;  %7086 = vmatpush1.bf16.msra.mxu0 %v8901_v41  ;;  %v3949_v0 = vmax.f32 %v3675_v52, 0.0  ;;  %v8939_v35 = vld [vmem:[#allocation8 + $0x4] ss:$16 sps:$4 sm:$0xff]   ;;  %v8949_v41 = vld [vmem:[#allocation8 + $0x1c0] ss:$16 sps:$4 sm:$0xff]  }
 0x24a   :  { %v3678_v56 = vpop.f32.mrf.mxu1  ;;  %7087 = vmatprep.subr.bf16.mxu0 %v8909_v51  ;;  %v8957_v51 = vld [vmem:[#allocation8 + $0x1a4] ss:$16 sps:$4 sm:$0xff]   ;;  %v8958_v54 = vld [vmem:[#allocation8 + $0x3a0] ss:$16 sps:$4 sm:$0xff]  }
 0x24b   :  { %7129 = vmatpush1.bf16.msra.mxu1 %v8904_v49  ;;  %v3679_v60 = vadd.f32 %v3678_v56, %v3636_v55  ;;  %v8952_v49 = vld [vmem:[#allocation8 + $0x3c0] ss:$16 sps:$4 sm:$0xff]   ;;  %v8960_v52 = vld [vmem:[#allocation8 + $0x3a4] ss:$16 sps:$4 sm:$0xff]  }
 0x24c   :  { %7130 = vmatprep.subr.bf16.mxu1 %v8912_v53  ;;  %v8955_v53 = vld [vmem:[#allocation8 + $0x1a0] ss:$16 sps:$4 sm:$0xff]   ;;  %v8963_v55 = vld [vmem:[#allocation8 + $0x184] ss:$16 sps:$4 sm:$0xff]  }
 0x24d   :  { %v3965_v1 = vmax.f32 %v3679_v60, 0.0  ;;  %7088 = vmatpush1.bf16.msra.mxu0 %v8907_v23  ;;  %v8966_v23 = vld [vmem:[#allocation8 + $0x384] ss:$16 sps:$4 sm:$0xff]   ;;  %v8961_v56 = vld [vmem:[#allocation8 + $0x180] ss:$16 sps:$4 sm:$0xff]  }
 0x24e   :  { %7089 = vmatprep.subr.bf16.mxu0 %v8915_v59  ;;  %v8969_v59 = vld [vmem:[#allocation8 + $0x164] ss:$16 sps:$4 sm:$0xff]  }
 0x24f   :  { %7131 = vmatpush1.bf16.msra.mxu1 %v8910_v57  ;;  %v10002_v17 = vpack.c.bf16 %v3965_v1, %v3949_v0  ;;  %v8964_v57 = vld [vmem:[#allocation8 + $0x380] ss:$16 sps:$4 sm:$0xff]   ;;  %v8972_v60 = vld [vmem:[#allocation8 + $0x364] ss:$16 sps:$4 sm:$0xff]   ;;  %v635_v0 = vsub.s32 5, %v9888_v34 }
 0x250   :  { %7132 = vmatprep.subr.bf16.mxu1 %v8918_v62  ;;  %v8967_v62 = vld [vmem:[#allocation8 + $0x160] ss:$16 sps:$4 sm:$0xff]  }
 0x251   :  { %7090 = vmatpush1.bf16.msra.mxu0 %v8913_v4  ;;  %v8970_v1 = vld [vmem:[#allocation8 + $0x360] ss:$16 sps:$4 sm:$0xff]   ;;  %v8975_v4 = vld [vmem:[#allocation8 + $0x144] ss:$16 sps:$4 sm:$0xff]  }
 0x252   :  { %7091 = vmatprep.subr.bf16.mxu0 %v8921_v7  ;;  %v8978_v7 = vld [vmem:[#allocation8 + $0x344] ss:$16 sps:$4 sm:$0xff]  }
 0x253   :  { %7133 = vmatpush1.bf16.msra.mxu1 %v8916_v5  ;;  %v643_v5 = vsub.s32 7, %v9888_v34 }
 0x254   :  { %7134 = vmatprep.subr.bf16.mxu1 %v8924_v8  ;;  %v8973_v8 = vld [vmem:[#allocation8 + $0x140] ss:$16 sps:$4 sm:$0xff]  }
 0x255   :  { %7092 = vmatpush1.bf16.msra.mxu0 %v8919_v12  ;;  %v9668_v12 = vld [vmem:[#allocation7] sm:$0xff] }
 0x256   :  { %7093 = vmatprep.subr.bf16.mxu0 %v8927_v13  ;;  %v8976_v13 = vld [vmem:[#allocation8 + $0x340] ss:$16 sps:$4 sm:$0xff]  }
 0x257   :  { %7135 = vmatpush1.bf16.msra.mxu1 %v8922_v28  ;;  %v636_v28 = vrot.slane %v9668_v12, %v635_v0 }
 0x258   :  { %7136 = vmatprep.subr.bf16.mxu1 %v8930_v21  ;;  %v8981_v21 = vld [vmem:[#allocation8 + $0x124] ss:$16 sps:$4 sm:$0xff]  }
 0x259   :  { %7094 = vmatpush1.bf16.msra.mxu0 %v8925_v14  ;;  %v644_v14 = vrot.slane %v9668_v12, %v643_v5 }
 0x25a   :  { %7095 = vmatprep.subr.bf16.mxu0 %v8933_v18  ;;  %v3466_v18 = vadd.f32 %v9950_v46, %v636_v28  ;;  %v8985_v46 = vld [vmem:[#allocation8 + $0x100] ss:$16 sps:$4 sm:$0xff]  }
 0x25b   :  { %7137 = vmatpush1.bf16.msra.mxu1 %v8928_v15  ;;  %v8984_v15 = vld [vmem:[#allocation8 + $0x324] ss:$16 sps:$4 sm:$0xff]  }
 0x25c   :  { %7138 = vmatprep.subr.bf16.mxu1 %v8936_v43  ;;  %v3552_v43 = vadd.f32 %v9986_v26, %v644_v14 }
 0x25d   :  { %7096 = vmatpush1.bf16.msra.mxu0 %v8931_v19  ;;  %v8979_v19 = vld [vmem:[#allocation8 + $0x120] ss:$16 sps:$4 sm:$0xff]  }
 0x25e   :  { %7097 = vmatprep.subr.bf16.mxu0 %v8939_v35  ;;  %v8982_v35 = vld [vmem:[#allocation8 + $0x320] ss:$16 sps:$4 sm:$0xff]  }
 0x25f   :  { %7139 = vmatpush1.bf16.msra.mxu1 %v8934_v22  ;;  %v3462_v22 = vadd.f32 %v9938_v39, %v636_v28  ;;  %v8993_v39 = vld [vmem:[#allocation8 + $0x4e4] ss:$16 sps:$4 sm:$0xff]  }
 0x260   :  { %7140 = vmatprep.subr.bf16.mxu1 %v8942_v25  ;;  %v8987_v25 = vld [vmem:[#allocation8 + $0x104] ss:$16 sps:$4 sm:$0xff]  }
 0x261   :  { %7098 = vmatpush1.bf16.msra.mxu0 %v8937_v24  ;;  %v3548_v24 = vadd.f32 %v9956_v61, %v644_v14  ;;  %v3505_v26 = vadd.f32 %v9940_v45, %v3462_v22  ;;  %v8994_v45 = vld [vmem:[#allocation8 + $0x6e0] ss:$16 sps:$4 sm:$0xff]  }
 0x262   :  { %7099 = vmatprep.subr.bf16.mxu0 %v8945_v27  ;;  %v3509_v27 = vadd.f32 %v9952_v50, %v3466_v18  ;;  %v656_v50 = vrot.slane %v9981_v3, %v9908_v16  ;;  %v9006_v14 = vld [vmem:[#allocation8 + $0x6a0] ss:$16 sps:$4 sm:$0xff]  }
 0x263   :  { %7141 = vmatpush1.bf16.msra.mxu1 %v8940_v10  ;;  %v8990_v10 = vld [vmem:[#allocation8 + $0x304] ss:$16 sps:$4 sm:$0xff]  }
 0x264   :  { %7142 = vmatprep.subr.bf16.mxu1 %v8948_v48  ;;  %v3595_v48 = vadd.f32 %v9988_v30, %v3552_v43  ;;  %v3946_v30 = vmax.f32 %v3505_v26, 0.0  ;;  %v9014_v43 = vld [vmem:[#allocation8 + $0x684] ss:$16 sps:$4 sm:$0xff]  }
 0x265   :  { %7100 = vmatpush2.bf16.msra.mxu0 %v8943_v32  ;;  %v8988_v32 = vld [vmem:[#allocation8 + $0x300] ss:$16 sps:$4 sm:$0xff]   ;;  %v9023_v26 = vld [vmem:[#allocation8 + $0x444] ss:$16 sps:$4 sm:$0xff]  }
 0x266   :  { %7101 = vmatprep.subr.bf16.mxu0 %v8951_v38  ;;  %v8996_v38 = vld [vmem:[#allocation8 + $0x6e4] ss:$16 sps:$4 sm:$0xff]   ;;  %v3964_v61 = vmax.f32 %v3595_v48, 0.0  ;;  %v9015_v48 = vld [vmem:[#allocation8 + $0x460] ss:$16 sps:$4 sm:$0xff]  }
 0x267   :  { %7143 = vmatpush2.bf16.msra.mxu1 %v8946_v33  ;;  %v3591_v33 = vadd.f32 %v9958_v2, %v3548_v24  ;;  %v8999_v2 = vld [vmem:[#allocation8 + $0x4c4] ss:$16 sps:$4 sm:$0xff]  }
 0x268   :  { %7144 = vmatprep.subr.bf16.mxu1 %v8954_v42  ;;  %v3962_v42 = vmax.f32 %v3509_v27, 0.0  ;;  %v9017_v24 = vld [vmem:[#allocation8 + $0x464] ss:$16 sps:$4 sm:$0xff]  }
 0x269   :  { %7102 = vmatpush2.bf16.msra.mxu0 %v8949_v41  ;;  %v8991_v41 = vld [vmem:[#allocation8 + $0x4e0] ss:$16 sps:$4 sm:$0xff]   ;;  %v9020_v27 = vld [vmem:[#allocation8 + $0x664] ss:$16 sps:$4 sm:$0xff]  }
 0x26a   :  { %7103 = vmatprep.subr.bf16.mxu0 %v8957_v51  ;;  %v3948_v51 = vmax.f32 %v3591_v33, 0.0  ;;  %v9024_v33 = vld [vmem:[#allocation8 + $0x640] ss:$16 sps:$4 sm:$0xff]  }
 0x26b   :  { %7145 = vmatpush2.bf16.msra.mxu1 %v8952_v49  ;;  %v10020_v49 = vpop.f32.mrf.mxu0 }
 0x26c   :  { %7146 = vmatprep.subr.bf16.mxu1 %v8960_v52  ;;  %v10022_v52 = vpop.f32.mrf.mxu1 }
 0x26d   :  { %7104 = vmatpush2.bf16.msra.mxu0 %v8955_v53  ;;  %v10024_v53 = vpack.c.bf16 %v3962_v42, %v3946_v30  ;;  %v9032_v42 = vld [vmem:[#allocation8 + $0x624] ss:$16 sps:$4 sm:$0xff]  }
 0x26e   :  { %7105 = vmatprep.subr.bf16.mxu0 %v8963_v55  ;;  %v9002_v55 = vld [vmem:[#allocation8 + $0x6c4] ss:$16 sps:$4 sm:$0xff]  }
 0x26f   :  { %7147 = vmatpush2.bf16.msra.mxu1 %v8958_v54  ;;  %v9038_v30 = vld [vmem:[#allocation8 + $0x604] ss:$16 sps:$4 sm:$0xff]  }
 0x270   :  { %7148 = vmatprep.subr.bf16.mxu1 %v8966_v23  ;;  %v10027_v23 = vpack.c.bf16 %v3964_v61, %v3948_v51  ;;  %v9027_v61 = vld [vmem:[#allocation8 + $0x420] ss:$16 sps:$4 sm:$0xff]  }
 0x271   :  { %7106 = vmatpush2.bf16.msra.mxu0 %v8961_v56  ;;  %v9036_v51 = vld [vmem:[#allocation8 + $0x600] ss:$16 sps:$4 sm:$0xff]  }
 0x272   :  { %7107 = vmatprep.subr.bf16.mxu0 %v8969_v59  ;;  %v8997_v59 = vld [vmem:[#allocation8 + $0x4c0] ss:$16 sps:$4 sm:$0xff]  }
 0x273   :  { %7149 = vmatpush2.bf16.msra.mxu1 %v8964_v57 }
 0x274   :  { %7150 = vmatprep.subr.bf16.mxu1 %v8972_v60 }
 0x275   :  { %7108 = vmatpush2.bf16.msra.mxu0 %v8967_v62  ;;  %v9000_v62 = vld [vmem:[#allocation8 + $0x6c0] ss:$16 sps:$4 sm:$0xff]  }
 0x276   :  { %7109 = vmatprep.subr.bf16.mxu0 %v8975_v4 }
 0x277   :  { %7151 = vmatpush2.bf16.msra.mxu1 %v8970_v1  ;;  %v9005_v1 = vld [vmem:[#allocation8 + $0x4a4] ss:$16 sps:$4 sm:$0xff]  }
 0x278   :  { %7152 = vmatprep.subr.bf16.mxu1 %v8978_v7 }
 0x279   :  { %7110 = vmatpush2.bf16.msra.mxu0 %v8973_v8  ;;  %v9008_v8 = vld [vmem:[#allocation8 + $0x6a4] ss:$16 sps:$4 sm:$0xff]  }
 0x27a   :  { %7111 = vmatprep.subr.bf16.mxu0 %v8981_v21 }
 0x27b   :  { %7153 = vmatpush2.bf16.msra.mxu1 %v8976_v13  ;;  %v9003_v13 = vld [vmem:[#allocation8 + $0x4a0] ss:$16 sps:$4 sm:$0xff]  }
 0x27c   :  { %7154 = vmatprep.subr.bf16.mxu1 %v8984_v15  ;;  %v9011_v15 = vld [vmem:[#allocation8 + $0x484] ss:$16 sps:$4 sm:$0xff]  }
 0x27d   :  { %7112 = vmatpush2.bf16.msra.mxu0 %v8979_v19 }
 0x27e   :  { %7113 = vmatprep.subr.bf16.mxu0 %v8987_v25  ;;  %v9012_v25 = vld [vmem:[#allocation8 + $0x680] ss:$16 sps:$4 sm:$0xff]  }
 0x27f   :  { %7155 = vmatpush2.bf16.msra.mxu1 %v8982_v35  ;;  %v9009_v35 = vld [vmem:[#allocation8 + $0x480] ss:$16 sps:$4 sm:$0xff]  }
 0x280   :  { %7156 = vmatprep.subr.bf16.mxu1 %v8990_v10 }
 0x281   :  { %7114 = vmatpush2.bf16.msra.mxu0 %v8985_v46  ;;  %v9018_v46 = vld [vmem:[#allocation8 + $0x660] ss:$16 sps:$4 sm:$0xff]  }
 0x282   :  { %7169 = vmatprep.subr.bf16.mxu0 %v8993_v39  ;;  %v9021_v39 = vld [vmem:[#allocation8 + $0x440] ss:$16 sps:$4 sm:$0xff]  }
 0x283   :  { %7157 = vmatpush2.bf16.msra.mxu1 %v8988_v32  ;;  %v9026_v32 = vld [vmem:[#allocation8 + $0x644] ss:$16 sps:$4 sm:$0xff]  }
 0x284   :  { %7212 = vmatprep.subr.bf16.mxu1 %v8996_v38  ;;  %v3717_v54 = vpop.f32.mrf.mxu0  ;;  %7116 = vmatmul.mubr.bf16.vlgmr.msra.gmra.mxu0 %v9905_v36  ;;  %v9029_v38 = vld [vmem:[#allocation8 + $0x424] ss:$16 sps:$4 sm:$0xff]  }
 0x285   :  { %v3718_v56 = vadd.f32 %v3717_v54, %v656_v50  ;;  %7170 = vmatpush1.bf16.msra.mxu0 %v8991_v41  ;;  %7201 = vmatprep.mubr.bf16.mxu0 %v10024_v53  ;;  %v9035_v41 = vld [vmem:[#allocation8 + $0x404] ss:$16 sps:$4 sm:$0xff]  }
 0x286   :  { %v3760_v57 = vpop.f32.mrf.mxu1  ;;  %7159 = vmatmul.mubr.bf16.vlgmr.msra.gmra.mxu1 %v9924_v11  ;;  %v10031_v60 = vpop.f32.mrf.mxu0  ;;  %7171 = vmatprep.subr.bf16.mxu0 %v8999_v2  ;;  %v9041_v2 = vld [vmem:[#allocation8 + $0x5e4] ss:$16 sps:$4 sm:$0xff]  }
 0x287   :  { %7213 = vmatpush1.bf16.msra.mxu1 %v8994_v45  ;;  %v3761_v4 = vadd.f32 %v3760_v57, %v3718_v56  ;;  %7244 = vmatprep.mubr.bf16.mxu1 %v10027_v23  ;;  %v9033_v45 = vld [vmem:[#allocation8 + $0x400] ss:$16 sps:$4 sm:$0xff]   ;;  %v9044_v54 = vld [vmem:[#allocation8 + $0x7e4] ss:$16 sps:$4 sm:$0xff]  }
 0x288   :  { %v10034_v7 = vpop.f32.mrf.mxu1  ;;  %v3721_v12 = vpop.f32.mrf.mxu0  ;;  %7214 = vmatprep.subr.bf16.mxu1 %v9002_v55  ;;  %v9039_v55 = vld [vmem:[#allocation8 + $0x5e0] ss:$16 sps:$4 sm:$0xff]   ;;  %v9047_v57 = vld [vmem:[#allocation8 + $0x5c4] ss:$16 sps:$4 sm:$0xff]  }
 0x289   :  { %v3722_v28 = vadd.f32 %v3721_v12, %v656_v50  ;;  %7172 = vmatpush1.bf16.msra.mxu0 %v8997_v59  ;;  %v3951_v19 = vmax.f32 %v3761_v4, 0.0  ;;  %v9030_v50 = vld [vmem:[#allocation8 + $0x620] ss:$16 sps:$4 sm:$0xff]   ;;  %v9050_v59 = vld [vmem:[#allocation8 + $0x7c4] ss:$16 sps:$4 sm:$0xff]  }
 0x28a   :  { %v3764_v21 = vpop.f32.mrf.mxu1  ;;  %7173 = vmatprep.subr.bf16.mxu0 %v9005_v1  ;;  %v9042_v56 = vld [vmem:[#allocation8 + $0x7e0] ss:$16 sps:$4 sm:$0xff]   ;;  %v9053_v4 = vld [vmem:[#allocation8 + $0x5a4] ss:$16 sps:$4 sm:$0xff]  }
 0x28b   :  { %7215 = vmatpush1.bf16.msra.mxu1 %v9000_v62  ;;  %v3765_v18 = vadd.f32 %v3764_v21, %v3722_v28  ;;  %v9045_v62 = vld [vmem:[#allocation8 + $0x5c0] ss:$16 sps:$4 sm:$0xff]   ;;  %v9062_v21 = vld [vmem:[#allocation8 + $0x784] ss:$16 sps:$4 sm:$0xff]  }
 0x28c   :  { %7216 = vmatprep.subr.bf16.mxu1 %v9008_v8  ;;  %v9048_v1 = vld [vmem:[#allocation8 + $0x7c0] ss:$16 sps:$4 sm:$0xff]   ;;  %v9056_v8 = vld [vmem:[#allocation8 + $0x7a4] ss:$16 sps:$4 sm:$0xff]  }
 0x28d   :  { %v3967_v22 = vmax.f32 %v3765_v18, 0.0  ;;  %7174 = vmatpush1.bf16.msra.mxu0 %v9003_v13  ;;  %v9051_v12 = vld [vmem:[#allocation8 + $0x5a0] ss:$16 sps:$4 sm:$0xff]   ;;  %v9059_v13 = vld [vmem:[#allocation8 + $0x584] ss:$16 sps:$4 sm:$0xff]  }
 0x28e   :  { %7175 = vmatprep.subr.bf16.mxu0 %v9011_v15  ;;  %v9054_v28 = vld [vmem:[#allocation8 + $0x7a0] ss:$16 sps:$4 sm:$0xff]   ;;  %v9065_v18 = vld [vmem:[#allocation8 + $0x564] ss:$16 sps:$4 sm:$0xff]  }
 0x28f   :  { %7217 = vmatpush1.bf16.msra.mxu1 %v9006_v14  ;;  %v10036_v10 = vpack.c.bf16 %v3967_v22, %v3951_v19  ;;  %v9057_v14 = vld [vmem:[#allocation8 + $0x580] ss:$16 sps:$4 sm:$0xff]  }
 0x290   :  { %7218 = vmatprep.subr.bf16.mxu1 %v9014_v43  ;;  %v9060_v15 = vld [vmem:[#allocation8 + $0x780] ss:$16 sps:$4 sm:$0xff]   ;;  %v9068_v43 = vld [vmem:[#allocation8 + $0x764] ss:$16 sps:$4 sm:$0xff]  }
 0x291   :  { %7176 = vmatpush1.bf16.msra.mxu0 %v9009_v35  ;;  %v9063_v19 = vld [vmem:[#allocation8 + $0x560] ss:$16 sps:$4 sm:$0xff]   ;;  %v9071_v35 = vld [vmem:[#allocation8 + $0x544] ss:$16 sps:$4 sm:$0xff]  }
 0x292   :  { %7177 = vmatprep.subr.bf16.mxu0 %v9017_v24  ;;  %v9066_v22 = vld [vmem:[#allocation8 + $0x760] ss:$16 sps:$4 sm:$0xff]  }
 0x293   :  { %7219 = vmatpush1.bf16.msra.mxu1 %v9012_v25  ;;  %v9074_v25 = vld [vmem:[#allocation8 + $0x744] ss:$16 sps:$4 sm:$0xff]   ;;  %v9069_v24 = vld [vmem:[#allocation8 + $0x540] ss:$16 sps:$4 sm:$0xff]  }
 0x294   :  { %7220 = vmatprep.subr.bf16.mxu1 %v9020_v27  ;;  %v652_v27 = vrot.slane %v9981_v3, %v9965_v58 }
 0x295   :  { %7178 = vmatpush1.bf16.msra.mxu0 %v9015_v48  ;;  %v3723_v48 = vpop.f32.mrf.mxu0 }
 0x296   :  { %7179 = vmatprep.subr.bf16.mxu0 %v9023_v26  ;;  %v9077_v26 = vld [vmem:[#allocation8 + $0x524] ss:$16 sps:$4 sm:$0xff]  }
 0x297   :  { %7221 = vmatpush1.bf16.msra.mxu1 %v9018_v46  ;;  %v9072_v46 = vld [vmem:[#allocation8 + $0x740] ss:$16 sps:$4 sm:$0xff]  }
 0x298   :  { %7222 = vmatprep.subr.bf16.mxu1 %v9026_v32  ;;  %v660_v32 = vrot.slane %v9981_v3, %v9968_v37 }
 0x299   :  { %7180 = vmatpush1.bf16.msra.mxu0 %v9021_v39  ;;  %v9080_v39 = vld [vmem:[#allocation8 + $0x724] ss:$16 sps:$4 sm:$0xff]  }
 0x29a   :  { %7181 = vmatprep.subr.bf16.mxu0 %v9029_v38  ;;  %v3724_v38 = vadd.f32 %v3723_v48, %v660_v32  ;;  %v9099_v48 = vld [vmem:[#allocation8 + $0x8a0] ss:$16 sps:$4 sm:$0xff]  }
 0x29b   :  { %7223 = vmatpush1.bf16.msra.mxu1 %v9024_v33  ;;  %v3638_v33 = vadd.f32 %v10020_v49, %v652_v27 }
 0x29c   :  { %7224 = vmatprep.subr.bf16.mxu1 %v9032_v42  ;;  %v9075_v42 = vld [vmem:[#allocation8 + $0x520] ss:$16 sps:$4 sm:$0xff]  }
 0x29d   :  { %7182 = vmatpush1.bf16.msra.mxu0 %v9027_v61  ;;  %v3634_v61 = vadd.f32 %v9997_v47, %v652_v27  ;;  %v9089_v47 = vld [vmem:[#allocation8 + $0x8e4] ss:$16 sps:$4 sm:$0xff]  }
 0x29e   :  { %7183 = vmatprep.subr.bf16.mxu0 %v9035_v41  ;;  %v9083_v41 = vld [vmem:[#allocation8 + $0x504] ss:$16 sps:$4 sm:$0xff]  }
 0x29f   :  { %7225 = vmatpush1.bf16.msra.mxu1 %v9030_v50  ;;  %v9078_v50 = vld [vmem:[#allocation8 + $0x720] ss:$16 sps:$4 sm:$0xff]   ;;  %v3677_v49 = vadd.f32 %v10000_v20, %v3634_v61 }
 0x2a0   :  { %7226 = vmatprep.subr.bf16.mxu1 %v9038_v30  ;;  %v3720_v30 = vadd.f32 %v10031_v60, %v660_v32  ;;  %v9090_v20 = vld [vmem:[#allocation8 + $0xae0] ss:$16 sps:$4 sm:$0xff]   ;;  %v9107_v32 = vld [vmem:[#allocation8 + $0x884] ss:$16 sps:$4 sm:$0xff]  }
 0x2a1   :  { %7184 = vmatpush1.bf16.msra.mxu0 %v9033_v45  ;;  %v9086_v45 = vld [vmem:[#allocation8 + $0x704] ss:$16 sps:$4 sm:$0xff]   ;;  %v9105_v61 = vld [vmem:[#allocation8 + $0x880] ss:$16 sps:$4 sm:$0xff]  }
 0x2a2   :  { %7185 = vmatprep.subr.bf16.mxu0 %v9041_v2  ;;  %v3766_v2 = vpop.f32.mrf.mxu1 }
 0x2a3   :  { %7227 = vmatpush1.bf16.msra.mxu1 %v9036_v51  ;;  %v3681_v51 = vadd.f32 %v10022_v52, %v3638_v33  ;;  %v664_v52 = vrot.slane %v9981_v3, %v631_v6  ;;  %v9093_v6 = vld [vmem:[#allocation8 + $0x8c0] ss:$16 sps:$4 sm:$0xff]   ;;  %v9110_v33 = vld [vmem:[#allocation8 + $0xa84] ss:$16 sps:$4 sm:$0xff]  }
 0x2a4   :  { %7228 = vmatprep.subr.bf16.mxu1 %v9044_v54  ;;  %v3767_v54 = vadd.f32 %v3766_v2, %v3724_v38  ;;  %v9114_v2 = vld [vmem:[#allocation8 + $0xa60] ss:$16 sps:$4 sm:$0xff]  }
 0x2a5   :  { %7186 = vmatpush2.bf16.msra.mxu0 %v9039_v55  ;;  %v9081_v55 = vld [vmem:[#allocation8 + $0x500] ss:$16 sps:$4 sm:$0xff]  }
 0x2a6   :  { %7187 = vmatprep.subr.bf16.mxu0 %v9047_v57  ;;  %v3763_v57 = vadd.f32 %v10034_v7, %v3720_v30  ;;  %v3968_v60 = vmax.f32 %v3767_v54, 0.0  ;;  %v9119_v54 = vld [vmem:[#allocation8 + $0x844] ss:$16 sps:$4 sm:$0xff]  }
 0x2a7   :  { %7229 = vmatpush2.bf16.msra.mxu1 %v9042_v56  ;;  %v9084_v56 = vld [vmem:[#allocation8 + $0x700] ss:$16 sps:$4 sm:$0xff]  }
 0x2a8   :  { %7230 = vmatprep.subr.bf16.mxu1 %v9050_v59  ;;  %v9092_v59 = vld [vmem:[#allocation8 + $0xae4] ss:$16 sps:$4 sm:$0xff]  }
 0x2a9   :  { %7188 = vmatpush2.bf16.msra.mxu0 %v9045_v62  ;;  %v3966_v62 = vmax.f32 %v3681_v51, 0.0  ;;  %v9111_v51 = vld [vmem:[#allocation8 + $0x860] ss:$16 sps:$4 sm:$0xff]  }
 0x2aa   :  { %7189 = vmatprep.subr.bf16.mxu0 %v9053_v4  ;;  %v3950_v4 = vmax.f32 %v3677_v49, 0.0  ;;  %v9117_v49 = vld [vmem:[#allocation8 + $0x840] ss:$16 sps:$4 sm:$0xff]  }
 0x2ab   :  { %7231 = vmatpush2.bf16.msra.mxu1 %v9048_v1  ;;  %v9087_v1 = vld [vmem:[#allocation8 + $0x8e0] ss:$16 sps:$4 sm:$0xff]  }
 0x2ac   :  { %7232 = vmatprep.subr.bf16.mxu1 %v9056_v8  ;;  %v3952_v8 = vmax.f32 %v3763_v57, 0.0  ;;  %v9128_v57 = vld [vmem:[#allocation8 + $0xa24] ss:$16 sps:$4 sm:$0xff]  }
 0x2ad   :  { %7190 = vmatpush2.bf16.msra.mxu0 %v9051_v12  ;;  %v9095_v12 = vld [vmem:[#allocation8 + $0x8c4] ss:$16 sps:$4 sm:$0xff]  }
 0x2ae   :  { %7191 = vmatprep.subr.bf16.mxu0 %v9059_v13  ;;  %v9098_v13 = vld [vmem:[#allocation8 + $0xac4] ss:$16 sps:$4 sm:$0xff]  }
 0x2af   :  { %7233 = vmatpush2.bf16.msra.mxu1 %v9054_v28  ;;  %v10051_v28 = vpack.c.bf16 %v3966_v62, %v3950_v4  ;;  %v9126_v62 = vld [vmem:[#allocation8 + $0xa20] ss:$16 sps:$4 sm:$0xff]  }
 0x2b0   :  { %7234 = vmatprep.subr.bf16.mxu1 %v9062_v21  ;;  %v10054_v21 = vpack.c.bf16 %v3968_v60, %v3952_v8  ;;  %v9131_v60 = vld [vmem:[#allocation8 + $0x804] ss:$16 sps:$4 sm:$0xff]   ;;  %v9132_v4 = vld [vmem:[#allocation8 + $0xa00] ss:$16 sps:$4 sm:$0xff]  }
 0x2b1   :  { %7192 = vmatpush2.bf16.msra.mxu0 %v9057_v14  ;;  %v9140_v8 = vld [vmem:[#allocation8 + $0xbe4] ss:$16 sps:$4 sm:$0xff]  }
 0x2b2   :  { %7193 = vmatprep.subr.bf16.mxu0 %v9065_v18 }
 0x2b3   :  { %7235 = vmatpush2.bf16.msra.mxu1 %v9060_v15 }
 0x2b4   :  { %7236 = vmatprep.subr.bf16.mxu1 %v9068_v43  ;;  %v9096_v43 = vld [vmem:[#allocation8 + $0xac0] ss:$16 sps:$4 sm:$0xff]  }
 0x2b5   :  { %7194 = vmatpush2.bf16.msra.mxu0 %v9063_v19  ;;  %v9101_v19 = vld [vmem:[#allocation8 + $0x8a4] ss:$16 sps:$4 sm:$0xff]  }
 0x2b6   :  { %7195 = vmatprep.subr.bf16.mxu0 %v9071_v35 }
 0x2b7   :  { %7237 = vmatpush2.bf16.msra.mxu1 %v9066_v22 }
 0x2b8   :  { %7238 = vmatprep.subr.bf16.mxu1 %v9074_v25  ;;  %v9104_v25 = vld [vmem:[#allocation8 + $0xaa4] ss:$16 sps:$4 sm:$0xff]  }
 0x2b9   :  { %7196 = vmatpush2.bf16.msra.mxu0 %v9069_v24 }
 0x2ba   :  { %7197 = vmatprep.subr.bf16.mxu0 %v9077_v26  ;;  %v9102_v26 = vld [vmem:[#allocation8 + $0xaa0] ss:$16 sps:$4 sm:$0xff]  }
 0x2bb   :  { %7239 = vmatpush2.bf16.msra.mxu1 %v9072_v46 }
 0x2bc   :  { %7240 = vmatprep.subr.bf16.mxu1 %v9080_v39 }
 0x2bd   :  { %7198 = vmatpush2.bf16.msra.mxu0 %v9075_v42 }
 0x2be   :  { %7199 = vmatprep.subr.bf16.mxu0 %v9083_v41  ;;  %v9113_v41 = vld [vmem:[#allocation8 + $0x864] ss:$16 sps:$4 sm:$0xff]  }
 0x2bf   :  { %7241 = vmatpush2.bf16.msra.mxu1 %v9078_v50  ;;  %v9108_v50 = vld [vmem:[#allocation8 + $0xa80] ss:$16 sps:$4 sm:$0xff]  }
 0x2c0   :  { %7242 = vmatprep.subr.bf16.mxu1 %v9086_v45  ;;  %v9116_v45 = vld [vmem:[#allocation8 + $0xa64] ss:$16 sps:$4 sm:$0xff]  }
 0x2c1   :  { %7200 = vmatpush2.bf16.msra.mxu0 %v9081_v55  ;;  %v9122_v55 = vld [vmem:[#allocation8 + $0xa44] ss:$16 sps:$4 sm:$0xff]  }
 0x2c2   :  { %7255 = vmatprep.subr.bf16.mxu0 %v9089_v47  ;;  %v9125_v47 = vld [vmem:[#allocation8 + $0x824] ss:$16 sps:$4 sm:$0xff]  }
 0x2c3   :  { %7243 = vmatpush2.bf16.msra.mxu1 %v9084_v56  ;;  %v9120_v56 = vld [vmem:[#allocation8 + $0xa40] ss:$16 sps:$4 sm:$0xff]  }
 0x2c4   :  { %7298 = vmatprep.subr.bf16.mxu1 %v9092_v59  ;;  %v3803_v7 = vpop.f32.mrf.mxu0  ;;  %7202 = vmatmul.mubr.bf16.vlgmr.msra.gmra.mxu0 %v9944_v9  ;;  %v9123_v59 = vld [vmem:[#allocation8 + $0x820] ss:$16 sps:$4 sm:$0xff]  }
 0x2c5   :  { %v3804_v14 = vadd.f32 %v3803_v7, %v664_v52  ;;  %7256 = vmatpush1.bf16.msra.mxu0 %v9087_v1  ;;  %7287 = vmatprep.mubr.bf16.mxu0 %v10051_v28  ;;  %v9129_v1 = vld [vmem:[#allocation8 + $0x800] ss:$16 sps:$4 sm:$0xff]  }
 0x2c6   :  { %v3846_v15 = vpop.f32.mrf.mxu1  ;;  %7245 = vmatmul.mubr.bf16.vlgmr.msra.gmra.mxu1 %v9962_v40  ;;  %v10058_v18 = vpop.f32.mrf.mxu0  ;;  %7257 = vmatprep.subr.bf16.mxu0 %v9095_v12  ;;  %v9135_v12 = vld [vmem:[#allocation8 + $0x9e0] ss:$16 sps:$4 sm:$0xff]  }
 0x2c7   :  { %7299 = vmatpush1.bf16.msra.mxu1 %v9090_v20  ;;  %v3847_v22 = vadd.f32 %v3846_v15, %v3804_v14  ;;  %7330 = vmatprep.mubr.bf16.mxu1 %v10054_v21  ;;  %v9137_v20 = vld [vmem:[#allocation8 + $0x9e4] ss:$16 sps:$4 sm:$0xff]   ;;  %v9138_v7 = vld [vmem:[#allocation8 + $0xbe0] ss:$16 sps:$4 sm:$0xff]  }
 0x2c8   :  { %v10061_v35 = vpop.f32.mrf.mxu1  ;;  %v3807_v24 = vpop.f32.mrf.mxu0  ;;  %7300 = vmatprep.subr.bf16.mxu1 %v9098_v13  ;;  %v9143_v13 = vld [vmem:[#allocation8 + $0x9c4] ss:$16 sps:$4 sm:$0xff]   ;;  %v9141_v15 = vld [vmem:[#allocation8 + $0x9c0] ss:$16 sps:$4 sm:$0xff]  }
 0x2c9   :  { %v3808_v27 = vadd.f32 %v3807_v24, %v664_v52  ;;  %7258 = vmatpush1.bf16.msra.mxu0 %v9093_v6  ;;  %v3953_v38 = vmax.f32 %v3847_v22, 0.0  ;;  %v9134_v52 = vld [vmem:[#allocation8 + $0xa04] ss:$16 sps:$4 sm:$0xff]   ;;  %v9144_v6 = vld [vmem:[#allocation8 + $0xbc0] ss:$16 sps:$4 sm:$0xff]  }
 0x2ca   :  { %v3850_v46 = vpop.f32.mrf.mxu1  ;;  %7259 = vmatprep.subr.bf16.mxu0 %v9101_v19  ;;  %v9146_v14 = vld [vmem:[#allocation8 + $0xbc4] ss:$16 sps:$4 sm:$0xff]   ;;  %v9147_v22 = vld [vmem:[#allocation8 + $0x9a0] ss:$16 sps:$4 sm:$0xff]  }
 0x2cb   :  { %7301 = vmatpush1.bf16.msra.mxu1 %v9096_v43  ;;  %v3851_v39 = vadd.f32 %v3850_v46, %v3808_v27  ;;  %v9149_v43 = vld [vmem:[#allocation8 + $0x9a4] ss:$16 sps:$4 sm:$0xff]   ;;  %v9156_v46 = vld [vmem:[#allocation8 + $0xb80] ss:$16 sps:$4 sm:$0xff]  }
 0x2cc   :  { %7302 = vmatprep.subr.bf16.mxu1 %v9104_v25  ;;  %v9152_v19 = vld [vmem:[#allocation8 + $0xba4] ss:$16 sps:$4 sm:$0xff]   ;;  %v9150_v25 = vld [vmem:[#allocation8 + $0xba0] ss:$16 sps:$4 sm:$0xff]  }
 0x2cd   :  { %v3969_v42 = vmax.f32 %v3851_v39, 0.0  ;;  %7260 = vmatpush1.bf16.msra.mxu0 %v9099_v48  ;;  %v9155_v24 = vld [vmem:[#allocation8 + $0x984] ss:$16 sps:$4 sm:$0xff]   ;;  %v9153_v48 = vld [vmem:[#allocation8 + $0x980] ss:$16 sps:$4 sm:$0xff]  }
 0x2ce   :  { %7261 = vmatprep.subr.bf16.mxu0 %v9107_v32  ;;  %v9158_v27 = vld [vmem:[#allocation8 + $0xb84] ss:$16 sps:$4 sm:$0xff]   ;;  %v9159_v39 = vld [vmem:[#allocation8 + $0x960] ss:$16 sps:$4 sm:$0xff]  }
 0x2cf   :  { %7303 = vmatpush1.bf16.msra.mxu1 %v9102_v26  ;;  %v10063_v30 = vpack.c.bf16 %v3969_v42, %v3953_v38  ;;  %v9161_v26 = vld [vmem:[#allocation8 + $0x964] ss:$16 sps:$4 sm:$0xff]  }
 0x2d0   :  { %7304 = vmatprep.subr.bf16.mxu1 %v9110_v33  ;;  %v9164_v32 = vld [vmem:[#allocation8 + $0xb64] ss:$16 sps:$4 sm:$0xff]   ;;  %v9162_v33 = vld [vmem:[#allocation8 + $0xb60] ss:$16 sps:$4 sm:$0xff]  }
 0x2d1   :  { %7262 = vmatpush1.bf16.msra.mxu0 %v9105_v61  ;;  %v9167_v38 = vld [vmem:[#allocation8 + $0x944] ss:$16 sps:$4 sm:$0xff]   ;;  %v3809_v61 = vpop.f32.mrf.mxu0 }
 0x2d2   :  { %7263 = vmatprep.subr.bf16.mxu0 %v9113_v41  ;;  %v9170_v42 = vld [vmem:[#allocation8 + $0xb44] ss:$16 sps:$4 sm:$0xff]   ;;  %v668_v41 = vrot.slane %v9981_v3, %v635_v0  ;;  %v9177_v0 = vld [vmem:[#allocation8 + $0x900] ss:$16 sps:$4 sm:$0xff]  }
 0x2d3   :  { %7305 = vmatpush1.bf16.msra.mxu1 %v9108_v50  ;;  %v9165_v50 = vld [vmem:[#allocation8 + $0x940] ss:$16 sps:$4 sm:$0xff]  }
 0x2d4   :  { %7306 = vmatprep.subr.bf16.mxu1 %v9116_v45  ;;  %v9168_v45 = vld [vmem:[#allocation8 + $0xb40] ss:$16 sps:$4 sm:$0xff]  }
 0x2d5   :  { %7264 = vmatpush1.bf16.msra.mxu0 %v9111_v51  ;;  %v9173_v51 = vld [vmem:[#allocation8 + $0x924] ss:$16 sps:$4 sm:$0xff]  }
 0x2d6   :  { %7265 = vmatprep.subr.bf16.mxu0 %v9119_v54  ;;  %v3810_v54 = vadd.f32 %v3809_v61, %v668_v41 }
 0x2d7   :  { %7307 = vmatpush1.bf16.msra.mxu1 %v9114_v2  ;;  %v9176_v2 = vld [vmem:[#allocation8 + $0xb24] ss:$16 sps:$4 sm:$0xff]  }
 0x2d8   :  { %7308 = vmatprep.subr.bf16.mxu1 %v9122_v55  ;;  %v9171_v55 = vld [vmem:[#allocation8 + $0x920] ss:$16 sps:$4 sm:$0xff]  }
 0x2d9   :  { %7266 = vmatpush1.bf16.msra.mxu0 %v9117_v49  ;;  %v3806_v49 = vadd.f32 %v10058_v18, %v668_v41  ;;  %v9183_v18 = vld [vmem:[#allocation8 + $0xce0] ss:$16 sps:$4 sm:$0xff]  }
 0x2da   :  { %7267 = vmatprep.subr.bf16.mxu0 %v9125_v47  ;;  %v9179_v47 = vld [vmem:[#allocation8 + $0x904] ss:$16 sps:$4 sm:$0xff]   ;;  %v9201_v41 = vld [vmem:[#allocation8 + $0xc80] ss:$16 sps:$4 sm:$0xff]  }
 0x2db   :  { %7309 = vmatpush1.bf16.msra.mxu1 %v9120_v56  ;;  %v9174_v56 = vld [vmem:[#allocation8 + $0xb20] ss:$16 sps:$4 sm:$0xff]  }
 0x2dc   :  { %7310 = vmatprep.subr.bf16.mxu1 %v9128_v57  ;;  %v3852_v57 = vpop.f32.mrf.mxu1 }
 0x2dd   :  { %7268 = vmatpush1.bf16.msra.mxu0 %v9123_v59  ;;  %v9182_v59 = vld [vmem:[#allocation8 + $0xb04] ss:$16 sps:$4 sm:$0xff]  }
 0x2de   :  { %7269 = vmatprep.subr.bf16.mxu0 %v9131_v60  ;;  %v3849_v60 = vadd.f32 %v10061_v35, %v3806_v49  ;;  %v9194_v35 = vld [vmem:[#allocation8 + $0xec4] ss:$16 sps:$4 sm:$0xff]  }
 0x2df   :  { %7311 = vmatpush1.bf16.msra.mxu1 %v9126_v62  ;;  %v3853_v62 = vadd.f32 %v3852_v57, %v3810_v54  ;;  %v9215_v57 = vld [vmem:[#allocation8 + $0xc44] ss:$16 sps:$4 sm:$0xff]  }
 0x2e0   :  { %7312 = vmatprep.subr.bf16.mxu1 %v9134_v52  ;;  %v9180_v52 = vld [vmem:[#allocation8 + $0xb00] ss:$16 sps:$4 sm:$0xff]  }
 0x2e1   :  { %7270 = vmatpush1.bf16.msra.mxu0 %v9129_v1  ;;  %v9185_v1 = vld [vmem:[#allocation8 + $0xce4] ss:$16 sps:$4 sm:$0xff]  }
 0x2e2   :  { %7271 = vmatprep.subr.bf16.mxu0 %v9137_v20  ;;  %v3970_v20 = vmax.f32 %v3853_v62, 0.0  ;;  %v9213_v62 = vld [vmem:[#allocation8 + $0xc40] ss:$16 sps:$4 sm:$0xff]  }
 0x2e3   :  { %7313 = vmatpush1.bf16.msra.mxu1 %v9132_v4  ;;  %v9188_v4 = vld [vmem:[#allocation8 + $0xee4] ss:$16 sps:$4 sm:$0xff]  }
 0x2e4   :  { %7314 = vmatprep.subr.bf16.mxu1 %v9140_v8  ;;  %v3954_v8 = vmax.f32 %v3849_v60, 0.0  ;;  %v9221_v60 = vld [vmem:[#allocation8 + $0xc24] ss:$16 sps:$4 sm:$0xff]  }
 0x2e5   :  { %7272 = vmatpush2.bf16.msra.mxu0 %v9135_v12  ;;  %v9186_v12 = vld [vmem:[#allocation8 + $0xee0] ss:$16 sps:$4 sm:$0xff]  }
 0x2e6   :  { %7273 = vmatprep.subr.bf16.mxu0 %v9143_v13  ;;  %v9191_v13 = vld [vmem:[#allocation8 + $0xcc4] ss:$16 sps:$4 sm:$0xff]  }
 0x2e7   :  { %7315 = vmatpush2.bf16.msra.mxu1 %v9138_v7  ;;  %v676_v7 = vrot.slane %v9981_v3, %v643_v5  ;;  %v9197_v3 = vld [vmem:[#allocation8 + $0xca4] ss:$16 sps:$4 sm:$0xff]  }
 0x2e8   :  { %7316 = vmatprep.subr.bf16.mxu1 %v9146_v14  ;;  %v10073_v14 = vpack.c.bf16 %v3970_v20, %v3954_v8  ;;  %v9227_v20 = vld [vmem:[#allocation8 + $0xc04] ss:$16 sps:$4 sm:$0xff]   ;;  %v9225_v8 = vld [vmem:[#allocation8 + $0xc00] ss:$16 sps:$4 sm:$0xff]  }
 0x2e9   :  { %7274 = vmatpush2.bf16.msra.mxu0 %v9141_v15 }
 0x2ea   :  { %7275 = vmatprep.subr.bf16.mxu0 %v9149_v43  ;;  %v9189_v43 = vld [vmem:[#allocation8 + $0xcc0] ss:$16 sps:$4 sm:$0xff]  }
 0x2eb   :  { %7317 = vmatpush2.bf16.msra.mxu1 %v9144_v6 }
 0x2ec   :  { %7318 = vmatprep.subr.bf16.mxu1 %v9152_v19 }
 0x2ed   :  { %7276 = vmatpush2.bf16.msra.mxu0 %v9147_v22  ;;  %v9192_v22 = vld [vmem:[#allocation8 + $0xec0] ss:$16 sps:$4 sm:$0xff]  }
 0x2ee   :  { %7277 = vmatprep.subr.bf16.mxu0 %v9155_v24  ;;  %v9200_v24 = vld [vmem:[#allocation8 + $0xea4] ss:$16 sps:$4 sm:$0xff]  }
 0x2ef   :  { %7319 = vmatpush2.bf16.msra.mxu1 %v9150_v25 }
 0x2f0   :  { %7320 = vmatprep.subr.bf16.mxu1 %v9158_v27 }
 0x2f1   :  { %7278 = vmatpush2.bf16.msra.mxu0 %v9153_v48 }
 0x2f2   :  { %7279 = vmatprep.subr.bf16.mxu0 %v9161_v26 }
 0x2f3   :  { %7321 = vmatpush2.bf16.msra.mxu1 %v9156_v46  ;;  %v9195_v46 = vld [vmem:[#allocation8 + $0xca0] ss:$16 sps:$4 sm:$0xff]  }
 0x2f4   :  { %7322 = vmatprep.subr.bf16.mxu1 %v9164_v32  ;;  %v9198_v32 = vld [vmem:[#allocation8 + $0xea0] ss:$16 sps:$4 sm:$0xff]  }
 0x2f5   :  { %7280 = vmatpush2.bf16.msra.mxu0 %v9159_v39  ;;  %v9203_v39 = vld [vmem:[#allocation8 + $0xc84] ss:$16 sps:$4 sm:$0xff]  }
 0x2f6   :  { %7281 = vmatprep.subr.bf16.mxu0 %v9167_v38 }
 0x2f7   :  { %7323 = vmatpush2.bf16.msra.mxu1 %v9162_v33 }
 0x2f8   :  { %7324 = vmatprep.subr.bf16.mxu1 %v9170_v42  ;;  %v9206_v42 = vld [vmem:[#allocation8 + $0xe84] ss:$16 sps:$4 sm:$0xff]  }
 0x2f9   :  { %7282 = vmatpush2.bf16.msra.mxu0 %v9165_v50 }
 0x2fa   :  { %7283 = vmatprep.subr.bf16.mxu0 %v9173_v51  ;;  %v9209_v51 = vld [vmem:[#allocation8 + $0xc64] ss:$16 sps:$4 sm:$0xff]  }
 0x2fb   :  { %7325 = vmatpush2.bf16.msra.mxu1 %v9168_v45  ;;  %v9204_v45 = vld [vmem:[#allocation8 + $0xe80] ss:$16 sps:$4 sm:$0xff]  }
 0x2fc   :  { %7326 = vmatprep.subr.bf16.mxu1 %v9176_v2 }
 0x2fd   :  { %7284 = vmatpush2.bf16.msra.mxu0 %v9171_v55  ;;  %v9212_v55 = vld [vmem:[#allocation8 + $0xe64] ss:$16 sps:$4 sm:$0xff]  }
 0x2fe   :  { %7285 = vmatprep.subr.bf16.mxu0 %v9179_v47  ;;  %v9210_v47 = vld [vmem:[#allocation8 + $0xe60] ss:$16 sps:$4 sm:$0xff]  }
 0x2ff   :  { %7327 = vmatpush2.bf16.msra.mxu1 %v9174_v56  ;;  %v9207_v56 = vld [vmem:[#allocation8 + $0xc60] ss:$16 sps:$4 sm:$0xff]  }
 0x300   :  { %7328 = vmatprep.subr.bf16.mxu1 %v9182_v59  ;;  %v9218_v59 = vld [vmem:[#allocation8 + $0xe44] ss:$16 sps:$4 sm:$0xff]  }
 0x301   :  { %7286 = vmatpush2.bf16.msra.mxu0 %v9177_v0  ;;  %v9216_v0 = vld [vmem:[#allocation8 + $0xe40] ss:$16 sps:$4 sm:$0xff]  }
 0x302   :  { %7341 = vmatprep.subr.bf16.mxu0 %v9185_v1  ;;  %v9219_v1 = vld [vmem:[#allocation8 + $0xc20] ss:$16 sps:$4 sm:$0xff]  }
 0x303   :  { %7329 = vmatpush2.bf16.msra.mxu1 %v9180_v52  ;;  %v9224_v52 = vld [vmem:[#allocation8 + $0xe24] ss:$16 sps:$4 sm:$0xff]  }
 0x304   :  { %7384 = vmatprep.subr.bf16.mxu1 %v9188_v4  ;;  %v10075_v15 = vpop.f32.mrf.mxu0  ;;  %7288 = vmatmul.mubr.bf16.vlgmr.msra.gmra.mxu0 %v10002_v17  ;;  %v9222_v4 = vld [vmem:[#allocation8 + $0xe20] ss:$16 sps:$4 sm:$0xff]  }
 0x305   :  { %7342 = vmatpush1.bf16.msra.mxu0 %v9183_v18  ;;  %7373 = vmatprep.mubr.bf16.mxu0 %v10073_v14  ;;  %v9230_v18 = vld [vmem:[#allocation8 + $0xe04] ss:$16 sps:$4 sm:$0xff]  }
 0x306   :  { %v10078_v6 = vpop.f32.mrf.mxu1  ;;  %7331 = vmatmul.mubr.bf16.vlgmr.msra.gmra.mxu1 %v10036_v10  ;;  %v3891_v19 = vpop.f32.mrf.mxu0  ;;  %7343 = vmatprep.subr.bf16.mxu0 %v9191_v13  ;;  %v9236_v13 = vld [vmem:[#allocation8 + $0xfe4] ss:$16 sps:$4 sm:$0xff]  }
 0x307   :  { %7385 = vmatpush1.bf16.msra.mxu1 %v9186_v12  ;;  %v3892_v5 = vadd.f32 %v3891_v19, %v676_v7  ;;  %v9228_v12 = vld [vmem:[#allocation8 + $0xe00] ss:$16 sps:$4 sm:$0xff]   ;;  %v9239_v19 = vld [vmem:[#allocation8 + $0xdc4] ss:$16 sps:$4 sm:$0xff]  }
 0x308   :  { %v3934_v25 = vpop.f32.mrf.mxu1  ;;  %7386 = vmatprep.subr.bf16.mxu1 %v9194_v35  ;;  %v10082_v27 = vpop.f32.mrf.mxu0  ;;  %v9231_v35 = vld [vmem:[#allocation8 + $0xde0] ss:$16 sps:$4 sm:$0xff]  }
 0x309   :  { %7344 = vmatpush1.bf16.msra.mxu0 %v9189_v43  ;;  %v3935_v33 = vadd.f32 %v3934_v25, %v3892_v5  ;;  %v9234_v43 = vld [vmem:[#allocation8 + $0xfe0] ss:$16 sps:$4 sm:$0xff]   ;;  %v9245_v25 = vld [vmem:[#allocation8 + $0xda4] ss:$16 sps:$4 sm:$0xff]  }
 0x30a   :  { %v10084_v48 = vpop.f32.mrf.mxu1  ;;  %v3895_v26 = vpop.f32.mrf.mxu0  ;;  %7345 = vmatprep.subr.bf16.mxu0 %v9197_v3  ;;  %v9237_v3 = vld [vmem:[#allocation8 + $0xdc0] ss:$16 sps:$4 sm:$0xff]  }
 0x30b   :  { %7387 = vmatpush1.bf16.msra.mxu1 %v9192_v22  ;;  %v3896_v38 = vadd.f32 %v3895_v26, %v676_v7  ;;  %v3956_v2 = vmax.f32 %v3935_v33, 0.0  ;;  %v9233_v7 = vld [vmem:[#allocation8 + $0xde4] ss:$16 sps:$4 sm:$0xff]   ;;  %v9240_v5 = vld [vmem:[#allocation8 + $0xfc0] ss:$16 sps:$4 sm:$0xff]  }
 0x30c   :  { %7388 = vmatprep.subr.bf16.mxu1 %v9200_v24  ;;  %v3938_v61 = vpop.f32.mrf.mxu1  ;;  %v9242_v22 = vld [vmem:[#allocation8 + $0xfc4] ss:$16 sps:$4 sm:$0xff]   ;;  %v9246_v26 = vld [vmem:[#allocation8 + $0xfa0] ss:$16 sps:$4 sm:$0xff]  }
 0x30d   :  { %v3939_v50 = vadd.f32 %v3938_v61, %v3896_v38  ;;  %7346 = vmatpush1.bf16.msra.mxu0 %v9195_v46  ;;  %v9248_v24 = vld [vmem:[#allocation8 + $0xfa4] ss:$16 sps:$4 sm:$0xff]   ;;  %v9243_v46 = vld [vmem:[#allocation8 + $0xda0] ss:$16 sps:$4 sm:$0xff]  }
 0x30e   :  { %7347 = vmatprep.subr.bf16.mxu0 %v9203_v39  ;;  %v9254_v39 = vld [vmem:[#allocation8 + $0xf84] ss:$16 sps:$4 sm:$0xff]   ;;  %v9249_v33 = vld [vmem:[#allocation8 + $0xd80] ss:$16 sps:$4 sm:$0xff]  }
 0x30f   :  { %7389 = vmatpush1.bf16.msra.mxu1 %v9198_v32  ;;  %v3972_v54 = vmax.f32 %v3939_v50, 0.0  ;;  %v9251_v32 = vld [vmem:[#allocation8 + $0xd84] ss:$16 sps:$4 sm:$0xff]   ;;  %v9252_v38 = vld [vmem:[#allocation8 + $0xf80] ss:$16 sps:$4 sm:$0xff]  }
 0x310   :  { %7390 = vmatprep.subr.bf16.mxu1 %v9206_v42  ;;  %v9257_v42 = vld [vmem:[#allocation8 + $0xd64] ss:$16 sps:$4 sm:$0xff]   ;;  %v9255_v50 = vld [vmem:[#allocation8 + $0xd60] ss:$16 sps:$4 sm:$0xff]  }
 0x311   :  { %v10086_v49 = vpack.c.bf16 %v3972_v54, %v3956_v2  ;;  %7348 = vmatpush1.bf16.msra.mxu0 %v9201_v41  ;;  %v9260_v61 = vld [vmem:[#allocation8 + $0xf64] ss:$16 sps:$4 sm:$0xff]   ;;  %v9258_v41 = vld [vmem:[#allocation8 + $0xf60] ss:$16 sps:$4 sm:$0xff]   ;;  %v9669_v2 = vld [vmem:[#allocation7 + $0x8] sm:$0xff] }
 0x312   :  { %7349 = vmatprep.subr.bf16.mxu0 %v9209_v51  ;;  %v9266_v51 = vld [vmem:[#allocation8 + $0xf44] ss:$16 sps:$4 sm:$0xff]   ;;  %v672_v54 = vrot.slane %v9669_v2, %v639_v29  ;;  %v9323_v2 = vld [vmem:[#allocation8 + $0xc] ss:$16 sps:$4 sm:$0xff]  }
 0x313   :  { %7391 = vmatpush1.bf16.msra.mxu1 %v9204_v45  ;;  %7416 = vmatprep.mubr.bf16.mxu1 %v10086_v49  ;;  %v9263_v45 = vld [vmem:[#allocation8 + $0xd44] ss:$16 sps:$4 sm:$0xff]  }
 0x314   :  { %7392 = vmatprep.subr.bf16.mxu1 %v9212_v55  ;;  %v9261_v55 = vld [vmem:[#allocation8 + $0xd40] ss:$16 sps:$4 sm:$0xff]   ;;  %v9278_v29 = vld [vmem:[#allocation8 + $0xf04] ss:$16 sps:$4 sm:$0xff]  }
 0x315   :  { %7350 = vmatpush1.bf16.msra.mxu0 %v9207_v56  ;;  %v9264_v56 = vld [vmem:[#allocation8 + $0xf40] ss:$16 sps:$4 sm:$0xff]  }
 0x316   :  { %7351 = vmatprep.subr.bf16.mxu0 %v9215_v57  ;;  %v3894_v57 = vadd.f32 %v10082_v27, %v672_v54  ;;  %v9276_v27 = vld [vmem:[#allocation8 + $0xf00] ss:$16 sps:$4 sm:$0xff]  }
 0x317   :  { %7393 = vmatpush1.bf16.msra.mxu1 %v9210_v47  ;;  %v9269_v47 = vld [vmem:[#allocation8 + $0xd24] ss:$16 sps:$4 sm:$0xff]  }
 0x318   :  { %7394 = vmatprep.subr.bf16.mxu1 %v9218_v59  ;;  %v9272_v59 = vld [vmem:[#allocation8 + $0xf24] ss:$16 sps:$4 sm:$0xff]   ;;  %v3937_v34 = vadd.f32 %v10084_v48, %v3894_v57  ;;  %v9332_v57 = vld [vmem:[#allocation8 + $0x3ec] ss:$16 sps:$4 sm:$0xff]  }
 0x319   :  { %7352 = vmatpush1.bf16.msra.mxu0 %v9213_v62  ;;  %v3890_v62 = vadd.f32 %v10075_v15, %v672_v54  ;;  %v9284_v15 = vld [vmem:[#allocation8 + $0x2ec] ss:$16 sps:$4 sm:$0xff]  }
 0x31a   :  { %7353 = vmatprep.subr.bf16.mxu0 %v9221_v60  ;;  %v9270_v60 = vld [vmem:[#allocation8 + $0xf20] ss:$16 sps:$4 sm:$0xff]   ;;  %v9326_v54 = vld [vmem:[#allocation8 + $0x20c] ss:$16 sps:$4 sm:$0xff]  }
 0x31b   :  { %7395 = vmatpush1.bf16.msra.mxu1 %v9216_v0  ;;  %v9267_v0 = vld [vmem:[#allocation8 + $0xd20] ss:$16 sps:$4 sm:$0xff]  }
 0x31c   :  { %7396 = vmatprep.subr.bf16.mxu1 %v9224_v52  ;;  %v9275_v52 = vld [vmem:[#allocation8 + $0xd04] ss:$16 sps:$4 sm:$0xff]  }
 0x31d   :  { %7354 = vmatpush1.bf16.msra.mxu0 %v9219_v1  ;;  %v3933_v1 = vadd.f32 %v10078_v6, %v3890_v62  ;;  %v9290_v6 = vld [vmem:[#allocation8 + $0x2cc] ss:$16 sps:$4 sm:$0xff]   ;;  %v9330_v62 = vld [vmem:[#allocation8 + $0x3e8] ss:$16 sps:$4 sm:$0xff]  }
 0x31e   :  { %7355 = vmatprep.subr.bf16.mxu0 %v9227_v20  ;;  %v9281_v20 = vld [vmem:[#allocation8 + $0xec] ss:$16 sps:$4 sm:$0xff]  }
 0x31f   :  { %7397 = vmatpush1.bf16.msra.mxu1 %v9222_v4  ;;  %v9273_v4 = vld [vmem:[#allocation8 + $0xd00] ss:$16 sps:$4 sm:$0xff]  }
 0x320   :  { %7398 = vmatprep.subr.bf16.mxu1 %v9230_v18  ;;  %v3971_v18 = vmax.f32 %v3937_v34, 0.0  ;;  %v9336_v34 = vld [vmem:[#allocation8 + $0x3c8] ss:$16 sps:$4 sm:$0xff]  }
 0x321   :  { %7356 = vmatpush1.bf16.msra.mxu0 %v9225_v8  ;;  %v3955_v8 = vmax.f32 %v3933_v1, 0.0  ;;  %v9344_v1 = vld [vmem:[#allocation8 + $0x3ac] ss:$16 sps:$4 sm:$0xff]  }
 0x322   :  { %7357 = vmatprep.subr.bf16.mxu0 %v9233_v7  ;;  %v9282_v7 = vld [vmem:[#allocation8 + $0x2e8] ss:$16 sps:$4 sm:$0xff]  }
 0x323   :  { %7399 = vmatpush1.bf16.msra.mxu1 %v9228_v12  ;;  %v9279_v12 = vld [vmem:[#allocation8 + $0xe8] ss:$16 sps:$4 sm:$0xff]   ;;  %v10095_v48 = vpack.c.bf16 %v3971_v18, %v3955_v8  ;;  %v9350_v18 = vld [vmem:[#allocation8 + $0x38c] ss:$16 sps:$4 sm:$0xff]  }
 0x324   :  { %7400 = vmatprep.subr.bf16.mxu1 %v9236_v13  ;;  %v9287_v13 = vld [vmem:[#allocation8 + $0xcc] ss:$16 sps:$4 sm:$0xff]   ;;  %v9348_v8 = vld [vmem:[#allocation8 + $0x388] ss:$16 sps:$4 sm:$0xff]  }
 0x325   :  { %7358 = vmatpush2.bf16.msra.mxu0 %v9231_v35  ;;  %v9285_v35 = vld [vmem:[#allocation8 + $0xc8] ss:$16 sps:$4 sm:$0xff]  }
 0x326   :  { %7359 = vmatprep.subr.bf16.mxu0 %v9239_v19  ;;  %v9293_v19 = vld [vmem:[#allocation8 + $0xac] ss:$16 sps:$4 sm:$0xff]  }
 0x327   :  { %7401 = vmatpush2.bf16.msra.mxu1 %v9234_v43  ;;  %v9288_v43 = vld [vmem:[#allocation8 + $0x2c8] ss:$16 sps:$4 sm:$0xff]  }
 0x328   :  { %7402 = vmatprep.subr.bf16.mxu1 %v9242_v22  ;;  %v9296_v22 = vld [vmem:[#allocation8 + $0x2ac] ss:$16 sps:$4 sm:$0xff]  }
 0x329   :  { %7360 = vmatpush2.bf16.msra.mxu0 %v9237_v3  ;;  %v9291_v3 = vld [vmem:[#allocation8 + $0xa8] ss:$16 sps:$4 sm:$0xff]  }
 0x32a   :  { %7361 = vmatprep.subr.bf16.mxu0 %v9245_v25  ;;  %v9299_v25 = vld [vmem:[#allocation8 + $0x8c] ss:$16 sps:$4 sm:$0xff]  }
 0x32b   :  { %7403 = vmatpush2.bf16.msra.mxu1 %v9240_v5  ;;  %v9294_v5 = vld [vmem:[#allocation8 + $0x2a8] ss:$16 sps:$4 sm:$0xff]  }
 0x32c   :  { %7404 = vmatprep.subr.bf16.mxu1 %v9248_v24  ;;  %v9302_v24 = vld [vmem:[#allocation8 + $0x28c] ss:$16 sps:$4 sm:$0xff]  }
 0x32d   :  { %7362 = vmatpush2.bf16.msra.mxu0 %v9243_v46  ;;  %v9297_v46 = vld [vmem:[#allocation8 + $0x88] ss:$16 sps:$4 sm:$0xff]  }
 0x32e   :  { %7363 = vmatprep.subr.bf16.mxu0 %v9251_v32  ;;  %v9308_v32 = vld [vmem:[#allocation8 + $0x26c] ss:$16 sps:$4 sm:$0xff]  }
 0x32f   :  { %7405 = vmatpush2.bf16.msra.mxu1 %v9246_v26  ;;  %v9305_v26 = vld [vmem:[#allocation8 + $0x6c] ss:$16 sps:$4 sm:$0xff]  }
 0x330   :  { %7406 = vmatprep.subr.bf16.mxu1 %v9254_v39  ;;  %v9306_v39 = vld [vmem:[#allocation8 + $0x268] ss:$16 sps:$4 sm:$0xff]  }
 0x331   :  { %7364 = vmatpush2.bf16.msra.mxu0 %v9249_v33  ;;  %v9311_v33 = vld [vmem:[#allocation8 + $0x4c] ss:$16 sps:$4 sm:$0xff]  }
 0x332   :  { %7365 = vmatprep.subr.bf16.mxu0 %v9257_v42  ;;  %v9309_v42 = vld [vmem:[#allocation8 + $0x48] ss:$16 sps:$4 sm:$0xff]  }
 0x333   :  { %7407 = vmatpush2.bf16.msra.mxu1 %v9252_v38  ;;  %v9314_v38 = vld [vmem:[#allocation8 + $0x24c] ss:$16 sps:$4 sm:$0xff]  }
 0x334   :  { %7408 = vmatprep.subr.bf16.mxu1 %v9260_v61  ;;  %v9312_v61 = vld [vmem:[#allocation8 + $0x248] ss:$16 sps:$4 sm:$0xff]  }
 0x335   :  { %7366 = vmatpush2.bf16.msra.mxu0 %v9255_v50  ;;  %v9317_v50 = vld [vmem:[#allocation8 + $0x2c] ss:$16 sps:$4 sm:$0xff]  }
 0x336   :  { %7367 = vmatprep.subr.bf16.mxu0 %v9263_v45  ;;  %v9315_v45 = vld [vmem:[#allocation8 + $0x28] ss:$16 sps:$4 sm:$0xff]  }
 0x337   :  { %7409 = vmatpush2.bf16.msra.mxu1 %v9258_v41  ;;  %v9320_v41 = vld [vmem:[#allocation8 + $0x22c] ss:$16 sps:$4 sm:$0xff]  }
 0x338   :  { %7410 = vmatprep.subr.bf16.mxu1 %v9266_v51  ;;  %v9318_v51 = vld [vmem:[#allocation8 + $0x228] ss:$16 sps:$4 sm:$0xff]  }
 0x339   :  { %7368 = vmatpush2.bf16.msra.mxu0 %v9261_v55  ;;  %v9321_v55 = vld [vmem:[#allocation8 + $0x8] ss:$16 sps:$4 sm:$0xff]  }
 0x33a   :  { %7369 = vmatprep.subr.bf16.mxu0 %v9269_v47  ;;  %v9329_v47 = vld [vmem:[#allocation8 + $0x1ec] ss:$16 sps:$4 sm:$0xff]  }
 0x33b   :  { %7411 = vmatpush2.bf16.msra.mxu1 %v9264_v56  ;;  %v9324_v56 = vld [vmem:[#allocation8 + $0x208] ss:$16 sps:$4 sm:$0xff]  }
 0x33c   :  { %7412 = vmatprep.subr.bf16.mxu1 %v9272_v59  ;;  %v9327_v59 = vld [vmem:[#allocation8 + $0x1e8] ss:$16 sps:$4 sm:$0xff]  }
 0x33d   :  { %7370 = vmatpush2.bf16.msra.mxu0 %v9267_v0  ;;  %v9335_v0 = vld [vmem:[#allocation8 + $0x1cc] ss:$16 sps:$4 sm:$0xff]  }
 0x33e   :  { %7371 = vmatprep.subr.bf16.mxu0 %v9275_v52  ;;  %v9333_v52 = vld [vmem:[#allocation8 + $0x1c8] ss:$16 sps:$4 sm:$0xff]  }
 0x33f   :  { %7413 = vmatpush2.bf16.msra.mxu1 %v9270_v60  ;;  %v9338_v60 = vld [vmem:[#allocation8 + $0x3cc] ss:$16 sps:$4 sm:$0xff]  }
 0x340   :  { %7414 = vmatprep.subr.bf16.mxu1 %v9278_v29  ;;  %v9341_v29 = vld [vmem:[#allocation8 + $0x1ac] ss:$16 sps:$4 sm:$0xff]  }
 0x341   :  { %7372 = vmatpush2.bf16.msra.mxu0 %v9273_v4  ;;  %v9339_v4 = vld [vmem:[#allocation8 + $0x1a8] ss:$16 sps:$4 sm:$0xff]  }
 0x342   :  { %7427 = vmatprep.subr.bf16.mxu0 %v9281_v20  ;;  %v9347_v20 = vld [vmem:[#allocation8 + $0x18c] ss:$16 sps:$4 sm:$0xff]  }
 0x343   :  { %7415 = vmatpush2.bf16.msra.mxu1 %v9276_v27  ;;  %v9342_v27 = vld [vmem:[#allocation8 + $0x3a8] ss:$16 sps:$4 sm:$0xff]  }
 0x344   :  { %7470 = vmatprep.subr.bf16.mxu1 %v9284_v15  ;;  %7374 = vmatmul.mubr.bf16.vlgmr.msra.gmra.mxu0 %v10063_v30  ;;  %v9345_v15 = vld [vmem:[#allocation8 + $0x188] ss:$16 sps:$4 sm:$0xff]  }
 0x345   :  { %7428 = vmatpush1.bf16.msra.mxu0 %v9279_v12  ;;  %7459 = vmatprep.mubr.bf16.mxu0 %v9990_v31  ;;  %v9300_v31 = vld [vmem:[#allocation8 + $0x288] ss:$16 sps:$4 sm:$0xff]   ;;  %v9353_v12 = vld [vmem:[#allocation8 + $0x16c] ss:$16 sps:$4 sm:$0xff]  }
 0x346   :  { %7417 = vmatmul.mubr.bf16.vlgmr.msra.gmra.mxu1 %v10095_v48  ;;  %7429 = vmatprep.subr.bf16.mxu0 %v9287_v13  ;;  %v9351_v13 = vld [vmem:[#allocation8 + $0x168] ss:$16 sps:$4 sm:$0xff]  }
 0x347   :  { %7471 = vmatpush1.bf16.msra.mxu1 %v9282_v7  ;;  %7502 = vmatprep.mubr.bf16.mxu1 %v9993_v63  ;;  %v9303_v63 = vld [vmem:[#allocation8 + $0x68] ss:$16 sps:$4 sm:$0xff]   ;;  %v9356_v7 = vld [vmem:[#allocation8 + $0x36c] ss:$16 sps:$4 sm:$0xff]  }
 0x348   :  { %7472 = vmatprep.subr.bf16.mxu1 %v9290_v6  ;;  %v9354_v6 = vld [vmem:[#allocation8 + $0x368] ss:$16 sps:$4 sm:$0xff]  }
 0x349   :  { %7430 = vmatpush1.bf16.msra.mxu0 %v9285_v35  ;;  %v9359_v35 = vld [vmem:[#allocation8 + $0x14c] ss:$16 sps:$4 sm:$0xff]  }
 0x34a   :  { %7431 = vmatprep.subr.bf16.mxu0 %v9293_v19  ;;  %v9357_v19 = vld [vmem:[#allocation8 + $0x148] ss:$16 sps:$4 sm:$0xff]  }
 0x34b   :  { %7473 = vmatpush1.bf16.msra.mxu1 %v9288_v43  ;;  %v9362_v43 = vld [vmem:[#allocation8 + $0x34c] ss:$16 sps:$4 sm:$0xff]  }
 0x34c   :  { %7474 = vmatprep.subr.bf16.mxu1 %v9296_v22  ;;  %v9360_v22 = vld [vmem:[#allocation8 + $0x348] ss:$16 sps:$4 sm:$0xff]  }
 0x34d   :  { %7432 = vmatpush1.bf16.msra.mxu0 %v9291_v3  ;;  %v9365_v3 = vld [vmem:[#allocation8 + $0x12c] ss:$16 sps:$4 sm:$0xff]  }
 0x34e   :  { %7433 = vmatprep.subr.bf16.mxu0 %v9299_v25  ;;  %v9363_v25 = vld [vmem:[#allocation8 + $0x128] ss:$16 sps:$4 sm:$0xff]  }
 0x34f   :  { %7475 = vmatpush1.bf16.msra.mxu1 %v9294_v5  ;;  %v9368_v5 = vld [vmem:[#allocation8 + $0x32c] ss:$16 sps:$4 sm:$0xff]  }
 0x350   :  { %7476 = vmatprep.subr.bf16.mxu1 %v9302_v24  ;;  %v9366_v24 = vld [vmem:[#allocation8 + $0x328] ss:$16 sps:$4 sm:$0xff]  }
 0x351   :  { %7434 = vmatpush1.bf16.msra.mxu0 %v9297_v46  ;;  %v9371_v46 = vld [vmem:[#allocation8 + $0x10c] ss:$16 sps:$4 sm:$0xff]  }
 0x352   :  { %7435 = vmatprep.subr.bf16.mxu0 %v9305_v26  ;;  %v9369_v26 = vld [vmem:[#allocation8 + $0x108] ss:$16 sps:$4 sm:$0xff]  }
 0x353   :  { %7477 = vmatpush1.bf16.msra.mxu1 %v9300_v31  ;;  %v9374_v31 = vld [vmem:[#allocation8 + $0x30c] ss:$16 sps:$4 sm:$0xff]  }
 0x354   :  { %7478 = vmatprep.subr.bf16.mxu1 %v9308_v32  ;;  %v9372_v32 = vld [vmem:[#allocation8 + $0x308] ss:$16 sps:$4 sm:$0xff]  }
 0x355   :  { %7436 = vmatpush1.bf16.msra.mxu0 %v9303_v63  ;;  %v9377_v63 = vld [vmem:[#allocation8 + $0x4ec] ss:$16 sps:$4 sm:$0xff]  }
 0x356   :  { %7437 = vmatprep.subr.bf16.mxu0 %v9311_v33  ;;  %v9375_v33 = vld [vmem:[#allocation8 + $0x4e8] ss:$16 sps:$4 sm:$0xff]  }
 0x357   :  { %7479 = vmatpush1.bf16.msra.mxu1 %v9306_v39  ;;  %v9380_v39 = vld [vmem:[#allocation8 + $0x6ec] ss:$16 sps:$4 sm:$0xff]  }
 0x358   :  { %7480 = vmatprep.subr.bf16.mxu1 %v9314_v38  ;;  %v9378_v38 = vld [vmem:[#allocation8 + $0x6e8] ss:$16 sps:$4 sm:$0xff]  }
 0x359   :  { %7438 = vmatpush1.bf16.msra.mxu0 %v9309_v42  ;;  %v9383_v42 = vld [vmem:[#allocation8 + $0x4cc] ss:$16 sps:$4 sm:$0xff]  }
 0x35a   :  { %7439 = vmatprep.subr.bf16.mxu0 %v9317_v50  ;;  %v9381_v50 = vld [vmem:[#allocation8 + $0x4c8] ss:$16 sps:$4 sm:$0xff]  }
 0x35b   :  { %7481 = vmatpush1.bf16.msra.mxu1 %v9312_v61  ;;  %v9386_v61 = vld [vmem:[#allocation8 + $0x6cc] ss:$16 sps:$4 sm:$0xff]  }
 0x35c   :  { %7482 = vmatprep.subr.bf16.mxu1 %v9320_v41  ;;  %v9384_v41 = vld [vmem:[#allocation8 + $0x6c8] ss:$16 sps:$4 sm:$0xff]  }
 0x35d   :  { %7440 = vmatpush1.bf16.msra.mxu0 %v9315_v45  ;;  %v9389_v45 = vld [vmem:[#allocation8 + $0x4ac] ss:$16 sps:$4 sm:$0xff]  }
 0x35e   :  { %7441 = vmatprep.subr.bf16.mxu0 %v9323_v2  ;;  %v9387_v2 = vld [vmem:[#allocation8 + $0x4a8] ss:$16 sps:$4 sm:$0xff]  }
 0x35f   :  { %7483 = vmatpush1.bf16.msra.mxu1 %v9318_v51  ;;  %v9392_v51 = vld [vmem:[#allocation8 + $0x6ac] ss:$16 sps:$4 sm:$0xff]  }
 0x360   :  { %7484 = vmatprep.subr.bf16.mxu1 %v9326_v54  ;;  %v9395_v54 = vld [vmem:[#allocation8 + $0x48c] ss:$16 sps:$4 sm:$0xff]  }
 0x361   :  { %7442 = vmatpush1.bf16.msra.mxu0 %v9321_v55  ;;  %v9393_v55 = vld [vmem:[#allocation8 + $0x488] ss:$16 sps:$4 sm:$0xff]  }
 0x362   :  { %7443 = vmatprep.subr.bf16.mxu0 %v9329_v47  ;;  %v9404_v47 = vld [vmem:[#allocation8 + $0x66c] ss:$16 sps:$4 sm:$0xff]  }
 0x363   :  { %7485 = vmatpush1.bf16.msra.mxu1 %v9324_v56  ;;  %v9401_v56 = vld [vmem:[#allocation8 + $0x46c] ss:$16 sps:$4 sm:$0xff]  }
 0x364   :  { %7486 = vmatprep.subr.bf16.mxu1 %v9332_v57  ;;  %v9402_v57 = vld [vmem:[#allocation8 + $0x668] ss:$16 sps:$4 sm:$0xff]  }
 0x365   :  { %7444 = vmatpush2.bf16.msra.mxu0 %v9327_v59  ;;  %v9407_v59 = vld [vmem:[#allocation8 + $0x44c] ss:$16 sps:$4 sm:$0xff]  }
 0x366   :  { %7445 = vmatprep.subr.bf16.mxu0 %v9335_v0  ;;  %v9405_v0 = vld [vmem:[#allocation8 + $0x448] ss:$16 sps:$4 sm:$0xff]  }
 0x367   :  { %7487 = vmatpush2.bf16.msra.mxu1 %v9330_v62  ;;  %v9410_v62 = vld [vmem:[#allocation8 + $0x64c] ss:$16 sps:$4 sm:$0xff]  }
 0x368   :  { %7488 = vmatprep.subr.bf16.mxu1 %v9338_v60  ;;  %v9408_v60 = vld [vmem:[#allocation8 + $0x648] ss:$16 sps:$4 sm:$0xff]  }
 0x369   :  { %7446 = vmatpush2.bf16.msra.mxu0 %v9333_v52  ;;  %v9413_v52 = vld [vmem:[#allocation8 + $0x42c] ss:$16 sps:$4 sm:$0xff]  }
 0x36a   :  { %7447 = vmatprep.subr.bf16.mxu0 %v9341_v29  ;;  %v9411_v29 = vld [vmem:[#allocation8 + $0x428] ss:$16 sps:$4 sm:$0xff]  }
 0x36b   :  { %7489 = vmatpush2.bf16.msra.mxu1 %v9336_v34  ;;  %v9416_v34 = vld [vmem:[#allocation8 + $0x62c] ss:$16 sps:$4 sm:$0xff]  }
 0x36c   :  { %7490 = vmatprep.subr.bf16.mxu1 %v9344_v1  ;;  %v9414_v1 = vld [vmem:[#allocation8 + $0x628] ss:$16 sps:$4 sm:$0xff]  }
 0x36d   :  { %7448 = vmatpush2.bf16.msra.mxu0 %v9339_v4  ;;  %v9419_v4 = vld [vmem:[#allocation8 + $0x40c] ss:$16 sps:$4 sm:$0xff]  }
 0x36e   :  { %7449 = vmatprep.subr.bf16.mxu0 %v9347_v20  ;;  %v9417_v20 = vld [vmem:[#allocation8 + $0x408] ss:$16 sps:$4 sm:$0xff]  }
 0x36f   :  { %7491 = vmatpush2.bf16.msra.mxu1 %v9342_v27  ;;  %v9422_v27 = vld [vmem:[#allocation8 + $0x60c] ss:$16 sps:$4 sm:$0xff]  }
 0x370   :  { %7492 = vmatprep.subr.bf16.mxu1 %v9350_v18  ;;  %v9420_v18 = vld [vmem:[#allocation8 + $0x608] ss:$16 sps:$4 sm:$0xff]  }
 0x371   :  { %7450 = vmatpush2.bf16.msra.mxu0 %v9345_v15  ;;  %v9425_v15 = vld [vmem:[#allocation8 + $0x5ec] ss:$16 sps:$4 sm:$0xff]  }
 0x372   :  { %7451 = vmatprep.subr.bf16.mxu0 %v9353_v12  ;;  %v9423_v12 = vld [vmem:[#allocation8 + $0x5e8] ss:$16 sps:$4 sm:$0xff]  }
 0x373   :  { %7493 = vmatpush2.bf16.msra.mxu1 %v9348_v8  ;;  %v9428_v8 = vld [vmem:[#allocation8 + $0x7ec] ss:$16 sps:$4 sm:$0xff]  }
 0x374   :  { %7494 = vmatprep.subr.bf16.mxu1 %v9356_v7  ;;  %v9426_v7 = vld [vmem:[#allocation8 + $0x7e8] ss:$16 sps:$4 sm:$0xff]  }
 0x375   :  { %7452 = vmatpush2.bf16.msra.mxu0 %v9351_v13  ;;  %v9431_v13 = vld [vmem:[#allocation8 + $0x5cc] ss:$16 sps:$4 sm:$0xff]  }
 0x376   :  { %7453 = vmatprep.subr.bf16.mxu0 %v9359_v35  ;;  %v9429_v35 = vld [vmem:[#allocation8 + $0x5c8] ss:$16 sps:$4 sm:$0xff]  }
 0x377   :  { %7495 = vmatpush2.bf16.msra.mxu1 %v9354_v6  ;;  %v9434_v6 = vld [vmem:[#allocation8 + $0x7cc] ss:$16 sps:$4 sm:$0xff]  }
 0x378   :  { %7496 = vmatprep.subr.bf16.mxu1 %v9362_v43  ;;  %v9432_v43 = vld [vmem:[#allocation8 + $0x7c8] ss:$16 sps:$4 sm:$0xff]  }
 0x379   :  { %7454 = vmatpush2.bf16.msra.mxu0 %v9357_v19  ;;  %v9437_v19 = vld [vmem:[#allocation8 + $0x5ac] ss:$16 sps:$4 sm:$0xff]  }
 0x37a   :  { %7455 = vmatprep.subr.bf16.mxu0 %v9365_v3  ;;  %v9435_v3 = vld [vmem:[#allocation8 + $0x5a8] ss:$16 sps:$4 sm:$0xff]  }
 0x37b   :  { %7497 = vmatpush2.bf16.msra.mxu1 %v9360_v22  ;;  %v9440_v22 = vld [vmem:[#allocation8 + $0x7ac] ss:$16 sps:$4 sm:$0xff]  }
 0x37c   :  { %7498 = vmatprep.subr.bf16.mxu1 %v9368_v5  ;;  %v9438_v5 = vld [vmem:[#allocation8 + $0x7a8] ss:$16 sps:$4 sm:$0xff]  }
 0x37d   :  { %7456 = vmatpush2.bf16.msra.mxu0 %v9363_v25  ;;  %v9443_v25 = vld [vmem:[#allocation8 + $0x58c] ss:$16 sps:$4 sm:$0xff]  }
 0x37e   :  { %7457 = vmatprep.subr.bf16.mxu0 %v9371_v46  ;;  %v9441_v46 = vld [vmem:[#allocation8 + $0x588] ss:$16 sps:$4 sm:$0xff]  }
 0x37f   :  { %7499 = vmatpush2.bf16.msra.mxu1 %v9366_v24  ;;  %v9446_v24 = vld [vmem:[#allocation8 + $0x78c] ss:$16 sps:$4 sm:$0xff]  }
 0x380   :  { %7500 = vmatprep.subr.bf16.mxu1 %v9374_v31  ;;  %v9444_v31 = vld [vmem:[#allocation8 + $0x788] ss:$16 sps:$4 sm:$0xff]  }
 0x381   :  { %7458 = vmatpush2.bf16.msra.mxu0 %v9369_v26  ;;  %v9449_v26 = vld [vmem:[#allocation8 + $0x56c] ss:$16 sps:$4 sm:$0xff]  }
 0x382   :  { %7513 = vmatprep.subr.bf16.mxu0 %v9377_v63  ;;  %v9447_v63 = vld [vmem:[#allocation8 + $0x568] ss:$16 sps:$4 sm:$0xff]  }
 0x383   :  { %7501 = vmatpush2.bf16.msra.mxu1 %v9372_v32  ;;  %v9452_v32 = vld [vmem:[#allocation8 + $0x76c] ss:$16 sps:$4 sm:$0xff]  }
 0x384   :  { %7556 = vmatprep.subr.bf16.mxu1 %v9380_v39  ;;  %7460 = vmatmul.mubr.bf16.vlgmr.msra.gmra.mxu0 %v9905_v36  ;;  %v9390_v36 = vld [vmem:[#allocation8 + $0x6a8] ss:$16 sps:$4 sm:$0xff]  }
 0x385   :  { %7514 = vmatpush1.bf16.msra.mxu0 %v9375_v33  ;;  %7545 = vmatprep.mubr.bf16.mxu0 %v10024_v53  ;;  %v9396_v53 = vld [vmem:[#allocation8 + $0x688] ss:$16 sps:$4 sm:$0xff]   ;;  %v9455_v33 = vld [vmem:[#allocation8 + $0x54c] ss:$16 sps:$4 sm:$0xff]  }
 0x386   :  { %7503 = vmatmul.mubr.bf16.vlgmr.msra.gmra.mxu1 %v9924_v11  ;;  %7515 = vmatprep.subr.bf16.mxu0 %v9383_v42  ;;  %v9398_v11 = vld [vmem:[#allocation8 + $0x68c] ss:$16 sps:$4 sm:$0xff]   ;;  %v9450_v39 = vld [vmem:[#allocation8 + $0x768] ss:$16 sps:$4 sm:$0xff]  }
 0x387   :  { %7557 = vmatpush1.bf16.msra.mxu1 %v9378_v38  ;;  %7588 = vmatprep.mubr.bf16.mxu1 %v10027_v23  ;;  %v9399_v23 = vld [vmem:[#allocation8 + $0x468] ss:$16 sps:$4 sm:$0xff]   ;;  %v9458_v38 = vld [vmem:[#allocation8 + $0x74c] ss:$16 sps:$4 sm:$0xff]  }
 0x388   :  { %7558 = vmatprep.subr.bf16.mxu1 %v9386_v61  ;;  %v9453_v42 = vld [vmem:[#allocation8 + $0x548] ss:$16 sps:$4 sm:$0xff]  }
 0x389   :  { %7516 = vmatpush1.bf16.msra.mxu0 %v9381_v50  ;;  %v9456_v61 = vld [vmem:[#allocation8 + $0x748] ss:$16 sps:$4 sm:$0xff]   ;;  %v9461_v50 = vld [vmem:[#allocation8 + $0x52c] ss:$16 sps:$4 sm:$0xff]  }
 0x38a   :  { %7517 = vmatprep.subr.bf16.mxu0 %v9389_v45  ;;  %v9459_v45 = vld [vmem:[#allocation8 + $0x528] ss:$16 sps:$4 sm:$0xff]  }
 0x38b   :  { %7559 = vmatpush1.bf16.msra.mxu1 %v9384_v41  ;;  %v9464_v41 = vld [vmem:[#allocation8 + $0x72c] ss:$16 sps:$4 sm:$0xff]  }
 0x38c   :  { %7560 = vmatprep.subr.bf16.mxu1 %v9392_v51  ;;  %v9462_v51 = vld [vmem:[#allocation8 + $0x728] ss:$16 sps:$4 sm:$0xff]  }
 0x38d   :  { %7518 = vmatpush1.bf16.msra.mxu0 %v9387_v2  ;;  %v9467_v2 = vld [vmem:[#allocation8 + $0x50c] ss:$16 sps:$4 sm:$0xff]  }
 0x38e   :  { %7519 = vmatprep.subr.bf16.mxu0 %v9395_v54  ;;  %v9465_v54 = vld [vmem:[#allocation8 + $0x508] ss:$16 sps:$4 sm:$0xff]  }
 0x38f   :  { %7561 = vmatpush1.bf16.msra.mxu1 %v9390_v36  ;;  %v9470_v36 = vld [vmem:[#allocation8 + $0x70c] ss:$16 sps:$4 sm:$0xff]  }
 0x390   :  { %7562 = vmatprep.subr.bf16.mxu1 %v9398_v11  ;;  %v9468_v11 = vld [vmem:[#allocation8 + $0x708] ss:$16 sps:$4 sm:$0xff]  }
 0x391   :  { %7520 = vmatpush1.bf16.msra.mxu0 %v9393_v55  ;;  %v9473_v55 = vld [vmem:[#allocation8 + $0x8ec] ss:$16 sps:$4 sm:$0xff]  }
 0x392   :  { %7521 = vmatprep.subr.bf16.mxu0 %v9401_v56  ;;  %v9471_v56 = vld [vmem:[#allocation8 + $0x8e8] ss:$16 sps:$4 sm:$0xff]  }
 0x393   :  { %7563 = vmatpush1.bf16.msra.mxu1 %v9396_v53  ;;  %v9476_v53 = vld [vmem:[#allocation8 + $0xaec] ss:$16 sps:$4 sm:$0xff]  }
 0x394   :  { %7564 = vmatprep.subr.bf16.mxu1 %v9404_v47  ;;  %v9474_v47 = vld [vmem:[#allocation8 + $0xae8] ss:$16 sps:$4 sm:$0xff]  }
 0x395   :  { %7522 = vmatpush1.bf16.msra.mxu0 %v9399_v23  ;;  %v9479_v23 = vld [vmem:[#allocation8 + $0x8cc] ss:$16 sps:$4 sm:$0xff]  }
 0x396   :  { %7523 = vmatprep.subr.bf16.mxu0 %v9407_v59  ;;  %v9477_v59 = vld [vmem:[#allocation8 + $0x8c8] ss:$16 sps:$4 sm:$0xff]  }
 0x397   :  { %7565 = vmatpush1.bf16.msra.mxu1 %v9402_v57  ;;  %v9482_v57 = vld [vmem:[#allocation8 + $0xacc] ss:$16 sps:$4 sm:$0xff]  }
 0x398   :  { %7566 = vmatprep.subr.bf16.mxu1 %v9410_v62  ;;  %v9480_v62 = vld [vmem:[#allocation8 + $0xac8] ss:$16 sps:$4 sm:$0xff]  }
 0x399   :  { %7524 = vmatpush1.bf16.msra.mxu0 %v9405_v0  ;;  %v9485_v0 = vld [vmem:[#allocation8 + $0x8ac] ss:$16 sps:$4 sm:$0xff]  }
 0x39a   :  { %7525 = vmatprep.subr.bf16.mxu0 %v9413_v52  ;;  %v9483_v52 = vld [vmem:[#allocation8 + $0x8a8] ss:$16 sps:$4 sm:$0xff]  }
 0x39b   :  { %7567 = vmatpush1.bf16.msra.mxu1 %v9408_v60  ;;  %v9488_v60 = vld [vmem:[#allocation8 + $0xaac] ss:$16 sps:$4 sm:$0xff]  }
 0x39c   :  { %7568 = vmatprep.subr.bf16.mxu1 %v9416_v34  ;;  %v9491_v34 = vld [vmem:[#allocation8 + $0x88c] ss:$16 sps:$4 sm:$0xff]  }
 0x39d   :  { %7526 = vmatpush1.bf16.msra.mxu0 %v9411_v29  ;;  %v9489_v29 = vld [vmem:[#allocation8 + $0x888] ss:$16 sps:$4 sm:$0xff]  }
 0x39e   :  { %7527 = vmatprep.subr.bf16.mxu0 %v9419_v4  ;;  %v9500_v4 = vld [vmem:[#allocation8 + $0xa6c] ss:$16 sps:$4 sm:$0xff]  }
 0x39f   :  { %7569 = vmatpush1.bf16.msra.mxu1 %v9414_v1  ;;  %v9497_v1 = vld [vmem:[#allocation8 + $0x86c] ss:$16 sps:$4 sm:$0xff]  }
 0x3a0   :  { %7570 = vmatprep.subr.bf16.mxu1 %v9422_v27  ;;  %v9498_v27 = vld [vmem:[#allocation8 + $0xa68] ss:$16 sps:$4 sm:$0xff]  }
 0x3a1   :  { %7528 = vmatpush1.bf16.msra.mxu0 %v9417_v20  ;;  %v9503_v20 = vld [vmem:[#allocation8 + $0x84c] ss:$16 sps:$4 sm:$0xff]  }
 0x3a2   :  { %7529 = vmatprep.subr.bf16.mxu0 %v9425_v15  ;;  %v9501_v15 = vld [vmem:[#allocation8 + $0x848] ss:$16 sps:$4 sm:$0xff]  }
 0x3a3   :  { %7571 = vmatpush1.bf16.msra.mxu1 %v9420_v18  ;;  %v9506_v18 = vld [vmem:[#allocation8 + $0xa4c] ss:$16 sps:$4 sm:$0xff]  }
 0x3a4   :  { %7572 = vmatprep.subr.bf16.mxu1 %v9428_v8  ;;  %v9504_v8 = vld [vmem:[#allocation8 + $0xa48] ss:$16 sps:$4 sm:$0xff]  }
 0x3a5   :  { %7530 = vmatpush2.bf16.msra.mxu0 %v9423_v12  ;;  %v9509_v12 = vld [vmem:[#allocation8 + $0x82c] ss:$16 sps:$4 sm:$0xff]  }
 0x3a6   :  { %7531 = vmatprep.subr.bf16.mxu0 %v9431_v13  ;;  %v9507_v13 = vld [vmem:[#allocation8 + $0x828] ss:$16 sps:$4 sm:$0xff]  }
 0x3a7   :  { %7573 = vmatpush2.bf16.msra.mxu1 %v9426_v7  ;;  %v9512_v7 = vld [vmem:[#allocation8 + $0xa2c] ss:$16 sps:$4 sm:$0xff]  }
 0x3a8   :  { %7574 = vmatprep.subr.bf16.mxu1 %v9434_v6  ;;  %v9510_v6 = vld [vmem:[#allocation8 + $0xa28] ss:$16 sps:$4 sm:$0xff]  }
 0x3a9   :  { %7532 = vmatpush2.bf16.msra.mxu0 %v9429_v35  ;;  %v9515_v35 = vld [vmem:[#allocation8 + $0x80c] ss:$16 sps:$4 sm:$0xff]  }
 0x3aa   :  { %7533 = vmatprep.subr.bf16.mxu0 %v9437_v19  ;;  %v9513_v19 = vld [vmem:[#allocation8 + $0x808] ss:$16 sps:$4 sm:$0xff]  }
 0x3ab   :  { %7575 = vmatpush2.bf16.msra.mxu1 %v9432_v43  ;;  %v9518_v43 = vld [vmem:[#allocation8 + $0xa0c] ss:$16 sps:$4 sm:$0xff]  }
 0x3ac   :  { %7576 = vmatprep.subr.bf16.mxu1 %v9440_v22  ;;  %v9516_v22 = vld [vmem:[#allocation8 + $0xa08] ss:$16 sps:$4 sm:$0xff]  }
 0x3ad   :  { %7534 = vmatpush2.bf16.msra.mxu0 %v9435_v3  ;;  %v9521_v3 = vld [vmem:[#allocation8 + $0x9ec] ss:$16 sps:$4 sm:$0xff]  }
 0x3ae   :  { %7535 = vmatprep.subr.bf16.mxu0 %v9443_v25  ;;  %v9519_v25 = vld [vmem:[#allocation8 + $0x9e8] ss:$16 sps:$4 sm:$0xff]  }
 0x3af   :  { %7577 = vmatpush2.bf16.msra.mxu1 %v9438_v5  ;;  %v9524_v5 = vld [vmem:[#allocation8 + $0xbec] ss:$16 sps:$4 sm:$0xff]  }
 0x3b0   :  { %7578 = vmatprep.subr.bf16.mxu1 %v9446_v24  ;;  %v9522_v24 = vld [vmem:[#allocation8 + $0xbe8] ss:$16 sps:$4 sm:$0xff]  }
 0x3b1   :  { %7536 = vmatpush2.bf16.msra.mxu0 %v9441_v46  ;;  %v9527_v46 = vld [vmem:[#allocation8 + $0x9cc] ss:$16 sps:$4 sm:$0xff]  }
 0x3b2   :  { %7537 = vmatprep.subr.bf16.mxu0 %v9449_v26  ;;  %v9525_v26 = vld [vmem:[#allocation8 + $0x9c8] ss:$16 sps:$4 sm:$0xff]  }
 0x3b3   :  { %7579 = vmatpush2.bf16.msra.mxu1 %v9444_v31  ;;  %v9530_v31 = vld [vmem:[#allocation8 + $0xbcc] ss:$16 sps:$4 sm:$0xff]  }
 0x3b4   :  { %7580 = vmatprep.subr.bf16.mxu1 %v9452_v32  ;;  %v9528_v32 = vld [vmem:[#allocation8 + $0xbc8] ss:$16 sps:$4 sm:$0xff]  }
 0x3b5   :  { %7538 = vmatpush2.bf16.msra.mxu0 %v9447_v63  ;;  %v9533_v63 = vld [vmem:[#allocation8 + $0x9ac] ss:$16 sps:$4 sm:$0xff]  }
 0x3b6   :  { %7539 = vmatprep.subr.bf16.mxu0 %v9455_v33  ;;  %v9531_v33 = vld [vmem:[#allocation8 + $0x9a8] ss:$16 sps:$4 sm:$0xff]  }
 0x3b7   :  { %7581 = vmatpush2.bf16.msra.mxu1 %v9450_v39  ;;  %v9536_v39 = vld [vmem:[#allocation8 + $0xbac] ss:$16 sps:$4 sm:$0xff]  }
 0x3b8   :  { %7582 = vmatprep.subr.bf16.mxu1 %v9458_v38  ;;  %v9534_v38 = vld [vmem:[#allocation8 + $0xba8] ss:$16 sps:$4 sm:$0xff]  }
 0x3b9   :  { %7540 = vmatpush2.bf16.msra.mxu0 %v9453_v42  ;;  %v9539_v42 = vld [vmem:[#allocation8 + $0x98c] ss:$16 sps:$4 sm:$0xff]  }
 0x3ba   :  { %7541 = vmatprep.subr.bf16.mxu0 %v9461_v50  ;;  %v9537_v50 = vld [vmem:[#allocation8 + $0x988] ss:$16 sps:$4 sm:$0xff]  }
 0x3bb   :  { %7583 = vmatpush2.bf16.msra.mxu1 %v9456_v61  ;;  %v9542_v61 = vld [vmem:[#allocation8 + $0xb8c] ss:$16 sps:$4 sm:$0xff]  }
 0x3bc   :  { %7584 = vmatprep.subr.bf16.mxu1 %v9464_v41  ;;  %v9540_v41 = vld [vmem:[#allocation8 + $0xb88] ss:$16 sps:$4 sm:$0xff]  }
 0x3bd   :  { %7542 = vmatpush2.bf16.msra.mxu0 %v9459_v45  ;;  %v9545_v45 = vld [vmem:[#allocation8 + $0x96c] ss:$16 sps:$4 sm:$0xff]  }
 0x3be   :  { %7543 = vmatprep.subr.bf16.mxu0 %v9467_v2  ;;  %v9543_v2 = vld [vmem:[#allocation8 + $0x968] ss:$16 sps:$4 sm:$0xff]  }
 0x3bf   :  { %7585 = vmatpush2.bf16.msra.mxu1 %v9462_v51  ;;  %v9548_v51 = vld [vmem:[#allocation8 + $0xb6c] ss:$16 sps:$4 sm:$0xff]  }
 0x3c0   :  { %7586 = vmatprep.subr.bf16.mxu1 %v9470_v36  ;;  %v9546_v36 = vld [vmem:[#allocation8 + $0xb68] ss:$16 sps:$4 sm:$0xff]  }
 0x3c1   :  { %7544 = vmatpush2.bf16.msra.mxu0 %v9465_v54  ;;  %v9551_v54 = vld [vmem:[#allocation8 + $0x94c] ss:$16 sps:$4 sm:$0xff]  }
 0x3c2   :  { %7599 = vmatprep.subr.bf16.mxu0 %v9473_v55  ;;  %v9549_v55 = vld [vmem:[#allocation8 + $0x948] ss:$16 sps:$4 sm:$0xff]  }
 0x3c3   :  { %7587 = vmatpush2.bf16.msra.mxu1 %v9468_v11  ;;  %v9554_v11 = vld [vmem:[#allocation8 + $0xb4c] ss:$16 sps:$4 sm:$0xff]  }
 0x3c4   :  { %7642 = vmatprep.subr.bf16.mxu1 %v9476_v53  ;;  %7546 = vmatmul.mubr.bf16.vlgmr.msra.gmra.mxu0 %v9944_v9  ;;  %v9486_v9 = vld [vmem:[#allocation8 + $0xaa8] ss:$16 sps:$4 sm:$0xff]  }
 0x3c5   :  { %7600 = vmatpush1.bf16.msra.mxu0 %v9471_v56  ;;  %7631 = vmatprep.mubr.bf16.mxu0 %v10051_v28  ;;  %v9492_v28 = vld [vmem:[#allocation8 + $0xa88] ss:$16 sps:$4 sm:$0xff]   ;;  %v9557_v56 = vld [vmem:[#allocation8 + $0x92c] ss:$16 sps:$4 sm:$0xff]  }
 0x3c6   :  { %7589 = vmatmul.mubr.bf16.vlgmr.msra.gmra.mxu1 %v9962_v40  ;;  %7601 = vmatprep.subr.bf16.mxu0 %v9479_v23  ;;  %v9494_v40 = vld [vmem:[#allocation8 + $0xa8c] ss:$16 sps:$4 sm:$0xff]   ;;  %v9552_v53 = vld [vmem:[#allocation8 + $0xb48] ss:$16 sps:$4 sm:$0xff]  }
 0x3c7   :  { %7643 = vmatpush1.bf16.msra.mxu1 %v9474_v47  ;;  %7674 = vmatprep.mubr.bf16.mxu1 %v10054_v21  ;;  %v9495_v21 = vld [vmem:[#allocation8 + $0x868] ss:$16 sps:$4 sm:$0xff]   ;;  %v9560_v47 = vld [vmem:[#allocation8 + $0xb2c] ss:$16 sps:$4 sm:$0xff]  }
 0x3c8   :  { %7644 = vmatprep.subr.bf16.mxu1 %v9482_v57  ;;  %v9555_v23 = vld [vmem:[#allocation8 + $0x928] ss:$16 sps:$4 sm:$0xff]  }
 0x3c9   :  { %7602 = vmatpush1.bf16.msra.mxu0 %v9477_v59  ;;  %v9558_v57 = vld [vmem:[#allocation8 + $0xb28] ss:$16 sps:$4 sm:$0xff]   ;;  %v9563_v59 = vld [vmem:[#allocation8 + $0x90c] ss:$16 sps:$4 sm:$0xff]  }
 0x3ca   :  { %7603 = vmatprep.subr.bf16.mxu0 %v9485_v0  ;;  %v9561_v0 = vld [vmem:[#allocation8 + $0x908] ss:$16 sps:$4 sm:$0xff]  }
 0x3cb   :  { %7645 = vmatpush1.bf16.msra.mxu1 %v9480_v62  ;;  %v9566_v62 = vld [vmem:[#allocation8 + $0xb0c] ss:$16 sps:$4 sm:$0xff]  }
 0x3cc   :  { %7646 = vmatprep.subr.bf16.mxu1 %v9488_v60  ;;  %v9564_v60 = vld [vmem:[#allocation8 + $0xb08] ss:$16 sps:$4 sm:$0xff]  }
 0x3cd   :  { %7604 = vmatpush1.bf16.msra.mxu0 %v9483_v52  ;;  %v9569_v52 = vld [vmem:[#allocation8 + $0xcec] ss:$16 sps:$4 sm:$0xff]  }
 0x3ce   :  { %7605 = vmatprep.subr.bf16.mxu0 %v9491_v34  ;;  %v9567_v34 = vld [vmem:[#allocation8 + $0xce8] ss:$16 sps:$4 sm:$0xff]  }
 0x3cf   :  { %7647 = vmatpush1.bf16.msra.mxu1 %v9486_v9  ;;  %v9572_v9 = vld [vmem:[#allocation8 + $0xeec] ss:$16 sps:$4 sm:$0xff]  }
 0x3d0   :  { %7648 = vmatprep.subr.bf16.mxu1 %v9494_v40  ;;  %v9570_v40 = vld [vmem:[#allocation8 + $0xee8] ss:$16 sps:$4 sm:$0xff]  }
 0x3d1   :  { %7606 = vmatpush1.bf16.msra.mxu0 %v9489_v29  ;;  %v9575_v29 = vld [vmem:[#allocation8 + $0xccc] ss:$16 sps:$4 sm:$0xff]  }
 0x3d2   :  { %7607 = vmatprep.subr.bf16.mxu0 %v9497_v1  ;;  %v9573_v1 = vld [vmem:[#allocation8 + $0xcc8] ss:$16 sps:$4 sm:$0xff]  }
 0x3d3   :  { %7649 = vmatpush1.bf16.msra.mxu1 %v9492_v28  ;;  %v9578_v28 = vld [vmem:[#allocation8 + $0xecc] ss:$16 sps:$4 sm:$0xff]  }
 0x3d4   :  { %7650 = vmatprep.subr.bf16.mxu1 %v9500_v4  ;;  %v9576_v4 = vld [vmem:[#allocation8 + $0xec8] ss:$16 sps:$4 sm:$0xff]  }
 0x3d5   :  { %7608 = vmatpush1.bf16.msra.mxu0 %v9495_v21  ;;  %v9581_v21 = vld [vmem:[#allocation8 + $0xcac] ss:$16 sps:$4 sm:$0xff]  }
 0x3d6   :  { %7609 = vmatprep.subr.bf16.mxu0 %v9503_v20  ;;  %v9579_v20 = vld [vmem:[#allocation8 + $0xca8] ss:$16 sps:$4 sm:$0xff]  }
 0x3d7   :  { %7651 = vmatpush1.bf16.msra.mxu1 %v9498_v27  ;;  %v9584_v27 = vld [vmem:[#allocation8 + $0xeac] ss:$16 sps:$4 sm:$0xff]  }
 0x3d8   :  { %7652 = vmatprep.subr.bf16.mxu1 %v9506_v18  ;;  %v9587_v18 = vld [vmem:[#allocation8 + $0xc8c] ss:$16 sps:$4 sm:$0xff]  }
 0x3d9   :  { %7610 = vmatpush1.bf16.msra.mxu0 %v9501_v15  ;;  %v9585_v15 = vld [vmem:[#allocation8 + $0xc88] ss:$16 sps:$4 sm:$0xff]  }
 0x3da   :  { %7611 = vmatprep.subr.bf16.mxu0 %v9509_v12  ;;  %v9596_v12 = vld [vmem:[#allocation8 + $0xe6c] ss:$16 sps:$4 sm:$0xff]  }
 0x3db   :  { %7653 = vmatpush1.bf16.msra.mxu1 %v9504_v8  ;;  %v9593_v8 = vld [vmem:[#allocation8 + $0xc6c] ss:$16 sps:$4 sm:$0xff]  }
 0x3dc   :  { %7654 = vmatprep.subr.bf16.mxu1 %v9512_v7  ;;  %v9594_v7 = vld [vmem:[#allocation8 + $0xe68] ss:$16 sps:$4 sm:$0xff]  }
 0x3dd   :  { %7612 = vmatpush1.bf16.msra.mxu0 %v9507_v13  ;;  %v9599_v13 = vld [vmem:[#allocation8 + $0xc4c] ss:$16 sps:$4 sm:$0xff]  }
 0x3de   :  { %7613 = vmatprep.subr.bf16.mxu0 %v9515_v35  ;;  %v9597_v35 = vld [vmem:[#allocation8 + $0xc48] ss:$16 sps:$4 sm:$0xff]  }
 0x3df   :  { %7655 = vmatpush1.bf16.msra.mxu1 %v9510_v6  ;;  %v9602_v6 = vld [vmem:[#allocation8 + $0xe4c] ss:$16 sps:$4 sm:$0xff]  }
 0x3e0   :  { %7656 = vmatprep.subr.bf16.mxu1 %v9518_v43  ;;  %v9600_v43 = vld [vmem:[#allocation8 + $0xe48] ss:$16 sps:$4 sm:$0xff]  }
 0x3e1   :  { %7614 = vmatpush1.bf16.msra.mxu0 %v9513_v19  ;;  %v9605_v19 = vld [vmem:[#allocation8 + $0xc2c] ss:$16 sps:$4 sm:$0xff]  }
 0x3e2   :  { %7615 = vmatprep.subr.bf16.mxu0 %v9521_v3  ;;  %v9603_v3 = vld [vmem:[#allocation8 + $0xc28] ss:$16 sps:$4 sm:$0xff]  }
 0x3e3   :  { %7657 = vmatpush1.bf16.msra.mxu1 %v9516_v22  ;;  %v9608_v22 = vld [vmem:[#allocation8 + $0xe2c] ss:$16 sps:$4 sm:$0xff]  }
 0x3e4   :  { %7658 = vmatprep.subr.bf16.mxu1 %v9524_v5  ;;  %v9606_v5 = vld [vmem:[#allocation8 + $0xe28] ss:$16 sps:$4 sm:$0xff]  }
 0x3e5   :  { %7616 = vmatpush2.bf16.msra.mxu0 %v9519_v25  ;;  %v9611_v25 = vld [vmem:[#allocation8 + $0xc0c] ss:$16 sps:$4 sm:$0xff]  }
 0x3e6   :  { %7617 = vmatprep.subr.bf16.mxu0 %v9527_v46  ;;  %v9609_v46 = vld [vmem:[#allocation8 + $0xc08] ss:$16 sps:$4 sm:$0xff]  }
 0x3e7   :  { %7659 = vmatpush2.bf16.msra.mxu1 %v9522_v24  ;;  %v9614_v24 = vld [vmem:[#allocation8 + $0xe0c] ss:$16 sps:$4 sm:$0xff]  }
 0x3e8   :  { %7660 = vmatprep.subr.bf16.mxu1 %v9530_v31  ;;  %v9612_v31 = vld [vmem:[#allocation8 + $0xe08] ss:$16 sps:$4 sm:$0xff]  }
 0x3e9   :  { %7618 = vmatpush2.bf16.msra.mxu0 %v9525_v26  ;;  %v9617_v26 = vld [vmem:[#allocation8 + $0xdec] ss:$16 sps:$4 sm:$0xff]  }
 0x3ea   :  { %7619 = vmatprep.subr.bf16.mxu0 %v9533_v63  ;;  %v9615_v63 = vld [vmem:[#allocation8 + $0xde8] ss:$16 sps:$4 sm:$0xff]  }
 0x3eb   :  { %7661 = vmatpush2.bf16.msra.mxu1 %v9528_v32  ;;  %v9620_v32 = vld [vmem:[#allocation8 + $0xfec] ss:$16 sps:$4 sm:$0xff]  }
 0x3ec   :  { %7662 = vmatprep.subr.bf16.mxu1 %v9536_v39  ;;  %v9618_v39 = vld [vmem:[#allocation8 + $0xfe8] ss:$16 sps:$4 sm:$0xff]  }
 0x3ed   :  { %7620 = vmatpush2.bf16.msra.mxu0 %v9531_v33  ;;  %v9623_v33 = vld [vmem:[#allocation8 + $0xdcc] ss:$16 sps:$4 sm:$0xff]  }
 0x3ee   :  { %7621 = vmatprep.subr.bf16.mxu0 %v9539_v42  ;;  %v9621_v42 = vld [vmem:[#allocation8 + $0xdc8] ss:$16 sps:$4 sm:$0xff]  }
 0x3ef   :  { %7663 = vmatpush2.bf16.msra.mxu1 %v9534_v38  ;;  %v9626_v38 = vld [vmem:[#allocation8 + $0xfcc] ss:$16 sps:$4 sm:$0xff]  }
 0x3f0   :  { %7664 = vmatprep.subr.bf16.mxu1 %v9542_v61  ;;  %v9624_v61 = vld [vmem:[#allocation8 + $0xfc8] ss:$16 sps:$4 sm:$0xff]  }
 0x3f1   :  { %7622 = vmatpush2.bf16.msra.mxu0 %v9537_v50  ;;  %v9629_v50 = vld [vmem:[#allocation8 + $0xdac] ss:$16 sps:$4 sm:$0xff]  }
 0x3f2   :  { %7623 = vmatprep.subr.bf16.mxu0 %v9545_v45  ;;  %v9627_v45 = vld [vmem:[#allocation8 + $0xda8] ss:$16 sps:$4 sm:$0xff]  }
 0x3f3   :  { %7665 = vmatpush2.bf16.msra.mxu1 %v9540_v41  ;;  %v9632_v41 = vld [vmem:[#allocation8 + $0xfac] ss:$16 sps:$4 sm:$0xff]  }
 0x3f4   :  { %7666 = vmatprep.subr.bf16.mxu1 %v9548_v51  ;;  %v9630_v51 = vld [vmem:[#allocation8 + $0xfa8] ss:$16 sps:$4 sm:$0xff]  }
 0x3f5   :  { %7624 = vmatpush2.bf16.msra.mxu0 %v9543_v2  ;;  %v9635_v2 = vld [vmem:[#allocation8 + $0xd8c] ss:$16 sps:$4 sm:$0xff]  }
 0x3f6   :  { %7625 = vmatprep.subr.bf16.mxu0 %v9551_v54  ;;  %v9633_v54 = vld [vmem:[#allocation8 + $0xd88] ss:$16 sps:$4 sm:$0xff]  }
 0x3f7   :  { %7667 = vmatpush2.bf16.msra.mxu1 %v9546_v36  ;;  %v9638_v36 = vld [vmem:[#allocation8 + $0xf8c] ss:$16 sps:$4 sm:$0xff]  }
 0x3f8   :  { %7668 = vmatprep.subr.bf16.mxu1 %v9554_v11  ;;  %v9636_v11 = vld [vmem:[#allocation8 + $0xf88] ss:$16 sps:$4 sm:$0xff]  }
 0x3f9   :  { %7626 = vmatpush2.bf16.msra.mxu0 %v9549_v55  ;;  %v9641_v55 = vld [vmem:[#allocation8 + $0xd6c] ss:$16 sps:$4 sm:$0xff]  }
 0x3fa   :  { %7627 = vmatprep.subr.bf16.mxu0 %v9557_v56  ;;  %v9639_v56 = vld [vmem:[#allocation8 + $0xd68] ss:$16 sps:$4 sm:$0xff]  }
 0x3fb   :  { %7669 = vmatpush2.bf16.msra.mxu1 %v9552_v53  ;;  %v9644_v53 = vld [vmem:[#allocation8 + $0xf6c] ss:$16 sps:$4 sm:$0xff]  }
 0x3fc   :  { %7670 = vmatprep.subr.bf16.mxu1 %v9560_v47  ;;  %v9642_v47 = vld [vmem:[#allocation8 + $0xf68] ss:$16 sps:$4 sm:$0xff]  }
 0x3fd   :  { %7628 = vmatpush2.bf16.msra.mxu0 %v9555_v23  ;;  %v9647_v23 = vld [vmem:[#allocation8 + $0xd4c] ss:$16 sps:$4 sm:$0xff]  }
 0x3fe   :  { %7629 = vmatprep.subr.bf16.mxu0 %v9563_v59  ;;  %v9645_v59 = vld [vmem:[#allocation8 + $0xd48] ss:$16 sps:$4 sm:$0xff]  }
 0x3ff   :  { %7671 = vmatpush2.bf16.msra.mxu1 %v9558_v57  ;;  %v9650_v57 = vld [vmem:[#allocation8 + $0xf4c] ss:$16 sps:$4 sm:$0xff]  }
 0x400   :  { %7672 = vmatprep.subr.bf16.mxu1 %v9566_v62  ;;  %v9648_v62 = vld [vmem:[#allocation8 + $0xf48] ss:$16 sps:$4 sm:$0xff]  }
 0x401   :  { %7630 = vmatpush2.bf16.msra.mxu0 %v9561_v0  ;;  %v9653_v0 = vld [vmem:[#allocation8 + $0xd2c] ss:$16 sps:$4 sm:$0xff]  }
 0x402   :  { %7685 = vmatprep.subr.bf16.mxu0 %v9569_v52  ;;  %v9651_v52 = vld [vmem:[#allocation8 + $0xd28] ss:$16 sps:$4 sm:$0xff]  }
 0x403   :  { %7673 = vmatpush2.bf16.msra.mxu1 %v9564_v60  ;;  %v9656_v60 = vld [vmem:[#allocation8 + $0xf2c] ss:$16 sps:$4 sm:$0xff]  }
 0x404   :  { %7728 = vmatprep.subr.bf16.mxu1 %v9572_v9  ;;  %7632 = vmatmul.mubr.bf16.vlgmr.msra.gmra.mxu0 %v10002_v17  ;;  %v9582_v17 = vld [vmem:[#allocation8 + $0xea8] ss:$16 sps:$4 sm:$0xff]  }
 0x405   :  { %7686 = vmatpush1.bf16.msra.mxu0 %v9567_v34  ;;  %7717 = vmatprep.mubr.bf16.mxu0 %v10073_v14  ;;  %v9588_v14 = vld [vmem:[#allocation8 + $0xe88] ss:$16 sps:$4 sm:$0xff]   ;;  %v9659_v34 = vld [vmem:[#allocation8 + $0xd0c] ss:$16 sps:$4 sm:$0xff]  }
 0x406   :  { %7675 = vmatmul.mubr.bf16.vlgmr.msra.gmra.mxu1 %v10036_v10  ;;  %7687 = vmatprep.subr.bf16.mxu0 %v9575_v29  ;;  %v9590_v10 = vld [vmem:[#allocation8 + $0xe8c] ss:$16 sps:$4 sm:$0xff]   ;;  %v9654_v9 = vld [vmem:[#allocation8 + $0xf28] ss:$16 sps:$4 sm:$0xff]  }
 0x407   :  { %7729 = vmatpush1.bf16.msra.mxu1 %v9570_v40  ;;  %7760 = vmatprep.mubr.bf16.mxu1 %v10086_v49  ;;  %v9591_v49 = vld [vmem:[#allocation8 + $0xc68] ss:$16 sps:$4 sm:$0xff]   ;;  %v9662_v40 = vld [vmem:[#allocation8 + $0xf0c] ss:$16 sps:$4 sm:$0xff]  }
 0x408   :  { %7730 = vmatprep.subr.bf16.mxu1 %v9578_v28  ;;  %v9657_v29 = vld [vmem:[#allocation8 + $0xd08] ss:$16 sps:$4 sm:$0xff]  }
 0x409   :  { %7688 = vmatpush1.bf16.msra.mxu0 %v9573_v1  ;;  %v9660_v28 = vld [vmem:[#allocation8 + $0xf08] ss:$16 sps:$4 sm:$0xff]   ;;  %v7117_v1 = vpop.f32.mrf.mxu0 }
 0x40a   :  { %7689 = vmatprep.subr.bf16.mxu0 %v9581_v21 }
 0x40b   :  { %7731 = vmatpush1.bf16.msra.mxu1 %v9576_v4  ;;  %v7160_v4 = vpop.f32.mrf.mxu1  ;;  %v7119_v21 = vpop.f32.mrf.mxu0 }
 0x40c   :  { %7732 = vmatprep.subr.bf16.mxu1 %v9584_v27 }
 0x40d   :  { %7690 = vmatpush1.bf16.msra.mxu0 %v9579_v20  ;;  %v7162_v27 = vpop.f32.mrf.mxu1  ;;  %v7121_v20 = vpop.f32.mrf.mxu0 }
 0x40e   :  { %7691 = vmatprep.subr.bf16.mxu0 %v9587_v18 }
 0x40f   :  { %7733 = vmatpush1.bf16.msra.mxu1 %v9582_v17  ;;  %v7164_v17 = vpop.f32.mrf.mxu1  ;;  %v7123_v18 = vpop.f32.mrf.mxu0 }
 0x410   :  { %7734 = vmatprep.subr.bf16.mxu1 %v9590_v10 }
 0x411   :  { %7692 = vmatpush1.bf16.msra.mxu0 %v9585_v15  ;;  %v7166_v10 = vpop.f32.mrf.mxu1  ;;  %v7203_v15 = vpop.f32.mrf.mxu0 }
 0x412   :  { %7693 = vmatprep.subr.bf16.mxu0 %v9593_v8 }
 0x413   :  { %7735 = vmatpush1.bf16.msra.mxu1 %v9588_v14  ;;  %v7246_v14 = vpop.f32.mrf.mxu1  ;;  %v7205_v8 = vpop.f32.mrf.mxu0 }
 0x414   :  { %7736 = vmatprep.subr.bf16.mxu1 %v9596_v12 }
 0x415   :  { %7694 = vmatpush1.bf16.msra.mxu0 %v9591_v49  ;;  %v7248_v12 = vpop.f32.mrf.mxu1  ;;  %v7207_v49 = vpop.f32.mrf.mxu0 }
 0x416   :  { %7695 = vmatprep.subr.bf16.mxu0 %v9599_v13 }
 0x417   :  { %7737 = vmatpush1.bf16.msra.mxu1 %v9594_v7  ;;  %v10115_v7 = vpop.f32.mrf.mxu1  ;;  %v7209_v13 = vpop.f32.mrf.mxu0 }
 0x418   :  { %7738 = vmatprep.subr.bf16.mxu1 %v9602_v6 }
 0x419   :  { %7696 = vmatpush1.bf16.msra.mxu0 %v9597_v35  ;;  %v7252_v6 = vpop.f32.mrf.mxu1 }
 0x41a   :  { %7697 = vmatprep.subr.bf16.mxu0 %v9605_v19 }
 0x41b   :  { %7739 = vmatpush1.bf16.msra.mxu1 %v9600_v43  ;;  %v10117_v35 = vpop.f32.mrf.mxu1 }
 0x41c   :  { %7740 = vmatprep.subr.bf16.mxu1 %v9608_v22 }
 0x41d   :  { %7698 = vmatpush1.bf16.msra.mxu0 %v9603_v3  ;;  %v7334_v43 = vpop.f32.mrf.mxu1 }
 0x41e   :  { %7699 = vmatprep.subr.bf16.mxu0 %v9611_v25 }
 0x41f   :  { %7741 = vmatpush1.bf16.msra.mxu1 %v9606_v5  ;;  %v10121_v22 = vpop.f32.mrf.mxu1 }
 0x420   :  { %7742 = vmatprep.subr.bf16.mxu1 %v9614_v24 }
 0x421   :  { %7700 = vmatpush1.bf16.msra.mxu0 %v9609_v46  ;;  %v10123_v5 = vpop.f32.mrf.mxu1 }
 0x422   :  { %7701 = vmatprep.subr.bf16.mxu0 %v9617_v26 }
 0x423   :  { %7743 = vmatpush1.bf16.msra.mxu1 %v9612_v31  ;;  %v10127_v24 = vpop.f32.mrf.mxu1 }
 0x424   :  { %7744 = vmatprep.subr.bf16.mxu1 %v9620_v32 }
 0x425   :  { %7702 = vmatpush2.bf16.msra.mxu0 %v9615_v63  ;;  %v10129_v31 = vpop.f32.mrf.mxu1 }
 0x426   :  { %7703 = vmatprep.subr.bf16.mxu0 %v9623_v33 }
 0x427   :  { %7745 = vmatpush2.bf16.msra.mxu1 %v9618_v39  ;;  %v10133_v32 = vpop.f32.mrf.mxu1 }
 0x428   :  { %7746 = vmatprep.subr.bf16.mxu1 %v9626_v38  ;;  %10168 = vst [vmem:[#allocation17_spill] sm:$0xff] %v10133_v32 }
 0x429   :  { %7704 = vmatpush2.bf16.msra.mxu0 %v9621_v42  ;;  %v10137_v39 = vpop.f32.mrf.mxu1 }
 0x42a   :  { %7705 = vmatprep.subr.bf16.mxu0 %v9629_v50  ;;  %10169 = vst [vmem:[#allocation18_spill] sm:$0xff] %v10137_v39 }
 0x42b   :  { %7747 = vmatpush2.bf16.msra.mxu1 %v9624_v61 }
 0x42c   :  { %7748 = vmatprep.subr.bf16.mxu1 %v9632_v41 }
 0x42d   :  { %7706 = vmatpush2.bf16.msra.mxu0 %v9627_v45  ;;  %v4501_v45 = vld [vmem:[#allocation10] sm:$0xf] }
 0x42e   :  { %7707 = vmatprep.subr.bf16.mxu0 %v9635_v2 }
 0x42f   :  { %7749 = vmatpush2.bf16.msra.mxu1 %v9630_v51  ;;  %v4510_v51 = vrot.slane %v4501_v45, %v9965_v58  ;;  %v4518_v58 = vrot.slane %v4501_v45, %v9968_v37 }
 0x430   :  { %7750 = vmatprep.subr.bf16.mxu1 %v9638_v36 }
 0x431   :  { %7708 = vmatpush2.bf16.msra.mxu0 %v9633_v54  ;;  %v4506_v54 = vrot.slane %v4501_v45, %v9893_v44 }
 0x432   :  { %7709 = vmatprep.subr.bf16.mxu0 %v9641_v55 }
 0x433   :  { %7751 = vmatpush2.bf16.msra.mxu1 %v9636_v11 }
 0x434   :  { %7752 = vmatprep.subr.bf16.mxu1 %v9644_v53  ;;  %v7120_v53 = vadd.f32 %v7119_v21, %v4510_v51 }
 0x435   :  { %7710 = vmatpush2.bf16.msra.mxu0 %v9639_v56  ;;  %v7118_v56 = vadd.f32 %v7117_v1, %v4506_v54 }
 0x436   :  { %7711 = vmatprep.subr.bf16.mxu0 %v9647_v23 }
 0x437   :  { %7753 = vmatpush2.bf16.msra.mxu1 %v9642_v47 }
 0x438   :  { %7754 = vmatprep.subr.bf16.mxu1 %v9650_v57  ;;  %v7163_v57 = vadd.f32 %v7162_v27, %v7120_v53 }
 0x439   :  { %7712 = vmatpush2.bf16.msra.mxu0 %v9645_v59  ;;  %v7124_v59 = vadd.f32 %v7123_v18, %v4510_v51 }
 0x43a   :  { %7713 = vmatprep.subr.bf16.mxu0 %v9653_v0  ;;  %v7161_v0 = vadd.f32 %v7160_v4, %v7118_v56 }
 0x43b   :  { %7755 = vmatpush2.bf16.msra.mxu1 %v9648_v62  ;;  %v4514_v62 = vrot.slane %v4501_v45, %v9908_v16 }
 0x43c   :  { %7756 = vmatprep.subr.bf16.mxu1 %v9656_v60  ;;  %v7122_v60 = vadd.f32 %v7121_v20, %v4506_v54 }
 0x43d   :  { %7714 = vmatpush2.bf16.msra.mxu0 %v9651_v52  ;;  %v7206_v52 = vadd.f32 %v7205_v8, %v7163_v57 }
 0x43e   :  { %7715 = vmatprep.subr.bf16.mxu0 %v9659_v34 }
 0x43f   :  { %7757 = vmatpush2.bf16.msra.mxu1 %v9654_v9  ;;  %v7249_v32 = vadd.f32 %v7248_v12, %v7206_v52 }
 0x440   :  { %7758 = vmatprep.subr.bf16.mxu1 %v9662_v40  ;;  %v7167_v40 = vadd.f32 %v7166_v10, %v7124_v59  ;;  %v9670_v59 = vld [vmem:[#allocation2 + $0x8] sm:$0xff] }
 0x441   :  { %7716 = vmatpush2.bf16.msra.mxu0 %v9657_v29  ;;  %v7204_v29 = vadd.f32 %v7203_v15, %v7161_v0  ;;  %v10171_v0 = vld [vmem:[#allocation18_spill] sm:$0xff] }
 0x442   :  { %v7210_v21 = vadd.f32 %v7209_v13, %v7167_v40  ;;  %v10172_v40 = vld [vmem:[#allocation17_spill] sm:$0xff] }
 0x443   :  { %7759 = vmatpush2.bf16.msra.mxu1 %v9660_v28  ;;  %v7165_v28 = vadd.f32 %v7164_v17, %v7122_v60  ;;  %v7247_v27 = vadd.f32 %v7246_v14, %v7204_v29 }
 0x444   :  { %7718 = vmatmul.mubr.bf16.vlgmr.msra.gmra.mxu0 %v10063_v30  ;;  %v7289_v30 = vpop.f32.mrf.mxu0  ;;  %v7253_v54 = vadd.f32 %v7252_v6, %v7210_v21 }
 0x445   :  { %v7208_v18 = vadd.f32 %v7207_v49, %v7165_v28  ;;  %v7290_v53 = vadd.f32 %v7289_v30, %v7247_v27 }
 0x446   :  { %7761 = vmatmul.mubr.bf16.vlgmr.msra.gmra.mxu1 %v10095_v48  ;;  %v7291_v48 = vpop.f32.mrf.mxu0  ;;  %v7504_v38 = vpop.f32.mrf.mxu1 }
 0x447   :  { %v7292_v51 = vadd.f32 %v7291_v48, %v7249_v32  ;;  %v7251_v15 = vadd.f32 %v10115_v7, %v7208_v18  ;;  %v7333_v14 = vadd.f32 %v10117_v35, %v7290_v53 }
 0x448   :  { %v10119_v19 = vpop.f32.mrf.mxu0  ;;  %v7506_v61 = vpop.f32.mrf.mxu1 }
 0x449   :  { %v7335_v17 = vadd.f32 %v7334_v43, %v7292_v51  ;;  %v7294_v49 = vadd.f32 %v10119_v19, %v7251_v15 }
 0x44a   :  { %v7295_v3 = vpop.f32.mrf.mxu0  ;;  %v7508_v41 = vpop.f32.mrf.mxu1 }
 0x44b   :  { %v7296_v12 = vadd.f32 %v7295_v3, %v7253_v54 }
 0x44c   :  { %v10125_v25 = vpop.f32.mrf.mxu0  ;;  %v7510_v36 = vpop.f32.mrf.mxu1 }
 0x44d   :  { %v7339_v30 = vadd.f32 %v10123_v5, %v7296_v12  ;;  %v9675_v12 = vld [vmem:[#allocation2 + $0x18] sm:$0xff] }
 0x44e   :  { %v7377_v46 = vpop.f32.mrf.mxu0 }
 0x44f   :  { %v7378_v48 = vadd.f32 %v7377_v46, %v7335_v17 }
 0x450   :  { %v10131_v26 = vpop.f32.mrf.mxu0 }
 0x451   :  { %10167 = vst [vmem:[#allocation16_spill] sm:$0xff] %v10131_v26 }
 0x452   :  { %v10135_v63 = vpop.f32.mrf.mxu0 }
 0x453   :  { %v7382_v35 = vadd.f32 %v10135_v63, %v7339_v30 }
 0x454   :  { %v7461_v33 = vpop.f32.mrf.mxu0 }
 0x455   :  { %v7462_v44 = vadd.f32 %v7461_v33, %v4514_v62  ;;  %v7425_v60 = vadd.f32 %v10171_v0, %v7382_v35 }
 0x456   :  { %v7463_v42 = vpop.f32.mrf.mxu0 }
 0x457   :  { %v7464_v39 = vadd.f32 %v7463_v42, %v4518_v58  ;;  %v7505_v4 = vadd.f32 %v7504_v38, %v7462_v44 }
 0x458   :  { %v7465_v50 = vpop.f32.mrf.mxu0 }
 0x459   :  { %v7466_v20 = vadd.f32 %v7465_v50, %v4514_v62  ;;  %v7507_v37 = vadd.f32 %v7506_v61, %v7464_v39  ;;  %v7376_v39 = vadd.f32 %v10125_v25, %v7333_v14  ;;  %v9676_v14 = vld [vmem:[#allocation2 + $0x30] sm:$0xff] }
 0x45a   :  { %v7467_v2 = vpop.f32.mrf.mxu0 }
 0x45b   :  { %v7468_v45 = vadd.f32 %v7467_v2, %v4518_v58  ;;  %v7509_v33 = vadd.f32 %v7508_v41, %v7466_v20  ;;  %v7337_v41 = vadd.f32 %v10121_v22, %v7294_v49  ;;  %v7421_v2 = vadd.f32 %v10129_v31, %v7378_v48  ;;  %v9671_v58 = vld [vmem:[#allocation2] sm:$0xff] }
 0x45d   :  { %v7511_v32 = vadd.f32 %v7510_v36, %v7468_v45  ;;  %v7419_v36 = vadd.f32 %v10127_v24, %v7376_v39  ;;  %v7772_v62 = vadd.f32 %v9670_v59, %v7421_v2 }
 0x484   :  { %v7547_v11 = vpop.f32.mrf.mxu0 }
 0x485   :  { %v7548_v10 = vadd.f32 %v7547_v11, %v7505_v4  ;;  %v10170_v11 = vld [vmem:[#allocation16_spill] sm:$0xff] }
 0x486   :  { %v7590_v55 = vpop.f32.mrf.mxu1  ;;  %v7549_v47 = vpop.f32.mrf.mxu0  ;;  %v9673_v4 = vld [vmem:[#allocation2 + $0x10] sm:$0xff] }
 0x487   :  { %v7550_v42 = vadd.f32 %v7549_v47, %v7507_v37  ;;  %v7591_v38 = vadd.f32 %v7590_v55, %v7548_v10  ;;  %v7380_v55 = vadd.f32 %v10170_v11, %v7337_v41  ;;  %v9674_v37 = vld [vmem:[#allocation2 + $0x20] sm:$0xff] }
 0x488   :  { %v7592_v23 = vpop.f32.mrf.mxu1  ;;  %v7551_v9 = vpop.f32.mrf.mxu0 }
 0x489   :  { %v7552_v6 = vadd.f32 %v7551_v9, %v7509_v33  ;;  %v7593_v7 = vadd.f32 %v7592_v23, %v7550_v42  ;;  %v7423_v24 = vadd.f32 %v10172_v40, %v7380_v55 }
 0x48a   :  { %v7594_v34 = vpop.f32.mrf.mxu1  ;;  %v7553_v1 = vpop.f32.mrf.mxu0 }
 0x48b   :  { %v7554_v43 = vadd.f32 %v7553_v1, %v7511_v32  ;;  %v7595_v19 = vadd.f32 %v7594_v34, %v7552_v6  ;;  %v7771_v34 = vadd.f32 %v9671_v58, %v7419_v36  ;;  %v9672_v1 = vld [vmem:[#allocation2 + $0x28] sm:$0xff]  ;;  %v7775_v45 = vadd.f32 %v9674_v37, %v7423_v24 }
 0x48c   :  { %v7596_v26 = vpop.f32.mrf.mxu1  ;;  %v7776_v27 = vadd.f32 %v9672_v1, %v7425_v60 }
 0x48d   :  { %v7597_v47 = vadd.f32 %v7596_v26, %v7554_v43  ;;  %v7779_v51 = vadd.f32 %v7772_v62, %v7771_v34 }
 0x4c4   :  { %v7633_v16 = vpop.f32.mrf.mxu0 }
 0x4c5   :  { %v7634_v3 = vadd.f32 %v7633_v16, %v7591_v38  ;;  %v9677_v38 = vld [vmem:[#allocation2 + $0x38] sm:$0xff] }
 0x4c6   :  { %v7676_v8 = vpop.f32.mrf.mxu1  ;;  %v7635_v13 = vpop.f32.mrf.mxu0 }
 0x4c7   :  { %v7636_v46 = vadd.f32 %v7635_v13, %v7593_v7  ;;  %v7677_v25 = vadd.f32 %v7676_v8, %v7634_v3 }
 0x4c8   :  { %v7678_v56 = vpop.f32.mrf.mxu1  ;;  %v7637_v61 = vpop.f32.mrf.mxu0 }
 0x4c9   :  { %v7638_v57 = vadd.f32 %v7637_v61, %v7595_v19  ;;  %v7679_v52 = vadd.f32 %v7678_v56, %v7636_v46  ;;  %v7784_v56 = vadd.f32 %v7776_v27, %v7775_v45 }
 0x4ca   :  { %v7680_v50 = vpop.f32.mrf.mxu1  ;;  %v7639_v5 = vpop.f32.mrf.mxu0 }
 0x4cb   :  { %v7640_v31 = vadd.f32 %v7639_v5, %v7597_v47  ;;  %v7681_v44 = vadd.f32 %v7680_v50, %v7638_v57 }
 0x4cc   :  { %v7682_v23 = vpop.f32.mrf.mxu1 }
 0x4cd   :  { %v7683_v16 = vadd.f32 %v7682_v23, %v7640_v31 }
 0x504   :  { %v7719_v22 = vpop.f32.mrf.mxu0 }
 0x505   :  { %v7720_v9 = vadd.f32 %v7719_v22, %v7677_v25 }
 0x506   :  { %v7762_v63 = vpop.f32.mrf.mxu1  ;;  %v7721_v29 = vpop.f32.mrf.mxu0 }
 0x507   :  { %v7763_v28 = vadd.f32 %v7762_v63, %v7720_v9  ;;  %v7722_v26 = vadd.f32 %v7721_v29, %v7679_v52 }
 0x508   :  { %v7764_v21 = vpop.f32.mrf.mxu1  ;;  %v7723_v18 = vpop.f32.mrf.mxu0 }
 0x509   :  { %v7773_v20 = vadd.f32 %v9673_v4, %v7763_v28  ;;  %v7765_v8 = vadd.f32 %v7764_v21, %v7722_v26  ;;  %v7724_v54 = vadd.f32 %v7723_v18, %v7681_v44 }
 0x50a   :  { %v7766_v53 = vpop.f32.mrf.mxu1  ;;  %v7725_v10 = vpop.f32.mrf.mxu0 }
 0x50b   :  { %v7767_v15 = vadd.f32 %v7766_v53, %v7724_v54  ;;  %v7726_v17 = vadd.f32 %v7725_v10, %v7683_v16  ;;  %v7774_v13 = vadd.f32 %v9675_v12, %v7765_v8  ;;  %v7780_v33 = vadd.f32 %v7779_v51, %v7773_v20 }
 0x50c   :  { %v7768_v42 = vpop.f32.mrf.mxu1 }
 0x50d   :  { %v7777_v49 = vadd.f32 %v9676_v14, %v7767_v15  ;;  %v7769_v48 = vadd.f32 %v7768_v42, %v7726_v17  ;;  %v7781_v32 = vadd.f32 %v7780_v33, %v7774_v13 }
 0x50f   :  { %v7778_v6 = vadd.f32 %v9677_v38, %v7769_v48  ;;  %7782 = vadd.xlane.f32.xlu0 %v7781_v32  ;;  %v7785_v30 = vadd.f32 %v7784_v56, %v7777_v49 }
 0x511   :  { %v7786_v39 = vadd.f32 %v7785_v30, %v7778_v6 }
 0x513   :  { %7787 = vadd.xlane.f32.xlu0 %v7786_v39 }
 0x598   :  { %v7783_v61 = vpop.xlane.xlu0 %7782 }
 0x599   :  { %v7790_v7 = vmul.f32 0.001953125, %v7783_v61 }
 0x59b   :  { %v7792_v43 = vsub.f32 %v7771_v34, %v7790_v7  ;;  %v7793_v3 = vsub.f32 %v7772_v62, %v7790_v7  ;;  %v7794_v50 = vsub.f32 %v7773_v20, %v7790_v7  ;;  %v7795_v2 = vsub.f32 %v7774_v13, %v7790_v7 }
 0x59c   :  { %v7788_v41 = vpop.xlane.xlu0 %7787 }
 0x59d   :  { %v7791_v35 = vmul.f32 0.001953125, %v7788_v41  ;;  %v7800_v19 = vmul.f32 %v7792_v43, %v7792_v43  ;;  %v7801_v46 = vmul.f32 %v7793_v3, %v7793_v3  ;;  %v7802_v36 = vmul.f32 %v7794_v50, %v7794_v50 }
 0x59e   :  { %v7803_v25 = vmul.f32 %v7795_v2, %v7795_v2 }
 0x59f   :  { %v7796_v11 = vsub.f32 %v7775_v45, %v7791_v35  ;;  %v7797_v55 = vsub.f32 %v7776_v27, %v7791_v35  ;;  %v7808_v5 = vadd.f32 %v7801_v46, %v7800_v19  ;;  %v7798_v47 = vsub.f32 %v7777_v49, %v7791_v35 }
 0x5a0   :  { %v7799_v23 = vsub.f32 %v7778_v6, %v7791_v35 }
 0x5a1   :  { %v7809_v57 = vadd.f32 %v7808_v5, %v7802_v36  ;;  %v7804_v59 = vmul.f32 %v7796_v11, %v7796_v11  ;;  %v7805_v0 = vmul.f32 %v7797_v55, %v7797_v55  ;;  %v7806_v22 = vmul.f32 %v7798_v47, %v7798_v47 }
 0x5a2   :  { %v7807_v62 = vmul.f32 %v7799_v23, %v7799_v23 }
 0x5a3   :  { %v7810_v60 = vadd.f32 %v7809_v57, %v7803_v25  ;;  %v7813_v52 = vadd.f32 %v7805_v0, %v7804_v59 }
 0x5a5   :  { %7811 = vadd.xlane.f32.xlu1 %v7810_v60  ;;  %v7814_v31 = vadd.f32 %v7813_v52, %v7806_v22 }
 0x5a7   :  { %v7815_v9 = vadd.f32 %v7814_v31, %v7807_v62 }
 0x5a9   :  { %7816 = vadd.xlane.f32.xlu1 %v7815_v9 }
 0x62e   :  { %v7812_v63 = vpop.xlane.xlu1 %7811 }
 0x62f   :  { %v7818_v58 = vmul.f32 0.001953125, %v7812_v63 }
 0x631   :  { %v7820_v34 = vadd.f32 1e-05, %v7818_v58 }
 0x632   :  { %v7817_v40 = vpop.xlane.xlu1 %7816 }
 0x633   :  { %9663 = vrsqrt.f32 %v7820_v34  ;;  %v7819_v24 = vmul.f32 0.001953125, %v7817_v40 }
 0x635   :  { %v7821_v29 = vadd.f32 1e-05, %v7819_v24 }
 0x637   :  { %9665 = vrsqrt.f32 %v7821_v29 }
 0x640   :  { %v9664_v44 = vpop.eup %9663 }
 0x641   :  { %v7824_v28 = vmul.f32 %v9664_v44, %v7792_v43  ;;  %v7825_v26 = vmul.f32 %v9664_v44, %v7793_v3  ;;  %v7826_v21 = vmul.f32 %v9664_v44, %v7794_v50  ;;  %v7827_v1 = vmul.f32 %v9664_v44, %v7795_v2 }
 0x643   :  { %7832 = vst [vmem:[#allocation11] sm:$0xff] %v7824_v28  ;;  %7833 = vst [vmem:[#allocation11 + $0x8] sm:$0xff] %v7825_v26 }
 0x644   :  { %7834 = vst [vmem:[#allocation11 + $0x10] sm:$0xff] %v7826_v21  ;;  %7835 = vst [vmem:[#allocation11 + $0x18] sm:$0xff] %v7827_v1  ;;  %v9666_v27 = vpop.eup %9665 }
 0x645   :  { %v7828_v18 = vmul.f32 %v9666_v27, %v7796_v11  ;;  %v7829_v51 = vmul.f32 %v9666_v27, %v7797_v55  ;;  %v7830_v16 = vmul.f32 %v9666_v27, %v7798_v47  ;;  %v7831_v4 = vmul.f32 %v9666_v27, %v7799_v23 }
 0x647   :  { %7836 = vst [vmem:[#allocation11 + $0x20] sm:$0xff] %v7828_v18  ;;  %7837 = vst [vmem:[#allocation11 + $0x28] sm:$0xff] %v7829_v51 }
 0x648   :  { %7838 = vst [vmem:[#allocation11 + $0x30] sm:$0xff] %v7830_v16  ;;  %7839 = vst [vmem:[#allocation11 + $0x38] sm:$0xff] %v7831_v4 }
 0x649   :  { %9789 = shalt.err (!%p9786_p1)
}
 0x64a   :  { %7851 = dma.vmem_to_hbm [thread:$0]  %s7846_s4, 1024, %s10166_s5, [#allocation4], %s9813_s9, %s9813_s9, %s9814_s10  }
 0x64b   :  { %9804 = dma.done.wait [#allocation4], 1024  }
 0x64c   :  { %9805 = vsyncadd [#allocation4], 4294966272 }
 0x64d   :  { %7855 = vsyncpa [#allocation3], 1 }
 0x64e   :  { %7856 = vsyncpa [#allocation6], 1 }
 0x64f   :  { %7857 = vsyncpa [#allocation9], 1 }
 0x650   :  { %7858 = vsyncpa [#allocation4], 1 }

// kernel: tpu_custom_call.1
= control target key start
LH: loop header
LB: loop body
LE: loop exit
PB: predicated region body
PF: predicated region fallthrough
CT: control target
= control target key end

     0   :  { %10 = vsyncpa [#allocation3], 0  ;;  %s10161_s0 = inlined_call_operand.hbm [shape: f32[16,512], index: 0, kind: input, shape index: {}]   ;;  %s10162_s1 = inlined_call_operand.hbm [shape: bf16[512,2048], index: 1, kind: input, shape index: {}]   ;;  %s10163_s2 = inlined_call_operand.hbm [shape: f32[1,2048], index: 2, kind: input, shape index: {}]   ;;  %s10164_s3 = inlined_call_operand.hbm [shape: bf16[2048,512], index: 3, kind: input, shape index: {}]   ;;  %s10165_s4 = inlined_call_operand.hbm [shape: f32[1,512], index: 4, kind: input, shape index: {}]   ;;  %s10166_s5 = inlined_call_operand.hbm [shape: f32[16,512], index: 5, kind: output, shape index: {}]  }
   0x1   :  { %11 = vsyncpa [#allocation6], 0 }
   0x2   :  { %12 = vsyncpa [#allocation9], 0 }
   0x3   :  { %13 = vsyncpa [#allocation4], 0  ;;  %s9806_s18 = smov [#allocation5]  }
   0x4   :  { %s31_s19 = sshll.u32 %s9806_s18, 4  ;;  %s32_s19 = int_to_ptr.vmem [resolvable:$true] %s31_s19 }
   0x5   :  { %s9686_s20 = scalar_lea.vmem %s32_s19, 65536  ;;  %p9691_p1 = scmp.lt.s32.totalorder %s32_s19, %s32_s19 }
   0x6   :  { %p9687_p0 = scmp.ne.s32.totalorder %s32_s19, %s9686_s20  ;;  %p9692_p2 = scmp.lt.s32.totalorder %s9686_s20, %s9686_s20 }
   0x8   :  { %p9693_p3 = por %p9692_p2, %p9691_p1 }
   0xa   :  { %p9694_p4 = pnand %p9693_p3, %p9687_p0 }
   0xc   :  { %9697 = shalt.err (!%p9694_p4)
}
   0xd   :  { %s9807_s21 = smov 1024   ;;  %s9808_s22 = smov 64  }
   0xe   :  { %37 = dma.hbm_to_vmem [thread:$0]  %s10162_s1, 65536, %s32_s19, [#allocation6], %s9807_s21, %s9807_s21, %s9808_s22  }
   0xf   :  { %s9809_s25 = smov [#allocation8]  }
  0x10   :  { %s53_s26 = sshll.u32 %s9809_s25, 4  ;;  %s54_s26 = int_to_ptr.vmem [resolvable:$true] %s53_s26 }
  0x11   :  { %s9706_s27 = scalar_lea.vmem %s54_s26, 65536  ;;  %p9711_p6 = scmp.lt.s32.totalorder %s54_s26, %s54_s26 }
  0x12   :  { %p9707_p5 = scmp.ne.s32.totalorder %s54_s26, %s9706_s27  ;;  %p9712_p7 = scmp.lt.s32.totalorder %s9706_s27, %s9706_s27 }
  0x14   :  { %p9713_p8 = por %p9712_p7, %p9711_p6 }
  0x16   :  { %p9714_p9 = pnand %p9713_p8, %p9707_p5 }
  0x18   :  { %9717 = shalt.err (!%p9714_p9)
}
  0x19   :  { %s9810_s28 = smov 256   ;;  %s9811_s29 = smov 16  }
  0x1a   :  { %59 = dma.hbm_to_vmem [thread:$0]  %s10164_s3, 65536, %s54_s26, [#allocation9], %s9810_s28, %s9810_s28, %s9811_s29  }
  0x1b   :  { %s9812_s7 = smov [#allocation2]  }
  0x1c   :  { %s19_s8 = sshll.u32 %s9812_s7, 4  ;;  %s20_s8 = int_to_ptr.vmem [resolvable:$true] %s19_s8 }
  0x1d   :  { %s9726_s1 = scalar_lea.vmem %s20_s8, 1024  ;;  %p9731_p11 = scmp.lt.s32.totalorder %s20_s8, %s20_s8 }
  0x1e   :  { %p9727_p10 = scmp.ne.s32.totalorder %s20_s8, %s9726_s1  ;;  %p9732_p12 = scmp.lt.s32.totalorder %s9726_s1, %s9726_s1 }
  0x20   :  { %p9733_p13 = por %p9732_p12, %p9731_p11 }
  0x22   :  { %p9734_p0 = pnand %p9733_p13, %p9727_p10 }
  0x24   :  { %9737 = shalt.err (!%p9734_p0)
}
  0x25   :  { %s9813_s9 = smov 512   ;;  %s9814_s10 = smov 32  }
  0x26   :  { %25 = dma.hbm_to_vmem [thread:$0]  %s10161_s0, 1024, %s20_s8, [#allocation3], %s9813_s9, %s9813_s9, %s9814_s10  }
  0x27   :  { %s9815_s3 = smov [#allocation7]   ;;  %s9816_s14 = smov [#allocation10]  }
  0x28   :  { %s44_s13 = sshll.u32 %s9815_s3, 4  ;;  %s66_s15 = sshll.u32 %s9816_s14, 4  ;;  %s45_s13 = int_to_ptr.vmem [resolvable:$true] %s44_s13  ;;  %s67_s15 = int_to_ptr.vmem [resolvable:$true] %s66_s15 }
  0x29   :  { %s9746_s16 = scalar_lea.vmem %s45_s13, 256  ;;  %p9751_p2 = scmp.lt.s32.totalorder %s45_s13, %s45_s13 }
  0x2a   :  { %p9747_p1 = scmp.ne.s32.totalorder %s45_s13, %s9746_s16  ;;  %p9752_p3 = scmp.lt.s32.totalorder %s9746_s16, %s9746_s16 }
  0x2c   :  { %p9753_p4 = por %p9752_p3, %p9751_p2 }
  0x2e   :  { %p9754_p5 = pnand %p9753_p4, %p9747_p1 }
  0x30   :  { %9757 = shalt.err (!%p9754_p5)
}
  0x31   :  { %47 = dma.hbm_to_vmem [thread:$0]  %s10163_s2, 256, %s45_s13, [#allocation6]  }
  0x32   :  { %s9766_s19 = scalar_lea.vmem %s67_s15, 64  ;;  %p9771_p7 = scmp.lt.s32.totalorder %s67_s15, %s67_s15 }
  0x33   :  { %p9767_p6 = scmp.ne.s32.totalorder %s67_s15, %s9766_s19  ;;  %p9772_p8 = scmp.lt.s32.totalorder %s9766_s19, %s9766_s19 }
  0x35   :  { %p9773_p9 = por %p9772_p8, %p9771_p7 }
  0x37   :  { %p9774_p10 = pnand %p9773_p9, %p9767_p6 }
  0x39   :  { %9777 = shalt.err (!%p9774_p10)
}
  0x3a   :  { %69 = dma.hbm_to_vmem [thread:$0]  %s10165_s4, 64, %s67_s15, [#allocation9]  }
  0x3b   :  { %9798 = dma.done.wait [#allocation3], 1024  }
  0x3c   :  { %9799 = vsyncadd [#allocation3], 4294966272 }
  0x3d   :  { %9800 = dma.done.wait [#allocation6], 65792  }
  0x3e   :  { %9801 = vsyncadd [#allocation6], 4294901504 }
  0x3f   :  { %9802 = dma.done.wait [#allocation9], 65600  }
  0x40   :  { %9803 = vsyncadd [#allocation9], 4294901696  ;;  %v209_v0 = vld [vmem:[#allocation5 + $0x380] sm:$0xff]  ;;  %v86_v54 = vld [vmem:[#allocation2 + $0x8] sm:$0xff]  ;;  %s9817_s2 = smov [#allocation11]  }
  0x41   :  { %v217_v1 = vld [vmem:[#allocation5 + $0x3c0] sm:$0xff]  ;;  %v90_v55 = vld [vmem:[#allocation2 + $0x28] sm:$0xff]  ;;  %v88_v59 = vld [vmem:[#allocation2 + $0x18] sm:$0xff]  ;;  %s7845_s4 = sshll.u32 %s9817_s2, 4  ;;  %s7846_s4 = int_to_ptr.vmem [resolvable:$true] %s7845_s4 }
  0x42   :  { %v465_v2 = vld [vmem:[#allocation5 + $0xb80] sm:$0xff]  ;;  %v7972_v3 = vcombine.high %v209_v0, %v217_v1  ;;  %v7971_v5 = vcombine.low %v209_v0, %v217_v1  ;;  %v9866_v58 = vpack.c.bf16 %v90_v55, %v86_v54  ;;  %v92_v60 = vld [vmem:[#allocation2 + $0x38] sm:$0xff]  ;;  %s9778_s21 = scalar_lea.vmem %s7846_s4, 1024  ;;  %p9783_p12 = scmp.lt.s32.totalorder %s7846_s4, %s7846_s4 }
  0x43   :  { %v473_v4 = vld [vmem:[#allocation5 + $0xbc0] sm:$0xff]  ;;  %v9868_v63 = vpack.c.bf16 %v92_v60, %v88_v59  ;;  %p9779_p11 = scmp.ne.s32.totalorder %s7846_s4, %s9778_s21  ;;  %p9784_p13 = scmp.lt.s32.totalorder %s9778_s21, %s9778_s21 }
  0x44   :  { %v193_v6 = vld [vmem:[#allocation5 + $0x300] sm:$0xff]  ;;  %v8228_v8 = vcombine.high %v465_v2, %v473_v4  ;;  %v8227_v9 = vcombine.low %v465_v2, %v473_v4  ;;  %3253 = vmatprep.subr.bf16.mxu0 %v7972_v3  ;;  %3285 = vmatprep.mubr.bf16.mxu0 %v9866_v58 }
  0x45   :  { %v201_v7 = vld [vmem:[#allocation5 + $0x340] sm:$0xff]  ;;  %3254 = vmatpush1.bf16.msra.mxu0 %v7971_v5  ;;  %3328 = vmatprep.mubr.bf16.mxu1 %v9868_v63  ;;  %p9785_p0 = por %p9784_p13, %p9783_p12 }
  0x46   :  { %v7956_v10 = vcombine.high %v193_v6, %v201_v7  ;;  %v449_v11 = vld [vmem:[#allocation5 + $0xb00] sm:$0xff]  ;;  %3296 = vmatprep.subr.bf16.mxu1 %v8228_v8  ;;  %v7955_v18 = vcombine.low %v193_v6, %v201_v7 }
  0x47   :  { %v457_v12 = vld [vmem:[#allocation5 + $0xb40] sm:$0xff]  ;;  %3297 = vmatpush1.bf16.msra.mxu1 %v8227_v9  ;;  %p9786_p1 = pnand %p9785_p0, %p9779_p11 }
  0x48   :  { %v177_v13 = vld [vmem:[#allocation5 + $0x280] sm:$0xff]  ;;  %v8212_v14 = vcombine.high %v449_v11, %v457_v12  ;;  %3255 = vmatprep.subr.bf16.mxu0 %v7956_v10  ;;  %v8211_v19 = vcombine.low %v449_v11, %v457_v12 }
  0x49   :  { %v185_v15 = vld [vmem:[#allocation5 + $0x2c0] sm:$0xff]  ;;  %3256 = vmatpush1.bf16.msra.mxu0 %v7955_v18 }
  0x4a   :  { %v433_v16 = vld [vmem:[#allocation5 + $0xa80] sm:$0xff]  ;;  %v7940_v20 = vcombine.high %v177_v13, %v185_v15  ;;  %3298 = vmatprep.subr.bf16.mxu1 %v8212_v14  ;;  %v7939_v26 = vcombine.low %v177_v13, %v185_v15 }
  0x4b   :  { %v441_v17 = vld [vmem:[#allocation5 + $0xac0] sm:$0xff]  ;;  %3299 = vmatpush1.bf16.msra.mxu1 %v8211_v19 }
  0x4c   :  { %v8196_v21 = vcombine.high %v433_v16, %v441_v17  ;;  %v161_v22 = vld [vmem:[#allocation5 + $0x200] sm:$0xff]  ;;  %3257 = vmatprep.subr.bf16.mxu0 %v7940_v20  ;;  %v8195_v27 = vcombine.low %v433_v16, %v441_v17 }
  0x4d   :  { %v169_v23 = vld [vmem:[#allocation5 + $0x240] sm:$0xff]  ;;  %3258 = vmatpush1.bf16.msra.mxu0 %v7939_v26 }
  0x4e   :  { %v417_v24 = vld [vmem:[#allocation5 + $0xa00] sm:$0xff]  ;;  %v7924_v28 = vcombine.high %v161_v22, %v169_v23  ;;  %3300 = vmatprep.subr.bf16.mxu1 %v8196_v21  ;;  %v7923_v34 = vcombine.low %v161_v22, %v169_v23 }
  0x4f   :  { %v425_v25 = vld [vmem:[#allocation5 + $0xa40] sm:$0xff]  ;;  %3301 = vmatpush1.bf16.msra.mxu1 %v8195_v27 }
  0x50   :  { %v8180_v29 = vcombine.high %v417_v24, %v425_v25  ;;  %v145_v30 = vld [vmem:[#allocation5 + $0x180] sm:$0xff]  ;;  %3259 = vmatprep.subr.bf16.mxu0 %v7924_v28  ;;  %v8179_v35 = vcombine.low %v417_v24, %v425_v25 }
  0x51   :  { %v153_v31 = vld [vmem:[#allocation5 + $0x1c0] sm:$0xff]  ;;  %3260 = vmatpush1.bf16.msra.mxu0 %v7923_v34 }
  0x52   :  { %v401_v32 = vld [vmem:[#allocation5 + $0x980] sm:$0xff]  ;;  %v7908_v36 = vcombine.high %v145_v30, %v153_v31  ;;  %3302 = vmatprep.subr.bf16.mxu1 %v8180_v29  ;;  %v7907_v42 = vcombine.low %v145_v30, %v153_v31 }
  0x53   :  { %v409_v33 = vld [vmem:[#allocation5 + $0x9c0] sm:$0xff]  ;;  %3303 = vmatpush1.bf16.msra.mxu1 %v8179_v35 }
  0x54   :  { %v8164_v37 = vcombine.high %v401_v32, %v409_v33  ;;  %v129_v38 = vld [vmem:[#allocation5 + $0x100] sm:$0xff]  ;;  %3261 = vmatprep.subr.bf16.mxu0 %v7908_v36  ;;  %v8163_v43 = vcombine.low %v401_v32, %v409_v33 }
  0x55   :  { %v137_v39 = vld [vmem:[#allocation5 + $0x140] sm:$0xff]  ;;  %3262 = vmatpush1.bf16.msra.mxu0 %v7907_v42 }
  0x56   :  { %v385_v40 = vld [vmem:[#allocation5 + $0x900] sm:$0xff]  ;;  %v7892_v44 = vcombine.high %v129_v38, %v137_v39  ;;  %3304 = vmatprep.subr.bf16.mxu1 %v8164_v37  ;;  %v7891_v50 = vcombine.low %v129_v38, %v137_v39 }
  0x57   :  { %v393_v41 = vld [vmem:[#allocation5 + $0x940] sm:$0xff]  ;;  %3305 = vmatpush1.bf16.msra.mxu1 %v8163_v43 }
  0x58   :  { %v8148_v45 = vcombine.high %v385_v40, %v393_v41  ;;  %v113_v46 = vld [vmem:[#allocation5 + $0x80] sm:$0xff]  ;;  %3263 = vmatprep.subr.bf16.mxu0 %v7892_v44  ;;  %v8147_v51 = vcombine.low %v385_v40, %v393_v41 }
  0x59   :  { %v121_v47 = vld [vmem:[#allocation5 + $0xc0] sm:$0xff]  ;;  %3264 = vmatpush1.bf16.msra.mxu0 %v7891_v50 }
  0x5a   :  { %v369_v48 = vld [vmem:[#allocation5 + $0x880] sm:$0xff]  ;;  %v7876_v52 = vcombine.high %v113_v46, %v121_v47  ;;  %3306 = vmatprep.subr.bf16.mxu1 %v8148_v45  ;;  %v7875_v0 = vcombine.low %v113_v46, %v121_v47 }
  0x5b   :  { %v377_v49 = vld [vmem:[#allocation5 + $0x8c0] sm:$0xff]  ;;  %3307 = vmatpush1.bf16.msra.mxu1 %v8147_v51 }
  0x5c   :  { %v97_v53 = vld [vmem:[#allocation5] sm:$0xff]  ;;  %v8132_v56 = vcombine.high %v369_v48, %v377_v49  ;;  %3265 = vmatprep.subr.bf16.mxu0 %v7876_v52  ;;  %v8131_v1 = vcombine.low %v369_v48, %v377_v49 }
  0x5d   :  { %v105_v57 = vld [vmem:[#allocation5 + $0x40] sm:$0xff]  ;;  %3266 = vmatpush1.bf16.msra.mxu0 %v7875_v0 }
  0x5e   :  { %v353_v61 = vld [vmem:[#allocation5 + $0x800] sm:$0xff]  ;;  %v7860_v2 = vcombine.high %v97_v53, %v105_v57  ;;  %3308 = vmatprep.subr.bf16.mxu1 %v8132_v56  ;;  %v7859_v8 = vcombine.low %v97_v53, %v105_v57 }
  0x5f   :  { %v361_v62 = vld [vmem:[#allocation5 + $0x840] sm:$0xff]  ;;  %3309 = vmatpush1.bf16.msra.mxu1 %v8131_v1 }
  0x60   :  { %v8116_v3 = vcombine.high %v353_v61, %v361_v62  ;;  %v337_v4 = vld [vmem:[#allocation5 + $0x780] sm:$0xff]  ;;  %3267 = vmatprep.subr.bf16.mxu0 %v7860_v2  ;;  %v8115_v9 = vcombine.low %v353_v61, %v361_v62 }
  0x61   :  { %v345_v5 = vld [vmem:[#allocation5 + $0x7c0] sm:$0xff]  ;;  %3268 = vmatpush1.bf16.msra.mxu0 %v7859_v8  ;;  %v466_v8 = vld [vmem:[#allocation5 + $0xb88] sm:$0xff] }
  0x62   :  { %v593_v6 = vld [vmem:[#allocation5 + $0xf80] sm:$0xff]  ;;  %v8100_v10 = vcombine.high %v337_v4, %v345_v5  ;;  %3310 = vmatprep.subr.bf16.mxu1 %v8116_v3  ;;  %v8099_v16 = vcombine.low %v337_v4, %v345_v5 }
  0x63   :  { %v601_v7 = vld [vmem:[#allocation5 + $0xfc0] sm:$0xff]  ;;  %3311 = vmatpush1.bf16.msra.mxu1 %v8115_v9  ;;  %v474_v9 = vld [vmem:[#allocation5 + $0xbc8] sm:$0xff] }
  0x64   :  { %v8356_v11 = vcombine.high %v593_v6, %v601_v7  ;;  %v321_v12 = vld [vmem:[#allocation5 + $0x700] sm:$0xff]  ;;  %3269 = vmatprep.subr.bf16.mxu0 %v8100_v10  ;;  %v8355_v17 = vcombine.low %v593_v6, %v601_v7  ;;  %v210_v6 = vld [vmem:[#allocation5 + $0x388] sm:$0xff] }
  0x65   :  { %v329_v13 = vld [vmem:[#allocation5 + $0x740] sm:$0xff]  ;;  %3270 = vmatpush2.bf16.msra.mxu0 %v8099_v16  ;;  %v218_v7 = vld [vmem:[#allocation5 + $0x3c8] sm:$0xff] }
  0x66   :  { %v577_v14 = vld [vmem:[#allocation5 + $0xf00] sm:$0xff]  ;;  %v8084_v18 = vcombine.high %v321_v12, %v329_v13  ;;  %3312 = vmatprep.subr.bf16.mxu1 %v8356_v11  ;;  %v8083_v24 = vcombine.low %v321_v12, %v329_v13  ;;  %v7974_v16 = vcombine.high %v210_v6, %v218_v7 }
  0x67   :  { %v585_v15 = vld [vmem:[#allocation5 + $0xf40] sm:$0xff]  ;;  %3313 = vmatpush2.bf16.msra.mxu1 %v8355_v17  ;;  %v8230_v17 = vcombine.high %v466_v8, %v474_v9 }
  0x68   :  { %v8340_v19 = vcombine.high %v577_v14, %v585_v15  ;;  %v305_v20 = vld [vmem:[#allocation5 + $0x680] sm:$0xff]  ;;  %3271 = vmatprep.subr.bf16.mxu0 %v8084_v18  ;;  %v8339_v25 = vcombine.low %v577_v14, %v585_v15  ;;  %v87_v14 = vld [vmem:[#allocation2 + $0x10] sm:$0xff]  ;;  %v194_v18 = vld [vmem:[#allocation5 + $0x308] sm:$0xff] }
  0x69   :  { %v313_v21 = vld [vmem:[#allocation5 + $0x6c0] sm:$0xff]  ;;  %3272 = vmatpush2.bf16.msra.mxu0 %v8083_v24  ;;  %v91_v15 = vld [vmem:[#allocation2 + $0x30] sm:$0xff]  ;;  %v7973_v24 = vcombine.low %v210_v6, %v218_v7  ;;  %v106_v6 = vld [vmem:[#allocation5 + $0x48] sm:$0xff] }
  0x6a   :  { %v561_v22 = vld [vmem:[#allocation5 + $0xe80] sm:$0xff]  ;;  %v8068_v26 = vcombine.high %v305_v20, %v313_v21  ;;  %3314 = vmatprep.subr.bf16.mxu1 %v8340_v19  ;;  %v8067_v32 = vcombine.low %v305_v20, %v313_v21  ;;  %v202_v19 = vld [vmem:[#allocation5 + $0x348] sm:$0xff] }
  0x6b   :  { %v569_v23 = vld [vmem:[#allocation5 + $0xec0] sm:$0xff]  ;;  %3315 = vmatpush2.bf16.msra.mxu1 %v8339_v25  ;;  %v450_v21 = vld [vmem:[#allocation5 + $0xb08] sm:$0xff]  ;;  %v8229_v25 = vcombine.low %v466_v8, %v474_v9 }
  0x6c   :  { %v8324_v27 = vcombine.high %v561_v22, %v569_v23  ;;  %v289_v28 = vld [vmem:[#allocation5 + $0x600] sm:$0xff]  ;;  %3273 = vmatprep.subr.bf16.mxu0 %v8068_v26  ;;  %v8323_v33 = vcombine.low %v561_v22, %v569_v23  ;;  %v458_v22 = vld [vmem:[#allocation5 + $0xb48] sm:$0xff]  ;;  %v9874_v23 = vpack.c.bf16 %v91_v15, %v87_v14  ;;  %v7958_v26 = vcombine.high %v194_v18, %v202_v19 }
  0x6d   :  { %v297_v29 = vld [vmem:[#allocation5 + $0x640] sm:$0xff]  ;;  %3274 = vmatpush2.bf16.msra.mxu0 %v8067_v32  ;;  %v7957_v32 = vcombine.low %v194_v18, %v202_v19  ;;  %v354_v7 = vld [vmem:[#allocation5 + $0x808] sm:$0xff] }
  0x6e   :  { %v545_v30 = vld [vmem:[#allocation5 + $0xe00] sm:$0xff]  ;;  %v8052_v34 = vcombine.high %v289_v28, %v297_v29  ;;  %3316 = vmatprep.subr.bf16.mxu1 %v8324_v27  ;;  %v8051_v40 = vcombine.low %v289_v28, %v297_v29  ;;  %v8214_v27 = vcombine.high %v450_v21, %v458_v22  ;;  %v178_v28 = vld [vmem:[#allocation5 + $0x288] sm:$0xff] }
  0x6f   :  { %v553_v31 = vld [vmem:[#allocation5 + $0xe40] sm:$0xff]  ;;  %3317 = vmatpush2.bf16.msra.mxu1 %v8323_v33  ;;  %v186_v29 = vld [vmem:[#allocation5 + $0x2c8] sm:$0xff]  ;;  %v8213_v33 = vcombine.low %v450_v21, %v458_v22 }
  0x70   :  { %v8308_v35 = vcombine.high %v545_v30, %v553_v31  ;;  %v273_v36 = vld [vmem:[#allocation5 + $0x580] sm:$0xff]  ;;  %3275 = vmatprep.subr.bf16.mxu0 %v8052_v34  ;;  %v8307_v41 = vcombine.low %v545_v30, %v553_v31  ;;  %v434_v30 = vld [vmem:[#allocation5 + $0xa88] sm:$0xff]  ;;  %v7942_v34 = vcombine.high %v178_v28, %v186_v29 }
  0x71   :  { %v281_v37 = vld [vmem:[#allocation5 + $0x5c0] sm:$0xff]  ;;  %3276 = vmatpush2.bf16.msra.mxu0 %v8051_v40  ;;  %v442_v31 = vld [vmem:[#allocation5 + $0xac8] sm:$0xff]  ;;  %v7941_v40 = vcombine.low %v178_v28, %v186_v29 }
  0x72   :  { %v529_v38 = vld [vmem:[#allocation5 + $0xd80] sm:$0xff]  ;;  %v8036_v42 = vcombine.high %v273_v36, %v281_v37  ;;  %3318 = vmatprep.subr.bf16.mxu1 %v8308_v35  ;;  %v8035_v48 = vcombine.low %v273_v36, %v281_v37  ;;  %v162_v35 = vld [vmem:[#allocation5 + $0x208] sm:$0xff] }
  0x73   :  { %v537_v39 = vld [vmem:[#allocation5 + $0xdc0] sm:$0xff]  ;;  %3319 = vmatpush2.bf16.msra.mxu1 %v8307_v41  ;;  %v170_v36 = vld [vmem:[#allocation5 + $0x248] sm:$0xff]  ;;  %v8197_v41 = vcombine.low %v434_v30, %v442_v31 }
  0x74   :  { %v8292_v43 = vcombine.high %v529_v38, %v537_v39  ;;  %v257_v44 = vld [vmem:[#allocation5 + $0x500] sm:$0xff]  ;;  %3277 = vmatprep.subr.bf16.mxu0 %v8036_v42  ;;  %v8291_v49 = vcombine.low %v529_v38, %v537_v39  ;;  %v418_v37 = vld [vmem:[#allocation5 + $0xa08] sm:$0xff]  ;;  %v8198_v38 = vcombine.high %v434_v30, %v442_v31  ;;  %v7926_v42 = vcombine.high %v162_v35, %v170_v36 }
  0x75   :  { %v265_v45 = vld [vmem:[#allocation5 + $0x540] sm:$0xff]  ;;  %3278 = vmatpush2.bf16.msra.mxu0 %v8035_v48  ;;  %v426_v39 = vld [vmem:[#allocation5 + $0xa48] sm:$0xff]  ;;  %v7925_v48 = vcombine.low %v162_v35, %v170_v36 }
  0x76   :  { %v513_v46 = vld [vmem:[#allocation5 + $0xd00] sm:$0xff]  ;;  %v8020_v50 = vcombine.high %v257_v44, %v265_v45  ;;  %3320 = vmatprep.subr.bf16.mxu1 %v8292_v43  ;;  %v8019_v56 = vcombine.low %v257_v44, %v265_v45  ;;  %v146_v43 = vld [vmem:[#allocation5 + $0x188] sm:$0xff] }
  0x77   :  { %v521_v47 = vld [vmem:[#allocation5 + $0xd40] sm:$0xff]  ;;  %3321 = vmatpush2.bf16.msra.mxu1 %v8291_v49  ;;  %v154_v44 = vld [vmem:[#allocation5 + $0x1c8] sm:$0xff]  ;;  %v8181_v49 = vcombine.low %v418_v37, %v426_v39 }
  0x78   :  { %v8276_v51 = vcombine.high %v513_v46, %v521_v47  ;;  %v241_v52 = vld [vmem:[#allocation5 + $0x480] sm:$0xff]  ;;  %3279 = vmatprep.subr.bf16.mxu0 %v8020_v50  ;;  %v8275_v57 = vcombine.low %v513_v46, %v521_v47  ;;  %v402_v45 = vld [vmem:[#allocation5 + $0x988] sm:$0xff]  ;;  %v8182_v46 = vcombine.high %v418_v37, %v426_v39  ;;  %v7910_v50 = vcombine.high %v146_v43, %v154_v44 }
  0x79   :  { %v249_v53 = vld [vmem:[#allocation5 + $0x4c0] sm:$0xff]  ;;  %3280 = vmatpush2.bf16.msra.mxu0 %v8019_v56  ;;  %v410_v47 = vld [vmem:[#allocation5 + $0x9c8] sm:$0xff]  ;;  %v7909_v56 = vcombine.low %v146_v43, %v154_v44 }
  0x7a   :  { %v497_v54 = vld [vmem:[#allocation5 + $0xc80] sm:$0xff]  ;;  %v8004_v59 = vcombine.high %v241_v52, %v249_v53  ;;  %3322 = vmatprep.subr.bf16.mxu1 %v8276_v51  ;;  %v8003_v2 = vcombine.low %v241_v52, %v249_v53  ;;  %v130_v51 = vld [vmem:[#allocation5 + $0x108] sm:$0xff] }
  0x7b   :  { %v505_v55 = vld [vmem:[#allocation5 + $0xcc0] sm:$0xff]  ;;  %3323 = vmatpush2.bf16.msra.mxu1 %v8275_v57  ;;  %v138_v52 = vld [vmem:[#allocation5 + $0x148] sm:$0xff]  ;;  %v8165_v57 = vcombine.low %v402_v45, %v410_v47 }
  0x7c   :  { %v8260_v60 = vcombine.high %v497_v54, %v505_v55  ;;  %v225_v61 = vld [vmem:[#allocation5 + $0x400] sm:$0xff]  ;;  %3281 = vmatprep.subr.bf16.mxu0 %v8004_v59  ;;  %v8259_v3 = vcombine.low %v497_v54, %v505_v55  ;;  %v386_v53 = vld [vmem:[#allocation5 + $0x908] sm:$0xff]  ;;  %v8166_v54 = vcombine.high %v402_v45, %v410_v47  ;;  %v7894_v59 = vcombine.high %v130_v51, %v138_v52 }
  0x7d   :  { %v233_v62 = vld [vmem:[#allocation5 + $0x440] sm:$0xff]  ;;  %3282 = vmatpush2.bf16.msra.mxu0 %v8003_v2  ;;  %v394_v55 = vld [vmem:[#allocation5 + $0x948] sm:$0xff]  ;;  %v7893_v2 = vcombine.low %v130_v51, %v138_v52 }
  0x7e   :  { %v481_v0 = vld [vmem:[#allocation5 + $0xc00] sm:$0xff]  ;;  %v7988_v4 = vcombine.high %v225_v61, %v233_v62  ;;  %3324 = vmatprep.subr.bf16.mxu1 %v8260_v60  ;;  %v7987_v10 = vcombine.low %v225_v61, %v233_v62  ;;  %v114_v60 = vld [vmem:[#allocation5 + $0x88] sm:$0xff] }
  0x7f   :  { %v489_v1 = vld [vmem:[#allocation5 + $0xc40] sm:$0xff]  ;;  %3325 = vmatpush2.bf16.msra.mxu1 %v8259_v3  ;;  %v122_v61 = vld [vmem:[#allocation5 + $0xc8] sm:$0xff]  ;;  %v8149_v3 = vcombine.low %v386_v53, %v394_v55 }
  0x80   :  { %v8244_v5 = vcombine.high %v481_v0, %v489_v1  ;;  %v85_v11 = vld [vmem:[#allocation2] sm:$0xff]  ;;  %3283 = vmatprep.subr.bf16.mxu0 %v7988_v4  ;;  %v8243_v13 = vcombine.low %v481_v0, %v489_v1  ;;  %v370_v62 = vld [vmem:[#allocation5 + $0x888] sm:$0xff]  ;;  %v8150_v0 = vcombine.high %v386_v53, %v394_v55  ;;  %v7878_v4 = vcombine.high %v114_v60, %v122_v61 }
  0x81   :  { %v89_v12 = vld [vmem:[#allocation2 + $0x20] sm:$0xff]  ;;  %3284 = vmatpush2.bf16.msra.mxu0 %v7987_v10  ;;  %v378_v1 = vld [vmem:[#allocation5 + $0x8c8] sm:$0xff]  ;;  %v7877_v10 = vcombine.low %v114_v60, %v122_v61 }
  0x82   :  { %3326 = vmatprep.subr.bf16.mxu1 %v8244_v5  ;;  %v9872_v20 = vpack.c.bf16 %v89_v12, %v85_v11  ;;  %3339 = vmatprep.subr.bf16.mxu0 %v7974_v16  ;;  %v98_v5 = vld [vmem:[#allocation5 + $0x8] sm:$0xff]  ;;  %v8134_v8 = vcombine.high %v370_v62, %v378_v1  ;;  %v8133_v11 = vcombine.low %v370_v62, %v378_v1 }
  0x83   :  { %3327 = vmatpush2.bf16.msra.mxu1 %v8243_v13  ;;  %v362_v9 = vld [vmem:[#allocation5 + $0x848] sm:$0xff]  ;;  %v7862_v12 = vcombine.high %v98_v5, %v106_v6  ;;  %v7861_v18 = vcombine.low %v98_v5, %v106_v6 }
  0x84   :  { %3382 = vmatprep.subr.bf16.mxu1 %v8230_v17  ;;  %3286 = vmatmul.mubr.bf16.vlgmr.msra.gmra.mxu0 %v9872_v20  ;;  %v338_v13 = vld [vmem:[#allocation5 + $0x788] sm:$0xff]  ;;  %v8118_v16 = vcombine.high %v354_v7, %v362_v9  ;;  %v8117_v19 = vcombine.low %v354_v7, %v362_v9 }
  0x85   :  { %3340 = vmatpush1.bf16.msra.mxu0 %v7973_v24  ;;  %3371 = vmatprep.mubr.bf16.mxu0 %v9866_v58  ;;  %v346_v14 = vld [vmem:[#allocation5 + $0x7c8] sm:$0xff] }
  0x86   :  { %3329 = vmatmul.mubr.bf16.vlgmr.msra.gmra.mxu1 %v9874_v23  ;;  %3341 = vmatprep.subr.bf16.mxu0 %v7958_v26  ;;  %v594_v15 = vld [vmem:[#allocation5 + $0xf88] sm:$0xff]  ;;  %v8102_v21 = vcombine.high %v338_v13, %v346_v14  ;;  %v8101_v28 = vcombine.low %v338_v13, %v346_v14 }
  0x87   :  { %3383 = vmatpush1.bf16.msra.mxu1 %v8229_v25  ;;  %3414 = vmatprep.mubr.bf16.mxu1 %v9868_v63  ;;  %v602_v17 = vld [vmem:[#allocation5 + $0xfc8] sm:$0xff] }
  0x88   :  { %3384 = vmatprep.subr.bf16.mxu1 %v8214_v27  ;;  %v322_v22 = vld [vmem:[#allocation5 + $0x708] sm:$0xff]  ;;  %v8358_v26 = vcombine.high %v594_v15, %v602_v17  ;;  %v8357_v29 = vcombine.low %v594_v15, %v602_v17  ;;  %v211_v17 = vld [vmem:[#allocation5 + $0x390] sm:$0xff] }
  0x89   :  { %3342 = vmatpush1.bf16.msra.mxu0 %v7957_v32  ;;  %v330_v24 = vld [vmem:[#allocation5 + $0x748] sm:$0xff] }
  0x8a   :  { %3343 = vmatprep.subr.bf16.mxu0 %v7942_v34  ;;  %v578_v25 = vld [vmem:[#allocation5 + $0xf08] sm:$0xff]  ;;  %v8086_v30 = vcombine.high %v322_v22, %v330_v24  ;;  %v8085_v36 = vcombine.low %v322_v22, %v330_v24  ;;  %v475_v22 = vld [vmem:[#allocation5 + $0xbd0] sm:$0xff] }
  0x8b   :  { %3385 = vmatpush1.bf16.msra.mxu1 %v8213_v33  ;;  %v586_v27 = vld [vmem:[#allocation5 + $0xf48] sm:$0xff] }
  0x8c   :  { %3386 = vmatprep.subr.bf16.mxu1 %v8198_v38  ;;  %v306_v31 = vld [vmem:[#allocation5 + $0x688] sm:$0xff]  ;;  %v8342_v34 = vcombine.high %v578_v25, %v586_v27  ;;  %v8341_v37 = vcombine.low %v578_v25, %v586_v27  ;;  %v195_v27 = vld [vmem:[#allocation5 + $0x310] sm:$0xff] }
  0x8d   :  { %3344 = vmatpush1.bf16.msra.mxu0 %v7941_v40  ;;  %v314_v32 = vld [vmem:[#allocation5 + $0x6c8] sm:$0xff] }
  0x8e   :  { %3345 = vmatprep.subr.bf16.mxu0 %v7926_v42  ;;  %v562_v33 = vld [vmem:[#allocation5 + $0xe88] sm:$0xff]  ;;  %v8070_v38 = vcombine.high %v306_v31, %v314_v32  ;;  %v8069_v44 = vcombine.low %v306_v31, %v314_v32  ;;  %v459_v31 = vld [vmem:[#allocation5 + $0xb50] sm:$0xff] }
  0x8f   :  { %3387 = vmatpush1.bf16.msra.mxu1 %v8197_v41  ;;  %v570_v35 = vld [vmem:[#allocation5 + $0xec8] sm:$0xff] }
  0x90   :  { %3388 = vmatprep.subr.bf16.mxu1 %v8182_v46  ;;  %v290_v39 = vld [vmem:[#allocation5 + $0x608] sm:$0xff]  ;;  %v8326_v42 = vcombine.high %v562_v33, %v570_v35  ;;  %v8325_v45 = vcombine.low %v562_v33, %v570_v35  ;;  %v179_v35 = vld [vmem:[#allocation5 + $0x290] sm:$0xff] }
  0x91   :  { %3346 = vmatpush1.bf16.msra.mxu0 %v7925_v48  ;;  %v298_v40 = vld [vmem:[#allocation5 + $0x648] sm:$0xff] }
  0x92   :  { %3347 = vmatprep.subr.bf16.mxu0 %v7910_v50  ;;  %v546_v41 = vld [vmem:[#allocation5 + $0xe08] sm:$0xff]  ;;  %v8054_v46 = vcombine.high %v290_v39, %v298_v40  ;;  %v8053_v52 = vcombine.low %v290_v39, %v298_v40  ;;  %v443_v39 = vld [vmem:[#allocation5 + $0xad0] sm:$0xff] }
  0x93   :  { %3389 = vmatpush1.bf16.msra.mxu1 %v8181_v49  ;;  %v554_v43 = vld [vmem:[#allocation5 + $0xe48] sm:$0xff] }
  0x94   :  { %3390 = vmatprep.subr.bf16.mxu1 %v8166_v54  ;;  %v274_v47 = vld [vmem:[#allocation5 + $0x588] sm:$0xff]  ;;  %v8310_v50 = vcombine.high %v546_v41, %v554_v43  ;;  %v8309_v53 = vcombine.low %v546_v41, %v554_v43  ;;  %v163_v43 = vld [vmem:[#allocation5 + $0x210] sm:$0xff] }
  0x95   :  { %3348 = vmatpush1.bf16.msra.mxu0 %v7909_v56  ;;  %v282_v48 = vld [vmem:[#allocation5 + $0x5c8] sm:$0xff] }
  0x96   :  { %3349 = vmatprep.subr.bf16.mxu0 %v7894_v59  ;;  %v530_v49 = vld [vmem:[#allocation5 + $0xd88] sm:$0xff]  ;;  %v8038_v54 = vcombine.high %v274_v47, %v282_v48  ;;  %v8037_v61 = vcombine.low %v274_v47, %v282_v48  ;;  %v427_v47 = vld [vmem:[#allocation5 + $0xa50] sm:$0xff] }
  0x97   :  { %3391 = vmatpush1.bf16.msra.mxu1 %v8165_v57  ;;  %v538_v51 = vld [vmem:[#allocation5 + $0xdc8] sm:$0xff] }
  0x98   :  { %3392 = vmatprep.subr.bf16.mxu1 %v8150_v0  ;;  %v258_v55 = vld [vmem:[#allocation5 + $0x508] sm:$0xff]  ;;  %v8294_v59 = vcombine.high %v530_v49, %v538_v51  ;;  %v8293_v62 = vcombine.low %v530_v49, %v538_v51  ;;  %v147_v51 = vld [vmem:[#allocation5 + $0x190] sm:$0xff] }
  0x99   :  { %3350 = vmatpush1.bf16.msra.mxu0 %v7893_v2  ;;  %v266_v56 = vld [vmem:[#allocation5 + $0x548] sm:$0xff] }
  0x9a   :  { %3351 = vmatprep.subr.bf16.mxu0 %v7878_v4  ;;  %v514_v57 = vld [vmem:[#allocation5 + $0xd08] sm:$0xff]  ;;  %v8022_v0 = vcombine.high %v258_v55, %v266_v56  ;;  %v8021_v6 = vcombine.low %v258_v55, %v266_v56  ;;  %v411_v55 = vld [vmem:[#allocation5 + $0x9d0] sm:$0xff] }
  0x9b   :  { %3393 = vmatpush1.bf16.msra.mxu1 %v8149_v3  ;;  %v522_v60 = vld [vmem:[#allocation5 + $0xd48] sm:$0xff] }
  0x9c   :  { %3394 = vmatprep.subr.bf16.mxu1 %v8134_v8  ;;  %v242_v1 = vld [vmem:[#allocation5 + $0x488] sm:$0xff]  ;;  %v8278_v4 = vcombine.high %v514_v57, %v522_v60  ;;  %v8277_v7 = vcombine.low %v514_v57, %v522_v60  ;;  %v131_v60 = vld [vmem:[#allocation5 + $0x110] sm:$0xff] }
  0x9d   :  { %3352 = vmatpush1.bf16.msra.mxu0 %v7877_v10  ;;  %v250_v2 = vld [vmem:[#allocation5 + $0x4c8] sm:$0xff] }
  0x9e   :  { %3353 = vmatprep.subr.bf16.mxu0 %v7862_v12  ;;  %v498_v3 = vld [vmem:[#allocation5 + $0xc88] sm:$0xff]  ;;  %v8006_v8 = vcombine.high %v242_v1, %v250_v2  ;;  %v8005_v14 = vcombine.low %v242_v1, %v250_v2  ;;  %v395_v1 = vld [vmem:[#allocation5 + $0x950] sm:$0xff] }
  0x9f   :  { %3395 = vmatpush1.bf16.msra.mxu1 %v8133_v11  ;;  %v506_v5 = vld [vmem:[#allocation5 + $0xcc8] sm:$0xff] }
  0xa0   :  { %3396 = vmatprep.subr.bf16.mxu1 %v8118_v16  ;;  %v226_v9 = vld [vmem:[#allocation5 + $0x408] sm:$0xff]  ;;  %v8262_v12 = vcombine.high %v498_v3, %v506_v5  ;;  %v8261_v15 = vcombine.low %v498_v3, %v506_v5  ;;  %v115_v5 = vld [vmem:[#allocation5 + $0x90] sm:$0xff] }
  0xa1   :  { %3354 = vmatpush1.bf16.msra.mxu0 %v7861_v18  ;;  %v234_v10 = vld [vmem:[#allocation5 + $0x448] sm:$0xff]  ;;  %v219_v18 = vld [vmem:[#allocation5 + $0x3d0] sm:$0xff] }
  0xa2   :  { %3355 = vmatprep.subr.bf16.mxu0 %v8102_v21  ;;  %v482_v11 = vld [vmem:[#allocation5 + $0xc08] sm:$0xff]  ;;  %v7990_v16 = vcombine.high %v226_v9, %v234_v10  ;;  %v7989_v24 = vcombine.low %v226_v9, %v234_v10  ;;  %v7975_v32 = vcombine.low %v211_v17, %v219_v18  ;;  %v379_v9 = vld [vmem:[#allocation5 + $0x8d0] sm:$0xff] }
  0xa3   :  { %3397 = vmatpush1.bf16.msra.mxu1 %v8117_v19  ;;  %v490_v13 = vld [vmem:[#allocation5 + $0xc48] sm:$0xff]  ;;  %v467_v19 = vld [vmem:[#allocation5 + $0xb90] sm:$0xff] }
  0xa4   :  { %3398 = vmatprep.subr.bf16.mxu1 %v8358_v26  ;;  %v8246_v21 = vcombine.high %v482_v11, %v490_v13  ;;  %v8245_v25 = vcombine.low %v482_v11, %v490_v13  ;;  %v7976_v26 = vcombine.high %v211_v17, %v219_v18  ;;  %v8231_v33 = vcombine.low %v467_v19, %v475_v22  ;;  %v99_v13 = vld [vmem:[#allocation5 + $0x10] sm:$0xff] }
  0xa5   :  { %3356 = vmatpush2.bf16.msra.mxu0 %v8101_v28  ;;  %v203_v28 = vld [vmem:[#allocation5 + $0x350] sm:$0xff] }
  0xa6   :  { %3357 = vmatprep.subr.bf16.mxu0 %v8086_v30  ;;  %v8232_v30 = vcombine.high %v467_v19, %v475_v22  ;;  %v7959_v40 = vcombine.low %v195_v27, %v203_v28  ;;  %v363_v17 = vld [vmem:[#allocation5 + $0x850] sm:$0xff] }
  0xa7   :  { %3399 = vmatpush2.bf16.msra.mxu1 %v8357_v29  ;;  %v451_v29 = vld [vmem:[#allocation5 + $0xb10] sm:$0xff] }
  0xa8   :  { %3400 = vmatprep.subr.bf16.mxu1 %v8342_v34  ;;  %v7960_v34 = vcombine.high %v195_v27, %v203_v28  ;;  %v8215_v41 = vcombine.low %v451_v29, %v459_v31  ;;  %v339_v22 = vld [vmem:[#allocation5 + $0x790] sm:$0xff] }
  0xa9   :  { %3358 = vmatpush2.bf16.msra.mxu0 %v8085_v36  ;;  %v187_v36 = vld [vmem:[#allocation5 + $0x2d0] sm:$0xff] }
  0xaa   :  { %3359 = vmatprep.subr.bf16.mxu0 %v8070_v38  ;;  %v435_v38 = vld [vmem:[#allocation5 + $0xa90] sm:$0xff]  ;;  %v7943_v48 = vcombine.low %v179_v35, %v187_v36 }
  0xab   :  { %3401 = vmatpush2.bf16.msra.mxu1 %v8341_v37  ;;  %v8216_v37 = vcombine.high %v451_v29, %v459_v31  ;;  %v8199_v49 = vcombine.low %v435_v38, %v443_v39  ;;  %v603_v27 = vld [vmem:[#allocation5 + $0xfd0] sm:$0xff] }
  0xac   :  { %3402 = vmatprep.subr.bf16.mxu1 %v8326_v42  ;;  %v7944_v42 = vcombine.high %v179_v35, %v187_v36  ;;  %v323_v31 = vld [vmem:[#allocation5 + $0x710] sm:$0xff] }
  0xad   :  { %3360 = vmatpush2.bf16.msra.mxu0 %v8069_v44  ;;  %v171_v44 = vld [vmem:[#allocation5 + $0x250] sm:$0xff] }
  0xae   :  { %3361 = vmatprep.subr.bf16.mxu0 %v8054_v46  ;;  %v8200_v46 = vcombine.high %v435_v38, %v443_v39  ;;  %v7927_v56 = vcombine.low %v163_v43, %v171_v44  ;;  %v587_v35 = vld [vmem:[#allocation5 + $0xf50] sm:$0xff] }
  0xaf   :  { %3403 = vmatpush2.bf16.msra.mxu1 %v8325_v45  ;;  %v419_v45 = vld [vmem:[#allocation5 + $0xa10] sm:$0xff] }
  0xb0   :  { %3404 = vmatprep.subr.bf16.mxu1 %v8310_v50  ;;  %v7928_v50 = vcombine.high %v163_v43, %v171_v44  ;;  %v8183_v57 = vcombine.low %v419_v45, %v427_v47  ;;  %v307_v39 = vld [vmem:[#allocation5 + $0x690] sm:$0xff] }
  0xb1   :  { %3362 = vmatpush2.bf16.msra.mxu0 %v8053_v52  ;;  %v155_v52 = vld [vmem:[#allocation5 + $0x1d0] sm:$0xff] }
  0xb2   :  { %3363 = vmatprep.subr.bf16.mxu0 %v8038_v54  ;;  %v8184_v54 = vcombine.high %v419_v45, %v427_v47  ;;  %v7911_v2 = vcombine.low %v147_v51, %v155_v52  ;;  %v571_v43 = vld [vmem:[#allocation5 + $0xed0] sm:$0xff] }
  0xb3   :  { %3405 = vmatpush2.bf16.msra.mxu1 %v8309_v53  ;;  %v403_v53 = vld [vmem:[#allocation5 + $0x990] sm:$0xff] }
  0xb4   :  { %3406 = vmatprep.subr.bf16.mxu1 %v8294_v59  ;;  %v7912_v59 = vcombine.high %v147_v51, %v155_v52  ;;  %v8167_v3 = vcombine.low %v403_v53, %v411_v55  ;;  %v291_v47 = vld [vmem:[#allocation5 + $0x610] sm:$0xff] }
  0xb5   :  { %3364 = vmatpush2.bf16.msra.mxu0 %v8037_v61  ;;  %v139_v61 = vld [vmem:[#allocation5 + $0x150] sm:$0xff] }
  0xb6   :  { %3365 = vmatprep.subr.bf16.mxu0 %v8022_v0  ;;  %v8168_v0 = vcombine.high %v403_v53, %v411_v55  ;;  %v7895_v10 = vcombine.low %v131_v60, %v139_v61  ;;  %v555_v51 = vld [vmem:[#allocation5 + $0xe50] sm:$0xff] }
  0xb7   :  { %3407 = vmatpush2.bf16.msra.mxu1 %v8293_v62  ;;  %v387_v62 = vld [vmem:[#allocation5 + $0x910] sm:$0xff] }
  0xb8   :  { %3408 = vmatprep.subr.bf16.mxu1 %v8278_v4  ;;  %v7896_v4 = vcombine.high %v131_v60, %v139_v61  ;;  %v8151_v11 = vcombine.low %v387_v62, %v395_v1  ;;  %v275_v55 = vld [vmem:[#allocation5 + $0x590] sm:$0xff] }
  0xb9   :  { %3366 = vmatpush2.bf16.msra.mxu0 %v8021_v6  ;;  %v123_v6 = vld [vmem:[#allocation5 + $0xd0] sm:$0xff] }
  0xba   :  { %3367 = vmatprep.subr.bf16.mxu0 %v8006_v8  ;;  %v8152_v8 = vcombine.high %v387_v62, %v395_v1  ;;  %v7879_v18 = vcombine.low %v115_v5, %v123_v6  ;;  %v539_v60 = vld [vmem:[#allocation5 + $0xdd0] sm:$0xff] }
  0xbb   :  { %3409 = vmatpush2.bf16.msra.mxu1 %v8277_v7  ;;  %v371_v7 = vld [vmem:[#allocation5 + $0x890] sm:$0xff] }
  0xbc   :  { %3410 = vmatprep.subr.bf16.mxu1 %v8262_v12  ;;  %v7880_v12 = vcombine.high %v115_v5, %v123_v6  ;;  %v8135_v19 = vcombine.low %v371_v7, %v379_v9  ;;  %v259_v1 = vld [vmem:[#allocation5 + $0x510] sm:$0xff] }
  0xbd   :  { %3368 = vmatpush2.bf16.msra.mxu0 %v8005_v14  ;;  %v107_v14 = vld [vmem:[#allocation5 + $0x50] sm:$0xff] }
  0xbe   :  { %3369 = vmatprep.subr.bf16.mxu0 %v7990_v16  ;;  %v8136_v16 = vcombine.high %v371_v7, %v379_v9  ;;  %v7863_v28 = vcombine.low %v99_v13, %v107_v14  ;;  %v523_v5 = vld [vmem:[#allocation5 + $0xd50] sm:$0xff] }
  0xbf   :  { %3411 = vmatpush2.bf16.msra.mxu1 %v8261_v15  ;;  %v355_v15 = vld [vmem:[#allocation5 + $0x810] sm:$0xff] }
  0xc0   :  { %3412 = vmatprep.subr.bf16.mxu1 %v8246_v21  ;;  %v7864_v21 = vcombine.high %v99_v13, %v107_v14  ;;  %v8119_v29 = vcombine.low %v355_v15, %v363_v17  ;;  %v243_v9 = vld [vmem:[#allocation5 + $0x490] sm:$0xff] }
  0xc1   :  { %3370 = vmatpush2.bf16.msra.mxu0 %v7989_v24  ;;  %v347_v24 = vld [vmem:[#allocation5 + $0x7d0] sm:$0xff] }
  0xc2   :  { %3425 = vmatprep.subr.bf16.mxu0 %v7976_v26  ;;  %v8120_v26 = vcombine.high %v355_v15, %v363_v17  ;;  %v8103_v36 = vcombine.low %v339_v22, %v347_v24  ;;  %v507_v13 = vld [vmem:[#allocation5 + $0xcd0] sm:$0xff] }
  0xc3   :  { %3413 = vmatpush2.bf16.msra.mxu1 %v8245_v25  ;;  %v595_v25 = vld [vmem:[#allocation5 + $0xf90] sm:$0xff] }
  0xc4   :  { %3468 = vmatprep.subr.bf16.mxu1 %v8232_v30  ;;  %3372 = vmatmul.mubr.bf16.vlgmr.msra.gmra.mxu0 %v9872_v20  ;;  %v8104_v30 = vcombine.high %v339_v22, %v347_v24  ;;  %v227_v17 = vld [vmem:[#allocation5 + $0x410] sm:$0xff] }
  0xc5   :  { %3426 = vmatpush1.bf16.msra.mxu0 %v7975_v32  ;;  %3457 = vmatprep.mubr.bf16.mxu0 %v9866_v58  ;;  %v331_v32 = vld [vmem:[#allocation5 + $0x750] sm:$0xff] }
  0xc6   :  { %3415 = vmatmul.mubr.bf16.vlgmr.msra.gmra.mxu1 %v9874_v23  ;;  %3427 = vmatprep.subr.bf16.mxu0 %v7960_v34  ;;  %v8360_v34 = vcombine.high %v595_v25, %v603_v27  ;;  %v8088_v38 = vcombine.high %v323_v31, %v331_v32  ;;  %v8087_v44 = vcombine.low %v323_v31, %v331_v32  ;;  %v491_v22 = vld [vmem:[#allocation5 + $0xc50] sm:$0xff]  ;;  %v476_v31 = vld [vmem:[#allocation5 + $0xbd8] sm:$0xff] }
  0xc7   :  { %3469 = vmatpush1.bf16.msra.mxu1 %v8231_v33  ;;  %3500 = vmatprep.mubr.bf16.mxu1 %v9868_v63  ;;  %v579_v33 = vld [vmem:[#allocation5 + $0xf10] sm:$0xff] }
  0xc8   :  { %3470 = vmatprep.subr.bf16.mxu1 %v8216_v37  ;;  %v8359_v37 = vcombine.low %v595_v25, %v603_v27  ;;  %v8343_v45 = vcombine.low %v579_v33, %v587_v35  ;;  %v212_v27 = vld [vmem:[#allocation5 + $0x398] sm:$0xff] }
  0xc9   :  { %3428 = vmatpush1.bf16.msra.mxu0 %v7959_v40  ;;  %v315_v40 = vld [vmem:[#allocation5 + $0x6d0] sm:$0xff] }
  0xca   :  { %3429 = vmatprep.subr.bf16.mxu0 %v7944_v42  ;;  %v8344_v42 = vcombine.high %v579_v33, %v587_v35  ;;  %v8071_v52 = vcombine.low %v307_v39, %v315_v40  ;;  %v196_v35 = vld [vmem:[#allocation5 + $0x318] sm:$0xff] }
  0xcb   :  { %3471 = vmatpush1.bf16.msra.mxu1 %v8215_v41  ;;  %v563_v41 = vld [vmem:[#allocation5 + $0xe90] sm:$0xff] }
  0xcc   :  { %3472 = vmatprep.subr.bf16.mxu1 %v8200_v46  ;;  %v8072_v46 = vcombine.high %v307_v39, %v315_v40  ;;  %v8327_v53 = vcombine.low %v563_v41, %v571_v43  ;;  %v460_v39 = vld [vmem:[#allocation5 + $0xb58] sm:$0xff] }
  0xcd   :  { %3430 = vmatpush1.bf16.msra.mxu0 %v7943_v48  ;;  %v299_v48 = vld [vmem:[#allocation5 + $0x650] sm:$0xff] }
  0xce   :  { %3431 = vmatprep.subr.bf16.mxu0 %v7928_v50  ;;  %v8328_v50 = vcombine.high %v563_v41, %v571_v43  ;;  %v8055_v61 = vcombine.low %v291_v47, %v299_v48  ;;  %v180_v43 = vld [vmem:[#allocation5 + $0x298] sm:$0xff] }
  0xcf   :  { %3473 = vmatpush1.bf16.msra.mxu1 %v8199_v49  ;;  %v547_v49 = vld [vmem:[#allocation5 + $0xe10] sm:$0xff] }
  0xd0   :  { %3474 = vmatprep.subr.bf16.mxu1 %v8184_v54  ;;  %v8056_v54 = vcombine.high %v291_v47, %v299_v48  ;;  %v8311_v62 = vcombine.low %v547_v49, %v555_v51  ;;  %v444_v47 = vld [vmem:[#allocation5 + $0xad8] sm:$0xff] }
  0xd1   :  { %3432 = vmatpush1.bf16.msra.mxu0 %v7927_v56  ;;  %v283_v56 = vld [vmem:[#allocation5 + $0x5d0] sm:$0xff] }
  0xd2   :  { %3433 = vmatprep.subr.bf16.mxu0 %v7912_v59  ;;  %v8312_v59 = vcombine.high %v547_v49, %v555_v51  ;;  %v8039_v6 = vcombine.low %v275_v55, %v283_v56  ;;  %v164_v51 = vld [vmem:[#allocation5 + $0x218] sm:$0xff] }
  0xd3   :  { %3475 = vmatpush1.bf16.msra.mxu1 %v8183_v57  ;;  %v531_v57 = vld [vmem:[#allocation5 + $0xd90] sm:$0xff] }
  0xd4   :  { %3476 = vmatprep.subr.bf16.mxu1 %v8168_v0  ;;  %v8040_v0 = vcombine.high %v275_v55, %v283_v56  ;;  %v8295_v7 = vcombine.low %v531_v57, %v539_v60  ;;  %v428_v55 = vld [vmem:[#allocation5 + $0xa58] sm:$0xff] }
  0xd5   :  { %3434 = vmatpush1.bf16.msra.mxu0 %v7911_v2  ;;  %v267_v2 = vld [vmem:[#allocation5 + $0x550] sm:$0xff] }
  0xd6   :  { %3435 = vmatprep.subr.bf16.mxu0 %v7896_v4  ;;  %v8296_v4 = vcombine.high %v531_v57, %v539_v60  ;;  %v8023_v14 = vcombine.low %v259_v1, %v267_v2  ;;  %v148_v60 = vld [vmem:[#allocation5 + $0x198] sm:$0xff] }
  0xd7   :  { %3477 = vmatpush1.bf16.msra.mxu1 %v8167_v3  ;;  %v515_v3 = vld [vmem:[#allocation5 + $0xd10] sm:$0xff] }
  0xd8   :  { %3478 = vmatprep.subr.bf16.mxu1 %v8152_v8  ;;  %v8024_v8 = vcombine.high %v259_v1, %v267_v2  ;;  %v8279_v15 = vcombine.low %v515_v3, %v523_v5  ;;  %v412_v1 = vld [vmem:[#allocation5 + $0x9d8] sm:$0xff] }
  0xd9   :  { %3436 = vmatpush1.bf16.msra.mxu0 %v7895_v10  ;;  %v251_v10 = vld [vmem:[#allocation5 + $0x4d0] sm:$0xff] }
  0xda   :  { %3437 = vmatprep.subr.bf16.mxu0 %v7880_v12  ;;  %v8280_v12 = vcombine.high %v515_v3, %v523_v5  ;;  %v8007_v24 = vcombine.low %v243_v9, %v251_v10  ;;  %v132_v5 = vld [vmem:[#allocation5 + $0x118] sm:$0xff] }
  0xdb   :  { %3479 = vmatpush1.bf16.msra.mxu1 %v8151_v11  ;;  %v499_v11 = vld [vmem:[#allocation5 + $0xc90] sm:$0xff] }
  0xdc   :  { %3480 = vmatprep.subr.bf16.mxu1 %v8136_v16  ;;  %v8008_v16 = vcombine.high %v243_v9, %v251_v10  ;;  %v8263_v25 = vcombine.low %v499_v11, %v507_v13  ;;  %v396_v9 = vld [vmem:[#allocation5 + $0x958] sm:$0xff] }
  0xdd   :  { %3438 = vmatpush1.bf16.msra.mxu0 %v7879_v18  ;;  %v235_v18 = vld [vmem:[#allocation5 + $0x450] sm:$0xff] }
  0xde   :  { %3439 = vmatprep.subr.bf16.mxu0 %v7864_v21  ;;  %v8264_v21 = vcombine.high %v499_v11, %v507_v13  ;;  %v7991_v32 = vcombine.low %v227_v17, %v235_v18  ;;  %v116_v13 = vld [vmem:[#allocation5 + $0x98] sm:$0xff] }
  0xdf   :  { %3481 = vmatpush1.bf16.msra.mxu1 %v8135_v19  ;;  %v483_v19 = vld [vmem:[#allocation5 + $0xc10] sm:$0xff] }
  0xe0   :  { %3482 = vmatprep.subr.bf16.mxu1 %v8120_v26  ;;  %v7992_v26 = vcombine.high %v227_v17, %v235_v18  ;;  %v8247_v33 = vcombine.low %v483_v19, %v491_v22  ;;  %v380_v17 = vld [vmem:[#allocation5 + $0x8d8] sm:$0xff] }
  0xe1   :  { %3440 = vmatpush1.bf16.msra.mxu0 %v7863_v28  ;;  %v220_v28 = vld [vmem:[#allocation5 + $0x3d8] sm:$0xff] }
  0xe2   :  { %3441 = vmatprep.subr.bf16.mxu0 %v8104_v30  ;;  %v8248_v30 = vcombine.high %v483_v19, %v491_v22  ;;  %v7977_v40 = vcombine.low %v212_v27, %v220_v28  ;;  %v100_v22 = vld [vmem:[#allocation5 + $0x18] sm:$0xff] }
  0xe3   :  { %3483 = vmatpush1.bf16.msra.mxu1 %v8119_v29  ;;  %v468_v29 = vld [vmem:[#allocation5 + $0xb98] sm:$0xff] }
  0xe4   :  { %3484 = vmatprep.subr.bf16.mxu1 %v8360_v34  ;;  %v7978_v34 = vcombine.high %v212_v27, %v220_v28  ;;  %v8233_v41 = vcombine.low %v468_v29, %v476_v31  ;;  %v364_v27 = vld [vmem:[#allocation5 + $0x858] sm:$0xff] }
  0xe5   :  { %3442 = vmatpush2.bf16.msra.mxu0 %v8103_v36  ;;  %v204_v36 = vld [vmem:[#allocation5 + $0x358] sm:$0xff] }
  0xe6   :  { %3443 = vmatprep.subr.bf16.mxu0 %v8088_v38  ;;  %v8234_v38 = vcombine.high %v468_v29, %v476_v31  ;;  %v7961_v48 = vcombine.low %v196_v35, %v204_v36  ;;  %v340_v31 = vld [vmem:[#allocation5 + $0x798] sm:$0xff] }
  0xe7   :  { %3485 = vmatpush2.bf16.msra.mxu1 %v8359_v37  ;;  %v452_v37 = vld [vmem:[#allocation5 + $0xb18] sm:$0xff] }
  0xe8   :  { %3486 = vmatprep.subr.bf16.mxu1 %v8344_v42  ;;  %v7962_v42 = vcombine.high %v196_v35, %v204_v36  ;;  %v8217_v49 = vcombine.low %v452_v37, %v460_v39  ;;  %v604_v35 = vld [vmem:[#allocation5 + $0xfd8] sm:$0xff] }
  0xe9   :  { %3444 = vmatpush2.bf16.msra.mxu0 %v8087_v44  ;;  %v188_v44 = vld [vmem:[#allocation5 + $0x2d8] sm:$0xff] }
  0xea   :  { %3445 = vmatprep.subr.bf16.mxu0 %v8072_v46  ;;  %v8218_v46 = vcombine.high %v452_v37, %v460_v39  ;;  %v7945_v56 = vcombine.low %v180_v43, %v188_v44  ;;  %v324_v39 = vld [vmem:[#allocation5 + $0x718] sm:$0xff] }
  0xeb   :  { %3487 = vmatpush2.bf16.msra.mxu1 %v8343_v45  ;;  %v436_v45 = vld [vmem:[#allocation5 + $0xa98] sm:$0xff] }
  0xec   :  { %3488 = vmatprep.subr.bf16.mxu1 %v8328_v50  ;;  %v7946_v50 = vcombine.high %v180_v43, %v188_v44  ;;  %v8201_v57 = vcombine.low %v436_v45, %v444_v47  ;;  %v588_v43 = vld [vmem:[#allocation5 + $0xf58] sm:$0xff] }
  0xed   :  { %3446 = vmatpush2.bf16.msra.mxu0 %v8071_v52  ;;  %v172_v52 = vld [vmem:[#allocation5 + $0x258] sm:$0xff] }
  0xee   :  { %3447 = vmatprep.subr.bf16.mxu0 %v8056_v54  ;;  %v8202_v54 = vcombine.high %v436_v45, %v444_v47  ;;  %v7929_v2 = vcombine.low %v164_v51, %v172_v52  ;;  %v308_v47 = vld [vmem:[#allocation5 + $0x698] sm:$0xff] }
  0xef   :  { %3489 = vmatpush2.bf16.msra.mxu1 %v8327_v53  ;;  %v420_v53 = vld [vmem:[#allocation5 + $0xa18] sm:$0xff] }
  0xf0   :  { %3490 = vmatprep.subr.bf16.mxu1 %v8312_v59  ;;  %v7930_v59 = vcombine.high %v164_v51, %v172_v52  ;;  %v8185_v3 = vcombine.low %v420_v53, %v428_v55  ;;  %v572_v51 = vld [vmem:[#allocation5 + $0xed8] sm:$0xff] }
  0xf1   :  { %3448 = vmatpush2.bf16.msra.mxu0 %v8055_v61  ;;  %v156_v61 = vld [vmem:[#allocation5 + $0x1d8] sm:$0xff] }
  0xf2   :  { %3449 = vmatprep.subr.bf16.mxu0 %v8040_v0  ;;  %v8186_v0 = vcombine.high %v420_v53, %v428_v55  ;;  %v7913_v10 = vcombine.low %v148_v60, %v156_v61  ;;  %v292_v55 = vld [vmem:[#allocation5 + $0x618] sm:$0xff] }
  0xf3   :  { %3491 = vmatpush2.bf16.msra.mxu1 %v8311_v62  ;;  %v404_v62 = vld [vmem:[#allocation5 + $0x998] sm:$0xff] }
  0xf4   :  { %3492 = vmatprep.subr.bf16.mxu1 %v8296_v4  ;;  %v7914_v4 = vcombine.high %v148_v60, %v156_v61  ;;  %v8169_v11 = vcombine.low %v404_v62, %v412_v1  ;;  %v556_v60 = vld [vmem:[#allocation5 + $0xe58] sm:$0xff] }
  0xf5   :  { %3450 = vmatpush2.bf16.msra.mxu0 %v8039_v6  ;;  %v140_v6 = vld [vmem:[#allocation5 + $0x158] sm:$0xff] }
  0xf6   :  { %3451 = vmatprep.subr.bf16.mxu0 %v8024_v8  ;;  %v8170_v8 = vcombine.high %v404_v62, %v412_v1  ;;  %v7897_v18 = vcombine.low %v132_v5, %v140_v6  ;;  %v276_v1 = vld [vmem:[#allocation5 + $0x598] sm:$0xff] }
  0xf7   :  { %3493 = vmatpush2.bf16.msra.mxu1 %v8295_v7  ;;  %v388_v7 = vld [vmem:[#allocation5 + $0x918] sm:$0xff] }
  0xf8   :  { %3494 = vmatprep.subr.bf16.mxu1 %v8280_v12  ;;  %v7898_v12 = vcombine.high %v132_v5, %v140_v6  ;;  %v8153_v19 = vcombine.low %v388_v7, %v396_v9  ;;  %v540_v5 = vld [vmem:[#allocation5 + $0xdd8] sm:$0xff] }
  0xf9   :  { %3452 = vmatpush2.bf16.msra.mxu0 %v8023_v14  ;;  %v124_v14 = vld [vmem:[#allocation5 + $0xd8] sm:$0xff] }
  0xfa   :  { %3453 = vmatprep.subr.bf16.mxu0 %v8008_v16  ;;  %v8154_v16 = vcombine.high %v388_v7, %v396_v9  ;;  %v7881_v28 = vcombine.low %v116_v13, %v124_v14  ;;  %v260_v9 = vld [vmem:[#allocation5 + $0x518] sm:$0xff] }
  0xfb   :  { %3495 = vmatpush2.bf16.msra.mxu1 %v8279_v15  ;;  %v372_v15 = vld [vmem:[#allocation5 + $0x898] sm:$0xff] }
  0xfc   :  { %3496 = vmatprep.subr.bf16.mxu1 %v8264_v21  ;;  %v7882_v21 = vcombine.high %v116_v13, %v124_v14  ;;  %v8137_v29 = vcombine.low %v372_v15, %v380_v17  ;;  %v524_v13 = vld [vmem:[#allocation5 + $0xd58] sm:$0xff] }
  0xfd   :  { %3454 = vmatpush2.bf16.msra.mxu0 %v8007_v24  ;;  %v108_v24 = vld [vmem:[#allocation5 + $0x58] sm:$0xff] }
  0xfe   :  { %3455 = vmatprep.subr.bf16.mxu0 %v7992_v26  ;;  %v8138_v26 = vcombine.high %v372_v15, %v380_v17  ;;  %v7865_v36 = vcombine.low %v100_v22, %v108_v24  ;;  %v244_v17 = vld [vmem:[#allocation5 + $0x498] sm:$0xff] }
  0xff   :  { %3497 = vmatpush2.bf16.msra.mxu1 %v8263_v25  ;;  %v356_v25 = vld [vmem:[#allocation5 + $0x818] sm:$0xff] }
 0x100   :  { %3498 = vmatprep.subr.bf16.mxu1 %v8248_v30  ;;  %v7866_v30 = vcombine.high %v100_v22, %v108_v24  ;;  %v8121_v37 = vcombine.low %v356_v25, %v364_v27  ;;  %v508_v22 = vld [vmem:[#allocation5 + $0xcd8] sm:$0xff] }
 0x101   :  { %3456 = vmatpush2.bf16.msra.mxu0 %v7991_v32  ;;  %v348_v32 = vld [vmem:[#allocation5 + $0x7d8] sm:$0xff] }
 0x102   :  { %3511 = vmatprep.subr.bf16.mxu0 %v7978_v34  ;;  %v8122_v34 = vcombine.high %v356_v25, %v364_v27  ;;  %v8105_v44 = vcombine.low %v340_v31, %v348_v32  ;;  %v613_v25 = vlaneseq }
 0x103   :  { %3499 = vmatpush2.bf16.msra.mxu1 %v8247_v33  ;;  %v596_v33 = vld [vmem:[#allocation5 + $0xf98] sm:$0xff] }
 0x104   :  { %3554 = vmatprep.subr.bf16.mxu1 %v8234_v38  ;;  %3458 = vmatmul.mubr.bf16.vlgmr.msra.gmra.mxu0 %v9872_v20  ;;  %v8106_v38 = vcombine.high %v340_v31, %v348_v32  ;;  %v8361_v45 = vcombine.low %v596_v33, %v604_v35  ;;  %v492_v32 = vld [vmem:[#allocation5 + $0xc58] sm:$0xff] }
 0x105   :  { %3512 = vmatpush1.bf16.msra.mxu0 %v7977_v40  ;;  %3543 = vmatprep.mubr.bf16.mxu0 %v9866_v58  ;;  %v332_v40 = vld [vmem:[#allocation5 + $0x758] sm:$0xff] }
 0x106   :  { %3501 = vmatmul.mubr.bf16.vlgmr.msra.gmra.mxu1 %v9874_v23  ;;  %3513 = vmatprep.subr.bf16.mxu0 %v7962_v42  ;;  %v8362_v42 = vcombine.high %v596_v33, %v604_v35  ;;  %v8089_v52 = vcombine.low %v324_v39, %v332_v40 }
 0x107   :  { %3555 = vmatpush1.bf16.msra.mxu1 %v8233_v41  ;;  %3586 = vmatprep.mubr.bf16.mxu1 %v9868_v63  ;;  %v580_v41 = vld [vmem:[#allocation5 + $0xf18] sm:$0xff] }
 0x108   :  { %3556 = vmatprep.subr.bf16.mxu1 %v8218_v46  ;;  %v8090_v46 = vcombine.high %v324_v39, %v332_v40  ;;  %v8345_v53 = vcombine.low %v580_v41, %v588_v43  ;;  %v469_v39 = vld [vmem:[#allocation5 + $0xba0] sm:$0xff] }
 0x109   :  { %3514 = vmatpush1.bf16.msra.mxu0 %v7961_v48  ;;  %v316_v48 = vld [vmem:[#allocation5 + $0x6d8] sm:$0xff] }
 0x10a   :  { %3515 = vmatprep.subr.bf16.mxu0 %v7946_v50  ;;  %v8346_v50 = vcombine.high %v580_v41, %v588_v43  ;;  %v8073_v61 = vcombine.low %v308_v47, %v316_v48  ;;  %v477_v41 = vld [vmem:[#allocation5 + $0xbe0] sm:$0xff] }
 0x10b   :  { %3557 = vmatpush1.bf16.msra.mxu1 %v8217_v49  ;;  %v564_v49 = vld [vmem:[#allocation5 + $0xe98] sm:$0xff] }
 0x10c   :  { %3558 = vmatprep.subr.bf16.mxu1 %v8202_v54  ;;  %v8074_v54 = vcombine.high %v308_v47, %v316_v48  ;;  %v8329_v62 = vcombine.low %v564_v49, %v572_v51  ;;  %v197_v47 = vld [vmem:[#allocation5 + $0x320] sm:$0xff] }
 0x10d   :  { %3516 = vmatpush1.bf16.msra.mxu0 %v7945_v56  ;;  %v300_v56 = vld [vmem:[#allocation5 + $0x658] sm:$0xff]  ;;  %v205_v48 = vld [vmem:[#allocation5 + $0x360] sm:$0xff] }
 0x10e   :  { %3517 = vmatprep.subr.bf16.mxu0 %v7930_v59  ;;  %v8330_v59 = vcombine.high %v564_v49, %v572_v51  ;;  %v8057_v6 = vcombine.low %v292_v55, %v300_v56  ;;  %v453_v49 = vld [vmem:[#allocation5 + $0xb20] sm:$0xff] }
 0x10f   :  { %3559 = vmatpush1.bf16.msra.mxu1 %v8201_v57  ;;  %v548_v57 = vld [vmem:[#allocation5 + $0xe18] sm:$0xff]  ;;  %v461_v51 = vld [vmem:[#allocation5 + $0xb60] sm:$0xff] }
 0x110   :  { %3560 = vmatprep.subr.bf16.mxu1 %v8186_v0  ;;  %v8058_v0 = vcombine.high %v292_v55, %v300_v56  ;;  %v8313_v7 = vcombine.low %v548_v57, %v556_v60  ;;  %v7964_v55 = vcombine.high %v197_v47, %v205_v48  ;;  %v181_v56 = vld [vmem:[#allocation5 + $0x2a0] sm:$0xff] }
 0x111   :  { %3518 = vmatpush1.bf16.msra.mxu0 %v7929_v2  ;;  %v284_v2 = vld [vmem:[#allocation5 + $0x5d8] sm:$0xff] }
 0x112   :  { %3519 = vmatprep.subr.bf16.mxu0 %v7914_v4  ;;  %v8314_v4 = vcombine.high %v548_v57, %v556_v60  ;;  %v8041_v14 = vcombine.low %v276_v1, %v284_v2  ;;  %v189_v57 = vld [vmem:[#allocation5 + $0x2e0] sm:$0xff]  ;;  %v8220_v60 = vcombine.high %v453_v49, %v461_v51 }
 0x113   :  { %3561 = vmatpush1.bf16.msra.mxu1 %v8185_v3  ;;  %v532_v3 = vld [vmem:[#allocation5 + $0xd98] sm:$0xff] }
 0x114   :  { %3562 = vmatprep.subr.bf16.mxu1 %v8170_v8  ;;  %v8042_v8 = vcombine.high %v276_v1, %v284_v2  ;;  %v8297_v15 = vcombine.low %v532_v3, %v540_v5  ;;  %v7963_v2 = vcombine.low %v197_v47, %v205_v48  ;;  %v381_v48 = vld [vmem:[#allocation5 + $0x8e0] sm:$0xff] }
 0x115   :  { %3520 = vmatpush1.bf16.msra.mxu0 %v7913_v10  ;;  %v268_v10 = vld [vmem:[#allocation5 + $0x558] sm:$0xff] }
 0x116   :  { %3521 = vmatprep.subr.bf16.mxu0 %v7898_v12  ;;  %v8298_v12 = vcombine.high %v532_v3, %v540_v5  ;;  %v8025_v24 = vcombine.low %v260_v9, %v268_v10  ;;  %v7948_v5 = vcombine.high %v181_v56, %v189_v57 }
 0x117   :  { %3563 = vmatpush1.bf16.msra.mxu1 %v8169_v11  ;;  %v516_v11 = vld [vmem:[#allocation5 + $0xd18] sm:$0xff] }
 0x118   :  { %3564 = vmatprep.subr.bf16.mxu1 %v8154_v16  ;;  %v8026_v16 = vcombine.high %v260_v9, %v268_v10 }
 0x119   :  { %3522 = vmatpush1.bf16.msra.mxu0 %v7897_v18  ;;  %v252_v18 = vld [vmem:[#allocation5 + $0x4d8] sm:$0xff] }
 0x11a   :  { %3523 = vmatprep.subr.bf16.mxu0 %v7882_v21  ;;  %v8282_v21 = vcombine.high %v516_v11, %v524_v13  ;;  %v8010_v27 = vcombine.high %v244_v17, %v252_v18  ;;  %v8009_v33 = vcombine.low %v244_v17, %v252_v18 }
 0x11b   :  { %3565 = vmatpush1.bf16.msra.mxu1 %v8153_v19  ;;  %v500_v19 = vld [vmem:[#allocation5 + $0xc98] sm:$0xff] }
 0x11c   :  { %3566 = vmatprep.subr.bf16.mxu1 %v8138_v26  ;;  %v8281_v26 = vcombine.low %v516_v11, %v524_v13  ;;  %v8266_v31 = vcombine.high %v500_v19, %v508_v22  ;;  %v8265_v35 = vcombine.low %v500_v19, %v508_v22  ;;  %v149_v19 = vld [vmem:[#allocation5 + $0x1a0] sm:$0xff] }
 0x11d   :  { %3524 = vmatpush1.bf16.msra.mxu0 %v7881_v28  ;;  %v228_v28 = vld [vmem:[#allocation5 + $0x418] sm:$0xff]  ;;  %v405_v22 = vld [vmem:[#allocation5 + $0x9a0] sm:$0xff] }
 0x11e   :  { %3525 = vmatprep.subr.bf16.mxu0 %v7866_v30  ;;  %v484_v30 = vld [vmem:[#allocation5 + $0xc18] sm:$0xff] }
 0x11f   :  { %3567 = vmatpush1.bf16.msra.mxu1 %v8137_v29  ;;  %v236_v29 = vld [vmem:[#allocation5 + $0x458] sm:$0xff]  ;;  %v8250_v40 = vcombine.high %v484_v30, %v492_v32 }
 0x120   :  { %3568 = vmatprep.subr.bf16.mxu1 %v8122_v34  ;;  %v9888_v34 = vshrl.u32 %v613_v25, 7  ;;  %v7993_v43 = vcombine.low %v228_v28, %v236_v29 }
 0x121   :  { %3526 = vmatpush1.bf16.msra.mxu0 %v7865_v36  ;;  %v7994_v36 = vcombine.high %v228_v28, %v236_v29 }
 0x122   :  { %3527 = vmatprep.subr.bf16.mxu0 %v8106_v38  ;;  %v221_v38 = vld [vmem:[#allocation5 + $0x3e0] sm:$0xff] }
 0x123   :  { %3569 = vmatpush1.bf16.msra.mxu1 %v8121_v37  ;;  %v213_v37 = vld [vmem:[#allocation5 + $0x3a0] sm:$0xff] }
 0x124   :  { %3570 = vmatprep.subr.bf16.mxu1 %v8362_v42  ;;  %v9890_v42 = vld [vmem:[#allocation7] sm:$0xff] }
 0x125   :  { %3528 = vmatpush2.bf16.msra.mxu0 %v8105_v44  ;;  %v9893_v44 = vsub.s32 0, %v9888_v34 }
 0x126   :  { %3529 = vmatprep.subr.bf16.mxu0 %v8090_v46  ;;  %v7980_v46 = vcombine.high %v213_v37, %v221_v38 }
 0x127   :  { %3571 = vmatpush2.bf16.msra.mxu1 %v8361_v45  ;;  %v8249_v45 = vcombine.low %v484_v30, %v492_v32  ;;  %v133_v32 = vld [vmem:[#allocation5 + $0x120] sm:$0xff] }
 0x128   :  { %3572 = vmatprep.subr.bf16.mxu1 %v8346_v50  ;;  %v8236_v50 = vcombine.high %v469_v39, %v477_v41 }
 0x129   :  { %3530 = vmatpush2.bf16.msra.mxu0 %v8089_v52  ;;  %v616_v52 = vrot.slane %v9890_v42, %v9893_v44 }
 0x12a   :  { %3531 = vmatprep.subr.bf16.mxu0 %v8074_v54  ;;  %v8235_v54 = vcombine.low %v469_v39, %v477_v41 }
 0x12b   :  { %3573 = vmatpush2.bf16.msra.mxu1 %v8345_v53  ;;  %v7979_v53 = vcombine.low %v213_v37, %v221_v38  ;;  %v397_v38 = vld [vmem:[#allocation5 + $0x960] sm:$0xff] }
 0x12c   :  { %3574 = vmatprep.subr.bf16.mxu1 %v8330_v59  ;;  %v437_v59 = vld [vmem:[#allocation5 + $0xaa0] sm:$0xff] }
 0x12d   :  { %3532 = vmatpush2.bf16.msra.mxu0 %v8073_v61  ;;  %v445_v61 = vld [vmem:[#allocation5 + $0xae0] sm:$0xff] }
 0x12e   :  { %3533 = vmatprep.subr.bf16.mxu0 %v8058_v0  ;;  %v8204_v11 = vcombine.high %v437_v59, %v445_v61  ;;  %v8203_v17 = vcombine.low %v437_v59, %v445_v61  ;;  %v341_v61 = vld [vmem:[#allocation5 + $0x7a0] sm:$0xff] }
 0x12f   :  { %3575 = vmatpush2.bf16.msra.mxu1 %v8329_v62 }
 0x130   :  { %3576 = vmatprep.subr.bf16.mxu1 %v8314_v4  ;;  %v8219_v4 = vcombine.low %v453_v49, %v461_v51 }
 0x131   :  { %3534 = vmatpush2.bf16.msra.mxu0 %v8057_v6  ;;  %v165_v6 = vld [vmem:[#allocation5 + $0x220] sm:$0xff] }
 0x132   :  { %3535 = vmatprep.subr.bf16.mxu0 %v8042_v8  ;;  %v421_v8 = vld [vmem:[#allocation5 + $0xa20] sm:$0xff] }
 0x133   :  { %3577 = vmatpush2.bf16.msra.mxu1 %v8313_v7  ;;  %v173_v7 = vld [vmem:[#allocation5 + $0x260] sm:$0xff] }
 0x134   :  { %3578 = vmatprep.subr.bf16.mxu1 %v8298_v12  ;;  %v429_v12 = vld [vmem:[#allocation5 + $0xa60] sm:$0xff]  ;;  %v7932_v18 = vcombine.high %v165_v6, %v173_v7  ;;  %v7931_v29 = vcombine.low %v165_v6, %v173_v7 }
 0x135   :  { %3536 = vmatpush2.bf16.msra.mxu0 %v8041_v14  ;;  %v8188_v25 = vcombine.high %v421_v8, %v429_v12  ;;  %v8187_v30 = vcombine.low %v421_v8, %v429_v12  ;;  %v325_v7 = vld [vmem:[#allocation5 + $0x720] sm:$0xff] }
 0x136   :  { %3537 = vmatprep.subr.bf16.mxu0 %v8026_v16  ;;  %v333_v8 = vld [vmem:[#allocation5 + $0x760] sm:$0xff] }
 0x137   :  { %3579 = vmatpush2.bf16.msra.mxu1 %v8297_v15  ;;  %v7947_v15 = vcombine.low %v181_v56, %v189_v57  ;;  %v365_v56 = vld [vmem:[#allocation5 + $0x860] sm:$0xff] }
 0x138   :  { %3580 = vmatprep.subr.bf16.mxu1 %v8282_v21  ;;  %v157_v21 = vld [vmem:[#allocation5 + $0x1e0] sm:$0xff] }
 0x139   :  { %3538 = vmatpush2.bf16.msra.mxu0 %v8025_v24  ;;  %v7915_v39 = vcombine.low %v149_v19, %v157_v21  ;;  %v589_v12 = vld [vmem:[#allocation5 + $0xf60] sm:$0xff] }
 0x13a   :  { %3539 = vmatprep.subr.bf16.mxu0 %v8010_v27 }
 0x13b   :  { %3581 = vmatpush2.bf16.msra.mxu1 %v8281_v26  ;;  %v413_v26 = vld [vmem:[#allocation5 + $0x9e0] sm:$0xff] }
 0x13c   :  { %3582 = vmatprep.subr.bf16.mxu1 %v8266_v31  ;;  %v7916_v31 = vcombine.high %v149_v19, %v157_v21  ;;  %v8172_v37 = vcombine.high %v405_v22, %v413_v26  ;;  %v573_v21 = vld [vmem:[#allocation5 + $0xee0] sm:$0xff] }
 0x13d   :  { %3540 = vmatpush2.bf16.msra.mxu0 %v8009_v33  ;;  %v141_v33 = vld [vmem:[#allocation5 + $0x160] sm:$0xff] }
 0x13e   :  { %3541 = vmatprep.subr.bf16.mxu0 %v7994_v36  ;;  %v7900_v41 = vcombine.high %v133_v32, %v141_v33  ;;  %v7899_v49 = vcombine.low %v133_v32, %v141_v33 }
 0x13f   :  { %3583 = vmatpush2.bf16.msra.mxu1 %v8265_v35  ;;  %v389_v35 = vld [vmem:[#allocation5 + $0x920] sm:$0xff] }
 0x140   :  { %3584 = vmatprep.subr.bf16.mxu1 %v8250_v40  ;;  %v8171_v40 = vcombine.low %v405_v22, %v413_v26  ;;  %v8156_v47 = vcombine.high %v389_v35, %v397_v38  ;;  %v8091_v22 = vcombine.low %v325_v7, %v333_v8  ;;  %v293_v26 = vld [vmem:[#allocation5 + $0x620] sm:$0xff] }
 0x141   :  { %3542 = vmatpush2.bf16.msra.mxu0 %v7993_v43  ;;  %v117_v43 = vld [vmem:[#allocation5 + $0xa0] sm:$0xff] }
 0x142   :  { %3597 = vmatprep.subr.bf16.mxu0 %v7980_v46  ;;  %v373_v46 = vld [vmem:[#allocation5 + $0x8a0] sm:$0xff] }
 0x143   :  { %3585 = vmatpush2.bf16.msra.mxu1 %v8249_v45  ;;  %v125_v45 = vld [vmem:[#allocation5 + $0xe0] sm:$0xff]  ;;  %v8139_v59 = vcombine.low %v373_v46, %v381_v48 }
 0x144   :  { %3640 = vmatprep.subr.bf16.mxu1 %v8236_v50  ;;  %v3287_v62 = vpop.f32.mrf.mxu0  ;;  %3544 = vmatmul.mubr.bf16.vlgmr.msra.gmra.mxu0 %v9872_v20  ;;  %v8155_v50 = vcombine.low %v389_v35, %v397_v38  ;;  %v7884_v51 = vcombine.high %v117_v43, %v125_v45  ;;  %v7883_v57 = vcombine.low %v117_v43, %v125_v45  ;;  %v277_v35 = vld [vmem:[#allocation5 + $0x5a0] sm:$0xff] }
 0x145   :  { %v3288_v0 = vadd.f32 %v3287_v62, %v616_v52  ;;  %3598 = vmatpush1.bf16.msra.mxu0 %v7979_v53  ;;  %3629 = vmatprep.mubr.bf16.mxu0 %v9866_v58  ;;  %v109_v53 = vld [vmem:[#allocation5 + $0x60] sm:$0xff] }
 0x146   :  { %v3330_v1 = vpop.f32.mrf.mxu1  ;;  %3587 = vmatmul.mubr.bf16.vlgmr.msra.gmra.mxu1 %v9874_v23  ;;  %v9899_v3 = vpop.f32.mrf.mxu0  ;;  %3599 = vmatprep.subr.bf16.mxu0 %v7964_v55  ;;  %v8140_v55 = vcombine.high %v373_v46, %v381_v48  ;;  %v349_v62 = vld [vmem:[#allocation5 + $0x7e0] sm:$0xff] }
 0x147   :  { %3641 = vmatpush1.bf16.msra.mxu1 %v8235_v54  ;;  %v3331_v9 = vadd.f32 %v3330_v1, %v3288_v0  ;;  %3672 = vmatprep.mubr.bf16.mxu1 %v9868_v63  ;;  %v357_v54 = vld [vmem:[#allocation5 + $0x820] sm:$0xff]  ;;  %v8108_v6 = vcombine.high %v341_v61, %v349_v62 }
 0x148   :  { %v9901_v10 = vpop.f32.mrf.mxu1  ;;  %3642 = vmatprep.subr.bf16.mxu1 %v8220_v60  ;;  %v3291_v13 = vpop.f32.mrf.mxu0  ;;  %v597_v0 = vld [vmem:[#allocation5 + $0xfa0] sm:$0xff]  ;;  %v8124_v1 = vcombine.high %v357_v54, %v365_v56 }
 0x149   :  { %v3292_v14 = vadd.f32 %v3291_v13, %v616_v52  ;;  %3600 = vmatpush1.bf16.msra.mxu0 %v7963_v2  ;;  %v3941_v27 = vmax.f32 %v3331_v9, 0.0  ;;  %v101_v52 = vld [vmem:[#allocation5 + $0x20] sm:$0xff]  ;;  %v8107_v13 = vcombine.low %v341_v61, %v349_v62 }
 0x14a   :  { %v3334_v16 = vpop.f32.mrf.mxu1  ;;  %3601 = vmatprep.subr.bf16.mxu0 %v7948_v5  ;;  %v7868_v60 = vcombine.high %v101_v52, %v109_v53  ;;  %v605_v2 = vld [vmem:[#allocation5 + $0xfe0] sm:$0xff]  ;;  %v8123_v5 = vcombine.low %v357_v54, %v365_v56 }
 0x14b   :  { %3643 = vmatpush1.bf16.msra.mxu1 %v8219_v4  ;;  %v3335_v24 = vadd.f32 %v3334_v16, %v3292_v14  ;;  %v7867_v4 = vcombine.low %v101_v52, %v109_v53  ;;  %v581_v9 = vld [vmem:[#allocation5 + $0xf20] sm:$0xff]  ;;  %v8363_v14 = vcombine.low %v597_v0, %v605_v2 }
 0x14c   :  { %3644 = vmatprep.subr.bf16.mxu1 %v8204_v11  ;;  %v8364_v11 = vcombine.high %v597_v0, %v605_v2  ;;  %v309_v16 = vld [vmem:[#allocation5 + $0x6a0] sm:$0xff]  ;;  %v8348_v19 = vcombine.high %v581_v9, %v589_v12 }
 0x14d   :  { %v3957_v28 = vmax.f32 %v3335_v24, 0.0  ;;  %3602 = vmatpush1.bf16.msra.mxu0 %v7947_v15  ;;  %v8092_v15 = vcombine.high %v325_v7, %v333_v8  ;;  %v8347_v24 = vcombine.low %v581_v9, %v589_v12  ;;  %v533_v38 = vld [vmem:[#allocation5 + $0xda0] sm:$0xff]  ;;  %v214_v9 = vld [vmem:[#allocation5 + $0x3a8] sm:$0xff] }
 0x14e   :  { %3603 = vmatprep.subr.bf16.mxu0 %v7932_v18  ;;  %v565_v18 = vld [vmem:[#allocation5 + $0xea0] sm:$0xff]  ;;  %v470_v12 = vld [vmem:[#allocation5 + $0xba8] sm:$0xff] }
 0x14f   :  { %3645 = vmatpush1.bf16.msra.mxu1 %v8203_v17  ;;  %v9905_v36 = vpack.c.bf16 %v3957_v28, %v3941_v27  ;;  %v317_v17 = vld [vmem:[#allocation5 + $0x6e0] sm:$0xff]  ;;  %v8331_v32 = vcombine.low %v565_v18, %v573_v21 }
 0x150   :  { %3646 = vmatprep.subr.bf16.mxu1 %v8188_v25  ;;  %v8076_v25 = vcombine.high %v309_v16, %v317_v17  ;;  %v301_v27 = vld [vmem:[#allocation5 + $0x660] sm:$0xff] }
 0x151   :  { %3604 = vmatpush1.bf16.msra.mxu0 %v7931_v29  ;;  %v549_v28 = vld [vmem:[#allocation5 + $0xe20] sm:$0xff]  ;;  %v8332_v29 = vcombine.high %v565_v18, %v573_v21  ;;  %v8060_v33 = vcombine.high %v293_v26, %v301_v27  ;;  %v206_v21 = vld [vmem:[#allocation5 + $0x368] sm:$0xff] }
 0x152   :  { %3605 = vmatprep.subr.bf16.mxu0 %v7916_v31  ;;  %v8075_v31 = vcombine.low %v309_v16, %v317_v17  ;;  %v261_v46 = vld [vmem:[#allocation5 + $0x520] sm:$0xff]  ;;  %v9908_v16 = vsub.s32 2, %v9888_v34 }
 0x153   :  { %3647 = vmatpush1.bf16.msra.mxu1 %v8187_v30  ;;  %v557_v30 = vld [vmem:[#allocation5 + $0xe60] sm:$0xff] }
 0x154   :  { %3648 = vmatprep.subr.bf16.mxu1 %v8172_v37  ;;  %v285_v37 = vld [vmem:[#allocation5 + $0x5e0] sm:$0xff]  ;;  %v8315_v43 = vcombine.low %v549_v28, %v557_v30 }
 0x155   :  { %3606 = vmatpush1.bf16.msra.mxu0 %v7915_v39  ;;  %v8316_v39 = vcombine.high %v549_v28, %v557_v30  ;;  %v8044_v45 = vcombine.high %v277_v35, %v285_v37  ;;  %v517_v48 = vld [vmem:[#allocation5 + $0xd20] sm:$0xff]  ;;  %v9912_v28 = vpop.f32.mrf.mxu0 }
 0x156   :  { %3607 = vmatprep.subr.bf16.mxu0 %v7900_v41  ;;  %v8059_v41 = vcombine.low %v293_v26, %v301_v27  ;;  %v245_v54 = vld [vmem:[#allocation5 + $0x4a0] sm:$0xff]  ;;  %v624_v26 = vrot.slane %v9890_v42, %v9908_v16 }
 0x157   :  { %3649 = vmatpush1.bf16.msra.mxu1 %v8171_v40  ;;  %v541_v40 = vld [vmem:[#allocation5 + $0xde0] sm:$0xff] }
 0x158   :  { %3650 = vmatprep.subr.bf16.mxu1 %v8156_v47  ;;  %v269_v47 = vld [vmem:[#allocation5 + $0x560] sm:$0xff]  ;;  %v8299_v52 = vcombine.low %v533_v38, %v541_v40 }
 0x159   :  { %3608 = vmatpush1.bf16.msra.mxu0 %v7899_v49  ;;  %v8300_v49 = vcombine.high %v533_v38, %v541_v40  ;;  %v8028_v53 = vcombine.high %v261_v46, %v269_v47  ;;  %v501_v56 = vld [vmem:[#allocation5 + $0xca0] sm:$0xff]  ;;  %v446_v38 = vld [vmem:[#allocation5 + $0xae8] sm:$0xff] }
 0x15a   :  { %3609 = vmatprep.subr.bf16.mxu0 %v7884_v51  ;;  %v8043_v51 = vcombine.low %v277_v35, %v285_v37  ;;  %v229_v0 = vld [vmem:[#allocation5 + $0x420] sm:$0xff]  ;;  %v9914_v35 = vpop.f32.mrf.mxu1 }
 0x15b   :  { %3651 = vmatpush1.bf16.msra.mxu1 %v8155_v50  ;;  %v525_v50 = vld [vmem:[#allocation5 + $0xd60] sm:$0xff] }
 0x15c   :  { %3652 = vmatprep.subr.bf16.mxu1 %v8140_v55  ;;  %v253_v55 = vld [vmem:[#allocation5 + $0x4e0] sm:$0xff]  ;;  %v8283_v61 = vcombine.low %v517_v48, %v525_v50 }
 0x15d   :  { %3610 = vmatpush1.bf16.msra.mxu0 %v7883_v57  ;;  %v8284_v57 = vcombine.high %v517_v48, %v525_v50  ;;  %v8012_v62 = vcombine.high %v245_v54, %v253_v55  ;;  %v485_v2 = vld [vmem:[#allocation5 + $0xc20] sm:$0xff]  ;;  %v166_v50 = vld [vmem:[#allocation5 + $0x228] sm:$0xff] }
 0x15e   :  { %3611 = vmatprep.subr.bf16.mxu0 %v7868_v60  ;;  %v8027_v60 = vcombine.low %v261_v46, %v269_v47 }
 0x15f   :  { %3653 = vmatpush1.bf16.msra.mxu1 %v8139_v59  ;;  %v509_v59 = vld [vmem:[#allocation5 + $0xce0] sm:$0xff] }
 0x160   :  { %3654 = vmatprep.subr.bf16.mxu1 %v8124_v1  ;;  %v237_v1 = vld [vmem:[#allocation5 + $0x460] sm:$0xff]  ;;  %v8267_v7 = vcombine.low %v501_v56, %v509_v59 }
 0x161   :  { %3612 = vmatpush1.bf16.msra.mxu0 %v7867_v4  ;;  %v8268_v4 = vcombine.high %v501_v56, %v509_v59  ;;  %v7996_v8 = vcombine.high %v229_v0, %v237_v1 }
 0x162   :  { %3613 = vmatprep.subr.bf16.mxu0 %v8108_v6  ;;  %v8011_v6 = vcombine.low %v245_v54, %v253_v55  ;;  %v430_v54 = vld [vmem:[#allocation5 + $0xa68] sm:$0xff] }
 0x163   :  { %3655 = vmatpush1.bf16.msra.mxu1 %v8123_v5  ;;  %v493_v5 = vld [vmem:[#allocation5 + $0xc60] sm:$0xff] }
 0x164   :  { %3656 = vmatprep.subr.bf16.mxu1 %v8364_v11  ;;  %v222_v11 = vld [vmem:[#allocation5 + $0x3e8] sm:$0xff]  ;;  %v8251_v17 = vcombine.low %v485_v2, %v493_v5 }
 0x165   :  { %3614 = vmatpush2.bf16.msra.mxu0 %v8107_v13  ;;  %v8252_v13 = vcombine.high %v485_v2, %v493_v5  ;;  %v7982_v18 = vcombine.high %v214_v9, %v222_v11  ;;  %v7981_v27 = vcombine.low %v214_v9, %v222_v11  ;;  %v406_v2 = vld [vmem:[#allocation5 + $0x9a8] sm:$0xff] }
 0x166   :  { %3615 = vmatprep.subr.bf16.mxu0 %v8092_v15  ;;  %v7995_v15 = vcombine.low %v229_v0, %v237_v1  ;;  %v150_v0 = vld [vmem:[#allocation5 + $0x1a8] sm:$0xff] }
 0x167   :  { %3657 = vmatpush2.bf16.msra.mxu1 %v8363_v14  ;;  %v478_v14 = vld [vmem:[#allocation5 + $0xbe8] sm:$0xff] }
 0x168   :  { %3658 = vmatprep.subr.bf16.mxu1 %v8348_v19  ;;  %v198_v19 = vld [vmem:[#allocation5 + $0x328] sm:$0xff] }
 0x169   :  { %3616 = vmatpush2.bf16.msra.mxu0 %v8091_v22  ;;  %v454_v22 = vld [vmem:[#allocation5 + $0xb28] sm:$0xff]  ;;  %v7966_v30 = vcombine.high %v198_v19, %v206_v21 }
 0x16a   :  { %3617 = vmatprep.subr.bf16.mxu0 %v8076_v25  ;;  %v462_v25 = vld [vmem:[#allocation5 + $0xb68] sm:$0xff] }
 0x16b   :  { %3659 = vmatpush2.bf16.msra.mxu1 %v8347_v24  ;;  %v8238_v24 = vcombine.high %v470_v12, %v478_v14  ;;  %v8222_v37 = vcombine.high %v454_v22, %v462_v25  ;;  %v158_v1 = vld [vmem:[#allocation5 + $0x1e8] sm:$0xff] }
 0x16c   :  { %3660 = vmatprep.subr.bf16.mxu1 %v8332_v29  ;;  %v8237_v29 = vcombine.low %v470_v12, %v478_v14  ;;  %v7918_v9 = vcombine.high %v150_v0, %v158_v1  ;;  %v142_v14 = vld [vmem:[#allocation5 + $0x168] sm:$0xff] }
 0x16d   :  { %3618 = vmatpush2.bf16.msra.mxu0 %v8075_v31  ;;  %v182_v31 = vld [vmem:[#allocation5 + $0x2a8] sm:$0xff] }
 0x16e   :  { %3619 = vmatprep.subr.bf16.mxu0 %v8060_v33  ;;  %v438_v33 = vld [vmem:[#allocation5 + $0xaa8] sm:$0xff] }
 0x16f   :  { %3661 = vmatpush2.bf16.msra.mxu1 %v8331_v32  ;;  %v190_v32 = vld [vmem:[#allocation5 + $0x2e8] sm:$0xff]  ;;  %v8205_v59 = vcombine.low %v438_v33, %v446_v38 }
 0x170   :  { %3662 = vmatprep.subr.bf16.mxu1 %v8316_v39  ;;  %v7950_v46 = vcombine.high %v182_v31, %v190_v32  ;;  %v7949_v56 = vcombine.low %v182_v31, %v190_v32 }
 0x171   :  { %3620 = vmatpush2.bf16.msra.mxu0 %v8059_v41  ;;  %v7965_v41 = vcombine.low %v198_v19, %v206_v21 }
 0x172   :  { %3621 = vmatprep.subr.bf16.mxu0 %v8044_v45  ;;  %v8221_v45 = vcombine.low %v454_v22, %v462_v25  ;;  %v126_v25 = vld [vmem:[#allocation5 + $0xe8] sm:$0xff] }
 0x173   :  { %3663 = vmatpush2.bf16.msra.mxu1 %v8315_v43 }
 0x174   :  { %3664 = vmatprep.subr.bf16.mxu1 %v8300_v49  ;;  %v8206_v49 = vcombine.high %v438_v33, %v446_v38  ;;  %v102_v33 = vld [vmem:[#allocation5 + $0x28] sm:$0xff] }
 0x175   :  { %3622 = vmatpush2.bf16.msra.mxu0 %v8043_v51  ;;  %v174_v51 = vld [vmem:[#allocation5 + $0x268] sm:$0xff] }
 0x176   :  { %3623 = vmatprep.subr.bf16.mxu0 %v8028_v53  ;;  %v422_v53 = vld [vmem:[#allocation5 + $0xa28] sm:$0xff] }
 0x177   :  { %3665 = vmatpush2.bf16.msra.mxu1 %v8299_v52  ;;  %v358_v38 = vld [vmem:[#allocation5 + $0x828] sm:$0xff] }
 0x178   :  { %3666 = vmatprep.subr.bf16.mxu1 %v8284_v57 }
 0x179   :  { %3624 = vmatpush2.bf16.msra.mxu0 %v8027_v60  ;;  %v7934_v60 = vcombine.high %v166_v50, %v174_v51 }
 0x17a   :  { %3625 = vmatprep.subr.bf16.mxu0 %v8012_v62  ;;  %v8190_v62 = vcombine.high %v422_v53, %v430_v54 }
 0x17b   :  { %3667 = vmatpush2.bf16.msra.mxu1 %v8283_v61 }
 0x17c   :  { %3668 = vmatprep.subr.bf16.mxu1 %v8268_v4  ;;  %v414_v4 = vld [vmem:[#allocation5 + $0x9e8] sm:$0xff] }
 0x17d   :  { %3626 = vmatpush2.bf16.msra.mxu0 %v8011_v6  ;;  %v8174_v12 = vcombine.high %v406_v2, %v414_v4  ;;  %v8173_v19 = vcombine.low %v406_v2, %v414_v4  ;;  %v318_v2 = vld [vmem:[#allocation5 + $0x6e8] sm:$0xff] }
 0x17e   :  { %3627 = vmatprep.subr.bf16.mxu0 %v7996_v8  ;;  %v8189_v8 = vcombine.low %v422_v53, %v430_v54  ;;  %v566_v4 = vld [vmem:[#allocation5 + $0xea8] sm:$0xff] }
 0x17f   :  { %3669 = vmatpush2.bf16.msra.mxu1 %v8267_v7  ;;  %v7933_v7 = vcombine.low %v166_v50, %v174_v51  ;;  %v606_v50 = vld [vmem:[#allocation5 + $0xfe8] sm:$0xff] }
 0x180   :  { %3670 = vmatprep.subr.bf16.mxu1 %v8252_v13  ;;  %v134_v13 = vld [vmem:[#allocation5 + $0x128] sm:$0xff] }
 0x181   :  { %3628 = vmatpush2.bf16.msra.mxu0 %v7995_v15  ;;  %v390_v15 = vld [vmem:[#allocation5 + $0x928] sm:$0xff]  ;;  %v7902_v21 = vcombine.high %v134_v13, %v142_v14 }
 0x182   :  { %3683 = vmatprep.subr.bf16.mxu0 %v7982_v18  ;;  %v7917_v18 = vcombine.low %v150_v0, %v158_v1  ;;  %v310_v1 = vld [vmem:[#allocation5 + $0x6a8] sm:$0xff] }
 0x183   :  { %3671 = vmatpush2.bf16.msra.mxu1 %v8251_v17  ;;  %v398_v17 = vld [vmem:[#allocation5 + $0x968] sm:$0xff] }
 0x184   :  { %3726 = vmatprep.subr.bf16.mxu1 %v8238_v24  ;;  %v3373_v39 = vpop.f32.mrf.mxu0  ;;  %3630 = vmatmul.mubr.bf16.vlgmr.msra.gmra.mxu0 %v9872_v20  ;;  %v8158_v22 = vcombine.high %v390_v15, %v398_v17  ;;  %v118_v24 = vld [vmem:[#allocation5 + $0xa8] sm:$0xff] }
 0x185   :  { %v3374_v40 = vadd.f32 %v3373_v39, %v624_v26  ;;  %3684 = vmatpush1.bf16.msra.mxu0 %v7981_v27  ;;  %3715 = vmatprep.mubr.bf16.mxu0 %v9866_v58  ;;  %v382_v27 = vld [vmem:[#allocation5 + $0x8e8] sm:$0xff]  ;;  %v7886_v31 = vcombine.high %v118_v24, %v126_v25 }
 0x186   :  { %v3416_v42 = vpop.f32.mrf.mxu1  ;;  %3673 = vmatmul.mubr.bf16.vlgmr.msra.gmra.mxu1 %v9874_v23  ;;  %v9918_v43 = vpop.f32.mrf.mxu0  ;;  %3685 = vmatprep.subr.bf16.mxu0 %v7966_v30  ;;  %v8157_v30 = vcombine.low %v390_v15, %v398_v17  ;;  %v366_v39 = vld [vmem:[#allocation5 + $0x868] sm:$0xff]  ;;  %v8077_v17 = vcombine.low %v310_v1, %v318_v2 }
 0x187   :  { %3727 = vmatpush1.bf16.msra.mxu1 %v8237_v29  ;;  %v3417_v47 = vadd.f32 %v3416_v42, %v3374_v40  ;;  %3758 = vmatprep.mubr.bf16.mxu1 %v9868_v63  ;;  %v7901_v29 = vcombine.low %v134_v13, %v142_v14  ;;  %v7885_v40 = vcombine.low %v118_v24, %v126_v25  ;;  %v302_v13 = vld [vmem:[#allocation5 + $0x668] sm:$0xff] }
 0x188   :  { %v9920_v48 = vpop.f32.mrf.mxu1  ;;  %3728 = vmatprep.subr.bf16.mxu1 %v8222_v37  ;;  %v3377_v52 = vpop.f32.mrf.mxu0  ;;  %v110_v37 = vld [vmem:[#allocation5 + $0x68] sm:$0xff] }
 0x189   :  { %v3378_v55 = vadd.f32 %v3377_v52, %v624_v26  ;;  %3686 = vmatpush1.bf16.msra.mxu0 %v7965_v41  ;;  %v3943_v5 = vmax.f32 %v3417_v47, 0.0  ;;  %v374_v26 = vld [vmem:[#allocation5 + $0x8a8] sm:$0xff]  ;;  %v7870_v41 = vcombine.high %v102_v33, %v110_v37  ;;  %v7869_v51 = vcombine.low %v102_v33, %v110_v37 }
 0x18a   :  { %v3420_v57 = vpop.f32.mrf.mxu1  ;;  %3687 = vmatprep.subr.bf16.mxu0 %v7950_v46  ;;  %v8142_v32 = vcombine.high %v374_v26, %v382_v27  ;;  %v8141_v42 = vcombine.low %v374_v26, %v382_v27  ;;  %v342_v46 = vld [vmem:[#allocation5 + $0x7a8] sm:$0xff]  ;;  %v8125_v52 = vcombine.low %v358_v38, %v366_v39 }
 0x18b   :  { %3729 = vmatpush1.bf16.msra.mxu1 %v8221_v45  ;;  %v3421_v61 = vadd.f32 %v3420_v57, %v3378_v55  ;;  %v8126_v45 = vcombine.high %v358_v38, %v366_v39  ;;  %v350_v47 = vld [vmem:[#allocation5 + $0x7e8] sm:$0xff] }
 0x18c   :  { %3730 = vmatprep.subr.bf16.mxu1 %v8206_v49  ;;  %v598_v49 = vld [vmem:[#allocation5 + $0xfa8] sm:$0xff]  ;;  %v8110_v53 = vcombine.high %v342_v46, %v350_v47 }
 0x18d   :  { %v3959_v6 = vmax.f32 %v3421_v61, 0.0  ;;  %3688 = vmatpush1.bf16.msra.mxu0 %v7949_v56  ;;  %v8366_v54 = vcombine.high %v598_v49, %v606_v50  ;;  %v326_v55 = vld [vmem:[#allocation5 + $0x728] sm:$0xff]  ;;  %v8365_v61 = vcombine.low %v598_v49, %v606_v50 }
 0x18e   :  { %3689 = vmatprep.subr.bf16.mxu0 %v7934_v60  ;;  %v334_v56 = vld [vmem:[#allocation5 + $0x768] sm:$0xff]  ;;  %v8109_v60 = vcombine.low %v342_v46, %v350_v47 }
 0x18f   :  { %3731 = vmatpush1.bf16.msra.mxu1 %v8205_v59  ;;  %v9924_v11 = vpack.c.bf16 %v3959_v6, %v3943_v5  ;;  %v582_v57 = vld [vmem:[#allocation5 + $0xf28] sm:$0xff]  ;;  %v8093_v6 = vcombine.low %v326_v55, %v334_v56 }
 0x190   :  { %3732 = vmatprep.subr.bf16.mxu1 %v8190_v62  ;;  %v590_v59 = vld [vmem:[#allocation5 + $0xf68] sm:$0xff]  ;;  %v8094_v62 = vcombine.high %v326_v55, %v334_v56 }
 0x191   :  { %3690 = vmatpush1.bf16.msra.mxu0 %v7933_v7  ;;  %v8350_v0 = vcombine.high %v582_v57, %v590_v59  ;;  %v574_v5 = vld [vmem:[#allocation5 + $0xee8] sm:$0xff]  ;;  %v8349_v7 = vcombine.low %v582_v57, %v590_v59 }
 0x192   :  { %3691 = vmatprep.subr.bf16.mxu0 %v7918_v9  ;;  %v8334_v9 = vcombine.high %v566_v4, %v574_v5  ;;  %v550_v14 = vld [vmem:[#allocation5 + $0xe28] sm:$0xff] }
 0x193   :  { %3733 = vmatpush1.bf16.msra.mxu1 %v8189_v8  ;;  %v8078_v8 = vcombine.high %v310_v1, %v318_v2  ;;  %v558_v15 = vld [vmem:[#allocation5 + $0xe68] sm:$0xff]  ;;  %v223_v1 = vld [vmem:[#allocation5 + $0x3f0] sm:$0xff] }
 0x194   :  { %3734 = vmatprep.subr.bf16.mxu1 %v8174_v12  ;;  %v294_v12 = vld [vmem:[#allocation5 + $0x628] sm:$0xff]  ;;  %v471_v2 = vld [vmem:[#allocation5 + $0xbb0] sm:$0xff] }
 0x195   :  { %3692 = vmatpush1.bf16.msra.mxu0 %v7917_v18  ;;  %v8333_v18 = vcombine.low %v566_v4, %v574_v5  ;;  %v286_v24 = vld [vmem:[#allocation5 + $0x5e8] sm:$0xff]  ;;  %v8061_v27 = vcombine.low %v294_v12, %v302_v13  ;;  %v479_v4 = vld [vmem:[#allocation5 + $0xbf0] sm:$0xff] }
 0x196   :  { %3693 = vmatprep.subr.bf16.mxu0 %v7902_v21  ;;  %v8318_v21 = vcombine.high %v550_v14, %v558_v15  ;;  %v534_v25 = vld [vmem:[#allocation5 + $0xda8] sm:$0xff] }
 0x197   :  { %3735 = vmatpush1.bf16.msra.mxu1 %v8173_v19  ;;  %v8062_v19 = vcombine.high %v294_v12, %v302_v13  ;;  %v542_v26 = vld [vmem:[#allocation5 + $0xde8] sm:$0xff]  ;;  %v199_v12 = vld [vmem:[#allocation5 + $0x330] sm:$0xff] }
 0x198   :  { %3736 = vmatprep.subr.bf16.mxu1 %v8158_v22  ;;  %v278_v22 = vld [vmem:[#allocation5 + $0x5a8] sm:$0xff]  ;;  %v207_v13 = vld [vmem:[#allocation5 + $0x370] sm:$0xff] }
 0x199   :  { %3694 = vmatpush1.bf16.msra.mxu0 %v7901_v29  ;;  %v8317_v29 = vcombine.low %v550_v14, %v558_v15  ;;  %v270_v33 = vld [vmem:[#allocation5 + $0x568] sm:$0xff]  ;;  %v8045_v39 = vcombine.low %v278_v22, %v286_v24  ;;  %v455_v14 = vld [vmem:[#allocation5 + $0xb30] sm:$0xff] }
 0x19a   :  { %3695 = vmatprep.subr.bf16.mxu0 %v7886_v31  ;;  %v8302_v31 = vcombine.high %v534_v25, %v542_v26  ;;  %v518_v37 = vld [vmem:[#allocation5 + $0xd28] sm:$0xff]  ;;  %v463_v15 = vld [vmem:[#allocation5 + $0xb70] sm:$0xff] }
 0x19b   :  { %3737 = vmatpush1.bf16.msra.mxu1 %v8157_v30  ;;  %v8046_v30 = vcombine.high %v278_v22, %v286_v24  ;;  %v526_v38 = vld [vmem:[#allocation5 + $0xd68] sm:$0xff]  ;;  %v8239_v22 = vcombine.low %v471_v2, %v479_v4  ;;  %v7968_v24 = vcombine.high %v199_v12, %v207_v13 }
 0x19c   :  { %3738 = vmatprep.subr.bf16.mxu1 %v8142_v32  ;;  %v262_v32 = vld [vmem:[#allocation5 + $0x528] sm:$0xff] }
 0x19d   :  { %3696 = vmatpush1.bf16.msra.mxu0 %v7885_v40  ;;  %v8301_v40 = vcombine.low %v534_v25, %v542_v26  ;;  %v254_v46 = vld [vmem:[#allocation5 + $0x4e8] sm:$0xff]  ;;  %v8029_v50 = vcombine.low %v262_v32, %v270_v33  ;;  %v9934_v25 = vpop.f32.mrf.mxu1  ;;  %v8224_v26 = vcombine.high %v455_v14, %v463_v15 }
 0x19e   :  { %3697 = vmatprep.subr.bf16.mxu0 %v7870_v41  ;;  %v8286_v41 = vcombine.high %v518_v37, %v526_v38  ;;  %v502_v47 = vld [vmem:[#allocation5 + $0xca8] sm:$0xff] }
 0x19f   :  { %3739 = vmatpush1.bf16.msra.mxu1 %v8141_v42  ;;  %v8030_v42 = vcombine.high %v262_v32, %v270_v33  ;;  %v510_v49 = vld [vmem:[#allocation5 + $0xce8] sm:$0xff]  ;;  %v447_v32 = vld [vmem:[#allocation5 + $0xaf0] sm:$0xff] }
 0x1a0   :  { %3740 = vmatprep.subr.bf16.mxu1 %v8126_v45  ;;  %v246_v45 = vld [vmem:[#allocation5 + $0x4a8] sm:$0xff] }
 0x1a1   :  { %3698 = vmatpush1.bf16.msra.mxu0 %v7869_v51  ;;  %v8285_v51 = vcombine.low %v518_v37, %v526_v38  ;;  %v238_v55 = vld [vmem:[#allocation5 + $0x468] sm:$0xff]  ;;  %v8013_v59 = vcombine.low %v246_v45, %v254_v46  ;;  %v7967_v38 = vcombine.low %v199_v12, %v207_v13  ;;  %v135_v13 = vld [vmem:[#allocation5 + $0x130] sm:$0xff] }
 0x1a2   :  { %3699 = vmatprep.subr.bf16.mxu0 %v8110_v53  ;;  %v8270_v53 = vcombine.high %v502_v47, %v510_v49  ;;  %v486_v56 = vld [vmem:[#allocation5 + $0xc28] sm:$0xff] }
 0x1a3   :  { %3741 = vmatpush1.bf16.msra.mxu1 %v8125_v52  ;;  %v8014_v52 = vcombine.high %v246_v45, %v254_v46  ;;  %v494_v57 = vld [vmem:[#allocation5 + $0xc68] sm:$0xff] }
 0x1a4   :  { %3742 = vmatprep.subr.bf16.mxu1 %v8366_v54  ;;  %v230_v54 = vld [vmem:[#allocation5 + $0x428] sm:$0xff] }
 0x1a5   :  { %3700 = vmatpush2.bf16.msra.mxu0 %v8109_v60  ;;  %v8269_v60 = vcombine.low %v502_v47, %v510_v49  ;;  %v7997_v5 = vcombine.low %v230_v54, %v238_v55  ;;  %v167_v47 = vld [vmem:[#allocation5 + $0x230] sm:$0xff] }
 0x1a6   :  { %3701 = vmatprep.subr.bf16.mxu0 %v8094_v62  ;;  %v8254_v62 = vcombine.high %v486_v56, %v494_v57  ;;  %v175_v49 = vld [vmem:[#allocation5 + $0x270] sm:$0xff] }
 0x1a7   :  { %3743 = vmatpush2.bf16.msra.mxu1 %v8365_v61  ;;  %v7998_v61 = vcombine.high %v230_v54, %v238_v55 }
 0x1a8   :  { %3744 = vmatprep.subr.bf16.mxu1 %v8350_v0  ;;  %v215_v0 = vld [vmem:[#allocation5 + $0x3b0] sm:$0xff] }
 0x1a9   :  { %3702 = vmatpush2.bf16.msra.mxu0 %v8093_v6  ;;  %v631_v6 = vsub.s32 4, %v9888_v34 }
 0x1aa   :  { %3703 = vmatprep.subr.bf16.mxu0 %v8078_v8  ;;  %v7984_v8 = vcombine.high %v215_v0, %v223_v1 }
 0x1ab   :  { %3745 = vmatpush2.bf16.msra.mxu1 %v8349_v7  ;;  %v8253_v7 = vcombine.low %v486_v56, %v494_v57  ;;  %v7936_v57 = vcombine.high %v167_v47, %v175_v49 }
 0x1ac   :  { %3746 = vmatprep.subr.bf16.mxu1 %v8334_v9  ;;  %v8240_v9 = vcombine.high %v471_v2, %v479_v4 }
 0x1ad   :  { %3704 = vmatpush2.bf16.msra.mxu0 %v8077_v17  ;;  %v9927_v17 = vld [vmem:[#allocation7] sm:$0xff] }
 0x1ae   :  { %3705 = vmatprep.subr.bf16.mxu0 %v8062_v19  ;;  %v7983_v19 = vcombine.low %v215_v0, %v223_v1  ;;  %v407_v0 = vld [vmem:[#allocation5 + $0x9b0] sm:$0xff] }
 0x1af   :  { %3747 = vmatpush2.bf16.msra.mxu1 %v8333_v18  ;;  %v632_v18 = vrot.slane %v9927_v17, %v631_v6  ;;  %v415_v1 = vld [vmem:[#allocation5 + $0x9f0] sm:$0xff] }
 0x1b0   :  { %3748 = vmatprep.subr.bf16.mxu1 %v8318_v21  ;;  %v9932_v21 = vpop.f32.mrf.mxu0  ;;  %v8176_v12 = vcombine.high %v407_v0, %v415_v1 }
 0x1b1   :  { %3706 = vmatpush2.bf16.msra.mxu0 %v8061_v27  ;;  %v183_v27 = vld [vmem:[#allocation5 + $0x2b0] sm:$0xff] }
 0x1b2   :  { %3707 = vmatprep.subr.bf16.mxu0 %v8046_v30 }
 0x1b3   :  { %3749 = vmatpush2.bf16.msra.mxu1 %v8317_v29  ;;  %v191_v29 = vld [vmem:[#allocation5 + $0x2f0] sm:$0xff] }
 0x1b4   :  { %3750 = vmatprep.subr.bf16.mxu1 %v8302_v31  ;;  %v439_v31 = vld [vmem:[#allocation5 + $0xab0] sm:$0xff]  ;;  %v7951_v54 = vcombine.low %v183_v27, %v191_v29 }
 0x1b5   :  { %3708 = vmatpush2.bf16.msra.mxu0 %v8045_v39  ;;  %v8208_v46 = vcombine.high %v439_v31, %v447_v32  ;;  %v8207_v56 = vcombine.low %v439_v31, %v447_v32  ;;  %v383_v31 = vld [vmem:[#allocation5 + $0x8f0] sm:$0xff] }
 0x1b6   :  { %3709 = vmatprep.subr.bf16.mxu0 %v8030_v42  ;;  %v7952_v42 = vcombine.high %v183_v27, %v191_v29  ;;  %v119_v27 = vld [vmem:[#allocation5 + $0xb0] sm:$0xff] }
 0x1b7   :  { %3751 = vmatpush2.bf16.msra.mxu1 %v8301_v40  ;;  %v8223_v40 = vcombine.low %v455_v14, %v463_v15  ;;  %v143_v14 = vld [vmem:[#allocation5 + $0x170] sm:$0xff] }
 0x1b8   :  { %3752 = vmatprep.subr.bf16.mxu1 %v8286_v41  ;;  %v391_v15 = vld [vmem:[#allocation5 + $0x930] sm:$0xff]  ;;  %v7903_v32 = vcombine.low %v135_v13, %v143_v14 }
 0x1b9   :  { %3710 = vmatpush2.bf16.msra.mxu0 %v8029_v50  ;;  %v127_v29 = vld [vmem:[#allocation5 + $0xf0] sm:$0xff] }
 0x1ba   :  { %3711 = vmatprep.subr.bf16.mxu0 %v8014_v52  ;;  %v431_v52 = vld [vmem:[#allocation5 + $0xa70] sm:$0xff] }
 0x1bb   :  { %3753 = vmatpush2.bf16.msra.mxu1 %v8285_v51  ;;  %v423_v51 = vld [vmem:[#allocation5 + $0xa30] sm:$0xff] }
 0x1bc   :  { %3754 = vmatprep.subr.bf16.mxu1 %v8270_v53 }
 0x1bd   :  { %3712 = vmatpush2.bf16.msra.mxu0 %v8013_v59 }
 0x1be   :  { %3713 = vmatprep.subr.bf16.mxu0 %v7998_v61  ;;  %v151_v61 = vld [vmem:[#allocation5 + $0x1b0] sm:$0xff] }
 0x1bf   :  { %3755 = vmatpush2.bf16.msra.mxu1 %v8269_v60  ;;  %v8192_v60 = vcombine.high %v423_v51, %v431_v52 }
 0x1c0   :  { %3756 = vmatprep.subr.bf16.mxu1 %v8254_v62  ;;  %v159_v62 = vld [vmem:[#allocation5 + $0x1f0] sm:$0xff] }
 0x1c1   :  { %3714 = vmatpush2.bf16.msra.mxu0 %v7997_v5  ;;  %v7935_v5 = vcombine.low %v167_v47, %v175_v49  ;;  %v7887_v47 = vcombine.low %v119_v27, %v127_v29 }
 0x1c2   :  { %3769 = vmatprep.subr.bf16.mxu0 %v7984_v8  ;;  %v7920_v8 = vcombine.high %v151_v61, %v159_v62 }
 0x1c3   :  { %3757 = vmatpush2.bf16.msra.mxu1 %v8253_v7  ;;  %v8191_v7 = vcombine.low %v423_v51, %v431_v52  ;;  %v343_v52 = vld [vmem:[#allocation5 + $0x7b0] sm:$0xff] }
 0x1c4   :  { %3812 = vmatprep.subr.bf16.mxu1 %v8240_v9  ;;  %v3459_v30 = vpop.f32.mrf.mxu0  ;;  %3716 = vmatmul.mubr.bf16.vlgmr.msra.gmra.mxu0 %v9872_v20 }
 0x1c5   :  { %v3460_v33 = vadd.f32 %v3459_v30, %v632_v18  ;;  %3770 = vmatpush1.bf16.msra.mxu0 %v7983_v19  ;;  %3801 = vmatprep.mubr.bf16.mxu0 %v9866_v58  ;;  %v7919_v19 = vcombine.low %v151_v61, %v159_v62  ;;  %v375_v30 = vld [vmem:[#allocation5 + $0x8b0] sm:$0xff] }
 0x1c6   :  { %v3502_v37 = vpop.f32.mrf.mxu1  ;;  %3759 = vmatmul.mubr.bf16.vlgmr.msra.gmra.mxu1 %v9874_v23  ;;  %v9938_v39 = vpop.f32.mrf.mxu0  ;;  %3771 = vmatprep.subr.bf16.mxu0 %v7968_v24  ;;  %v7904_v24 = vcombine.high %v135_v13, %v143_v14  ;;  %v8143_v49 = vcombine.low %v375_v30, %v383_v31  ;;  %v327_v61 = vld [vmem:[#allocation5 + $0x730] sm:$0xff] }
 0x1c7   :  { %3813 = vmatpush1.bf16.msra.mxu1 %v8239_v22  ;;  %v3503_v41 = vadd.f32 %v3502_v37, %v3460_v33  ;;  %3844 = vmatprep.mubr.bf16.mxu1 %v9868_v63  ;;  %v8175_v22 = vcombine.low %v407_v0, %v415_v1  ;;  %v7888_v37 = vcombine.high %v119_v27, %v127_v29  ;;  %v335_v62 = vld [vmem:[#allocation5 + $0x770] sm:$0xff] }
 0x1c8   :  { %v9940_v45 = vpop.f32.mrf.mxu1  ;;  %3814 = vmatprep.subr.bf16.mxu1 %v8224_v26  ;;  %v3463_v50 = vpop.f32.mrf.mxu0  ;;  %v583_v0 = vld [vmem:[#allocation5 + $0xf30] sm:$0xff] }
 0x1c9   :  { %v3464_v53 = vadd.f32 %v3463_v50, %v632_v18  ;;  %3772 = vmatpush1.bf16.msra.mxu0 %v7967_v38  ;;  %v3945_v2 = vmax.f32 %v3503_v41, 0.0  ;;  %v399_v18 = vld [vmem:[#allocation5 + $0x970] sm:$0xff]  ;;  %v8144_v38 = vcombine.high %v375_v30, %v383_v31 }
 0x1ca   :  { %v3506_v55 = vpop.f32.mrf.mxu1  ;;  %3773 = vmatprep.subr.bf16.mxu0 %v7952_v42  ;;  %v8160_v26 = vcombine.high %v391_v15, %v399_v18  ;;  %v8159_v33 = vcombine.low %v391_v15, %v399_v18  ;;  %v111_v42 = vld [vmem:[#allocation5 + $0x70] sm:$0xff]  ;;  %v8095_v15 = vcombine.low %v327_v61, %v335_v62 }
 0x1cb   :  { %3815 = vmatpush1.bf16.msra.mxu1 %v8223_v40  ;;  %v3507_v59 = vadd.f32 %v3506_v55, %v3464_v53  ;;  %v103_v40 = vld [vmem:[#allocation5 + $0x30] sm:$0xff] }
 0x1cc   :  { %3816 = vmatprep.subr.bf16.mxu1 %v8208_v46  ;;  %v359_v41 = vld [vmem:[#allocation5 + $0x830] sm:$0xff]  ;;  %v7872_v50 = vcombine.high %v103_v40, %v111_v42 }
 0x1cd   :  { %v3961_v4 = vmax.f32 %v3507_v59, 0.0  ;;  %3774 = vmatpush1.bf16.msra.mxu0 %v7951_v54  ;;  %v367_v46 = vld [vmem:[#allocation5 + $0x870] sm:$0xff] }
 0x1ce   :  { %3775 = vmatprep.subr.bf16.mxu0 %v7936_v57  ;;  %v8128_v51 = vcombine.high %v359_v41, %v367_v46  ;;  %v351_v53 = vld [vmem:[#allocation5 + $0x7f0] sm:$0xff]  ;;  %v8127_v57 = vcombine.low %v359_v41, %v367_v46 }
 0x1cf   :  { %3817 = vmatpush1.bf16.msra.mxu1 %v8207_v56  ;;  %v9944_v9 = vpack.c.bf16 %v3961_v4, %v3945_v2  ;;  %v599_v54 = vld [vmem:[#allocation5 + $0xfb0] sm:$0xff]  ;;  %v7871_v56 = vcombine.low %v103_v40, %v111_v42  ;;  %v8112_v59 = vcombine.high %v343_v52, %v351_v53  ;;  %v8111_v2 = vcombine.low %v343_v52, %v351_v53 }
 0x1d0   :  { %3818 = vmatprep.subr.bf16.mxu1 %v8192_v60  ;;  %v607_v55 = vld [vmem:[#allocation5 + $0xff0] sm:$0xff] }
 0x1d1   :  { %3776 = vmatpush1.bf16.msra.mxu0 %v7935_v5  ;;  %v8368_v60 = vcombine.high %v599_v54, %v607_v55  ;;  %v591_v1 = vld [vmem:[#allocation5 + $0xf70] sm:$0xff]  ;;  %v8367_v4 = vcombine.low %v599_v54, %v607_v55  ;;  %v8096_v5 = vcombine.high %v327_v61, %v335_v62 }
 0x1d2   :  { %3777 = vmatprep.subr.bf16.mxu0 %v7920_v8  ;;  %v311_v8 = vld [vmem:[#allocation5 + $0x6b0] sm:$0xff]  ;;  %v8351_v18 = vcombine.low %v583_v0, %v591_v1 }
 0x1d3   :  { %3819 = vmatpush1.bf16.msra.mxu1 %v8191_v7  ;;  %v8352_v7 = vcombine.high %v583_v0, %v591_v1  ;;  %v567_v13 = vld [vmem:[#allocation5 + $0xeb0] sm:$0xff] }
 0x1d4   :  { %3820 = vmatprep.subr.bf16.mxu1 %v8176_v12  ;;  %v319_v12 = vld [vmem:[#allocation5 + $0x6f0] sm:$0xff] }
 0x1d5   :  { %3778 = vmatpush1.bf16.msra.mxu0 %v7919_v19  ;;  %v575_v14 = vld [vmem:[#allocation5 + $0xef0] sm:$0xff]  ;;  %v8080_v19 = vcombine.high %v311_v8, %v319_v12  ;;  %v8079_v30 = vcombine.low %v311_v8, %v319_v12 }
 0x1d6   :  { %3779 = vmatprep.subr.bf16.mxu0 %v7904_v24  ;;  %v295_v24 = vld [vmem:[#allocation5 + $0x630] sm:$0xff]  ;;  %v8335_v31 = vcombine.low %v567_v13, %v575_v14 }
 0x1d7   :  { %3821 = vmatpush1.bf16.msra.mxu1 %v8175_v22  ;;  %v8336_v22 = vcombine.high %v567_v13, %v575_v14  ;;  %v551_v27 = vld [vmem:[#allocation5 + $0xe30] sm:$0xff] }
 0x1d8   :  { %3822 = vmatprep.subr.bf16.mxu1 %v8160_v26  ;;  %v303_v26 = vld [vmem:[#allocation5 + $0x670] sm:$0xff] }
 0x1d9   :  { %3780 = vmatpush1.bf16.msra.mxu0 %v7903_v32  ;;  %v559_v29 = vld [vmem:[#allocation5 + $0xe70] sm:$0xff]  ;;  %v8064_v32 = vcombine.high %v295_v24, %v303_v26  ;;  %v8063_v41 = vcombine.low %v295_v24, %v303_v26  ;;  %v472_v24 = vld [vmem:[#allocation5 + $0xbb8] sm:$0xff] }
 0x1da   :  { %3781 = vmatprep.subr.bf16.mxu0 %v7888_v37  ;;  %v279_v37 = vld [vmem:[#allocation5 + $0x5b0] sm:$0xff]  ;;  %v8319_v46 = vcombine.low %v551_v27, %v559_v29  ;;  %v480_v26 = vld [vmem:[#allocation5 + $0xbf8] sm:$0xff] }
 0x1db   :  { %3823 = vmatpush1.bf16.msra.mxu1 %v8159_v33  ;;  %v8320_v33 = vcombine.high %v551_v27, %v559_v29  ;;  %v535_v40 = vld [vmem:[#allocation5 + $0xdb0] sm:$0xff]  ;;  %v639_v29 = vsub.s32 6, %v9888_v34 }
 0x1dc   :  { %3824 = vmatprep.subr.bf16.mxu1 %v8144_v38  ;;  %v287_v38 = vld [vmem:[#allocation5 + $0x5f0] sm:$0xff] }
 0x1dd   :  { %3782 = vmatpush1.bf16.msra.mxu0 %v7887_v47  ;;  %v543_v42 = vld [vmem:[#allocation5 + $0xdf0] sm:$0xff]  ;;  %v8048_v47 = vcombine.high %v279_v37, %v287_v38  ;;  %v8047_v54 = vcombine.low %v279_v37, %v287_v38  ;;  %v208_v37 = vld [vmem:[#allocation5 + $0x378] sm:$0xff] }
 0x1de   :  { %3783 = vmatprep.subr.bf16.mxu0 %v7872_v50  ;;  %v263_v50 = vld [vmem:[#allocation5 + $0x530] sm:$0xff]  ;;  %v8303_v55 = vcombine.low %v535_v40, %v543_v42  ;;  %v456_v38 = vld [vmem:[#allocation5 + $0xb38] sm:$0xff] }
 0x1df   :  { %3825 = vmatpush1.bf16.msra.mxu1 %v8143_v49  ;;  %v8304_v49 = vcombine.high %v535_v40, %v543_v42  ;;  %v519_v52 = vld [vmem:[#allocation5 + $0xd30] sm:$0xff]  ;;  %v464_v40 = vld [vmem:[#allocation5 + $0xb78] sm:$0xff]  ;;  %v640_v42 = vrot.slane %v9927_v17, %v639_v29 }
 0x1e0   :  { %3826 = vmatprep.subr.bf16.mxu1 %v8128_v51  ;;  %v271_v51 = vld [vmem:[#allocation5 + $0x570] sm:$0xff] }
 0x1e1   :  { %3784 = vmatpush1.bf16.msra.mxu0 %v7871_v56  ;;  %v527_v53 = vld [vmem:[#allocation5 + $0xd70] sm:$0xff]  ;;  %v8032_v56 = vcombine.high %v263_v50, %v271_v51  ;;  %v8031_v0 = vcombine.low %v263_v50, %v271_v51  ;;  %v9952_v50 = vpop.f32.mrf.mxu1  ;;  %v8226_v51 = vcombine.high %v456_v38, %v464_v40 }
 0x1e2   :  { %3785 = vmatprep.subr.bf16.mxu0 %v8112_v59  ;;  %v247_v59 = vld [vmem:[#allocation5 + $0x4b0] sm:$0xff]  ;;  %v8287_v1 = vcombine.low %v519_v52, %v527_v53 }
 0x1e3   :  { %3827 = vmatpush1.bf16.msra.mxu1 %v8127_v57  ;;  %v8288_v57 = vcombine.high %v519_v52, %v527_v53  ;;  %v503_v61 = vld [vmem:[#allocation5 + $0xcb0] sm:$0xff]  ;;  %v184_v52 = vld [vmem:[#allocation5 + $0x2b8] sm:$0xff] }
 0x1e4   :  { %3828 = vmatprep.subr.bf16.mxu1 %v8368_v60  ;;  %v255_v60 = vld [vmem:[#allocation5 + $0x4f0] sm:$0xff]  ;;  %v192_v53 = vld [vmem:[#allocation5 + $0x2f8] sm:$0xff] }
 0x1e5   :  { %3786 = vmatpush2.bf16.msra.mxu0 %v8111_v2  ;;  %v511_v62 = vld [vmem:[#allocation5 + $0xcf0] sm:$0xff]  ;;  %v8016_v2 = vcombine.high %v247_v59, %v255_v60  ;;  %v8015_v13 = vcombine.low %v247_v59, %v255_v60 }
 0x1e6   :  { %3787 = vmatprep.subr.bf16.mxu0 %v8096_v5  ;;  %v231_v5 = vld [vmem:[#allocation5 + $0x430] sm:$0xff]  ;;  %v8271_v14 = vcombine.low %v503_v61, %v511_v62 }
 0x1e7   :  { %3829 = vmatpush2.bf16.msra.mxu1 %v8367_v4  ;;  %v8272_v4 = vcombine.high %v503_v61, %v511_v62  ;;  %v487_v8 = vld [vmem:[#allocation5 + $0xc30] sm:$0xff]  ;;  %v8225_v62 = vcombine.low %v456_v38, %v464_v40 }
 0x1e8   :  { %3830 = vmatprep.subr.bf16.mxu1 %v8352_v7  ;;  %v239_v7 = vld [vmem:[#allocation5 + $0x470] sm:$0xff] }
 0x1e9   :  { %3788 = vmatpush2.bf16.msra.mxu0 %v8095_v15  ;;  %v495_v12 = vld [vmem:[#allocation5 + $0xc70] sm:$0xff]  ;;  %v8000_v15 = vcombine.high %v231_v5, %v239_v7  ;;  %v7999_v27 = vcombine.low %v231_v5, %v239_v7  ;;  %v168_v5 = vld [vmem:[#allocation5 + $0x238] sm:$0xff] }
 0x1ea   :  { %3789 = vmatprep.subr.bf16.mxu0 %v8080_v19  ;;  %v216_v19 = vld [vmem:[#allocation5 + $0x3b8] sm:$0xff] }
 0x1eb   :  { %3831 = vmatpush2.bf16.msra.mxu1 %v8351_v18  ;;  %v8256_v18 = vcombine.high %v487_v8, %v495_v12  ;;  %v176_v7 = vld [vmem:[#allocation5 + $0x278] sm:$0xff] }
 0x1ec   :  { %3832 = vmatprep.subr.bf16.mxu1 %v8336_v22  ;;  %v224_v22 = vld [vmem:[#allocation5 + $0x3f8] sm:$0xff] }
 0x1ed   :  { %3790 = vmatpush2.bf16.msra.mxu0 %v8079_v30  ;;  %v8255_v30 = vcombine.low %v487_v8, %v495_v12  ;;  %v424_v12 = vld [vmem:[#allocation5 + $0xa38] sm:$0xff] }
 0x1ee   :  { %3791 = vmatprep.subr.bf16.mxu0 %v8064_v32  ;;  %v8242_v32 = vcombine.high %v472_v24, %v480_v26 }
 0x1ef   :  { %3833 = vmatpush2.bf16.msra.mxu1 %v8335_v31  ;;  %v7986_v31 = vcombine.high %v216_v19, %v224_v22 }
 0x1f0   :  { %3834 = vmatprep.subr.bf16.mxu1 %v8320_v33  ;;  %v200_v33 = vld [vmem:[#allocation5 + $0x338] sm:$0xff] }
 0x1f1   :  { %3792 = vmatpush2.bf16.msra.mxu0 %v8063_v41  ;;  %v7985_v41 = vcombine.low %v216_v19, %v224_v22  ;;  %v7969_v60 = vcombine.low %v200_v33, %v208_v37  ;;  %v7938_v22 = vcombine.high %v168_v5, %v176_v7 }
 0x1f2   :  { %3793 = vmatprep.subr.bf16.mxu0 %v8048_v47  ;;  %v8241_v47 = vcombine.low %v472_v24, %v480_v26 }
 0x1f3   :  { %3835 = vmatpush2.bf16.msra.mxu1 %v8319_v46  ;;  %v9950_v46 = vpop.f32.mrf.mxu0 }
 0x1f4   :  { %3836 = vmatprep.subr.bf16.mxu1 %v8304_v49  ;;  %v7970_v49 = vcombine.high %v200_v33, %v208_v37  ;;  %v7937_v37 = vcombine.low %v168_v5, %v176_v7  ;;  %v104_v5 = vld [vmem:[#allocation5 + $0x38] sm:$0xff] }
 0x1f5   :  { %3794 = vmatpush2.bf16.msra.mxu0 %v8047_v54  ;;  %v112_v7 = vld [vmem:[#allocation5 + $0x78] sm:$0xff] }
 0x1f6   :  { %3795 = vmatprep.subr.bf16.mxu0 %v8032_v56  ;;  %v448_v56 = vld [vmem:[#allocation5 + $0xaf8] sm:$0xff] }
 0x1f7   :  { %3837 = vmatpush2.bf16.msra.mxu1 %v8303_v55  ;;  %v440_v55 = vld [vmem:[#allocation5 + $0xab8] sm:$0xff] }
 0x1f8   :  { %3838 = vmatprep.subr.bf16.mxu1 %v8288_v57  ;;  %v8209_v19 = vcombine.low %v440_v55, %v448_v56 }
 0x1f9   :  { %3796 = vmatpush2.bf16.msra.mxu0 %v8031_v0  ;;  %v7954_v0 = vcombine.high %v184_v52, %v192_v53 }
 0x1fa   :  { %3797 = vmatprep.subr.bf16.mxu0 %v8016_v2 }
 0x1fb   :  { %3839 = vmatpush2.bf16.msra.mxu1 %v8287_v1 }
 0x1fc   :  { %3840 = vmatprep.subr.bf16.mxu1 %v8272_v4  ;;  %v8210_v4 = vcombine.high %v440_v55, %v448_v56  ;;  %v120_v56 = vld [vmem:[#allocation5 + $0xb8] sm:$0xff] }
 0x1fd   :  { %3798 = vmatpush2.bf16.msra.mxu0 %v8015_v13  ;;  %v432_v13 = vld [vmem:[#allocation5 + $0xa78] sm:$0xff] }
 0x1fe   :  { %3799 = vmatprep.subr.bf16.mxu0 %v8000_v15  ;;  %v7953_v15 = vcombine.low %v184_v52, %v192_v53  ;;  %v8194_v26 = vcombine.high %v424_v12, %v432_v13 }
 0x1ff   :  { %3841 = vmatpush2.bf16.msra.mxu1 %v8271_v14 }
 0x200   :  { %3842 = vmatprep.subr.bf16.mxu1 %v8256_v18 }
 0x201   :  { %3800 = vmatpush2.bf16.msra.mxu0 %v7999_v27  ;;  %v152_v27 = vld [vmem:[#allocation5 + $0x1b8] sm:$0xff] }
 0x202   :  { %3855 = vmatprep.subr.bf16.mxu0 %v7986_v31  ;;  %v408_v31 = vld [vmem:[#allocation5 + $0x9b8] sm:$0xff] }
 0x203   :  { %3843 = vmatpush2.bf16.msra.mxu1 %v8255_v30  ;;  %v160_v30 = vld [vmem:[#allocation5 + $0x1f8] sm:$0xff] }
 0x204   :  { %3898 = vmatprep.subr.bf16.mxu1 %v8242_v32  ;;  %v3545_v54 = vpop.f32.mrf.mxu0  ;;  %3802 = vmatmul.mubr.bf16.vlgmr.msra.gmra.mxu0 %v9872_v20  ;;  %v7922_v38 = vcombine.high %v152_v27, %v160_v30  ;;  %v7921_v52 = vcombine.low %v152_v27, %v160_v30  ;;  %v7873_v27 = vcombine.low %v104_v5, %v112_v7 }
 0x205   :  { %v3546_v57 = vadd.f32 %v3545_v54, %v640_v42  ;;  %3856 = vmatpush1.bf16.msra.mxu0 %v7985_v41  ;;  %3887 = vmatprep.mubr.bf16.mxu0 %v9866_v58  ;;  %v416_v58 = vld [vmem:[#allocation5 + $0x9f8] sm:$0xff] }
 0x206   :  { %v3588_v59 = vpop.f32.mrf.mxu1  ;;  %3845 = vmatmul.mubr.bf16.vlgmr.msra.gmra.mxu1 %v9874_v23  ;;  %v9956_v61 = vpop.f32.mrf.mxu0  ;;  %3857 = vmatprep.subr.bf16.mxu0 %v7970_v49  ;;  %v136_v41 = vld [vmem:[#allocation5 + $0x138] sm:$0xff]  ;;  %v8177_v53 = vcombine.low %v408_v31, %v416_v58 }
 0x207   :  { %3899 = vmatpush1.bf16.msra.mxu1 %v8241_v47  ;;  %v3589_v1 = vadd.f32 %v3588_v59, %v3546_v57  ;;  %3930 = vmatprep.mubr.bf16.mxu1 %v9868_v63  ;;  %v8193_v63 = vcombine.low %v424_v12, %v432_v13  ;;  %v144_v47 = vld [vmem:[#allocation5 + $0x178] sm:$0xff] }
 0x208   :  { %v9958_v2 = vpop.f32.mrf.mxu1  ;;  %3900 = vmatprep.subr.bf16.mxu1 %v8226_v51  ;;  %v3549_v8 = vpop.f32.mrf.mxu0  ;;  %v392_v49 = vld [vmem:[#allocation5 + $0x938] sm:$0xff]  ;;  %v7906_v54 = vcombine.high %v136_v41, %v144_v47 }
 0x209   :  { %v3550_v14 = vadd.f32 %v3549_v8, %v640_v42  ;;  %3858 = vmatpush1.bf16.msra.mxu0 %v7969_v60  ;;  %v3947_v32 = vmax.f32 %v3589_v1, 0.0  ;;  %v8178_v42 = vcombine.high %v408_v31, %v416_v58  ;;  %v400_v51 = vld [vmem:[#allocation5 + $0x978] sm:$0xff] }
 0x20a   :  { %v3592_v18 = vpop.f32.mrf.mxu1  ;;  %3859 = vmatprep.subr.bf16.mxu0 %v7954_v0  ;;  %v8162_v55 = vcombine.high %v392_v49, %v400_v51  ;;  %v128_v57 = vld [vmem:[#allocation5 + $0xf8] sm:$0xff]  ;;  %v8161_v0 = vcombine.low %v392_v49, %v400_v51 }
 0x20b   :  { %3901 = vmatpush1.bf16.msra.mxu1 %v8225_v62  ;;  %v3593_v24 = vadd.f32 %v3592_v18, %v3550_v14  ;;  %v376_v59 = vld [vmem:[#allocation5 + $0x8b8] sm:$0xff]  ;;  %v7905_v62 = vcombine.low %v136_v41, %v144_v47  ;;  %v7890_v1 = vcombine.high %v120_v56, %v128_v57  ;;  %v7889_v13 = vcombine.low %v120_v56, %v128_v57 }
 0x20c   :  { %3902 = vmatprep.subr.bf16.mxu1 %v8210_v4  ;;  %v384_v60 = vld [vmem:[#allocation5 + $0x8f8] sm:$0xff] }
 0x20d   :  { %v3963_v33 = vmax.f32 %v3593_v24, 0.0  ;;  %3860 = vmatpush1.bf16.msra.mxu0 %v7953_v15  ;;  %v8146_v4 = vcombine.high %v376_v59, %v384_v60  ;;  %v360_v8 = vld [vmem:[#allocation5 + $0x838] sm:$0xff]  ;;  %v8145_v14 = vcombine.low %v376_v59, %v384_v60  ;;  %v7874_v15 = vcombine.high %v104_v5, %v112_v7 }
 0x20e   :  { %3861 = vmatprep.subr.bf16.mxu0 %v7938_v22  ;;  %v368_v12 = vld [vmem:[#allocation5 + $0x878] sm:$0xff] }
 0x20f   :  { %3903 = vmatpush1.bf16.msra.mxu1 %v8209_v19  ;;  %v9962_v40 = vpack.c.bf16 %v3963_v33, %v3947_v32  ;;  %v8130_v18 = vcombine.high %v360_v8, %v368_v12  ;;  %v344_v19 = vld [vmem:[#allocation5 + $0x7b8] sm:$0xff]  ;;  %v8129_v30 = vcombine.low %v360_v8, %v368_v12 }
 0x210   :  { %3904 = vmatprep.subr.bf16.mxu1 %v8194_v26  ;;  %v352_v22 = vld [vmem:[#allocation5 + $0x7f8] sm:$0xff] }
 0x211   :  { %3862 = vmatpush1.bf16.msra.mxu0 %v7937_v37  ;;  %v600_v24 = vld [vmem:[#allocation5 + $0xfb8] sm:$0xff]  ;;  %v8114_v31 = vcombine.high %v344_v19, %v352_v22 }
 0x212   :  { %3863 = vmatprep.subr.bf16.mxu0 %v7922_v38  ;;  %v608_v26 = vld [vmem:[#allocation5 + $0xff8] sm:$0xff]  ;;  %v8113_v38 = vcombine.low %v344_v19, %v352_v22 }
 0x213   :  { %3905 = vmatpush1.bf16.msra.mxu1 %v8193_v63  ;;  %v8370_v58 = vcombine.high %v600_v24, %v608_v26  ;;  %v328_v32 = vld [vmem:[#allocation5 + $0x738] sm:$0xff] }
 0x214   :  { %3906 = vmatprep.subr.bf16.mxu1 %v8178_v42  ;;  %v336_v33 = vld [vmem:[#allocation5 + $0x778] sm:$0xff]  ;;  %v8369_v42 = vcombine.low %v600_v24, %v608_v26 }
 0x215   :  { %3864 = vmatpush1.bf16.msra.mxu0 %v7921_v52  ;;  %v584_v37 = vld [vmem:[#allocation5 + $0xf38] sm:$0xff]  ;;  %v8098_v41 = vcombine.high %v328_v32, %v336_v33 }
 0x216   :  { %3865 = vmatprep.subr.bf16.mxu0 %v7906_v54  ;;  %v592_v63 = vld [vmem:[#allocation5 + $0xf78] sm:$0xff]  ;;  %v8097_v54 = vcombine.low %v328_v32, %v336_v33 }
 0x217   :  { %3907 = vmatpush1.bf16.msra.mxu1 %v8177_v53  ;;  %v8354_v47 = vcombine.high %v584_v37, %v592_v63  ;;  %v312_v49 = vld [vmem:[#allocation5 + $0x6b8] sm:$0xff] }
 0x218   :  { %3908 = vmatprep.subr.bf16.mxu1 %v8162_v55  ;;  %v320_v51 = vld [vmem:[#allocation5 + $0x6f8] sm:$0xff]  ;;  %v8353_v55 = vcombine.low %v584_v37, %v592_v63  ;;  %v9968_v37 = vsub.s32 3, %v9888_v34 }
 0x219   :  { %3866 = vmatpush1.bf16.msra.mxu0 %v7905_v62  ;;  %v568_v52 = vld [vmem:[#allocation5 + $0xeb8] sm:$0xff]  ;;  %v8082_v56 = vcombine.high %v312_v49, %v320_v51 }
 0x21a   :  { %3867 = vmatprep.subr.bf16.mxu0 %v7890_v1  ;;  %v576_v53 = vld [vmem:[#allocation5 + $0xef8] sm:$0xff]  ;;  %v8081_v1 = vcombine.low %v312_v49, %v320_v51 }
 0x21b   :  { %3909 = vmatpush1.bf16.msra.mxu1 %v8161_v0  ;;  %v8338_v57 = vcombine.high %v568_v52, %v576_v53  ;;  %v296_v59 = vld [vmem:[#allocation5 + $0x638] sm:$0xff] }
 0x21c   :  { %3910 = vmatprep.subr.bf16.mxu1 %v8146_v4  ;;  %v304_v60 = vld [vmem:[#allocation5 + $0x678] sm:$0xff]  ;;  %v8337_v4 = vcombine.low %v568_v52, %v576_v53 }
 0x21d   :  { %3868 = vmatpush1.bf16.msra.mxu0 %v7889_v13  ;;  %v552_v62 = vld [vmem:[#allocation5 + $0xe38] sm:$0xff]  ;;  %v8066_v5 = vcombine.high %v296_v59, %v304_v60 }
 0x21e   :  { %3869 = vmatprep.subr.bf16.mxu0 %v7874_v15  ;;  %v560_v0 = vld [vmem:[#allocation5 + $0xe78] sm:$0xff]  ;;  %v8065_v15 = vcombine.low %v296_v59, %v304_v60 }
 0x21f   :  { %3911 = vmatpush1.bf16.msra.mxu1 %v8145_v14  ;;  %v8322_v7 = vcombine.high %v552_v62, %v560_v0  ;;  %v280_v8 = vld [vmem:[#allocation5 + $0x5b8] sm:$0xff] }
 0x220   :  { %3912 = vmatprep.subr.bf16.mxu1 %v8130_v18  ;;  %v288_v12 = vld [vmem:[#allocation5 + $0x5f8] sm:$0xff]  ;;  %v8321_v18 = vcombine.low %v552_v62, %v560_v0 }
 0x221   :  { %3870 = vmatpush1.bf16.msra.mxu0 %v7873_v27  ;;  %v536_v13 = vld [vmem:[#allocation5 + $0xdb8] sm:$0xff]  ;;  %v8050_v19 = vcombine.high %v280_v8, %v288_v12 }
 0x222   :  { %3871 = vmatprep.subr.bf16.mxu0 %v8114_v31  ;;  %v544_v14 = vld [vmem:[#allocation5 + $0xdf8] sm:$0xff]  ;;  %v8049_v31 = vcombine.low %v280_v8, %v288_v12 }
 0x223   :  { %3913 = vmatpush1.bf16.msra.mxu1 %v8129_v30  ;;  %v8306_v22 = vcombine.high %v536_v13, %v544_v14  ;;  %v264_v24 = vld [vmem:[#allocation5 + $0x538] sm:$0xff]  ;;  %v8305_v32 = vcombine.low %v536_v13, %v544_v14 }
 0x224   :  { %3914 = vmatprep.subr.bf16.mxu1 %v8370_v58  ;;  %v272_v26 = vld [vmem:[#allocation5 + $0x578] sm:$0xff]  ;;  %v9965_v58 = vsub.s32 1, %v9888_v34 }
 0x225   :  { %3872 = vmatpush2.bf16.msra.mxu0 %v8113_v38  ;;  %v520_v27 = vld [vmem:[#allocation5 + $0xd38] sm:$0xff]  ;;  %v8034_v33 = vcombine.high %v264_v24, %v272_v26  ;;  %v8033_v49 = vcombine.low %v264_v24, %v272_v26  ;;  %v9986_v26 = vpop.f32.mrf.mxu0 }
 0x226   :  { %3873 = vmatprep.subr.bf16.mxu0 %v8098_v41  ;;  %v528_v30 = vld [vmem:[#allocation5 + $0xd78] sm:$0xff]  ;;  %v620_v51 = vrot.slane %v9927_v17, %v9965_v58 }
 0x227   :  { %3915 = vmatpush2.bf16.msra.mxu1 %v8369_v42  ;;  %v8290_v63 = vcombine.high %v520_v27, %v528_v30  ;;  %v248_v38 = vld [vmem:[#allocation5 + $0x4b8] sm:$0xff]  ;;  %v8289_v52 = vcombine.low %v520_v27, %v528_v30  ;;  %v9988_v30 = vpop.f32.mrf.mxu1 }
 0x228   :  { %3916 = vmatprep.subr.bf16.mxu1 %v8354_v47  ;;  %v256_v42 = vld [vmem:[#allocation5 + $0x4f8] sm:$0xff]  ;;  %v3294_v59 = vadd.f32 %v9912_v28, %v620_v51 }
 0x229   :  { %3874 = vmatpush2.bf16.msra.mxu0 %v8097_v54  ;;  %v504_v41 = vld [vmem:[#allocation5 + $0xcb8] sm:$0xff]  ;;  %v8018_v53 = vcombine.high %v248_v38, %v256_v42  ;;  %v628_v54 = vrot.slane %v9927_v17, %v9968_v37 }
 0x22a   :  { %3875 = vmatprep.subr.bf16.mxu0 %v8082_v56  ;;  %v512_v47 = vld [vmem:[#allocation5 + $0xcf8] sm:$0xff]  ;;  %v3337_v12 = vadd.f32 %v9914_v35, %v3294_v59  ;;  %v8915_v59 = vld [vmem:[#allocation8 + $0x84] ss:$16 sps:$4 sm:$0xff]  }
 0x22b   :  { %3917 = vmatpush2.bf16.msra.mxu1 %v8353_v55  ;;  %v8274_v55 = vcombine.high %v504_v41, %v512_v47  ;;  %v232_v56 = vld [vmem:[#allocation5 + $0x438] sm:$0xff]  ;;  %v3380_v0 = vadd.f32 %v9932_v21, %v628_v54  ;;  %v3376_v17 = vadd.f32 %v9918_v43, %v628_v54  ;;  %v8900_v43 = vld [vmem:[#allocation8 + $0x2e4] ss:$16 sps:$4 sm:$0xff]  }
 0x22c   :  { %3918 = vmatprep.subr.bf16.mxu1 %v8338_v57  ;;  %v240_v57 = vld [vmem:[#allocation5 + $0x478] sm:$0xff] }
 0x22d   :  { %3876 = vmatpush2.bf16.msra.mxu0 %v8081_v1  ;;  %v488_v60 = vld [vmem:[#allocation5 + $0xc38] sm:$0xff]  ;;  %v8017_v1 = vcombine.low %v248_v38, %v256_v42  ;;  %v3423_v28 = vadd.f32 %v9934_v25, %v3380_v0  ;;  %v8001_v13 = vcombine.low %v232_v56, %v240_v57  ;;  %v8895_v25 = vld [vmem:[#allocation8 + $0xe0] ss:$16 sps:$4 sm:$0xff]  }
 0x22e   :  { %3877 = vmatprep.subr.bf16.mxu0 %v8066_v5  ;;  %v496_v62 = vld [vmem:[#allocation5 + $0xc78] sm:$0xff]  ;;  %v8273_v5 = vcombine.low %v504_v41, %v512_v47  ;;  %v8901_v41 = vld [vmem:[#allocation8 + $0xc0] ss:$16 sps:$4 sm:$0xff]  }
 0x22f   :  { %3919 = vmatpush2.bf16.msra.mxu1 %v8337_v4  ;;  %v3290_v4 = vadd.f32 %v9899_v3, %v620_v51  ;;  %v8258_v8 = vcombine.high %v488_v60, %v496_v62  ;;  %v8257_v14 = vcombine.low %v488_v60, %v496_v62  ;;  %v9981_v3 = vld [vmem:[#allocation7 + $0x8] sm:$0xff]  ;;  %v8909_v51 = vld [vmem:[#allocation8 + $0xa4] ss:$16 sps:$4 sm:$0xff]  }
 0x230   :  { %3920 = vmatprep.subr.bf16.mxu1 %v8322_v7  ;;  %v8002_v7 = vcombine.high %v232_v56, %v240_v57  ;;  %v648_v35 = vrot.slane %v9981_v3, %v9893_v44  ;;  %v8910_v57 = vld [vmem:[#allocation8 + $0x2a0] ss:$16 sps:$4 sm:$0xff]   ;;  %v8918_v62 = vld [vmem:[#allocation8 + $0x284] ss:$16 sps:$4 sm:$0xff]  }
 0x231   :  { %3878 = vmatpush2.bf16.msra.mxu0 %v8065_v15  ;;  %v3333_v21 = vadd.f32 %v9901_v10, %v3290_v4  ;;  %v8897_v15 = vld [vmem:[#allocation8 + $0xe4] ss:$16 sps:$4 sm:$0xff]   ;;  %v8898_v10 = vld [vmem:[#allocation8 + $0x2e0] ss:$16 sps:$4 sm:$0xff]  }
 0x232   :  { %3879 = vmatprep.subr.bf16.mxu0 %v8050_v19  ;;  %v3958_v19 = vmax.f32 %v3337_v12, 0.0  ;;  %v8913_v4 = vld [vmem:[#allocation8 + $0x80] ss:$16 sps:$4 sm:$0xff]  }
 0x233   :  { %3921 = vmatpush2.bf16.msra.mxu1 %v8321_v18  ;;  %v3419_v18 = vadd.f32 %v9920_v48, %v3376_v17  ;;  %v3942_v24 = vmax.f32 %v3333_v21, 0.0  ;;  %v8903_v48 = vld [vmem:[#allocation8 + $0xc4] ss:$16 sps:$4 sm:$0xff]   ;;  %v8919_v12 = vld [vmem:[#allocation8 + $0x60] ss:$16 sps:$4 sm:$0xff]  }
 0x234   :  { %3922 = vmatprep.subr.bf16.mxu1 %v8306_v22  ;;  %v3960_v22 = vmax.f32 %v3423_v28, 0.0  ;;  %v8922_v28 = vld [vmem:[#allocation8 + $0x260] ss:$16 sps:$4 sm:$0xff]   ;;  %v8930_v21 = vld [vmem:[#allocation8 + $0x244] ss:$16 sps:$4 sm:$0xff]  }
 0x235   :  { %3880 = vmatpush2.bf16.msra.mxu0 %v8049_v31  ;;  %v3944_v27 = vmax.f32 %v3419_v18, 0.0  ;;  %v9990_v31 = vpack.c.bf16 %v3958_v19, %v3942_v24  ;;  %v8933_v18 = vld [vmem:[#allocation8 + $0x24] ss:$16 sps:$4 sm:$0xff]   ;;  %v8931_v19 = vld [vmem:[#allocation8 + $0x20] ss:$16 sps:$4 sm:$0xff]  }
 0x236   :  { %3881 = vmatprep.subr.bf16.mxu0 %v8034_v33  ;;  %v8906_v33 = vld [vmem:[#allocation8 + $0x2c4] ss:$16 sps:$4 sm:$0xff]   ;;  %v8937_v24 = vld [vmem:[#allocation8] ss:$16 sps:$4 sm:$0xff]  }
 0x237   :  { %3923 = vmatpush2.bf16.msra.mxu1 %v8305_v32 }
 0x238   :  { %3924 = vmatprep.subr.bf16.mxu1 %v8290_v63  ;;  %v9993_v63 = vpack.c.bf16 %v3960_v22, %v3944_v27  ;;  %v8934_v22 = vld [vmem:[#allocation8 + $0x220] ss:$16 sps:$4 sm:$0xff]   ;;  %v8945_v27 = vld [vmem:[#allocation8 + $0x1e4] ss:$16 sps:$4 sm:$0xff]  }
 0x239   :  { %3882 = vmatpush2.bf16.msra.mxu0 %v8033_v49  ;;  %v8904_v49 = vld [vmem:[#allocation8 + $0x2c0] ss:$16 sps:$4 sm:$0xff]  }
 0x23a   :  { %3883 = vmatprep.subr.bf16.mxu0 %v8018_v53  ;;  %v8912_v53 = vld [vmem:[#allocation8 + $0x2a4] ss:$16 sps:$4 sm:$0xff]  }
 0x23b   :  { %3925 = vmatpush2.bf16.msra.mxu1 %v8289_v52 }
 0x23c   :  { %3926 = vmatprep.subr.bf16.mxu1 %v8274_v55 }
 0x23d   :  { %3884 = vmatpush2.bf16.msra.mxu0 %v8017_v1 }
 0x23e   :  { %3885 = vmatprep.subr.bf16.mxu0 %v8002_v7  ;;  %v8921_v7 = vld [vmem:[#allocation8 + $0x64] ss:$16 sps:$4 sm:$0xff]  }
 0x23f   :  { %3927 = vmatpush2.bf16.msra.mxu1 %v8273_v5  ;;  %v8916_v5 = vld [vmem:[#allocation8 + $0x280] ss:$16 sps:$4 sm:$0xff]  }
 0x240   :  { %3928 = vmatprep.subr.bf16.mxu1 %v8258_v8  ;;  %v8924_v8 = vld [vmem:[#allocation8 + $0x264] ss:$16 sps:$4 sm:$0xff]  }
 0x241   :  { %3886 = vmatpush2.bf16.msra.mxu0 %v8001_v13  ;;  %v8927_v13 = vld [vmem:[#allocation8 + $0x44] ss:$16 sps:$4 sm:$0xff]  }
 0x242   :  { %7083 = vmatprep.subr.bf16.mxu0 %v8897_v15  ;;  %v8928_v15 = vld [vmem:[#allocation8 + $0x240] ss:$16 sps:$4 sm:$0xff]  }
 0x243   :  { %3929 = vmatpush2.bf16.msra.mxu1 %v8257_v14  ;;  %v8925_v14 = vld [vmem:[#allocation8 + $0x40] ss:$16 sps:$4 sm:$0xff]  }
 0x244   :  { %7126 = vmatprep.subr.bf16.mxu1 %v8900_v43  ;;  %v3631_v32 = vpop.f32.mrf.mxu0  ;;  %3888 = vmatmul.mubr.bf16.vlgmr.msra.gmra.mxu0 %v9872_v20  ;;  %v8936_v43 = vld [vmem:[#allocation8 + $0x224] ss:$16 sps:$4 sm:$0xff]  }
 0x245   :  { %v3632_v38 = vadd.f32 %v3631_v32, %v648_v35  ;;  %7084 = vmatpush1.bf16.msra.mxu0 %v8895_v25  ;;  %7115 = vmatprep.mubr.bf16.mxu0 %v9990_v31  ;;  %v8942_v25 = vld [vmem:[#allocation8 + $0x204] ss:$16 sps:$4 sm:$0xff]   ;;  %v8943_v32 = vld [vmem:[#allocation8 + $0x1e0] ss:$16 sps:$4 sm:$0xff]  }
 0x246   :  { %v3674_v42 = vpop.f32.mrf.mxu1  ;;  %3931 = vmatmul.mubr.bf16.vlgmr.msra.gmra.mxu1 %v9874_v23  ;;  %v9997_v47 = vpop.f32.mrf.mxu0  ;;  %7085 = vmatprep.subr.bf16.mxu0 %v8903_v48  ;;  %v8907_v23 = vld [vmem:[#allocation8 + $0xa0] ss:$16 sps:$4 sm:$0xff]   ;;  %v8948_v48 = vld [vmem:[#allocation8 + $0x3e4] ss:$16 sps:$4 sm:$0xff]  }
 0x247   :  { %7127 = vmatpush1.bf16.msra.mxu1 %v8898_v10  ;;  %v3675_v52 = vadd.f32 %v3674_v42, %v3632_v38  ;;  %7158 = vmatprep.mubr.bf16.mxu1 %v9993_v63  ;;  %v8940_v10 = vld [vmem:[#allocation8 + $0x200] ss:$16 sps:$4 sm:$0xff]   ;;  %v8951_v38 = vld [vmem:[#allocation8 + $0x1c4] ss:$16 sps:$4 sm:$0xff]  }
 0x248   :  { %v10000_v20 = vpop.f32.mrf.mxu1  ;;  %v3635_v54 = vpop.f32.mrf.mxu0  ;;  %7128 = vmatprep.subr.bf16.mxu1 %v8906_v33  ;;  %v8946_v33 = vld [vmem:[#allocation8 + $0x3e0] ss:$16 sps:$4 sm:$0xff]   ;;  %v8954_v42 = vld [vmem:[#allocation8 + $0x3c4] ss:$16 sps:$4 sm:$0xff]  }
 0x249   :  { %v3636_v55 = vadd.f32 %v3635_v54, %v648_v35  ;;  %7086 = vmatpush1.bf16.msra.mxu0 %v8901_v41  ;;  %v3949_v0 = vmax.f32 %v3675_v52, 0.0  ;;  %v8939_v35 = vld [vmem:[#allocation8 + $0x4] ss:$16 sps:$4 sm:$0xff]   ;;  %v8949_v41 = vld [vmem:[#allocation8 + $0x1c0] ss:$16 sps:$4 sm:$0xff]  }
 0x24a   :  { %v3678_v56 = vpop.f32.mrf.mxu1  ;;  %7087 = vmatprep.subr.bf16.mxu0 %v8909_v51  ;;  %v8957_v51 = vld [vmem:[#allocation8 + $0x1a4] ss:$16 sps:$4 sm:$0xff]   ;;  %v8958_v54 = vld [vmem:[#allocation8 + $0x3a0] ss:$16 sps:$4 sm:$0xff]  }
 0x24b   :  { %7129 = vmatpush1.bf16.msra.mxu1 %v8904_v49  ;;  %v3679_v60 = vadd.f32 %v3678_v56, %v3636_v55  ;;  %v8952_v49 = vld [vmem:[#allocation8 + $0x3c0] ss:$16 sps:$4 sm:$0xff]   ;;  %v8960_v52 = vld [vmem:[#allocation8 + $0x3a4] ss:$16 sps:$4 sm:$0xff]  }
 0x24c   :  { %7130 = vmatprep.subr.bf16.mxu1 %v8912_v53  ;;  %v8955_v53 = vld [vmem:[#allocation8 + $0x1a0] ss:$16 sps:$4 sm:$0xff]   ;;  %v8963_v55 = vld [vmem:[#allocation8 + $0x184] ss:$16 sps:$4 sm:$0xff]  }
 0x24d   :  { %v3965_v1 = vmax.f32 %v3679_v60, 0.0  ;;  %7088 = vmatpush1.bf16.msra.mxu0 %v8907_v23  ;;  %v8966_v23 = vld [vmem:[#allocation8 + $0x384] ss:$16 sps:$4 sm:$0xff]   ;;  %v8961_v56 = vld [vmem:[#allocation8 + $0x180] ss:$16 sps:$4 sm:$0xff]  }
 0x24e   :  { %7089 = vmatprep.subr.bf16.mxu0 %v8915_v59  ;;  %v8969_v59 = vld [vmem:[#allocation8 + $0x164] ss:$16 sps:$4 sm:$0xff]  }
 0x24f   :  { %7131 = vmatpush1.bf16.msra.mxu1 %v8910_v57  ;;  %v10002_v17 = vpack.c.bf16 %v3965_v1, %v3949_v0  ;;  %v8964_v57 = vld [vmem:[#allocation8 + $0x380] ss:$16 sps:$4 sm:$0xff]   ;;  %v8972_v60 = vld [vmem:[#allocation8 + $0x364] ss:$16 sps:$4 sm:$0xff]   ;;  %v635_v0 = vsub.s32 5, %v9888_v34 }
 0x250   :  { %7132 = vmatprep.subr.bf16.mxu1 %v8918_v62  ;;  %v8967_v62 = vld [vmem:[#allocation8 + $0x160] ss:$16 sps:$4 sm:$0xff]  }
 0x251   :  { %7090 = vmatpush1.bf16.msra.mxu0 %v8913_v4  ;;  %v8970_v1 = vld [vmem:[#allocation8 + $0x360] ss:$16 sps:$4 sm:$0xff]   ;;  %v8975_v4 = vld [vmem:[#allocation8 + $0x144] ss:$16 sps:$4 sm:$0xff]  }
 0x252   :  { %7091 = vmatprep.subr.bf16.mxu0 %v8921_v7  ;;  %v8978_v7 = vld [vmem:[#allocation8 + $0x344] ss:$16 sps:$4 sm:$0xff]  }
 0x253   :  { %7133 = vmatpush1.bf16.msra.mxu1 %v8916_v5  ;;  %v643_v5 = vsub.s32 7, %v9888_v34 }
 0x254   :  { %7134 = vmatprep.subr.bf16.mxu1 %v8924_v8  ;;  %v8973_v8 = vld [vmem:[#allocation8 + $0x140] ss:$16 sps:$4 sm:$0xff]  }
 0x255   :  { %7092 = vmatpush1.bf16.msra.mxu0 %v8919_v12  ;;  %v9668_v12 = vld [vmem:[#allocation7] sm:$0xff] }
 0x256   :  { %7093 = vmatprep.subr.bf16.mxu0 %v8927_v13  ;;  %v8976_v13 = vld [vmem:[#allocation8 + $0x340] ss:$16 sps:$4 sm:$0xff]  }
 0x257   :  { %7135 = vmatpush1.bf16.msra.mxu1 %v8922_v28  ;;  %v636_v28 = vrot.slane %v9668_v12, %v635_v0 }
 0x258   :  { %7136 = vmatprep.subr.bf16.mxu1 %v8930_v21  ;;  %v8981_v21 = vld [vmem:[#allocation8 + $0x124] ss:$16 sps:$4 sm:$0xff]  }
 0x259   :  { %7094 = vmatpush1.bf16.msra.mxu0 %v8925_v14  ;;  %v644_v14 = vrot.slane %v9668_v12, %v643_v5 }
 0x25a   :  { %7095 = vmatprep.subr.bf16.mxu0 %v8933_v18  ;;  %v3466_v18 = vadd.f32 %v9950_v46, %v636_v28  ;;  %v8985_v46 = vld [vmem:[#allocation8 + $0x100] ss:$16 sps:$4 sm:$0xff]  }
 0x25b   :  { %7137 = vmatpush1.bf16.msra.mxu1 %v8928_v15  ;;  %v8984_v15 = vld [vmem:[#allocation8 + $0x324] ss:$16 sps:$4 sm:$0xff]  }
 0x25c   :  { %7138 = vmatprep.subr.bf16.mxu1 %v8936_v43  ;;  %v3552_v43 = vadd.f32 %v9986_v26, %v644_v14 }
 0x25d   :  { %7096 = vmatpush1.bf16.msra.mxu0 %v8931_v19  ;;  %v8979_v19 = vld [vmem:[#allocation8 + $0x120] ss:$16 sps:$4 sm:$0xff]  }
 0x25e   :  { %7097 = vmatprep.subr.bf16.mxu0 %v8939_v35  ;;  %v8982_v35 = vld [vmem:[#allocation8 + $0x320] ss:$16 sps:$4 sm:$0xff]  }
 0x25f   :  { %7139 = vmatpush1.bf16.msra.mxu1 %v8934_v22  ;;  %v3462_v22 = vadd.f32 %v9938_v39, %v636_v28  ;;  %v8993_v39 = vld [vmem:[#allocation8 + $0x4e4] ss:$16 sps:$4 sm:$0xff]  }
 0x260   :  { %7140 = vmatprep.subr.bf16.mxu1 %v8942_v25  ;;  %v8987_v25 = vld [vmem:[#allocation8 + $0x104] ss:$16 sps:$4 sm:$0xff]  }
 0x261   :  { %7098 = vmatpush1.bf16.msra.mxu0 %v8937_v24  ;;  %v3548_v24 = vadd.f32 %v9956_v61, %v644_v14  ;;  %v3505_v26 = vadd.f32 %v9940_v45, %v3462_v22  ;;  %v8994_v45 = vld [vmem:[#allocation8 + $0x6e0] ss:$16 sps:$4 sm:$0xff]  }
 0x262   :  { %7099 = vmatprep.subr.bf16.mxu0 %v8945_v27  ;;  %v3509_v27 = vadd.f32 %v9952_v50, %v3466_v18  ;;  %v656_v50 = vrot.slane %v9981_v3, %v9908_v16  ;;  %v9006_v14 = vld [vmem:[#allocation8 + $0x6a0] ss:$16 sps:$4 sm:$0xff]  }
 0x263   :  { %7141 = vmatpush1.bf16.msra.mxu1 %v8940_v10  ;;  %v8990_v10 = vld [vmem:[#allocation8 + $0x304] ss:$16 sps:$4 sm:$0xff]  }
 0x264   :  { %7142 = vmatprep.subr.bf16.mxu1 %v8948_v48  ;;  %v3595_v48 = vadd.f32 %v9988_v30, %v3552_v43  ;;  %v3946_v30 = vmax.f32 %v3505_v26, 0.0  ;;  %v9014_v43 = vld [vmem:[#allocation8 + $0x684] ss:$16 sps:$4 sm:$0xff]  }
 0x265   :  { %7100 = vmatpush2.bf16.msra.mxu0 %v8943_v32  ;;  %v8988_v32 = vld [vmem:[#allocation8 + $0x300] ss:$16 sps:$4 sm:$0xff]   ;;  %v9023_v26 = vld [vmem:[#allocation8 + $0x444] ss:$16 sps:$4 sm:$0xff]  }
 0x266   :  { %7101 = vmatprep.subr.bf16.mxu0 %v8951_v38  ;;  %v8996_v38 = vld [vmem:[#allocation8 + $0x6e4] ss:$16 sps:$4 sm:$0xff]   ;;  %v3964_v61 = vmax.f32 %v3595_v48, 0.0  ;;  %v9015_v48 = vld [vmem:[#allocation8 + $0x460] ss:$16 sps:$4 sm:$0xff]  }
 0x267   :  { %7143 = vmatpush2.bf16.msra.mxu1 %v8946_v33  ;;  %v3591_v33 = vadd.f32 %v9958_v2, %v3548_v24  ;;  %v8999_v2 = vld [vmem:[#allocation8 + $0x4c4] ss:$16 sps:$4 sm:$0xff]  }
 0x268   :  { %7144 = vmatprep.subr.bf16.mxu1 %v8954_v42  ;;  %v3962_v42 = vmax.f32 %v3509_v27, 0.0  ;;  %v9017_v24 = vld [vmem:[#allocation8 + $0x464] ss:$16 sps:$4 sm:$0xff]  }
 0x269   :  { %7102 = vmatpush2.bf16.msra.mxu0 %v8949_v41  ;;  %v8991_v41 = vld [vmem:[#allocation8 + $0x4e0] ss:$16 sps:$4 sm:$0xff]   ;;  %v9020_v27 = vld [vmem:[#allocation8 + $0x664] ss:$16 sps:$4 sm:$0xff]  }
 0x26a   :  { %7103 = vmatprep.subr.bf16.mxu0 %v8957_v51  ;;  %v3948_v51 = vmax.f32 %v3591_v33, 0.0  ;;  %v9024_v33 = vld [vmem:[#allocation8 + $0x640] ss:$16 sps:$4 sm:$0xff]  }
 0x26b   :  { %7145 = vmatpush2.bf16.msra.mxu1 %v8952_v49  ;;  %v10020_v49 = vpop.f32.mrf.mxu0 }
 0x26c   :  { %7146 = vmatprep.subr.bf16.mxu1 %v8960_v52  ;;  %v10022_v52 = vpop.f32.mrf.mxu1 }
 0x26d   :  { %7104 = vmatpush2.bf16.msra.mxu0 %v8955_v53  ;;  %v10024_v53 = vpack.c.bf16 %v3962_v42, %v3946_v30  ;;  %v9032_v42 = vld [vmem:[#allocation8 + $0x624] ss:$16 sps:$4 sm:$0xff]  }
 0x26e   :  { %7105 = vmatprep.subr.bf16.mxu0 %v8963_v55  ;;  %v9002_v55 = vld [vmem:[#allocation8 + $0x6c4] ss:$16 sps:$4 sm:$0xff]  }
 0x26f   :  { %7147 = vmatpush2.bf16.msra.mxu1 %v8958_v54  ;;  %v9038_v30 = vld [vmem:[#allocation8 + $0x604] ss:$16 sps:$4 sm:$0xff]  }
 0x270   :  { %7148 = vmatprep.subr.bf16.mxu1 %v8966_v23  ;;  %v10027_v23 = vpack.c.bf16 %v3964_v61, %v3948_v51  ;;  %v9027_v61 = vld [vmem:[#allocation8 + $0x420] ss:$16 sps:$4 sm:$0xff]  }
 0x271   :  { %7106 = vmatpush2.bf16.msra.mxu0 %v8961_v56  ;;  %v9036_v51 = vld [vmem:[#allocation8 + $0x600] ss:$16 sps:$4 sm:$0xff]  }
 0x272   :  { %7107 = vmatprep.subr.bf16.mxu0 %v8969_v59  ;;  %v8997_v59 = vld [vmem:[#allocation8 + $0x4c0] ss:$16 sps:$4 sm:$0xff]  }
 0x273   :  { %7149 = vmatpush2.bf16.msra.mxu1 %v8964_v57 }
 0x274   :  { %7150 = vmatprep.subr.bf16.mxu1 %v8972_v60 }
 0x275   :  { %7108 = vmatpush2.bf16.msra.mxu0 %v8967_v62  ;;  %v9000_v62 = vld [vmem:[#allocation8 + $0x6c0] ss:$16 sps:$4 sm:$0xff]  }
 0x276   :  { %7109 = vmatprep.subr.bf16.mxu0 %v8975_v4 }
 0x277   :  { %7151 = vmatpush2.bf16.msra.mxu1 %v8970_v1  ;;  %v9005_v1 = vld [vmem:[#allocation8 + $0x4a4] ss:$16 sps:$4 sm:$0xff]  }
 0x278   :  { %7152 = vmatprep.subr.bf16.mxu1 %v8978_v7 }
 0x279   :  { %7110 = vmatpush2.bf16.msra.mxu0 %v8973_v8  ;;  %v9008_v8 = vld [vmem:[#allocation8 + $0x6a4] ss:$16 sps:$4 sm:$0xff]  }
 0x27a   :  { %7111 = vmatprep.subr.bf16.mxu0 %v8981_v21 }
 0x27b   :  { %7153 = vmatpush2.bf16.msra.mxu1 %v8976_v13  ;;  %v9003_v13 = vld [vmem:[#allocation8 + $0x4a0] ss:$16 sps:$4 sm:$0xff]  }
 0x27c   :  { %7154 = vmatprep.subr.bf16.mxu1 %v8984_v15  ;;  %v9011_v15 = vld [vmem:[#allocation8 + $0x484] ss:$16 sps:$4 sm:$0xff]  }
 0x27d   :  { %7112 = vmatpush2.bf16.msra.mxu0 %v8979_v19 }
 0x27e   :  { %7113 = vmatprep.subr.bf16.mxu0 %v8987_v25  ;;  %v9012_v25 = vld [vmem:[#allocation8 + $0x680] ss:$16 sps:$4 sm:$0xff]  }
 0x27f   :  { %7155 = vmatpush2.bf16.msra.mxu1 %v8982_v35  ;;  %v9009_v35 = vld [vmem:[#allocation8 + $0x480] ss:$16 sps:$4 sm:$0xff]  }
 0x280   :  { %7156 = vmatprep.subr.bf16.mxu1 %v8990_v10 }
 0x281   :  { %7114 = vmatpush2.bf16.msra.mxu0 %v8985_v46  ;;  %v9018_v46 = vld [vmem:[#allocation8 + $0x660] ss:$16 sps:$4 sm:$0xff]  }
 0x282   :  { %7169 = vmatprep.subr.bf16.mxu0 %v8993_v39  ;;  %v9021_v39 = vld [vmem:[#allocation8 + $0x440] ss:$16 sps:$4 sm:$0xff]  }
 0x283   :  { %7157 = vmatpush2.bf16.msra.mxu1 %v8988_v32  ;;  %v9026_v32 = vld [vmem:[#allocation8 + $0x644] ss:$16 sps:$4 sm:$0xff]  }
 0x284   :  { %7212 = vmatprep.subr.bf16.mxu1 %v8996_v38  ;;  %v3717_v54 = vpop.f32.mrf.mxu0  ;;  %7116 = vmatmul.mubr.bf16.vlgmr.msra.gmra.mxu0 %v9905_v36  ;;  %v9029_v38 = vld [vmem:[#allocation8 + $0x424] ss:$16 sps:$4 sm:$0xff]  }
 0x285   :  { %v3718_v56 = vadd.f32 %v3717_v54, %v656_v50  ;;  %7170 = vmatpush1.bf16.msra.mxu0 %v8991_v41  ;;  %7201 = vmatprep.mubr.bf16.mxu0 %v10024_v53  ;;  %v9035_v41 = vld [vmem:[#allocation8 + $0x404] ss:$16 sps:$4 sm:$0xff]  }
 0x286   :  { %v3760_v57 = vpop.f32.mrf.mxu1  ;;  %7159 = vmatmul.mubr.bf16.vlgmr.msra.gmra.mxu1 %v9924_v11  ;;  %v10031_v60 = vpop.f32.mrf.mxu0  ;;  %7171 = vmatprep.subr.bf16.mxu0 %v8999_v2  ;;  %v9041_v2 = vld [vmem:[#allocation8 + $0x5e4] ss:$16 sps:$4 sm:$0xff]  }
 0x287   :  { %7213 = vmatpush1.bf16.msra.mxu1 %v8994_v45  ;;  %v3761_v4 = vadd.f32 %v3760_v57, %v3718_v56  ;;  %7244 = vmatprep.mubr.bf16.mxu1 %v10027_v23  ;;  %v9033_v45 = vld [vmem:[#allocation8 + $0x400] ss:$16 sps:$4 sm:$0xff]   ;;  %v9044_v54 = vld [vmem:[#allocation8 + $0x7e4] ss:$16 sps:$4 sm:$0xff]  }
 0x288   :  { %v10034_v7 = vpop.f32.mrf.mxu1  ;;  %v3721_v12 = vpop.f32.mrf.mxu0  ;;  %7214 = vmatprep.subr.bf16.mxu1 %v9002_v55  ;;  %v9039_v55 = vld [vmem:[#allocation8 + $0x5e0] ss:$16 sps:$4 sm:$0xff]   ;;  %v9047_v57 = vld [vmem:[#allocation8 + $0x5c4] ss:$16 sps:$4 sm:$0xff]  }
 0x289   :  { %v3722_v28 = vadd.f32 %v3721_v12, %v656_v50  ;;  %7172 = vmatpush1.bf16.msra.mxu0 %v8997_v59  ;;  %v3951_v19 = vmax.f32 %v3761_v4, 0.0  ;;  %v9030_v50 = vld [vmem:[#allocation8 + $0x620] ss:$16 sps:$4 sm:$0xff]   ;;  %v9050_v59 = vld [vmem:[#allocation8 + $0x7c4] ss:$16 sps:$4 sm:$0xff]  }
 0x28a   :  { %v3764_v21 = vpop.f32.mrf.mxu1  ;;  %7173 = vmatprep.subr.bf16.mxu0 %v9005_v1  ;;  %v9042_v56 = vld [vmem:[#allocation8 + $0x7e0] ss:$16 sps:$4 sm:$0xff]   ;;  %v9053_v4 = vld [vmem:[#allocation8 + $0x5a4] ss:$16 sps:$4 sm:$0xff]  }
 0x28b   :  { %7215 = vmatpush1.bf16.msra.mxu1 %v9000_v62  ;;  %v3765_v18 = vadd.f32 %v3764_v21, %v3722_v28  ;;  %v9045_v62 = vld [vmem:[#allocation8 + $0x5c0] ss:$16 sps:$4 sm:$0xff]   ;;  %v9062_v21 = vld [vmem:[#allocation8 + $0x784] ss:$16 sps:$4 sm:$0xff]  }
 0x28c   :  { %7216 = vmatprep.subr.bf16.mxu1 %v9008_v8  ;;  %v9048_v1 = vld [vmem:[#allocation8 + $0x7c0] ss:$16 sps:$4 sm:$0xff]   ;;  %v9056_v8 = vld [vmem:[#allocation8 + $0x7a4] ss:$16 sps:$4 sm:$0xff]  }
 0x28d   :  { %v3967_v22 = vmax.f32 %v3765_v18, 0.0  ;;  %7174 = vmatpush1.bf16.msra.mxu0 %v9003_v13  ;;  %v9051_v12 = vld [vmem:[#allocation8 + $0x5a0] ss:$16 sps:$4 sm:$0xff]   ;;  %v9059_v13 = vld [vmem:[#allocation8 + $0x584] ss:$16 sps:$4 sm:$0xff]  }
 0x28e   :  { %7175 = vmatprep.subr.bf16.mxu0 %v9011_v15  ;;  %v9054_v28 = vld [vmem:[#allocation8 + $0x7a0] ss:$16 sps:$4 sm:$0xff]   ;;  %v9065_v18 = vld [vmem:[#allocation8 + $0x564] ss:$16 sps:$4 sm:$0xff]  }
 0x28f   :  { %7217 = vmatpush1.bf16.msra.mxu1 %v9006_v14  ;;  %v10036_v10 = vpack.c.bf16 %v3967_v22, %v3951_v19  ;;  %v9057_v14 = vld [vmem:[#allocation8 + $0x580] ss:$16 sps:$4 sm:$0xff]  }
 0x290   :  { %7218 = vmatprep.subr.bf16.mxu1 %v9014_v43  ;;  %v9060_v15 = vld [vmem:[#allocation8 + $0x780] ss:$16 sps:$4 sm:$0xff]   ;;  %v9068_v43 = vld [vmem:[#allocation8 + $0x764] ss:$16 sps:$4 sm:$0xff]  }
 0x291   :  { %7176 = vmatpush1.bf16.msra.mxu0 %v9009_v35  ;;  %v9063_v19 = vld [vmem:[#allocation8 + $0x560] ss:$16 sps:$4 sm:$0xff]   ;;  %v9071_v35 = vld [vmem:[#allocation8 + $0x544] ss:$16 sps:$4 sm:$0xff]  }
 0x292   :  { %7177 = vmatprep.subr.bf16.mxu0 %v9017_v24  ;;  %v9066_v22 = vld [vmem:[#allocation8 + $0x760] ss:$16 sps:$4 sm:$0xff]  }
 0x293   :  { %7219 = vmatpush1.bf16.msra.mxu1 %v9012_v25  ;;  %v9074_v25 = vld [vmem:[#allocation8 + $0x744] ss:$16 sps:$4 sm:$0xff]   ;;  %v9069_v24 = vld [vmem:[#allocation8 + $0x540] ss:$16 sps:$4 sm:$0xff]  }
 0x294   :  { %7220 = vmatprep.subr.bf16.mxu1 %v9020_v27  ;;  %v652_v27 = vrot.slane %v9981_v3, %v9965_v58 }
 0x295   :  { %7178 = vmatpush1.bf16.msra.mxu0 %v9015_v48  ;;  %v3723_v48 = vpop.f32.mrf.mxu0 }
 0x296   :  { %7179 = vmatprep.subr.bf16.mxu0 %v9023_v26  ;;  %v9077_v26 = vld [vmem:[#allocation8 + $0x524] ss:$16 sps:$4 sm:$0xff]  }
 0x297   :  { %7221 = vmatpush1.bf16.msra.mxu1 %v9018_v46  ;;  %v9072_v46 = vld [vmem:[#allocation8 + $0x740] ss:$16 sps:$4 sm:$0xff]  }
 0x298   :  { %7222 = vmatprep.subr.bf16.mxu1 %v9026_v32  ;;  %v660_v32 = vrot.slane %v9981_v3, %v9968_v37 }
 0x299   :  { %7180 = vmatpush1.bf16.msra.mxu0 %v9021_v39  ;;  %v9080_v39 = vld [vmem:[#allocation8 + $0x724] ss:$16 sps:$4 sm:$0xff]  }
 0x29a   :  { %7181 = vmatprep.subr.bf16.mxu0 %v9029_v38  ;;  %v3724_v38 = vadd.f32 %v3723_v48, %v660_v32  ;;  %v9099_v48 = vld [vmem:[#allocation8 + $0x8a0] ss:$16 sps:$4 sm:$0xff]  }
 0x29b   :  { %7223 = vmatpush1.bf16.msra.mxu1 %v9024_v33  ;;  %v3638_v33 = vadd.f32 %v10020_v49, %v652_v27 }
 0x29c   :  { %7224 = vmatprep.subr.bf16.mxu1 %v9032_v42  ;;  %v9075_v42 = vld [vmem:[#allocation8 + $0x520] ss:$16 sps:$4 sm:$0xff]  }
 0x29d   :  { %7182 = vmatpush1.bf16.msra.mxu0 %v9027_v61  ;;  %v3634_v61 = vadd.f32 %v9997_v47, %v652_v27  ;;  %v9089_v47 = vld [vmem:[#allocation8 + $0x8e4] ss:$16 sps:$4 sm:$0xff]  }
 0x29e   :  { %7183 = vmatprep.subr.bf16.mxu0 %v9035_v41  ;;  %v9083_v41 = vld [vmem:[#allocation8 + $0x504] ss:$16 sps:$4 sm:$0xff]  }
 0x29f   :  { %7225 = vmatpush1.bf16.msra.mxu1 %v9030_v50  ;;  %v9078_v50 = vld [vmem:[#allocation8 + $0x720] ss:$16 sps:$4 sm:$0xff]   ;;  %v3677_v49 = vadd.f32 %v10000_v20, %v3634_v61 }
 0x2a0   :  { %7226 = vmatprep.subr.bf16.mxu1 %v9038_v30  ;;  %v3720_v30 = vadd.f32 %v10031_v60, %v660_v32  ;;  %v9090_v20 = vld [vmem:[#allocation8 + $0xae0] ss:$16 sps:$4 sm:$0xff]   ;;  %v9107_v32 = vld [vmem:[#allocation8 + $0x884] ss:$16 sps:$4 sm:$0xff]  }
 0x2a1   :  { %7184 = vmatpush1.bf16.msra.mxu0 %v9033_v45  ;;  %v9086_v45 = vld [vmem:[#allocation8 + $0x704] ss:$16 sps:$4 sm:$0xff]   ;;  %v9105_v61 = vld [vmem:[#allocation8 + $0x880] ss:$16 sps:$4 sm:$0xff]  }
 0x2a2   :  { %7185 = vmatprep.subr.bf16.mxu0 %v9041_v2  ;;  %v3766_v2 = vpop.f32.mrf.mxu1 }
 0x2a3   :  { %7227 = vmatpush1.bf16.msra.mxu1 %v9036_v51  ;;  %v3681_v51 = vadd.f32 %v10022_v52, %v3638_v33  ;;  %v664_v52 = vrot.slane %v9981_v3, %v631_v6  ;;  %v9093_v6 = vld [vmem:[#allocation8 + $0x8c0] ss:$16 sps:$4 sm:$0xff]   ;;  %v9110_v33 = vld [vmem:[#allocation8 + $0xa84] ss:$16 sps:$4 sm:$0xff]  }
 0x2a4   :  { %7228 = vmatprep.subr.bf16.mxu1 %v9044_v54  ;;  %v3767_v54 = vadd.f32 %v3766_v2, %v3724_v38  ;;  %v9114_v2 = vld [vmem:[#allocation8 + $0xa60] ss:$16 sps:$4 sm:$0xff]  }
 0x2a5   :  { %7186 = vmatpush2.bf16.msra.mxu0 %v9039_v55  ;;  %v9081_v55 = vld [vmem:[#allocation8 + $0x500] ss:$16 sps:$4 sm:$0xff]  }
 0x2a6   :  { %7187 = vmatprep.subr.bf16.mxu0 %v9047_v57  ;;  %v3763_v57 = vadd.f32 %v10034_v7, %v3720_v30  ;;  %v3968_v60 = vmax.f32 %v3767_v54, 0.0  ;;  %v9119_v54 = vld [vmem:[#allocation8 + $0x844] ss:$16 sps:$4 sm:$0xff]  }
 0x2a7   :  { %7229 = vmatpush2.bf16.msra.mxu1 %v9042_v56  ;;  %v9084_v56 = vld [vmem:[#allocation8 + $0x700] ss:$16 sps:$4 sm:$0xff]  }
 0x2a8   :  { %7230 = vmatprep.subr.bf16.mxu1 %v9050_v59  ;;  %v9092_v59 = vld [vmem:[#allocation8 + $0xae4] ss:$16 sps:$4 sm:$0xff]  }
 0x2a9   :  { %7188 = vmatpush2.bf16.msra.mxu0 %v9045_v62  ;;  %v3966_v62 = vmax.f32 %v3681_v51, 0.0  ;;  %v9111_v51 = vld [vmem:[#allocation8 + $0x860] ss:$16 sps:$4 sm:$0xff]  }
 0x2aa   :  { %7189 = vmatprep.subr.bf16.mxu0 %v9053_v4  ;;  %v3950_v4 = vmax.f32 %v3677_v49, 0.0  ;;  %v9117_v49 = vld [vmem:[#allocation8 + $0x840] ss:$16 sps:$4 sm:$0xff]  }
 0x2ab   :  { %7231 = vmatpush2.bf16.msra.mxu1 %v9048_v1  ;;  %v9087_v1 = vld [vmem:[#allocation8 + $0x8e0] ss:$16 sps:$4 sm:$0xff]  }
 0x2ac   :  { %7232 = vmatprep.subr.bf16.mxu1 %v9056_v8  ;;  %v3952_v8 = vmax.f32 %v3763_v57, 0.0  ;;  %v9128_v57 = vld [vmem:[#allocation8 + $0xa24] ss:$16 sps:$4 sm:$0xff]  }
 0x2ad   :  { %7190 = vmatpush2.bf16.msra.mxu0 %v9051_v12  ;;  %v9095_v12 = vld [vmem:[#allocation8 + $0x8c4] ss:$16 sps:$4 sm:$0xff]  }
 0x2ae   :  { %7191 = vmatprep.subr.bf16.mxu0 %v9059_v13  ;;  %v9098_v13 = vld [vmem:[#allocation8 + $0xac4] ss:$16 sps:$4 sm:$0xff]  }
 0x2af   :  { %7233 = vmatpush2.bf16.msra.mxu1 %v9054_v28  ;;  %v10051_v28 = vpack.c.bf16 %v3966_v62, %v3950_v4  ;;  %v9126_v62 = vld [vmem:[#allocation8 + $0xa20] ss:$16 sps:$4 sm:$0xff]  }
 0x2b0   :  { %7234 = vmatprep.subr.bf16.mxu1 %v9062_v21  ;;  %v10054_v21 = vpack.c.bf16 %v3968_v60, %v3952_v8  ;;  %v9131_v60 = vld [vmem:[#allocation8 + $0x804] ss:$16 sps:$4 sm:$0xff]   ;;  %v9132_v4 = vld [vmem:[#allocation8 + $0xa00] ss:$16 sps:$4 sm:$0xff]  }
 0x2b1   :  { %7192 = vmatpush2.bf16.msra.mxu0 %v9057_v14  ;;  %v9140_v8 = vld [vmem:[#allocation8 + $0xbe4] ss:$16 sps:$4 sm:$0xff]  }
 0x2b2   :  { %7193 = vmatprep.subr.bf16.mxu0 %v9065_v18 }
 0x2b3   :  { %7235 = vmatpush2.bf16.msra.mxu1 %v9060_v15 }
 0x2b4   :  { %7236 = vmatprep.subr.bf16.mxu1 %v9068_v43  ;;  %v9096_v43 = vld [vmem:[#allocation8 + $0xac0] ss:$16 sps:$4 sm:$0xff]  }
 0x2b5   :  { %7194 = vmatpush2.bf16.msra.mxu0 %v9063_v19  ;;  %v9101_v19 = vld [vmem:[#allocation8 + $0x8a4] ss:$16 sps:$4 sm:$0xff]  }
 0x2b6   :  { %7195 = vmatprep.subr.bf16.mxu0 %v9071_v35 }
 0x2b7   :  { %7237 = vmatpush2.bf16.msra.mxu1 %v9066_v22 }
 0x2b8   :  { %7238 = vmatprep.subr.bf16.mxu1 %v9074_v25  ;;  %v9104_v25 = vld [vmem:[#allocation8 + $0xaa4] ss:$16 sps:$4 sm:$0xff]  }
 0x2b9   :  { %7196 = vmatpush2.bf16.msra.mxu0 %v9069_v24 }
 0x2ba   :  { %7197 = vmatprep.subr.bf16.mxu0 %v9077_v26  ;;  %v9102_v26 = vld [vmem:[#allocation8 + $0xaa0] ss:$16 sps:$4 sm:$0xff]  }
 0x2bb   :  { %7239 = vmatpush2.bf16.msra.mxu1 %v9072_v46 }
 0x2bc   :  { %7240 = vmatprep.subr.bf16.mxu1 %v9080_v39 }
 0x2bd   :  { %7198 = vmatpush2.bf16.msra.mxu0 %v9075_v42 }
 0x2be   :  { %7199 = vmatprep.subr.bf16.mxu0 %v9083_v41  ;;  %v9113_v41 = vld [vmem:[#allocation8 + $0x864] ss:$16 sps:$4 sm:$0xff]  }
 0x2bf   :  { %7241 = vmatpush2.bf16.msra.mxu1 %v9078_v50  ;;  %v9108_v50 = vld [vmem:[#allocation8 + $0xa80] ss:$16 sps:$4 sm:$0xff]  }
 0x2c0   :  { %7242 = vmatprep.subr.bf16.mxu1 %v9086_v45  ;;  %v9116_v45 = vld [vmem:[#allocation8 + $0xa64] ss:$16 sps:$4 sm:$0xff]  }
 0x2c1   :  { %7200 = vmatpush2.bf16.msra.mxu0 %v9081_v55  ;;  %v9122_v55 = vld [vmem:[#allocation8 + $0xa44] ss:$16 sps:$4 sm:$0xff]  }
 0x2c2   :  { %7255 = vmatprep.subr.bf16.mxu0 %v9089_v47  ;;  %v9125_v47 = vld [vmem:[#allocation8 + $0x824] ss:$16 sps:$4 sm:$0xff]  }
 0x2c3   :  { %7243 = vmatpush2.bf16.msra.mxu1 %v9084_v56  ;;  %v9120_v56 = vld [vmem:[#allocation8 + $0xa40] ss:$16 sps:$4 sm:$0xff]  }
 0x2c4   :  { %7298 = vmatprep.subr.bf16.mxu1 %v9092_v59  ;;  %v3803_v7 = vpop.f32.mrf.mxu0  ;;  %7202 = vmatmul.mubr.bf16.vlgmr.msra.gmra.mxu0 %v9944_v9  ;;  %v9123_v59 = vld [vmem:[#allocation8 + $0x820] ss:$16 sps:$4 sm:$0xff]  }
 0x2c5   :  { %v3804_v14 = vadd.f32 %v3803_v7, %v664_v52  ;;  %7256 = vmatpush1.bf16.msra.mxu0 %v9087_v1  ;;  %7287 = vmatprep.mubr.bf16.mxu0 %v10051_v28  ;;  %v9129_v1 = vld [vmem:[#allocation8 + $0x800] ss:$16 sps:$4 sm:$0xff]  }
 0x2c6   :  { %v3846_v15 = vpop.f32.mrf.mxu1  ;;  %7245 = vmatmul.mubr.bf16.vlgmr.msra.gmra.mxu1 %v9962_v40  ;;  %v10058_v18 = vpop.f32.mrf.mxu0  ;;  %7257 = vmatprep.subr.bf16.mxu0 %v9095_v12  ;;  %v9135_v12 = vld [vmem:[#allocation8 + $0x9e0] ss:$16 sps:$4 sm:$0xff]  }
 0x2c7   :  { %7299 = vmatpush1.bf16.msra.mxu1 %v9090_v20  ;;  %v3847_v22 = vadd.f32 %v3846_v15, %v3804_v14  ;;  %7330 = vmatprep.mubr.bf16.mxu1 %v10054_v21  ;;  %v9137_v20 = vld [vmem:[#allocation8 + $0x9e4] ss:$16 sps:$4 sm:$0xff]   ;;  %v9138_v7 = vld [vmem:[#allocation8 + $0xbe0] ss:$16 sps:$4 sm:$0xff]  }
 0x2c8   :  { %v10061_v35 = vpop.f32.mrf.mxu1  ;;  %v3807_v24 = vpop.f32.mrf.mxu0  ;;  %7300 = vmatprep.subr.bf16.mxu1 %v9098_v13  ;;  %v9143_v13 = vld [vmem:[#allocation8 + $0x9c4] ss:$16 sps:$4 sm:$0xff]   ;;  %v9141_v15 = vld [vmem:[#allocation8 + $0x9c0] ss:$16 sps:$4 sm:$0xff]  }
 0x2c9   :  { %v3808_v27 = vadd.f32 %v3807_v24, %v664_v52  ;;  %7258 = vmatpush1.bf16.msra.mxu0 %v9093_v6  ;;  %v3953_v38 = vmax.f32 %v3847_v22, 0.0  ;;  %v9134_v52 = vld [vmem:[#allocation8 + $0xa04] ss:$16 sps:$4 sm:$0xff]   ;;  %v9144_v6 = vld [vmem:[#allocation8 + $0xbc0] ss:$16 sps:$4 sm:$0xff]  }
 0x2ca   :  { %v3850_v46 = vpop.f32.mrf.mxu1  ;;  %7259 = vmatprep.subr.bf16.mxu0 %v9101_v19  ;;  %v9146_v14 = vld [vmem:[#allocation8 + $0xbc4] ss:$16 sps:$4 sm:$0xff]   ;;  %v9147_v22 = vld [vmem:[#allocation8 + $0x9a0] ss:$16 sps:$4 sm:$0xff]  }
 0x2cb   :  { %7301 = vmatpush1.bf16.msra.mxu1 %v9096_v43  ;;  %v3851_v39 = vadd.f32 %v3850_v46, %v3808_v27  ;;  %v9149_v43 = vld [vmem:[#allocation8 + $0x9a4] ss:$16 sps:$4 sm:$0xff]   ;;  %v9156_v46 = vld [vmem:[#allocation8 + $0xb80] ss:$16 sps:$4 sm:$0xff]  }
 0x2cc   :  { %7302 = vmatprep.subr.bf16.mxu1 %v9104_v25  ;;  %v9152_v19 = vld [vmem:[#allocation8 + $0xba4] ss:$16 sps:$4 sm:$0xff]   ;;  %v9150_v25 = vld [vmem:[#allocation8 + $0xba0] ss:$16 sps:$4 sm:$0xff]  }
 0x2cd   :  { %v3969_v42 = vmax.f32 %v3851_v39, 0.0  ;;  %7260 = vmatpush1.bf16.msra.mxu0 %v9099_v48  ;;  %v9155_v24 = vld [vmem:[#allocation8 + $0x984] ss:$16 sps:$4 sm:$0xff]   ;;  %v9153_v48 = vld [vmem:[#allocation8 + $0x980] ss:$16 sps:$4 sm:$0xff]  }
 0x2ce   :  { %7261 = vmatprep.subr.bf16.mxu0 %v9107_v32  ;;  %v9158_v27 = vld [vmem:[#allocation8 + $0xb84] ss:$16 sps:$4 sm:$0xff]   ;;  %v9159_v39 = vld [vmem:[#allocation8 + $0x960] ss:$16 sps:$4 sm:$0xff]  }
 0x2cf   :  { %7303 = vmatpush1.bf16.msra.mxu1 %v9102_v26  ;;  %v10063_v30 = vpack.c.bf16 %v3969_v42, %v3953_v38  ;;  %v9161_v26 = vld [vmem:[#allocation8 + $0x964] ss:$16 sps:$4 sm:$0xff]  }
 0x2d0   :  { %7304 = vmatprep.subr.bf16.mxu1 %v9110_v33  ;;  %v9164_v32 = vld [vmem:[#allocation8 + $0xb64] ss:$16 sps:$4 sm:$0xff]   ;;  %v9162_v33 = vld [vmem:[#allocation8 + $0xb60] ss:$16 sps:$4 sm:$0xff]  }
 0x2d1   :  { %7262 = vmatpush1.bf16.msra.mxu0 %v9105_v61  ;;  %v9167_v38 = vld [vmem:[#allocation8 + $0x944] ss:$16 sps:$4 sm:$0xff]   ;;  %v3809_v61 = vpop.f32.mrf.mxu0 }
 0x2d2   :  { %7263 = vmatprep.subr.bf16.mxu0 %v9113_v41  ;;  %v9170_v42 = vld [vmem:[#allocation8 + $0xb44] ss:$16 sps:$4 sm:$0xff]   ;;  %v668_v41 = vrot.slane %v9981_v3, %v635_v0  ;;  %v9177_v0 = vld [vmem:[#allocation8 + $0x900] ss:$16 sps:$4 sm:$0xff]  }
 0x2d3   :  { %7305 = vmatpush1.bf16.msra.mxu1 %v9108_v50  ;;  %v9165_v50 = vld [vmem:[#allocation8 + $0x940] ss:$16 sps:$4 sm:$0xff]  }
 0x2d4   :  { %7306 = vmatprep.subr.bf16.mxu1 %v9116_v45  ;;  %v9168_v45 = vld [vmem:[#allocation8 + $0xb40] ss:$16 sps:$4 sm:$0xff]  }
 0x2d5   :  { %7264 = vmatpush1.bf16.msra.mxu0 %v9111_v51  ;;  %v9173_v51 = vld [vmem:[#allocation8 + $0x924] ss:$16 sps:$4 sm:$0xff]  }
 0x2d6   :  { %7265 = vmatprep.subr.bf16.mxu0 %v9119_v54  ;;  %v3810_v54 = vadd.f32 %v3809_v61, %v668_v41 }
 0x2d7   :  { %7307 = vmatpush1.bf16.msra.mxu1 %v9114_v2  ;;  %v9176_v2 = vld [vmem:[#allocation8 + $0xb24] ss:$16 sps:$4 sm:$0xff]  }
 0x2d8   :  { %7308 = vmatprep.subr.bf16.mxu1 %v9122_v55  ;;  %v9171_v55 = vld [vmem:[#allocation8 + $0x920] ss:$16 sps:$4 sm:$0xff]  }
 0x2d9   :  { %7266 = vmatpush1.bf16.msra.mxu0 %v9117_v49  ;;  %v3806_v49 = vadd.f32 %v10058_v18, %v668_v41  ;;  %v9183_v18 = vld [vmem:[#allocation8 + $0xce0] ss:$16 sps:$4 sm:$0xff]  }
 0x2da   :  { %7267 = vmatprep.subr.bf16.mxu0 %v9125_v47  ;;  %v9179_v47 = vld [vmem:[#allocation8 + $0x904] ss:$16 sps:$4 sm:$0xff]   ;;  %v9201_v41 = vld [vmem:[#allocation8 + $0xc80] ss:$16 sps:$4 sm:$0xff]  }
 0x2db   :  { %7309 = vmatpush1.bf16.msra.mxu1 %v9120_v56  ;;  %v9174_v56 = vld [vmem:[#allocation8 + $0xb20] ss:$16 sps:$4 sm:$0xff]  }
 0x2dc   :  { %7310 = vmatprep.subr.bf16.mxu1 %v9128_v57  ;;  %v3852_v57 = vpop.f32.mrf.mxu1 }
 0x2dd   :  { %7268 = vmatpush1.bf16.msra.mxu0 %v9123_v59  ;;  %v9182_v59 = vld [vmem:[#allocation8 + $0xb04] ss:$16 sps:$4 sm:$0xff]  }
 0x2de   :  { %7269 = vmatprep.subr.bf16.mxu0 %v9131_v60  ;;  %v3849_v60 = vadd.f32 %v10061_v35, %v3806_v49  ;;  %v9194_v35 = vld [vmem:[#allocation8 + $0xec4] ss:$16 sps:$4 sm:$0xff]  }
 0x2df   :  { %7311 = vmatpush1.bf16.msra.mxu1 %v9126_v62  ;;  %v3853_v62 = vadd.f32 %v3852_v57, %v3810_v54  ;;  %v9215_v57 = vld [vmem:[#allocation8 + $0xc44] ss:$16 sps:$4 sm:$0xff]  }
 0x2e0   :  { %7312 = vmatprep.subr.bf16.mxu1 %v9134_v52  ;;  %v9180_v52 = vld [vmem:[#allocation8 + $0xb00] ss:$16 sps:$4 sm:$0xff]  }
 0x2e1   :  { %7270 = vmatpush1.bf16.msra.mxu0 %v9129_v1  ;;  %v9185_v1 = vld [vmem:[#allocation8 + $0xce4] ss:$16 sps:$4 sm:$0xff]  }
 0x2e2   :  { %7271 = vmatprep.subr.bf16.mxu0 %v9137_v20  ;;  %v3970_v20 = vmax.f32 %v3853_v62, 0.0  ;;  %v9213_v62 = vld [vmem:[#allocation8 + $0xc40] ss:$16 sps:$4 sm:$0xff]  }
 0x2e3   :  { %7313 = vmatpush1.bf16.msra.mxu1 %v9132_v4  ;;  %v9188_v4 = vld [vmem:[#allocation8 + $0xee4] ss:$16 sps:$4 sm:$0xff]  }
 0x2e4   :  { %7314 = vmatprep.subr.bf16.mxu1 %v9140_v8  ;;  %v3954_v8 = vmax.f32 %v3849_v60, 0.0  ;;  %v9221_v60 = vld [vmem:[#allocation8 + $0xc24] ss:$16 sps:$4 sm:$0xff]  }
 0x2e5   :  { %7272 = vmatpush2.bf16.msra.mxu0 %v9135_v12  ;;  %v9186_v12 = vld [vmem:[#allocation8 + $0xee0] ss:$16 sps:$4 sm:$0xff]  }
 0x2e6   :  { %7273 = vmatprep.subr.bf16.mxu0 %v9143_v13  ;;  %v9191_v13 = vld [vmem:[#allocation8 + $0xcc4] ss:$16 sps:$4 sm:$0xff]  }
 0x2e7   :  { %7315 = vmatpush2.bf16.msra.mxu1 %v9138_v7  ;;  %v676_v7 = vrot.slane %v9981_v3, %v643_v5  ;;  %v9197_v3 = vld [vmem:[#allocation8 + $0xca4] ss:$16 sps:$4 sm:$0xff]  }
 0x2e8   :  { %7316 = vmatprep.subr.bf16.mxu1 %v9146_v14  ;;  %v10073_v14 = vpack.c.bf16 %v3970_v20, %v3954_v8  ;;  %v9227_v20 = vld [vmem:[#allocation8 + $0xc04] ss:$16 sps:$4 sm:$0xff]   ;;  %v9225_v8 = vld [vmem:[#allocation8 + $0xc00] ss:$16 sps:$4 sm:$0xff]  }
 0x2e9   :  { %7274 = vmatpush2.bf16.msra.mxu0 %v9141_v15 }
 0x2ea   :  { %7275 = vmatprep.subr.bf16.mxu0 %v9149_v43  ;;  %v9189_v43 = vld [vmem:[#allocation8 + $0xcc0] ss:$16 sps:$4 sm:$0xff]  }
 0x2eb   :  { %7317 = vmatpush2.bf16.msra.mxu1 %v9144_v6 }
 0x2ec   :  { %7318 = vmatprep.subr.bf16.mxu1 %v9152_v19 }
 0x2ed   :  { %7276 = vmatpush2.bf16.msra.mxu0 %v9147_v22  ;;  %v9192_v22 = vld [vmem:[#allocation8 + $0xec0] ss:$16 sps:$4 sm:$0xff]  }
 0x2ee   :  { %7277 = vmatprep.subr.bf16.mxu0 %v9155_v24  ;;  %v9200_v24 = vld [vmem:[#allocation8 + $0xea4] ss:$16 sps:$4 sm:$0xff]  }
 0x2ef   :  { %7319 = vmatpush2.bf16.msra.mxu1 %v9150_v25 }
 0x2f0   :  { %7320 = vmatprep.subr.bf16.mxu1 %v9158_v27 }
 0x2f1   :  { %7278 = vmatpush2.bf16.msra.mxu0 %v9153_v48 }
 0x2f2   :  { %7279 = vmatprep.subr.bf16.mxu0 %v9161_v26 }
 0x2f3   :  { %7321 = vmatpush2.bf16.msra.mxu1 %v9156_v46  ;;  %v9195_v46 = vld [vmem:[#allocation8 + $0xca0] ss:$16 sps:$4 sm:$0xff]  }
 0x2f4   :  { %7322 = vmatprep.subr.bf16.mxu1 %v9164_v32  ;;  %v9198_v32 = vld [vmem:[#allocation8 + $0xea0] ss:$16 sps:$4 sm:$0xff]  }
 0x2f5   :  { %7280 = vmatpush2.bf16.msra.mxu0 %v9159_v39  ;;  %v9203_v39 = vld [vmem:[#allocation8 + $0xc84] ss:$16 sps:$4 sm:$0xff]  }
 0x2f6   :  { %7281 = vmatprep.subr.bf16.mxu0 %v9167_v38 }
 0x2f7   :  { %7323 = vmatpush2.bf16.msra.mxu1 %v9162_v33 }
 0x2f8   :  { %7324 = vmatprep.subr.bf16.mxu1 %v9170_v42  ;;  %v9206_v42 = vld [vmem:[#allocation8 + $0xe84] ss:$16 sps:$4 sm:$0xff]  }
 0x2f9   :  { %7282 = vmatpush2.bf16.msra.mxu0 %v9165_v50 }
 0x2fa   :  { %7283 = vmatprep.subr.bf16.mxu0 %v9173_v51  ;;  %v9209_v51 = vld [vmem:[#allocation8 + $0xc64] ss:$16 sps:$4 sm:$0xff]  }
 0x2fb   :  { %7325 = vmatpush2.bf16.msra.mxu1 %v9168_v45  ;;  %v9204_v45 = vld [vmem:[#allocation8 + $0xe80] ss:$16 sps:$4 sm:$0xff]  }
 0x2fc   :  { %7326 = vmatprep.subr.bf16.mxu1 %v9176_v2 }
 0x2fd   :  { %7284 = vmatpush2.bf16.msra.mxu0 %v9171_v55  ;;  %v9212_v55 = vld [vmem:[#allocation8 + $0xe64] ss:$16 sps:$4 sm:$0xff]  }
 0x2fe   :  { %7285 = vmatprep.subr.bf16.mxu0 %v9179_v47  ;;  %v9210_v47 = vld [vmem:[#allocation8 + $0xe60] ss:$16 sps:$4 sm:$0xff]  }
 0x2ff   :  { %7327 = vmatpush2.bf16.msra.mxu1 %v9174_v56  ;;  %v9207_v56 = vld [vmem:[#allocation8 + $0xc60] ss:$16 sps:$4 sm:$0xff]  }
 0x300   :  { %7328 = vmatprep.subr.bf16.mxu1 %v9182_v59  ;;  %v9218_v59 = vld [vmem:[#allocation8 + $0xe44] ss:$16 sps:$4 sm:$0xff]  }
 0x301   :  { %7286 = vmatpush2.bf16.msra.mxu0 %v9177_v0  ;;  %v9216_v0 = vld [vmem:[#allocation8 + $0xe40] ss:$16 sps:$4 sm:$0xff]  }
 0x302   :  { %7341 = vmatprep.subr.bf16.mxu0 %v9185_v1  ;;  %v9219_v1 = vld [vmem:[#allocation8 + $0xc20] ss:$16 sps:$4 sm:$0xff]  }
 0x303   :  { %7329 = vmatpush2.bf16.msra.mxu1 %v9180_v52  ;;  %v9224_v52 = vld [vmem:[#allocation8 + $0xe24] ss:$16 sps:$4 sm:$0xff]  }
 0x304   :  { %7384 = vmatprep.subr.bf16.mxu1 %v9188_v4  ;;  %v10075_v15 = vpop.f32.mrf.mxu0  ;;  %7288 = vmatmul.mubr.bf16.vlgmr.msra.gmra.mxu0 %v10002_v17  ;;  %v9222_v4 = vld [vmem:[#allocation8 + $0xe20] ss:$16 sps:$4 sm:$0xff]  }
 0x305   :  { %7342 = vmatpush1.bf16.msra.mxu0 %v9183_v18  ;;  %7373 = vmatprep.mubr.bf16.mxu0 %v10073_v14  ;;  %v9230_v18 = vld [vmem:[#allocation8 + $0xe04] ss:$16 sps:$4 sm:$0xff]  }
 0x306   :  { %v10078_v6 = vpop.f32.mrf.mxu1  ;;  %7331 = vmatmul.mubr.bf16.vlgmr.msra.gmra.mxu1 %v10036_v10  ;;  %v3891_v19 = vpop.f32.mrf.mxu0  ;;  %7343 = vmatprep.subr.bf16.mxu0 %v9191_v13  ;;  %v9236_v13 = vld [vmem:[#allocation8 + $0xfe4] ss:$16 sps:$4 sm:$0xff]  }
 0x307   :  { %7385 = vmatpush1.bf16.msra.mxu1 %v9186_v12  ;;  %v3892_v5 = vadd.f32 %v3891_v19, %v676_v7  ;;  %v9228_v12 = vld [vmem:[#allocation8 + $0xe00] ss:$16 sps:$4 sm:$0xff]   ;;  %v9239_v19 = vld [vmem:[#allocation8 + $0xdc4] ss:$16 sps:$4 sm:$0xff]  }
 0x308   :  { %v3934_v25 = vpop.f32.mrf.mxu1  ;;  %7386 = vmatprep.subr.bf16.mxu1 %v9194_v35  ;;  %v10082_v27 = vpop.f32.mrf.mxu0  ;;  %v9231_v35 = vld [vmem:[#allocation8 + $0xde0] ss:$16 sps:$4 sm:$0xff]  }
 0x309   :  { %7344 = vmatpush1.bf16.msra.mxu0 %v9189_v43  ;;  %v3935_v33 = vadd.f32 %v3934_v25, %v3892_v5  ;;  %v9234_v43 = vld [vmem:[#allocation8 + $0xfe0] ss:$16 sps:$4 sm:$0xff]   ;;  %v9245_v25 = vld [vmem:[#allocation8 + $0xda4] ss:$16 sps:$4 sm:$0xff]  }
 0x30a   :  { %v10084_v48 = vpop.f32.mrf.mxu1  ;;  %v3895_v26 = vpop.f32.mrf.mxu0  ;;  %7345 = vmatprep.subr.bf16.mxu0 %v9197_v3  ;;  %v9237_v3 = vld [vmem:[#allocation8 + $0xdc0] ss:$16 sps:$4 sm:$0xff]  }
 0x30b   :  { %7387 = vmatpush1.bf16.msra.mxu1 %v9192_v22  ;;  %v3896_v38 = vadd.f32 %v3895_v26, %v676_v7  ;;  %v3956_v2 = vmax.f32 %v3935_v33, 0.0  ;;  %v9233_v7 = vld [vmem:[#allocation8 + $0xde4] ss:$16 sps:$4 sm:$0xff]   ;;  %v9240_v5 = vld [vmem:[#allocation8 + $0xfc0] ss:$16 sps:$4 sm:$0xff]  }
 0x30c   :  { %7388 = vmatprep.subr.bf16.mxu1 %v9200_v24  ;;  %v3938_v61 = vpop.f32.mrf.mxu1  ;;  %v9242_v22 = vld [vmem:[#allocation8 + $0xfc4] ss:$16 sps:$4 sm:$0xff]   ;;  %v9246_v26 = vld [vmem:[#allocation8 + $0xfa0] ss:$16 sps:$4 sm:$0xff]  }
 0x30d   :  { %v3939_v50 = vadd.f32 %v3938_v61, %v3896_v38  ;;  %7346 = vmatpush1.bf16.msra.mxu0 %v9195_v46  ;;  %v9248_v24 = vld [vmem:[#allocation8 + $0xfa4] ss:$16 sps:$4 sm:$0xff]   ;;  %v9243_v46 = vld [vmem:[#allocation8 + $0xda0] ss:$16 sps:$4 sm:$0xff]  }
 0x30e   :  { %7347 = vmatprep.subr.bf16.mxu0 %v9203_v39  ;;  %v9254_v39 = vld [vmem:[#allocation8 + $0xf84] ss:$16 sps:$4 sm:$0xff]   ;;  %v9249_v33 = vld [vmem:[#allocation8 + $0xd80] ss:$16 sps:$4 sm:$0xff]  }
 0x30f   :  { %7389 = vmatpush1.bf16.msra.mxu1 %v9198_v32  ;;  %v3972_v54 = vmax.f32 %v3939_v50, 0.0  ;;  %v9251_v32 = vld [vmem:[#allocation8 + $0xd84] ss:$16 sps:$4 sm:$0xff]   ;;  %v9252_v38 = vld [vmem:[#allocation8 + $0xf80] ss:$16 sps:$4 sm:$0xff]  }
 0x310   :  { %7390 = vmatprep.subr.bf16.mxu1 %v9206_v42  ;;  %v9257_v42 = vld [vmem:[#allocation8 + $0xd64] ss:$16 sps:$4 sm:$0xff]   ;;  %v9255_v50 = vld [vmem:[#allocation8 + $0xd60] ss:$16 sps:$4 sm:$0xff]  }
 0x311   :  { %v10086_v49 = vpack.c.bf16 %v3972_v54, %v3956_v2  ;;  %7348 = vmatpush1.bf16.msra.mxu0 %v9201_v41  ;;  %v9260_v61 = vld [vmem:[#allocation8 + $0xf64] ss:$16 sps:$4 sm:$0xff]   ;;  %v9258_v41 = vld [vmem:[#allocation8 + $0xf60] ss:$16 sps:$4 sm:$0xff]   ;;  %v9669_v2 = vld [vmem:[#allocation7 + $0x8] sm:$0xff] }
 0x312   :  { %7349 = vmatprep.subr.bf16.mxu0 %v9209_v51  ;;  %v9266_v51 = vld [vmem:[#allocation8 + $0xf44] ss:$16 sps:$4 sm:$0xff]   ;;  %v672_v54 = vrot.slane %v9669_v2, %v639_v29  ;;  %v9323_v2 = vld [vmem:[#allocation8 + $0xc] ss:$16 sps:$4 sm:$0xff]  }
 0x313   :  { %7391 = vmatpush1.bf16.msra.mxu1 %v9204_v45  ;;  %7416 = vmatprep.mubr.bf16.mxu1 %v10086_v49  ;;  %v9263_v45 = vld [vmem:[#allocation8 + $0xd44] ss:$16 sps:$4 sm:$0xff]  }
 0x314   :  { %7392 = vmatprep.subr.bf16.mxu1 %v9212_v55  ;;  %v9261_v55 = vld [vmem:[#allocation8 + $0xd40] ss:$16 sps:$4 sm:$0xff]   ;;  %v9278_v29 = vld [vmem:[#allocation8 + $0xf04] ss:$16 sps:$4 sm:$0xff]  }
 0x315   :  { %7350 = vmatpush1.bf16.msra.mxu0 %v9207_v56  ;;  %v9264_v56 = vld [vmem:[#allocation8 + $0xf40] ss:$16 sps:$4 sm:$0xff]  }
 0x316   :  { %7351 = vmatprep.subr.bf16.mxu0 %v9215_v57  ;;  %v3894_v57 = vadd.f32 %v10082_v27, %v672_v54  ;;  %v9276_v27 = vld [vmem:[#allocation8 + $0xf00] ss:$16 sps:$4 sm:$0xff]  }
 0x317   :  { %7393 = vmatpush1.bf16.msra.mxu1 %v9210_v47  ;;  %v9269_v47 = vld [vmem:[#allocation8 + $0xd24] ss:$16 sps:$4 sm:$0xff]  }
 0x318   :  { %7394 = vmatprep.subr.bf16.mxu1 %v9218_v59  ;;  %v9272_v59 = vld [vmem:[#allocation8 + $0xf24] ss:$16 sps:$4 sm:$0xff]   ;;  %v3937_v34 = vadd.f32 %v10084_v48, %v3894_v57  ;;  %v9332_v57 = vld [vmem:[#allocation8 + $0x3ec] ss:$16 sps:$4 sm:$0xff]  }
 0x319   :  { %7352 = vmatpush1.bf16.msra.mxu0 %v9213_v62  ;;  %v3890_v62 = vadd.f32 %v10075_v15, %v672_v54  ;;  %v9284_v15 = vld [vmem:[#allocation8 + $0x2ec] ss:$16 sps:$4 sm:$0xff]  }
 0x31a   :  { %7353 = vmatprep.subr.bf16.mxu0 %v9221_v60  ;;  %v9270_v60 = vld [vmem:[#allocation8 + $0xf20] ss:$16 sps:$4 sm:$0xff]   ;;  %v9326_v54 = vld [vmem:[#allocation8 + $0x20c] ss:$16 sps:$4 sm:$0xff]  }
 0x31b   :  { %7395 = vmatpush1.bf16.msra.mxu1 %v9216_v0  ;;  %v9267_v0 = vld [vmem:[#allocation8 + $0xd20] ss:$16 sps:$4 sm:$0xff]  }
 0x31c   :  { %7396 = vmatprep.subr.bf16.mxu1 %v9224_v52  ;;  %v9275_v52 = vld [vmem:[#allocation8 + $0xd04] ss:$16 sps:$4 sm:$0xff]  }
 0x31d   :  { %7354 = vmatpush1.bf16.msra.mxu0 %v9219_v1  ;;  %v3933_v1 = vadd.f32 %v10078_v6, %v3890_v62  ;;  %v9290_v6 = vld [vmem:[#allocation8 + $0x2cc] ss:$16 sps:$4 sm:$0xff]   ;;  %v9330_v62 = vld [vmem:[#allocation8 + $0x3e8] ss:$16 sps:$4 sm:$0xff]  }
 0x31e   :  { %7355 = vmatprep.subr.bf16.mxu0 %v9227_v20  ;;  %v9281_v20 = vld [vmem:[#allocation8 + $0xec] ss:$16 sps:$4 sm:$0xff]  }
 0x31f   :  { %7397 = vmatpush1.bf16.msra.mxu1 %v9222_v4  ;;  %v9273_v4 = vld [vmem:[#allocation8 + $0xd00] ss:$16 sps:$4 sm:$0xff]  }
 0x320   :  { %7398 = vmatprep.subr.bf16.mxu1 %v9230_v18  ;;  %v3971_v18 = vmax.f32 %v3937_v34, 0.0  ;;  %v9336_v34 = vld [vmem:[#allocation8 + $0x3c8] ss:$16 sps:$4 sm:$0xff]  }
 0x321   :  { %7356 = vmatpush1.bf16.msra.mxu0 %v9225_v8  ;;  %v3955_v8 = vmax.f32 %v3933_v1, 0.0  ;;  %v9344_v1 = vld [vmem:[#allocation8 + $0x3ac] ss:$16 sps:$4 sm:$0xff]  }
 0x322   :  { %7357 = vmatprep.subr.bf16.mxu0 %v9233_v7  ;;  %v9282_v7 = vld [vmem:[#allocation8 + $0x2e8] ss:$16 sps:$4 sm:$0xff]  }
 0x323   :  { %7399 = vmatpush1.bf16.msra.mxu1 %v9228_v12  ;;  %v9279_v12 = vld [vmem:[#allocation8 + $0xe8] ss:$16 sps:$4 sm:$0xff]   ;;  %v10095_v48 = vpack.c.bf16 %v3971_v18, %v3955_v8  ;;  %v9350_v18 = vld [vmem:[#allocation8 + $0x38c] ss:$16 sps:$4 sm:$0xff]  }
 0x324   :  { %7400 = vmatprep.subr.bf16.mxu1 %v9236_v13  ;;  %v9287_v13 = vld [vmem:[#allocation8 + $0xcc] ss:$16 sps:$4 sm:$0xff]   ;;  %v9348_v8 = vld [vmem:[#allocation8 + $0x388] ss:$16 sps:$4 sm:$0xff]  }
 0x325   :  { %7358 = vmatpush2.bf16.msra.mxu0 %v9231_v35  ;;  %v9285_v35 = vld [vmem:[#allocation8 + $0xc8] ss:$16 sps:$4 sm:$0xff]  }
 0x326   :  { %7359 = vmatprep.subr.bf16.mxu0 %v9239_v19  ;;  %v9293_v19 = vld [vmem:[#allocation8 + $0xac] ss:$16 sps:$4 sm:$0xff]  }
 0x327   :  { %7401 = vmatpush2.bf16.msra.mxu1 %v9234_v43  ;;  %v9288_v43 = vld [vmem:[#allocation8 + $0x2c8] ss:$16 sps:$4 sm:$0xff]  }
 0x328   :  { %7402 = vmatprep.subr.bf16.mxu1 %v9242_v22  ;;  %v9296_v22 = vld [vmem:[#allocation8 + $0x2ac] ss:$16 sps:$4 sm:$0xff]  }
 0x329   :  { %7360 = vmatpush2.bf16.msra.mxu0 %v9237_v3  ;;  %v9291_v3 = vld [vmem:[#allocation8 + $0xa8] ss:$16 sps:$4 sm:$0xff]  }
 0x32a   :  { %7361 = vmatprep.subr.bf16.mxu0 %v9245_v25  ;;  %v9299_v25 = vld [vmem:[#allocation8 + $0x8c] ss:$16 sps:$4 sm:$0xff]  }
 0x32b   :  { %7403 = vmatpush2.bf16.msra.mxu1 %v9240_v5  ;;  %v9294_v5 = vld [vmem:[#allocation8 + $0x2a8] ss:$16 sps:$4 sm:$0xff]  }
 0x32c   :  { %7404 = vmatprep.subr.bf16.mxu1 %v9248_v24  ;;  %v9302_v24 = vld [vmem:[#allocation8 + $0x28c] ss:$16 sps:$4 sm:$0xff]  }
 0x32d   :  { %7362 = vmatpush2.bf16.msra.mxu0 %v9243_v46  ;;  %v9297_v46 = vld [vmem:[#allocation8 + $0x88] ss:$16 sps:$4 sm:$0xff]  }
 0x32e   :  { %7363 = vmatprep.subr.bf16.mxu0 %v9251_v32  ;;  %v9308_v32 = vld [vmem:[#allocation8 + $0x26c] ss:$16 sps:$4 sm:$0xff]  }
 0x32f   :  { %7405 = vmatpush2.bf16.msra.mxu1 %v9246_v26  ;;  %v9305_v26 = vld [vmem:[#allocation8 + $0x6c] ss:$16 sps:$4 sm:$0xff]  }
 0x330   :  { %7406 = vmatprep.subr.bf16.mxu1 %v9254_v39  ;;  %v9306_v39 = vld [vmem:[#allocation8 + $0x268] ss:$16 sps:$4 sm:$0xff]  }
 0x331   :  { %7364 = vmatpush2.bf16.msra.mxu0 %v9249_v33  ;;  %v9311_v33 = vld [vmem:[#allocation8 + $0x4c] ss:$16 sps:$4 sm:$0xff]  }
 0x332   :  { %7365 = vmatprep.subr.bf16.mxu0 %v9257_v42  ;;  %v9309_v42 = vld [vmem:[#allocation8 + $0x48] ss:$16 sps:$4 sm:$0xff]  }
 0x333   :  { %7407 = vmatpush2.bf16.msra.mxu1 %v9252_v38  ;;  %v9314_v38 = vld [vmem:[#allocation8 + $0x24c] ss:$16 sps:$4 sm:$0xff]  }
 0x334   :  { %7408 = vmatprep.subr.bf16.mxu1 %v9260_v61  ;;  %v9312_v61 = vld [vmem:[#allocation8 + $0x248] ss:$16 sps:$4 sm:$0xff]  }
 0x335   :  { %7366 = vmatpush2.bf16.msra.mxu0 %v9255_v50  ;;  %v9317_v50 = vld [vmem:[#allocation8 + $0x2c] ss:$16 sps:$4 sm:$0xff]  }
 0x336   :  { %7367 = vmatprep.subr.bf16.mxu0 %v9263_v45  ;;  %v9315_v45 = vld [vmem:[#allocation8 + $0x28] ss:$16 sps:$4 sm:$0xff]  }
 0x337   :  { %7409 = vmatpush2.bf16.msra.mxu1 %v9258_v41  ;;  %v9320_v41 = vld [vmem:[#allocation8 + $0x22c] ss:$16 sps:$4 sm:$0xff]  }
 0x338   :  { %7410 = vmatprep.subr.bf16.mxu1 %v9266_v51  ;;  %v9318_v51 = vld [vmem:[#allocation8 + $0x228] ss:$16 sps:$4 sm:$0xff]  }
 0x339   :  { %7368 = vmatpush2.bf16.msra.mxu0 %v9261_v55  ;;  %v9321_v55 = vld [vmem:[#allocation8 + $0x8] ss:$16 sps:$4 sm:$0xff]  }
 0x33a   :  { %7369 = vmatprep.subr.bf16.mxu0 %v9269_v47  ;;  %v9329_v47 = vld [vmem:[#allocation8 + $0x1ec] ss:$16 sps:$4 sm:$0xff]  }
 0x33b   :  { %7411 = vmatpush2.bf16.msra.mxu1 %v9264_v56  ;;  %v9324_v56 = vld [vmem:[#allocation8 + $0x208] ss:$16 sps:$4 sm:$0xff]  }
 0x33c   :  { %7412 = vmatprep.subr.bf16.mxu1 %v9272_v59  ;;  %v9327_v59 = vld [vmem:[#allocation8 + $0x1e8] ss:$16 sps:$4 sm:$0xff]  }
 0x33d   :  { %7370 = vmatpush2.bf16.msra.mxu0 %v9267_v0  ;;  %v9335_v0 = vld [vmem:[#allocation8 + $0x1cc] ss:$16 sps:$4 sm:$0xff]  }
 0x33e   :  { %7371 = vmatprep.subr.bf16.mxu0 %v9275_v52  ;;  %v9333_v52 = vld [vmem:[#allocation8 + $0x1c8] ss:$16 sps:$4 sm:$0xff]  }
 0x33f   :  { %7413 = vmatpush2.bf16.msra.mxu1 %v9270_v60  ;;  %v9338_v60 = vld [vmem:[#allocation8 + $0x3cc] ss:$16 sps:$4 sm:$0xff]  }
 0x340   :  { %7414 = vmatprep.subr.bf16.mxu1 %v9278_v29  ;;  %v9341_v29 = vld [vmem:[#allocation8 + $0x1ac] ss:$16 sps:$4 sm:$0xff]  }
 0x341   :  { %7372 = vmatpush2.bf16.msra.mxu0 %v9273_v4  ;;  %v9339_v4 = vld [vmem:[#allocation8 + $0x1a8] ss:$16 sps:$4 sm:$0xff]  }
 0x342   :  { %7427 = vmatprep.subr.bf16.mxu0 %v9281_v20  ;;  %v9347_v20 = vld [vmem:[#allocation8 + $0x18c] ss:$16 sps:$4 sm:$0xff]  }
 0x343   :  { %7415 = vmatpush2.bf16.msra.mxu1 %v9276_v27  ;;  %v9342_v27 = vld [vmem:[#allocation8 + $0x3a8] ss:$16 sps:$4 sm:$0xff]  }
 0x344   :  { %7470 = vmatprep.subr.bf16.mxu1 %v9284_v15  ;;  %7374 = vmatmul.mubr.bf16.vlgmr.msra.gmra.mxu0 %v10063_v30  ;;  %v9345_v15 = vld [vmem:[#allocation8 + $0x188] ss:$16 sps:$4 sm:$0xff]  }
 0x345   :  { %7428 = vmatpush1.bf16.msra.mxu0 %v9279_v12  ;;  %7459 = vmatprep.mubr.bf16.mxu0 %v9990_v31  ;;  %v9300_v31 = vld [vmem:[#allocation8 + $0x288] ss:$16 sps:$4 sm:$0xff]   ;;  %v9353_v12 = vld [vmem:[#allocation8 + $0x16c] ss:$16 sps:$4 sm:$0xff]  }
 0x346   :  { %7417 = vmatmul.mubr.bf16.vlgmr.msra.gmra.mxu1 %v10095_v48  ;;  %7429 = vmatprep.subr.bf16.mxu0 %v9287_v13  ;;  %v9351_v13 = vld [vmem:[#allocation8 + $0x168] ss:$16 sps:$4 sm:$0xff]  }
 0x347   :  { %7471 = vmatpush1.bf16.msra.mxu1 %v9282_v7  ;;  %7502 = vmatprep.mubr.bf16.mxu1 %v9993_v63  ;;  %v9303_v63 = vld [vmem:[#allocation8 + $0x68] ss:$16 sps:$4 sm:$0xff]   ;;  %v9356_v7 = vld [vmem:[#allocation8 + $0x36c] ss:$16 sps:$4 sm:$0xff]  }
 0x348   :  { %7472 = vmatprep.subr.bf16.mxu1 %v9290_v6  ;;  %v9354_v6 = vld [vmem:[#allocation8 + $0x368] ss:$16 sps:$4 sm:$0xff]  }
 0x349   :  { %7430 = vmatpush1.bf16.msra.mxu0 %v9285_v35  ;;  %v9359_v35 = vld [vmem:[#allocation8 + $0x14c] ss:$16 sps:$4 sm:$0xff]  }
 0x34a   :  { %7431 = vmatprep.subr.bf16.mxu0 %v9293_v19  ;;  %v9357_v19 = vld [vmem:[#allocation8 + $0x148] ss:$16 sps:$4 sm:$0xff]  }
 0x34b   :  { %7473 = vmatpush1.bf16.msra.mxu1 %v9288_v43  ;;  %v9362_v43 = vld [vmem:[#allocation8 + $0x34c] ss:$16 sps:$4 sm:$0xff]  }
 0x34c   :  { %7474 = vmatprep.subr.bf16.mxu1 %v9296_v22  ;;  %v9360_v22 = vld [vmem:[#allocation8 + $0x348] ss:$16 sps:$4 sm:$0xff]  }
 0x34d   :  { %7432 = vmatpush1.bf16.msra.mxu0 %v9291_v3  ;;  %v9365_v3 = vld [vmem:[#allocation8 + $0x12c] ss:$16 sps:$4 sm:$0xff]  }
 0x34e   :  { %7433 = vmatprep.subr.bf16.mxu0 %v9299_v25  ;;  %v9363_v25 = vld [vmem:[#allocation8 + $0x128] ss:$16 sps:$4 sm:$0xff]  }
 0x34f   :  { %7475 = vmatpush1.bf16.msra.mxu1 %v9294_v5  ;;  %v9368_v5 = vld [vmem:[#allocation8 + $0x32c] ss:$16 sps:$4 sm:$0xff]  }
 0x350   :  { %7476 = vmatprep.subr.bf16.mxu1 %v9302_v24  ;;  %v9366_v24 = vld [vmem:[#allocation8 + $0x328] ss:$16 sps:$4 sm:$0xff]  }
 0x351   :  { %7434 = vmatpush1.bf16.msra.mxu0 %v9297_v46  ;;  %v9371_v46 = vld [vmem:[#allocation8 + $0x10c] ss:$16 sps:$4 sm:$0xff]  }
 0x352   :  { %7435 = vmatprep.subr.bf16.mxu0 %v9305_v26  ;;  %v9369_v26 = vld [vmem:[#allocation8 + $0x108] ss:$16 sps:$4 sm:$0xff]  }
 0x353   :  { %7477 = vmatpush1.bf16.msra.mxu1 %v9300_v31  ;;  %v9374_v31 = vld [vmem:[#allocation8 + $0x30c] ss:$16 sps:$4 sm:$0xff]  }
 0x354   :  { %7478 = vmatprep.subr.bf16.mxu1 %v9308_v32  ;;  %v9372_v32 = vld [vmem:[#allocation8 + $0x308] ss:$16 sps:$4 sm:$0xff]  }
 0x355   :  { %7436 = vmatpush1.bf16.msra.mxu0 %v9303_v63  ;;  %v9377_v63 = vld [vmem:[#allocation8 + $0x4ec] ss:$16 sps:$4 sm:$0xff]  }
 0x356   :  { %7437 = vmatprep.subr.bf16.mxu0 %v9311_v33  ;;  %v9375_v33 = vld [vmem:[#allocation8 + $0x4e8] ss:$16 sps:$4 sm:$0xff]  }
 0x357   :  { %7479 = vmatpush1.bf16.msra.mxu1 %v9306_v39  ;;  %v9380_v39 = vld [vmem:[#allocation8 + $0x6ec] ss:$16 sps:$4 sm:$0xff]  }
 0x358   :  { %7480 = vmatprep.subr.bf16.mxu1 %v9314_v38  ;;  %v9378_v38 = vld [vmem:[#allocation8 + $0x6e8] ss:$16 sps:$4 sm:$0xff]  }
 0x359   :  { %7438 = vmatpush1.bf16.msra.mxu0 %v9309_v42  ;;  %v9383_v42 = vld [vmem:[#allocation8 + $0x4cc] ss:$16 sps:$4 sm:$0xff]  }
 0x35a   :  { %7439 = vmatprep.subr.bf16.mxu0 %v9317_v50  ;;  %v9381_v50 = vld [vmem:[#allocation8 + $0x4c8] ss:$16 sps:$4 sm:$0xff]  }
 0x35b   :  { %7481 = vmatpush1.bf16.msra.mxu1 %v9312_v61  ;;  %v9386_v61 = vld [vmem:[#allocation8 + $0x6cc] ss:$16 sps:$4 sm:$0xff]  }
 0x35c   :  { %7482 = vmatprep.subr.bf16.mxu1 %v9320_v41  ;;  %v9384_v41 = vld [vmem:[#allocation8 + $0x6c8] ss:$16 sps:$4 sm:$0xff]  }
 0x35d   :  { %7440 = vmatpush1.bf16.msra.mxu0 %v9315_v45  ;;  %v9389_v45 = vld [vmem:[#allocation8 + $0x4ac] ss:$16 sps:$4 sm:$0xff]  }
 0x35e   :  { %7441 = vmatprep.subr.bf16.mxu0 %v9323_v2  ;;  %v9387_v2 = vld [vmem:[#allocation8 + $0x4a8] ss:$16 sps:$4 sm:$0xff]  }
 0x35f   :  { %7483 = vmatpush1.bf16.msra.mxu1 %v9318_v51  ;;  %v9392_v51 = vld [vmem:[#allocation8 + $0x6ac] ss:$16 sps:$4 sm:$0xff]  }
 0x360   :  { %7484 = vmatprep.subr.bf16.mxu1 %v9326_v54  ;;  %v9395_v54 = vld [vmem:[#allocation8 + $0x48c] ss:$16 sps:$4 sm:$0xff]  }
 0x361   :  { %7442 = vmatpush1.bf16.msra.mxu0 %v9321_v55  ;;  %v9393_v55 = vld [vmem:[#allocation8 + $0x488] ss:$16 sps:$4 sm:$0xff]  }
 0x362   :  { %7443 = vmatprep.subr.bf16.mxu0 %v9329_v47  ;;  %v9404_v47 = vld [vmem:[#allocation8 + $0x66c] ss:$16 sps:$4 sm:$0xff]  }
 0x363   :  { %7485 = vmatpush1.bf16.msra.mxu1 %v9324_v56  ;;  %v9401_v56 = vld [vmem:[#allocation8 + $0x46c] ss:$16 sps:$4 sm:$0xff]  }
 0x364   :  { %7486 = vmatprep.subr.bf16.mxu1 %v9332_v57  ;;  %v9402_v57 = vld [vmem:[#allocation8 + $0x668] ss:$16 sps:$4 sm:$0xff]  }
 0x365   :  { %7444 = vmatpush2.bf16.msra.mxu0 %v9327_v59  ;;  %v9407_v59 = vld [vmem:[#allocation8 + $0x44c] ss:$16 sps:$4 sm:$0xff]  }
 0x366   :  { %7445 = vmatprep.subr.bf16.mxu0 %v9335_v0  ;;  %v9405_v0 = vld [vmem:[#allocation8 + $0x448] ss:$16 sps:$4 sm:$0xff]  }
 0x367   :  { %7487 = vmatpush2.bf16.msra.mxu1 %v9330_v62  ;;  %v9410_v62 = vld [vmem:[#allocation8 + $0x64c] ss:$16 sps:$4 sm:$0xff]  }
 0x368   :  { %7488 = vmatprep.subr.bf16.mxu1 %v9338_v60  ;;  %v9408_v60 = vld [vmem:[#allocation8 + $0x648] ss:$16 sps:$4 sm:$0xff]  }
 0x369   :  { %7446 = vmatpush2.bf16.msra.mxu0 %v9333_v52  ;;  %v9413_v52 = vld [vmem:[#allocation8 + $0x42c] ss:$16 sps:$4 sm:$0xff]  }
 0x36a   :  { %7447 = vmatprep.subr.bf16.mxu0 %v9341_v29  ;;  %v9411_v29 = vld [vmem:[#allocation8 + $0x428] ss:$16 sps:$4 sm:$0xff]  }
 0x36b   :  { %7489 = vmatpush2.bf16.msra.mxu1 %v9336_v34  ;;  %v9416_v34 = vld [vmem:[#allocation8 + $0x62c] ss:$16 sps:$4 sm:$0xff]  }
 0x36c   :  { %7490 = vmatprep.subr.bf16.mxu1 %v9344_v1  ;;  %v9414_v1 = vld [vmem:[#allocation8 + $0x628] ss:$16 sps:$4 sm:$0xff]  }
 0x36d   :  { %7448 = vmatpush2.bf16.msra.mxu0 %v9339_v4  ;;  %v9419_v4 = vld [vmem:[#allocation8 + $0x40c] ss:$16 sps:$4 sm:$0xff]  }
 0x36e   :  { %7449 = vmatprep.subr.bf16.mxu0 %v9347_v20  ;;  %v9417_v20 = vld [vmem:[#allocation8 + $0x408] ss:$16 sps:$4 sm:$0xff]  }
 0x36f   :  { %7491 = vmatpush2.bf16.msra.mxu1 %v9342_v27  ;;  %v9422_v27 = vld [vmem:[#allocation8 + $0x60c] ss:$16 sps:$4 sm:$0xff]  }
 0x370   :  { %7492 = vmatprep.subr.bf16.mxu1 %v9350_v18  ;;  %v9420_v18 = vld [vmem:[#allocation8 + $0x608] ss:$16 sps:$4 sm:$0xff]  }
 0x371   :  { %7450 = vmatpush2.bf16.msra.mxu0 %v9345_v15  ;;  %v9425_v15 = vld [vmem:[#allocation8 + $0x5ec] ss:$16 sps:$4 sm:$0xff]  }
 0x372   :  { %7451 = vmatprep.subr.bf16.mxu0 %v9353_v12  ;;  %v9423_v12 = vld [vmem:[#allocation8 + $0x5e8] ss:$16 sps:$4 sm:$0xff]  }
 0x373   :  { %7493 = vmatpush2.bf16.msra.mxu1 %v9348_v8  ;;  %v9428_v8 = vld [vmem:[#allocation8 + $0x7ec] ss:$16 sps:$4 sm:$0xff]  }
 0x374   :  { %7494 = vmatprep.subr.bf16.mxu1 %v9356_v7  ;;  %v9426_v7 = vld [vmem:[#allocation8 + $0x7e8] ss:$16 sps:$4 sm:$0xff]  }
 0x375   :  { %7452 = vmatpush2.bf16.msra.mxu0 %v9351_v13  ;;  %v9431_v13 = vld [vmem:[#allocation8 + $0x5cc] ss:$16 sps:$4 sm:$0xff]  }
 0x376   :  { %7453 = vmatprep.subr.bf16.mxu0 %v9359_v35  ;;  %v9429_v35 = vld [vmem:[#allocation8 + $0x5c8] ss:$16 sps:$4 sm:$0xff]  }
 0x377   :  { %7495 = vmatpush2.bf16.msra.mxu1 %v9354_v6  ;;  %v9434_v6 = vld [vmem:[#allocation8 + $0x7cc] ss:$16 sps:$4 sm:$0xff]  }
 0x378   :  { %7496 = vmatprep.subr.bf16.mxu1 %v9362_v43  ;;  %v9432_v43 = vld [vmem:[#allocation8 + $0x7c8] ss:$16 sps:$4 sm:$0xff]  }
 0x379   :  { %7454 = vmatpush2.bf16.msra.mxu0 %v9357_v19  ;;  %v9437_v19 = vld [vmem:[#allocation8 + $0x5ac] ss:$16 sps:$4 sm:$0xff]  }
 0x37a   :  { %7455 = vmatprep.subr.bf16.mxu0 %v9365_v3  ;;  %v9435_v3 = vld [vmem:[#allocation8 + $0x5a8] ss:$16 sps:$4 sm:$0xff]  }
 0x37b   :  { %7497 = vmatpush2.bf16.msra.mxu1 %v9360_v22  ;;  %v9440_v22 = vld [vmem:[#allocation8 + $0x7ac] ss:$16 sps:$4 sm:$0xff]  }
 0x37c   :  { %7498 = vmatprep.subr.bf16.mxu1 %v9368_v5  ;;  %v9438_v5 = vld [vmem:[#allocation8 + $0x7a8] ss:$16 sps:$4 sm:$0xff]  }
 0x37d   :  { %7456 = vmatpush2.bf16.msra.mxu0 %v9363_v25  ;;  %v9443_v25 = vld [vmem:[#allocation8 + $0x58c] ss:$16 sps:$4 sm:$0xff]  }
 0x37e   :  { %7457 = vmatprep.subr.bf16.mxu0 %v9371_v46  ;;  %v9441_v46 = vld [vmem:[#allocation8 + $0x588] ss:$16 sps:$4 sm:$0xff]  }
 0x37f   :  { %7499 = vmatpush2.bf16.msra.mxu1 %v9366_v24  ;;  %v9446_v24 = vld [vmem:[#allocation8 + $0x78c] ss:$16 sps:$4 sm:$0xff]  }
 0x380   :  { %7500 = vmatprep.subr.bf16.mxu1 %v9374_v31  ;;  %v9444_v31 = vld [vmem:[#allocation8 + $0x788] ss:$16 sps:$4 sm:$0xff]  }
 0x381   :  { %7458 = vmatpush2.bf16.msra.mxu0 %v9369_v26  ;;  %v9449_v26 = vld [vmem:[#allocation8 + $0x56c] ss:$16 sps:$4 sm:$0xff]  }
 0x382   :  { %7513 = vmatprep.subr.bf16.mxu0 %v9377_v63  ;;  %v9447_v63 = vld [vmem:[#allocation8 + $0x568] ss:$16 sps:$4 sm:$0xff]  }
 0x383   :  { %7501 = vmatpush2.bf16.msra.mxu1 %v9372_v32  ;;  %v9452_v32 = vld [vmem:[#allocation8 + $0x76c] ss:$16 sps:$4 sm:$0xff]  }
 0x384   :  { %7556 = vmatprep.subr.bf16.mxu1 %v9380_v39  ;;  %7460 = vmatmul.mubr.bf16.vlgmr.msra.gmra.mxu0 %v9905_v36  ;;  %v9390_v36 = vld [vmem:[#allocation8 + $0x6a8] ss:$16 sps:$4 sm:$0xff]  }
 0x385   :  { %7514 = vmatpush1.bf16.msra.mxu0 %v9375_v33  ;;  %7545 = vmatprep.mubr.bf16.mxu0 %v10024_v53  ;;  %v9396_v53 = vld [vmem:[#allocation8 + $0x688] ss:$16 sps:$4 sm:$0xff]   ;;  %v9455_v33 = vld [vmem:[#allocation8 + $0x54c] ss:$16 sps:$4 sm:$0xff]  }
 0x386   :  { %7503 = vmatmul.mubr.bf16.vlgmr.msra.gmra.mxu1 %v9924_v11  ;;  %7515 = vmatprep.subr.bf16.mxu0 %v9383_v42  ;;  %v9398_v11 = vld [vmem:[#allocation8 + $0x68c] ss:$16 sps:$4 sm:$0xff]   ;;  %v9450_v39 = vld [vmem:[#allocation8 + $0x768] ss:$16 sps:$4 sm:$0xff]  }
 0x387   :  { %7557 = vmatpush1.bf16.msra.mxu1 %v9378_v38  ;;  %7588 = vmatprep.mubr.bf16.mxu1 %v10027_v23  ;;  %v9399_v23 = vld [vmem:[#allocation8 + $0x468] ss:$16 sps:$4 sm:$0xff]   ;;  %v9458_v38 = vld [vmem:[#allocation8 + $0x74c] ss:$16 sps:$4 sm:$0xff]  }
 0x388   :  { %7558 = vmatprep.subr.bf16.mxu1 %v9386_v61  ;;  %v9453_v42 = vld [vmem:[#allocation8 + $0x548] ss:$16 sps:$4 sm:$0xff]  }
 0x389   :  { %7516 = vmatpush1.bf16.msra.mxu0 %v9381_v50  ;;  %v9456_v61 = vld [vmem:[#allocation8 + $0x748] ss:$16 sps:$4 sm:$0xff]   ;;  %v9461_v50 = vld [vmem:[#allocation8 + $0x52c] ss:$16 sps:$4 sm:$0xff]  }
 0x38a   :  { %7517 = vmatprep.subr.bf16.mxu0 %v9389_v45  ;;  %v9459_v45 = vld [vmem:[#allocation8 + $0x528] ss:$16 sps:$4 sm:$0xff]  }
 0x38b   :  { %7559 = vmatpush1.bf16.msra.mxu1 %v9384_v41  ;;  %v9464_v41 = vld [vmem:[#allocation8 + $0x72c] ss:$16 sps:$4 sm:$0xff]  }
 0x38c   :  { %7560 = vmatprep.subr.bf16.mxu1 %v9392_v51  ;;  %v9462_v51 = vld [vmem:[#allocation8 + $0x728] ss:$16 sps:$4 sm:$0xff]  }
 0x38d   :  { %7518 = vmatpush1.bf16.msra.mxu0 %v9387_v2  ;;  %v9467_v2 = vld [vmem:[#allocation8 + $0x50c] ss:$16 sps:$4 sm:$0xff]  }
 0x38e   :  { %7519 = vmatprep.subr.bf16.mxu0 %v9395_v54  ;;  %v9465_v54 = vld [vmem:[#allocation8 + $0x508] ss:$16 sps:$4 sm:$0xff]  }
 0x38f   :  { %7561 = vmatpush1.bf16.msra.mxu1 %v9390_v36  ;;  %v9470_v36 = vld [vmem:[#allocation8 + $0x70c] ss:$16 sps:$4 sm:$0xff]  }
 0x390   :  { %7562 = vmatprep.subr.bf16.mxu1 %v9398_v11  ;;  %v9468_v11 = vld [vmem:[#allocation8 + $0x708] ss:$16 sps:$4 sm:$0xff]  }
 0x391   :  { %7520 = vmatpush1.bf16.msra.mxu0 %v9393_v55  ;;  %v9473_v55 = vld [vmem:[#allocation8 + $0x8ec] ss:$16 sps:$4 sm:$0xff]  }
 0x392   :  { %7521 = vmatprep.subr.bf16.mxu0 %v9401_v56  ;;  %v9471_v56 = vld [vmem:[#allocation8 + $0x8e8] ss:$16 sps:$4 sm:$0xff]  }
 0x393   :  { %7563 = vmatpush1.bf16.msra.mxu1 %v9396_v53  ;;  %v9476_v53 = vld [vmem:[#allocation8 + $0xaec] ss:$16 sps:$4 sm:$0xff]  }
 0x394   :  { %7564 = vmatprep.subr.bf16.mxu1 %v9404_v47  ;;  %v9474_v47 = vld [vmem:[#allocation8 + $0xae8] ss:$16 sps:$4 sm:$0xff]  }
 0x395   :  { %7522 = vmatpush1.bf16.msra.mxu0 %v9399_v23  ;;  %v9479_v23 = vld [vmem:[#allocation8 + $0x8cc] ss:$16 sps:$4 sm:$0xff]  }
 0x396   :  { %7523 = vmatprep.subr.bf16.mxu0 %v9407_v59  ;;  %v9477_v59 = vld [vmem:[#allocation8 + $0x8c8] ss:$16 sps:$4 sm:$0xff]  }
 0x397   :  { %7565 = vmatpush1.bf16.msra.mxu1 %v9402_v57  ;;  %v9482_v57 = vld [vmem:[#allocation8 + $0xacc] ss:$16 sps:$4 sm:$0xff]  }
 0x398   :  { %7566 = vmatprep.subr.bf16.mxu1 %v9410_v62  ;;  %v9480_v62 = vld [vmem:[#allocation8 + $0xac8] ss:$16 sps:$4 sm:$0xff]  }
 0x399   :  { %7524 = vmatpush1.bf16.msra.mxu0 %v9405_v0  ;;  %v9485_v0 = vld [vmem:[#allocation8 + $0x8ac] ss:$16 sps:$4 sm:$0xff]  }
 0x39a   :  { %7525 = vmatprep.subr.bf16.mxu0 %v9413_v52  ;;  %v9483_v52 = vld [vmem:[#allocation8 + $0x8a8] ss:$16 sps:$4 sm:$0xff]  }
 0x39b   :  { %7567 = vmatpush1.bf16.msra.mxu1 %v9408_v60  ;;  %v9488_v60 = vld [vmem:[#allocation8 + $0xaac] ss:$16 sps:$4 sm:$0xff]  }
 0x39c   :  { %7568 = vmatprep.subr.bf16.mxu1 %v9416_v34  ;;  %v9491_v34 = vld [vmem:[#allocation8 + $0x88c] ss:$16 sps:$4 sm:$0xff]  }
 0x39d   :  { %7526 = vmatpush1.bf16.msra.mxu0 %v9411_v29  ;;  %v9489_v29 = vld [vmem:[#allocation8 + $0x888] ss:$16 sps:$4 sm:$0xff]  }
 0x39e   :  { %7527 = vmatprep.subr.bf16.mxu0 %v9419_v4  ;;  %v9500_v4 = vld [vmem:[#allocation8 + $0xa6c] ss:$16 sps:$4 sm:$0xff]  }
 0x39f   :  { %7569 = vmatpush1.bf16.msra.mxu1 %v9414_v1  ;;  %v9497_v1 = vld [vmem:[#allocation8 + $0x86c] ss:$16 sps:$4 sm:$0xff]  }
 0x3a0   :  { %7570 = vmatprep.subr.bf16.mxu1 %v9422_v27  ;;  %v9498_v27 = vld [vmem:[#allocation8 + $0xa68] ss:$16 sps:$4 sm:$0xff]  }
 0x3a1   :  { %7528 = vmatpush1.bf16.msra.mxu0 %v9417_v20  ;;  %v9503_v20 = vld [vmem:[#allocation8 + $0x84c] ss:$16 sps:$4 sm:$0xff]  }
 0x3a2   :  { %7529 = vmatprep.subr.bf16.mxu0 %v9425_v15  ;;  %v9501_v15 = vld [vmem:[#allocation8 + $0x848] ss:$16 sps:$4 sm:$0xff]  }
 0x3a3   :  { %7571 = vmatpush1.bf16.msra.mxu1 %v9420_v18  ;;  %v9506_v18 = vld [vmem:[#allocation8 + $0xa4c] ss:$16 sps:$4 sm:$0xff]  }
 0x3a4   :  { %7572 = vmatprep.subr.bf16.mxu1 %v9428_v8  ;;  %v9504_v8 = vld [vmem:[#allocation8 + $0xa48] ss:$16 sps:$4 sm:$0xff]  }
 0x3a5   :  { %7530 = vmatpush2.bf16.msra.mxu0 %v9423_v12  ;;  %v9509_v12 = vld [vmem:[#allocation8 + $0x82c] ss:$16 sps:$4 sm:$0xff]  }
 0x3a6   :  { %7531 = vmatprep.subr.bf16.mxu0 %v9431_v13  ;;  %v9507_v13 = vld [vmem:[#allocation8 + $0x828] ss:$16 sps:$4 sm:$0xff]  }
 0x3a7   :  { %7573 = vmatpush2.bf16.msra.mxu1 %v9426_v7  ;;  %v9512_v7 = vld [vmem:[#allocation8 + $0xa2c] ss:$16 sps:$4 sm:$0xff]  }
 0x3a8   :  { %7574 = vmatprep.subr.bf16.mxu1 %v9434_v6  ;;  %v9510_v6 = vld [vmem:[#allocation8 + $0xa28] ss:$16 sps:$4 sm:$0xff]  }
 0x3a9   :  { %7532 = vmatpush2.bf16.msra.mxu0 %v9429_v35  ;;  %v9515_v35 = vld [vmem:[#allocation8 + $0x80c] ss:$16 sps:$4 sm:$0xff]  }
 0x3aa   :  { %7533 = vmatprep.subr.bf16.mxu0 %v9437_v19  ;;  %v9513_v19 = vld [vmem:[#allocation8 + $0x808] ss:$16 sps:$4 sm:$0xff]  }
 0x3ab   :  { %7575 = vmatpush2.bf16.msra.mxu1 %v9432_v43  ;;  %v9518_v43 = vld [vmem:[#allocation8 + $0xa0c] ss:$16 sps:$4 sm:$0xff]  }
 0x3ac   :  { %7576 = vmatprep.subr.bf16.mxu1 %v9440_v22  ;;  %v9516_v22 = vld [vmem:[#allocation8 + $0xa08] ss:$16 sps:$4 sm:$0xff]  }
 0x3ad   :  { %7534 = vmatpush2.bf16.msra.mxu0 %v9435_v3  ;;  %v9521_v3 = vld [vmem:[#allocation8 + $0x9ec] ss:$16 sps:$4 sm:$0xff]  }
 0x3ae   :  { %7535 = vmatprep.subr.bf16.mxu0 %v9443_v25  ;;  %v9519_v25 = vld [vmem:[#allocation8 + $0x9e8] ss:$16 sps:$4 sm:$0xff]  }
 0x3af   :  { %7577 = vmatpush2.bf16.msra.mxu1 %v9438_v5  ;;  %v9524_v5 = vld [vmem:[#allocation8 + $0xbec] ss:$16 sps:$4 sm:$0xff]  }
 0x3b0   :  { %7578 = vmatprep.subr.bf16.mxu1 %v9446_v24  ;;  %v9522_v24 = vld [vmem:[#allocation8 + $0xbe8] ss:$16 sps:$4 sm:$0xff]  }
 0x3b1   :  { %7536 = vmatpush2.bf16.msra.mxu0 %v9441_v46  ;;  %v9527_v46 = vld [vmem:[#allocation8 + $0x9cc] ss:$16 sps:$4 sm:$0xff]  }
 0x3b2   :  { %7537 = vmatprep.subr.bf16.mxu0 %v9449_v26  ;;  %v9525_v26 = vld [vmem:[#allocation8 + $0x9c8] ss:$16 sps:$4 sm:$0xff]  }
 0x3b3   :  { %7579 = vmatpush2.bf16.msra.mxu1 %v9444_v31  ;;  %v9530_v31 = vld [vmem:[#allocation8 + $0xbcc] ss:$16 sps:$4 sm:$0xff]  }
 0x3b4   :  { %7580 = vmatprep.subr.bf16.mxu1 %v9452_v32  ;;  %v9528_v32 = vld [vmem:[#allocation8 + $0xbc8] ss:$16 sps:$4 sm:$0xff]  }
 0x3b5   :  { %7538 = vmatpush2.bf16.msra.mxu0 %v9447_v63  ;;  %v9533_v63 = vld [vmem:[#allocation8 + $0x9ac] ss:$16 sps:$4 sm:$0xff]  }
 0x3b6   :  { %7539 = vmatprep.subr.bf16.mxu0 %v9455_v33  ;;  %v9531_v33 = vld [vmem:[#allocation8 + $0x9a8] ss:$16 sps:$4 sm:$0xff]  }
 0x3b7   :  { %7581 = vmatpush2.bf16.msra.mxu1 %v9450_v39  ;;  %v9536_v39 = vld [vmem:[#allocation8 + $0xbac] ss:$16 sps:$4 sm:$0xff]  }
 0x3b8   :  { %7582 = vmatprep.subr.bf16.mxu1 %v9458_v38  ;;  %v9534_v38 = vld [vmem:[#allocation8 + $0xba8] ss:$16 sps:$4 sm:$0xff]  }
 0x3b9   :  { %7540 = vmatpush2.bf16.msra.mxu0 %v9453_v42  ;;  %v9539_v42 = vld [vmem:[#allocation8 + $0x98c] ss:$16 sps:$4 sm:$0xff]  }
 0x3ba   :  { %7541 = vmatprep.subr.bf16.mxu0 %v9461_v50  ;;  %v9537_v50 = vld [vmem:[#allocation8 + $0x988] ss:$16 sps:$4 sm:$0xff]  }
 0x3bb   :  { %7583 = vmatpush2.bf16.msra.mxu1 %v9456_v61  ;;  %v9542_v61 = vld [vmem:[#allocation8 + $0xb8c] ss:$16 sps:$4 sm:$0xff]  }
 0x3bc   :  { %7584 = vmatprep.subr.bf16.mxu1 %v9464_v41  ;;  %v9540_v41 = vld [vmem:[#allocation8 + $0xb88] ss:$16 sps:$4 sm:$0xff]  }
 0x3bd   :  { %7542 = vmatpush2.bf16.msra.mxu0 %v9459_v45  ;;  %v9545_v45 = vld [vmem:[#allocation8 + $0x96c] ss:$16 sps:$4 sm:$0xff]  }
 0x3be   :  { %7543 = vmatprep.subr.bf16.mxu0 %v9467_v2  ;;  %v9543_v2 = vld [vmem:[#allocation8 + $0x968] ss:$16 sps:$4 sm:$0xff]  }
 0x3bf   :  { %7585 = vmatpush2.bf16.msra.mxu1 %v9462_v51  ;;  %v9548_v51 = vld [vmem:[#allocation8 + $0xb6c] ss:$16 sps:$4 sm:$0xff]  }
 0x3c0   :  { %7586 = vmatprep.subr.bf16.mxu1 %v9470_v36  ;;  %v9546_v36 = vld [vmem:[#allocation8 + $0xb68] ss:$16 sps:$4 sm:$0xff]  }
 0x3c1   :  { %7544 = vmatpush2.bf16.msra.mxu0 %v9465_v54  ;;  %v9551_v54 = vld [vmem:[#allocation8 + $0x94c] ss:$16 sps:$4 sm:$0xff]  }
 0x3c2   :  { %7599 = vmatprep.subr.bf16.mxu0 %v9473_v55  ;;  %v9549_v55 = vld [vmem:[#allocation8 + $0x948] ss:$16 sps:$4 sm:$0xff]  }
 0x3c3   :  { %7587 = vmatpush2.bf16.msra.mxu1 %v9468_v11  ;;  %v9554_v11 = vld [vmem:[#allocation8 + $0xb4c] ss:$16 sps:$4 sm:$0xff]  }
 0x3c4   :  { %7642 = vmatprep.subr.bf16.mxu1 %v9476_v53  ;;  %7546 = vmatmul.mubr.bf16.vlgmr.msra.gmra.mxu0 %v9944_v9  ;;  %v9486_v9 = vld [vmem:[#allocation8 + $0xaa8] ss:$16 sps:$4 sm:$0xff]  }
 0x3c5   :  { %7600 = vmatpush1.bf16.msra.mxu0 %v9471_v56  ;;  %7631 = vmatprep.mubr.bf16.mxu0 %v10051_v28  ;;  %v9492_v28 = vld [vmem:[#allocation8 + $0xa88] ss:$16 sps:$4 sm:$0xff]   ;;  %v9557_v56 = vld [vmem:[#allocation8 + $0x92c] ss:$16 sps:$4 sm:$0xff]  }
 0x3c6   :  { %7589 = vmatmul.mubr.bf16.vlgmr.msra.gmra.mxu1 %v9962_v40  ;;  %7601 = vmatprep.subr.bf16.mxu0 %v9479_v23  ;;  %v9494_v40 = vld [vmem:[#allocation8 + $0xa8c] ss:$16 sps:$4 sm:$0xff]   ;;  %v9552_v53 = vld [vmem:[#allocation8 + $0xb48] ss:$16 sps:$4 sm:$0xff]  }
 0x3c7   :  { %7643 = vmatpush1.bf16.msra.mxu1 %v9474_v47  ;;  %7674 = vmatprep.mubr.bf16.mxu1 %v10054_v21  ;;  %v9495_v21 = vld [vmem:[#allocation8 + $0x868] ss:$16 sps:$4 sm:$0xff]   ;;  %v9560_v47 = vld [vmem:[#allocation8 + $0xb2c] ss:$16 sps:$4 sm:$0xff]  }
 0x3c8   :  { %7644 = vmatprep.subr.bf16.mxu1 %v9482_v57  ;;  %v9555_v23 = vld [vmem:[#allocation8 + $0x928] ss:$16 sps:$4 sm:$0xff]  }
 0x3c9   :  { %7602 = vmatpush1.bf16.msra.mxu0 %v9477_v59  ;;  %v9558_v57 = vld [vmem:[#allocation8 + $0xb28] ss:$16 sps:$4 sm:$0xff]   ;;  %v9563_v59 = vld [vmem:[#allocation8 + $0x90c] ss:$16 sps:$4 sm:$0xff]  }
 0x3ca   :  { %7603 = vmatprep.subr.bf16.mxu0 %v9485_v0  ;;  %v9561_v0 = vld [vmem:[#allocation8 + $0x908] ss:$16 sps:$4 sm:$0xff]  }
 0x3cb   :  { %7645 = vmatpush1.bf16.msra.mxu1 %v9480_v62  ;;  %v9566_v62 = vld [vmem:[#allocation8 + $0xb0c] ss:$16 sps:$4 sm:$0xff]  }
 0x3cc   :  { %7646 = vmatprep.subr.bf16.mxu1 %v9488_v60  ;;  %v9564_v60 = vld [vmem:[#allocation8 + $0xb08] ss:$16 sps:$4 sm:$0xff]  }
 0x3cd   :  { %7604 = vmatpush1.bf16.msra.mxu0 %v9483_v52  ;;  %v9569_v52 = vld [vmem:[#allocation8 + $0xcec] ss:$16 sps:$4 sm:$0xff]  }
 0x3ce   :  { %7605 = vmatprep.subr.bf16.mxu0 %v9491_v34  ;;  %v9567_v34 = vld [vmem:[#allocation8 + $0xce8] ss:$16 sps:$4 sm:$0xff]  }
 0x3cf   :  { %7647 = vmatpush1.bf16.msra.mxu1 %v9486_v9  ;;  %v9572_v9 = vld [vmem:[#allocation8 + $0xeec] ss:$16 sps:$4 sm:$0xff]  }
 0x3d0   :  { %7648 = vmatprep.subr.bf16.mxu1 %v9494_v40  ;;  %v9570_v40 = vld [vmem:[#allocation8 + $0xee8] ss:$16 sps:$4 sm:$0xff]  }
 0x3d1   :  { %7606 = vmatpush1.bf16.msra.mxu0 %v9489_v29  ;;  %v9575_v29 = vld [vmem:[#allocation8 + $0xccc] ss:$16 sps:$4 sm:$0xff]  }
 0x3d2   :  { %7607 = vmatprep.subr.bf16.mxu0 %v9497_v1  ;;  %v9573_v1 = vld [vmem:[#allocation8 + $0xcc8] ss:$16 sps:$4 sm:$0xff]  }
 0x3d3   :  { %7649 = vmatpush1.bf16.msra.mxu1 %v9492_v28  ;;  %v9578_v28 = vld [vmem:[#allocation8 + $0xecc] ss:$16 sps:$4 sm:$0xff]  }
 0x3d4   :  { %7650 = vmatprep.subr.bf16.mxu1 %v9500_v4  ;;  %v9576_v4 = vld [vmem:[#allocation8 + $0xec8] ss:$16 sps:$4 sm:$0xff]  }
 0x3d5   :  { %7608 = vmatpush1.bf16.msra.mxu0 %v9495_v21  ;;  %v9581_v21 = vld [vmem:[#allocation8 + $0xcac] ss:$16 sps:$4 sm:$0xff]  }
 0x3d6   :  { %7609 = vmatprep.subr.bf16.mxu0 %v9503_v20  ;;  %v9579_v20 = vld [vmem:[#allocation8 + $0xca8] ss:$16 sps:$4 sm:$0xff]  }
 0x3d7   :  { %7651 = vmatpush1.bf16.msra.mxu1 %v9498_v27  ;;  %v9584_v27 = vld [vmem:[#allocation8 + $0xeac] ss:$16 sps:$4 sm:$0xff]  }
 0x3d8   :  { %7652 = vmatprep.subr.bf16.mxu1 %v9506_v18  ;;  %v9587_v18 = vld [vmem:[#allocation8 + $0xc8c] ss:$16 sps:$4 sm:$0xff]  }
 0x3d9   :  { %7610 = vmatpush1.bf16.msra.mxu0 %v9501_v15  ;;  %v9585_v15 = vld [vmem:[#allocation8 + $0xc88] ss:$16 sps:$4 sm:$0xff]  }
 0x3da   :  { %7611 = vmatprep.subr.bf16.mxu0 %v9509_v12  ;;  %v9596_v12 = vld [vmem:[#allocation8 + $0xe6c] ss:$16 sps:$4 sm:$0xff]  }
 0x3db   :  { %7653 = vmatpush1.bf16.msra.mxu1 %v9504_v8  ;;  %v9593_v8 = vld [vmem:[#allocation8 + $0xc6c] ss:$16 sps:$4 sm:$0xff]  }
 0x3dc   :  { %7654 = vmatprep.subr.bf16.mxu1 %v9512_v7  ;;  %v9594_v7 = vld [vmem:[#allocation8 + $0xe68] ss:$16 sps:$4 sm:$0xff]  }
 0x3dd   :  { %7612 = vmatpush1.bf16.msra.mxu0 %v9507_v13  ;;  %v9599_v13 = vld [vmem:[#allocation8 + $0xc4c] ss:$16 sps:$4 sm:$0xff]  }
 0x3de   :  { %7613 = vmatprep.subr.bf16.mxu0 %v9515_v35  ;;  %v9597_v35 = vld [vmem:[#allocation8 + $0xc48] ss:$16 sps:$4 sm:$0xff]  }
 0x3df   :  { %7655 = vmatpush1.bf16.msra.mxu1 %v9510_v6  ;;  %v9602_v6 = vld [vmem:[#allocation8 + $0xe4c] ss:$16 sps:$4 sm:$0xff]  }
 0x3e0   :  { %7656 = vmatprep.subr.bf16.mxu1 %v9518_v43  ;;  %v9600_v43 = vld [vmem:[#allocation8 + $0xe48] ss:$16 sps:$4 sm:$0xff]  }
 0x3e1   :  { %7614 = vmatpush1.bf16.msra.mxu0 %v9513_v19  ;;  %v9605_v19 = vld [vmem:[#allocation8 + $0xc2c] ss:$16 sps:$4 sm:$0xff]  }
 0x3e2   :  { %7615 = vmatprep.subr.bf16.mxu0 %v9521_v3  ;;  %v9603_v3 = vld [vmem:[#allocation8 + $0xc28] ss:$16 sps:$4 sm:$0xff]  }
 0x3e3   :  { %7657 = vmatpush1.bf16.msra.mxu1 %v9516_v22  ;;  %v9608_v22 = vld [vmem:[#allocation8 + $0xe2c] ss:$16 sps:$4 sm:$0xff]  }
 0x3e4   :  { %7658 = vmatprep.subr.bf16.mxu1 %v9524_v5  ;;  %v9606_v5 = vld [vmem:[#allocation8 + $0xe28] ss:$16 sps:$4 sm:$0xff]  }
 0x3e5   :  { %7616 = vmatpush2.bf16.msra.mxu0 %v9519_v25  ;;  %v9611_v25 = vld [vmem:[#allocation8 + $0xc0c] ss:$16 sps:$4 sm:$0xff]  }
 0x3e6   :  { %7617 = vmatprep.subr.bf16.mxu0 %v9527_v46  ;;  %v9609_v46 = vld [vmem:[#allocation8 + $0xc08] ss:$16 sps:$4 sm:$0xff]  }
 0x3e7   :  { %7659 = vmatpush2.bf16.msra.mxu1 %v9522_v24  ;;  %v9614_v24 = vld [vmem:[#allocation8 + $0xe0c] ss:$16 sps:$4 sm:$0xff]  }
 0x3e8   :  { %7660 = vmatprep.subr.bf16.mxu1 %v9530_v31  ;;  %v9612_v31 = vld [vmem:[#allocation8 + $0xe08] ss:$16 sps:$4 sm:$0xff]  }
 0x3e9   :  { %7618 = vmatpush2.bf16.msra.mxu0 %v9525_v26  ;;  %v9617_v26 = vld [vmem:[#allocation8 + $0xdec] ss:$16 sps:$4 sm:$0xff]  }
 0x3ea   :  { %7619 = vmatprep.subr.bf16.mxu0 %v9533_v63  ;;  %v9615_v63 = vld [vmem:[#allocation8 + $0xde8] ss:$16 sps:$4 sm:$0xff]  }
 0x3eb   :  { %7661 = vmatpush2.bf16.msra.mxu1 %v9528_v32  ;;  %v9620_v32 = vld [vmem:[#allocation8 + $0xfec] ss:$16 sps:$4 sm:$0xff]  }
 0x3ec   :  { %7662 = vmatprep.subr.bf16.mxu1 %v9536_v39  ;;  %v9618_v39 = vld [vmem:[#allocation8 + $0xfe8] ss:$16 sps:$4 sm:$0xff]  }
 0x3ed   :  { %7620 = vmatpush2.bf16.msra.mxu0 %v9531_v33  ;;  %v9623_v33 = vld [vmem:[#allocation8 + $0xdcc] ss:$16 sps:$4 sm:$0xff]  }
 0x3ee   :  { %7621 = vmatprep.subr.bf16.mxu0 %v9539_v42  ;;  %v9621_v42 = vld [vmem:[#allocation8 + $0xdc8] ss:$16 sps:$4 sm:$0xff]  }
 0x3ef   :  { %7663 = vmatpush2.bf16.msra.mxu1 %v9534_v38  ;;  %v9626_v38 = vld [vmem:[#allocation8 + $0xfcc] ss:$16 sps:$4 sm:$0xff]  }
 0x3f0   :  { %7664 = vmatprep.subr.bf16.mxu1 %v9542_v61  ;;  %v9624_v61 = vld [vmem:[#allocation8 + $0xfc8] ss:$16 sps:$4 sm:$0xff]  }
 0x3f1   :  { %7622 = vmatpush2.bf16.msra.mxu0 %v9537_v50  ;;  %v9629_v50 = vld [vmem:[#allocation8 + $0xdac] ss:$16 sps:$4 sm:$0xff]  }
 0x3f2   :  { %7623 = vmatprep.subr.bf16.mxu0 %v9545_v45  ;;  %v9627_v45 = vld [vmem:[#allocation8 + $0xda8] ss:$16 sps:$4 sm:$0xff]  }
 0x3f3   :  { %7665 = vmatpush2.bf16.msra.mxu1 %v9540_v41  ;;  %v9632_v41 = vld [vmem:[#allocation8 + $0xfac] ss:$16 sps:$4 sm:$0xff]  }
 0x3f4   :  { %7666 = vmatprep.subr.bf16.mxu1 %v9548_v51  ;;  %v9630_v51 = vld [vmem:[#allocation8 + $0xfa8] ss:$16 sps:$4 sm:$0xff]  }
 0x3f5   :  { %7624 = vmatpush2.bf16.msra.mxu0 %v9543_v2  ;;  %v9635_v2 = vld [vmem:[#allocation8 + $0xd8c] ss:$16 sps:$4 sm:$0xff]  }
 0x3f6   :  { %7625 = vmatprep.subr.bf16.mxu0 %v9551_v54  ;;  %v9633_v54 = vld [vmem:[#allocation8 + $0xd88] ss:$16 sps:$4 sm:$0xff]  }
 0x3f7   :  { %7667 = vmatpush2.bf16.msra.mxu1 %v9546_v36  ;;  %v9638_v36 = vld [vmem:[#allocation8 + $0xf8c] ss:$16 sps:$4 sm:$0xff]  }
 0x3f8   :  { %7668 = vmatprep.subr.bf16.mxu1 %v9554_v11  ;;  %v9636_v11 = vld [vmem:[#allocation8 + $0xf88] ss:$16 sps:$4 sm:$0xff]  }
 0x3f9   :  { %7626 = vmatpush2.bf16.msra.mxu0 %v9549_v55  ;;  %v9641_v55 = vld [vmem:[#allocation8 + $0xd6c] ss:$16 sps:$4 sm:$0xff]  }
 0x3fa   :  { %7627 = vmatprep.subr.bf16.mxu0 %v9557_v56  ;;  %v9639_v56 = vld [vmem:[#allocation8 + $0xd68] ss:$16 sps:$4 sm:$0xff]  }
 0x3fb   :  { %7669 = vmatpush2.bf16.msra.mxu1 %v9552_v53  ;;  %v9644_v53 = vld [vmem:[#allocation8 + $0xf6c] ss:$16 sps:$4 sm:$0xff]  }
 0x3fc   :  { %7670 = vmatprep.subr.bf16.mxu1 %v9560_v47  ;;  %v9642_v47 = vld [vmem:[#allocation8 + $0xf68] ss:$16 sps:$4 sm:$0xff]  }
 0x3fd   :  { %7628 = vmatpush2.bf16.msra.mxu0 %v9555_v23  ;;  %v9647_v23 = vld [vmem:[#allocation8 + $0xd4c] ss:$16 sps:$4 sm:$0xff]  }
 0x3fe   :  { %7629 = vmatprep.subr.bf16.mxu0 %v9563_v59  ;;  %v9645_v59 = vld [vmem:[#allocation8 + $0xd48] ss:$16 sps:$4 sm:$0xff]  }
 0x3ff   :  { %7671 = vmatpush2.bf16.msra.mxu1 %v9558_v57  ;;  %v9650_v57 = vld [vmem:[#allocation8 + $0xf4c] ss:$16 sps:$4 sm:$0xff]  }
 0x400   :  { %7672 = vmatprep.subr.bf16.mxu1 %v9566_v62  ;;  %v9648_v62 = vld [vmem:[#allocation8 + $0xf48] ss:$16 sps:$4 sm:$0xff]  }
 0x401   :  { %7630 = vmatpush2.bf16.msra.mxu0 %v9561_v0  ;;  %v9653_v0 = vld [vmem:[#allocation8 + $0xd2c] ss:$16 sps:$4 sm:$0xff]  }
 0x402   :  { %7685 = vmatprep.subr.bf16.mxu0 %v9569_v52  ;;  %v9651_v52 = vld [vmem:[#allocation8 + $0xd28] ss:$16 sps:$4 sm:$0xff]  }
 0x403   :  { %7673 = vmatpush2.bf16.msra.mxu1 %v9564_v60  ;;  %v9656_v60 = vld [vmem:[#allocation8 + $0xf2c] ss:$16 sps:$4 sm:$0xff]  }
 0x404   :  { %7728 = vmatprep.subr.bf16.mxu1 %v9572_v9  ;;  %7632 = vmatmul.mubr.bf16.vlgmr.msra.gmra.mxu0 %v10002_v17  ;;  %v9582_v17 = vld [vmem:[#allocation8 + $0xea8] ss:$16 sps:$4 sm:$0xff]  }
 0x405   :  { %7686 = vmatpush1.bf16.msra.mxu0 %v9567_v34  ;;  %7717 = vmatprep.mubr.bf16.mxu0 %v10073_v14  ;;  %v9588_v14 = vld [vmem:[#allocation8 + $0xe88] ss:$16 sps:$4 sm:$0xff]   ;;  %v9659_v34 = vld [vmem:[#allocation8 + $0xd0c] ss:$16 sps:$4 sm:$0xff]  }
 0x406   :  { %7675 = vmatmul.mubr.bf16.vlgmr.msra.gmra.mxu1 %v10036_v10  ;;  %7687 = vmatprep.subr.bf16.mxu0 %v9575_v29  ;;  %v9590_v10 = vld [vmem:[#allocation8 + $0xe8c] ss:$16 sps:$4 sm:$0xff]   ;;  %v9654_v9 = vld [vmem:[#allocation8 + $0xf28] ss:$16 sps:$4 sm:$0xff]  }
 0x407   :  { %7729 = vmatpush1.bf16.msra.mxu1 %v9570_v40  ;;  %7760 = vmatprep.mubr.bf16.mxu1 %v10086_v49  ;;  %v9591_v49 = vld [vmem:[#allocation8 + $0xc68] ss:$16 sps:$4 sm:$0xff]   ;;  %v9662_v40 = vld [vmem:[#allocation8 + $0xf0c] ss:$16 sps:$4 sm:$0xff]  }
 0x408   :  { %7730 = vmatprep.subr.bf16.mxu1 %v9578_v28  ;;  %v9657_v29 = vld [vmem:[#allocation8 + $0xd08] ss:$16 sps:$4 sm:$0xff]  }
 0x409   :  { %7688 = vmatpush1.bf16.msra.mxu0 %v9573_v1  ;;  %v9660_v28 = vld [vmem:[#allocation8 + $0xf08] ss:$16 sps:$4 sm:$0xff]   ;;  %v7117_v1 = vpop.f32.mrf.mxu0 }
 0x40a   :  { %7689 = vmatprep.subr.bf16.mxu0 %v9581_v21 }
 0x40b   :  { %7731 = vmatpush1.bf16.msra.mxu1 %v9576_v4  ;;  %v7160_v4 = vpop.f32.mrf.mxu1  ;;  %v7119_v21 = vpop.f32.mrf.mxu0 }
 0x40c   :  { %7732 = vmatprep.subr.bf16.mxu1 %v9584_v27 }
 0x40d   :  { %7690 = vmatpush1.bf16.msra.mxu0 %v9579_v20  ;;  %v7162_v27 = vpop.f32.mrf.mxu1  ;;  %v7121_v20 = vpop.f32.mrf.mxu0 }
 0x40e   :  { %7691 = vmatprep.subr.bf16.mxu0 %v9587_v18 }
 0x40f   :  { %7733 = vmatpush1.bf16.msra.mxu1 %v9582_v17  ;;  %v7164_v17 = vpop.f32.mrf.mxu1  ;;  %v7123_v18 = vpop.f32.mrf.mxu0 }
 0x410   :  { %7734 = vmatprep.subr.bf16.mxu1 %v9590_v10 }
 0x411   :  { %7692 = vmatpush1.bf16.msra.mxu0 %v9585_v15  ;;  %v7166_v10 = vpop.f32.mrf.mxu1  ;;  %v7203_v15 = vpop.f32.mrf.mxu0 }
 0x412   :  { %7693 = vmatprep.subr.bf16.mxu0 %v9593_v8 }
 0x413   :  { %7735 = vmatpush1.bf16.msra.mxu1 %v9588_v14  ;;  %v7246_v14 = vpop.f32.mrf.mxu1  ;;  %v7205_v8 = vpop.f32.mrf.mxu0 }
 0x414   :  { %7736 = vmatprep.subr.bf16.mxu1 %v9596_v12 }
 0x415   :  { %7694 = vmatpush1.bf16.msra.mxu0 %v9591_v49  ;;  %v7248_v12 = vpop.f32.mrf.mxu1  ;;  %v7207_v49 = vpop.f32.mrf.mxu0 }
 0x416   :  { %7695 = vmatprep.subr.bf16.mxu0 %v9599_v13 }
 0x417   :  { %7737 = vmatpush1.bf16.msra.mxu1 %v9594_v7  ;;  %v10115_v7 = vpop.f32.mrf.mxu1  ;;  %v7209_v13 = vpop.f32.mrf.mxu0 }
 0x418   :  { %7738 = vmatprep.subr.bf16.mxu1 %v9602_v6 }
 0x419   :  { %7696 = vmatpush1.bf16.msra.mxu0 %v9597_v35  ;;  %v7252_v6 = vpop.f32.mrf.mxu1 }
 0x41a   :  { %7697 = vmatprep.subr.bf16.mxu0 %v9605_v19 }
 0x41b   :  { %7739 = vmatpush1.bf16.msra.mxu1 %v9600_v43  ;;  %v10117_v35 = vpop.f32.mrf.mxu1 }
 0x41c   :  { %7740 = vmatprep.subr.bf16.mxu1 %v9608_v22 }
 0x41d   :  { %7698 = vmatpush1.bf16.msra.mxu0 %v9603_v3  ;;  %v7334_v43 = vpop.f32.mrf.mxu1 }
 0x41e   :  { %7699 = vmatprep.subr.bf16.mxu0 %v9611_v25 }
 0x41f   :  { %7741 = vmatpush1.bf16.msra.mxu1 %v9606_v5  ;;  %v10121_v22 = vpop.f32.mrf.mxu1 }
 0x420   :  { %7742 = vmatprep.subr.bf16.mxu1 %v9614_v24 }
 0x421   :  { %7700 = vmatpush1.bf16.msra.mxu0 %v9609_v46  ;;  %v10123_v5 = vpop.f32.mrf.mxu1 }
 0x422   :  { %7701 = vmatprep.subr.bf16.mxu0 %v9617_v26 }
 0x423   :  { %7743 = vmatpush1.bf16.msra.mxu1 %v9612_v31  ;;  %v10127_v24 = vpop.f32.mrf.mxu1 }
 0x424   :  { %7744 = vmatprep.subr.bf16.mxu1 %v9620_v32 }
 0x425   :  { %7702 = vmatpush2.bf16.msra.mxu0 %v9615_v63  ;;  %v10129_v31 = vpop.f32.mrf.mxu1 }
 0x426   :  { %7703 = vmatprep.subr.bf16.mxu0 %v9623_v33 }
 0x427   :  { %7745 = vmatpush2.bf16.msra.mxu1 %v9618_v39  ;;  %v10133_v32 = vpop.f32.mrf.mxu1 }
 0x428   :  { %7746 = vmatprep.subr.bf16.mxu1 %v9626_v38  ;;  %10168 = vst [vmem:[#allocation17_spill] sm:$0xff] %v10133_v32 }
 0x429   :  { %7704 = vmatpush2.bf16.msra.mxu0 %v9621_v42  ;;  %v10137_v39 = vpop.f32.mrf.mxu1 }
 0x42a   :  { %7705 = vmatprep.subr.bf16.mxu0 %v9629_v50  ;;  %10169 = vst [vmem:[#allocation18_spill] sm:$0xff] %v10137_v39 }
 0x42b   :  { %7747 = vmatpush2.bf16.msra.mxu1 %v9624_v61 }
 0x42c   :  { %7748 = vmatprep.subr.bf16.mxu1 %v9632_v41 }
 0x42d   :  { %7706 = vmatpush2.bf16.msra.mxu0 %v9627_v45  ;;  %v4501_v45 = vld [vmem:[#allocation10] sm:$0xf] }
 0x42e   :  { %7707 = vmatprep.subr.bf16.mxu0 %v9635_v2 }
 0x42f   :  { %7749 = vmatpush2.bf16.msra.mxu1 %v9630_v51  ;;  %v4510_v51 = vrot.slane %v4501_v45, %v9965_v58  ;;  %v4518_v58 = vrot.slane %v4501_v45, %v9968_v37 }
 0x430   :  { %7750 = vmatprep.subr.bf16.mxu1 %v9638_v36 }
 0x431   :  { %7708 = vmatpush2.bf16.msra.mxu0 %v9633_v54  ;;  %v4506_v54 = vrot.slane %v4501_v45, %v9893_v44 }
 0x432   :  { %7709 = vmatprep.subr.bf16.mxu0 %v9641_v55 }
 0x433   :  { %7751 = vmatpush2.bf16.msra.mxu1 %v9636_v11 }
 0x434   :  { %7752 = vmatprep.subr.bf16.mxu1 %v9644_v53  ;;  %v7120_v53 = vadd.f32 %v7119_v21, %v4510_v51 }
 0x435   :  { %7710 = vmatpush2.bf16.msra.mxu0 %v9639_v56  ;;  %v7118_v56 = vadd.f32 %v7117_v1, %v4506_v54 }
 0x436   :  { %7711 = vmatprep.subr.bf16.mxu0 %v9647_v23 }
 0x437   :  { %7753 = vmatpush2.bf16.msra.mxu1 %v9642_v47 }
 0x438   :  { %7754 = vmatprep.subr.bf16.mxu1 %v9650_v57  ;;  %v7163_v57 = vadd.f32 %v7162_v27, %v7120_v53 }
 0x439   :  { %7712 = vmatpush2.bf16.msra.mxu0 %v9645_v59  ;;  %v7124_v59 = vadd.f32 %v7123_v18, %v4510_v51 }
 0x43a   :  { %7713 = vmatprep.subr.bf16.mxu0 %v9653_v0  ;;  %v7161_v0 = vadd.f32 %v7160_v4, %v7118_v56 }
 0x43b   :  { %7755 = vmatpush2.bf16.msra.mxu1 %v9648_v62  ;;  %v4514_v62 = vrot.slane %v4501_v45, %v9908_v16 }
 0x43c   :  { %7756 = vmatprep.subr.bf16.mxu1 %v9656_v60  ;;  %v7122_v60 = vadd.f32 %v7121_v20, %v4506_v54 }
 0x43d   :  { %7714 = vmatpush2.bf16.msra.mxu0 %v9651_v52  ;;  %v7206_v52 = vadd.f32 %v7205_v8, %v7163_v57 }
 0x43e   :  { %7715 = vmatprep.subr.bf16.mxu0 %v9659_v34 }
 0x43f   :  { %7757 = vmatpush2.bf16.msra.mxu1 %v9654_v9  ;;  %v7249_v32 = vadd.f32 %v7248_v12, %v7206_v52 }
 0x440   :  { %7758 = vmatprep.subr.bf16.mxu1 %v9662_v40  ;;  %v7167_v40 = vadd.f32 %v7166_v10, %v7124_v59  ;;  %v9670_v59 = vld [vmem:[#allocation2 + $0x8] sm:$0xff] }
 0x441   :  { %7716 = vmatpush2.bf16.msra.mxu0 %v9657_v29  ;;  %v7204_v29 = vadd.f32 %v7203_v15, %v7161_v0  ;;  %v10171_v0 = vld [vmem:[#allocation18_spill] sm:$0xff] }
 0x442   :  { %v7210_v21 = vadd.f32 %v7209_v13, %v7167_v40  ;;  %v10172_v40 = vld [vmem:[#allocation17_spill] sm:$0xff] }
 0x443   :  { %7759 = vmatpush2.bf16.msra.mxu1 %v9660_v28  ;;  %v7165_v28 = vadd.f32 %v7164_v17, %v7122_v60  ;;  %v7247_v27 = vadd.f32 %v7246_v14, %v7204_v29 }
 0x444   :  { %7718 = vmatmul.mubr.bf16.vlgmr.msra.gmra.mxu0 %v10063_v30  ;;  %v7289_v30 = vpop.f32.mrf.mxu0  ;;  %v7253_v54 = vadd.f32 %v7252_v6, %v7210_v21 }
 0x445   :  { %v7208_v18 = vadd.f32 %v7207_v49, %v7165_v28  ;;  %v7290_v53 = vadd.f32 %v7289_v30, %v7247_v27 }
 0x446   :  { %7761 = vmatmul.mubr.bf16.vlgmr.msra.gmra.mxu1 %v10095_v48  ;;  %v7291_v48 = vpop.f32.mrf.mxu0  ;;  %v7504_v38 = vpop.f32.mrf.mxu1 }
 0x447   :  { %v7292_v51 = vadd.f32 %v7291_v48, %v7249_v32  ;;  %v7251_v15 = vadd.f32 %v10115_v7, %v7208_v18  ;;  %v7333_v14 = vadd.f32 %v10117_v35, %v7290_v53 }
 0x448   :  { %v10119_v19 = vpop.f32.mrf.mxu0  ;;  %v7506_v61 = vpop.f32.mrf.mxu1 }
 0x449   :  { %v7335_v17 = vadd.f32 %v7334_v43, %v7292_v51  ;;  %v7294_v49 = vadd.f32 %v10119_v19, %v7251_v15 }
 0x44a   :  { %v7295_v3 = vpop.f32.mrf.mxu0  ;;  %v7508_v41 = vpop.f32.mrf.mxu1 }
 0x44b   :  { %v7296_v12 = vadd.f32 %v7295_v3, %v7253_v54 }
 0x44c   :  { %v10125_v25 = vpop.f32.mrf.mxu0  ;;  %v7510_v36 = vpop.f32.mrf.mxu1 }
 0x44d   :  { %v7339_v30 = vadd.f32 %v10123_v5, %v7296_v12  ;;  %v9675_v12 = vld [vmem:[#allocation2 + $0x18] sm:$0xff] }
 0x44e   :  { %v7377_v46 = vpop.f32.mrf.mxu0 }
 0x44f   :  { %v7378_v48 = vadd.f32 %v7377_v46, %v7335_v17 }
 0x450   :  { %v10131_v26 = vpop.f32.mrf.mxu0 }
 0x451   :  { %10167 = vst [vmem:[#allocation16_spill] sm:$0xff] %v10131_v26 }
 0x452   :  { %v10135_v63 = vpop.f32.mrf.mxu0 }
 0x453   :  { %v7382_v35 = vadd.f32 %v10135_v63, %v7339_v30 }
 0x454   :  { %v7461_v33 = vpop.f32.mrf.mxu0 }
 0x455   :  { %v7462_v44 = vadd.f32 %v7461_v33, %v4514_v62  ;;  %v7425_v60 = vadd.f32 %v10171_v0, %v7382_v35 }
 0x456   :  { %v7463_v42 = vpop.f32.mrf.mxu0 }
 0x457   :  { %v7464_v39 = vadd.f32 %v7463_v42, %v4518_v58  ;;  %v7505_v4 = vadd.f32 %v7504_v38, %v7462_v44 }
 0x458   :  { %v7465_v50 = vpop.f32.mrf.mxu0 }
 0x459   :  { %v7466_v20 = vadd.f32 %v7465_v50, %v4514_v62  ;;  %v7507_v37 = vadd.f32 %v7506_v61, %v7464_v39  ;;  %v7376_v39 = vadd.f32 %v10125_v25, %v7333_v14  ;;  %v9676_v14 = vld [vmem:[#allocation2 + $0x30] sm:$0xff] }
 0x45a   :  { %v7467_v2 = vpop.f32.mrf.mxu0 }
 0x45b   :  { %v7468_v45 = vadd.f32 %v7467_v2, %v4518_v58  ;;  %v7509_v33 = vadd.f32 %v7508_v41, %v7466_v20  ;;  %v7337_v41 = vadd.f32 %v10121_v22, %v7294_v49  ;;  %v7421_v2 = vadd.f32 %v10129_v31, %v7378_v48  ;;  %v9671_v58 = vld [vmem:[#allocation2] sm:$0xff] }
 0x45d   :  { %v7511_v32 = vadd.f32 %v7510_v36, %v7468_v45  ;;  %v7419_v36 = vadd.f32 %v10127_v24, %v7376_v39  ;;  %v7772_v62 = vadd.f32 %v9670_v59, %v7421_v2 }
 0x484   :  { %v7547_v11 = vpop.f32.mrf.mxu0 }
 0x485   :  { %v7548_v10 = vadd.f32 %v7547_v11, %v7505_v4  ;;  %v10170_v11 = vld [vmem:[#allocation16_spill] sm:$0xff] }
 0x486   :  { %v7590_v55 = vpop.f32.mrf.mxu1  ;;  %v7549_v47 = vpop.f32.mrf.mxu0  ;;  %v9673_v4 = vld [vmem:[#allocation2 + $0x10] sm:$0xff] }
 0x487   :  { %v7550_v42 = vadd.f32 %v7549_v47, %v7507_v37  ;;  %v7591_v38 = vadd.f32 %v7590_v55, %v7548_v10  ;;  %v7380_v55 = vadd.f32 %v10170_v11, %v7337_v41  ;;  %v9674_v37 = vld [vmem:[#allocation2 + $0x20] sm:$0xff] }
 0x488   :  { %v7592_v23 = vpop.f32.mrf.mxu1  ;;  %v7551_v9 = vpop.f32.mrf.mxu0 }
 0x489   :  { %v7552_v6 = vadd.f32 %v7551_v9, %v7509_v33  ;;  %v7593_v7 = vadd.f32 %v7592_v23, %v7550_v42  ;;  %v7423_v24 = vadd.f32 %v10172_v40, %v7380_v55 }
 0x48a   :  { %v7594_v34 = vpop.f32.mrf.mxu1  ;;  %v7553_v1 = vpop.f32.mrf.mxu0 }
 0x48b   :  { %v7554_v43 = vadd.f32 %v7553_v1, %v7511_v32  ;;  %v7595_v19 = vadd.f32 %v7594_v34, %v7552_v6  ;;  %v7771_v34 = vadd.f32 %v9671_v58, %v7419_v36  ;;  %v9672_v1 = vld [vmem:[#allocation2 + $0x28] sm:$0xff]  ;;  %v7775_v45 = vadd.f32 %v9674_v37, %v7423_v24 }
 0x48c   :  { %v7596_v26 = vpop.f32.mrf.mxu1  ;;  %v7776_v27 = vadd.f32 %v9672_v1, %v7425_v60 }
 0x48d   :  { %v7597_v47 = vadd.f32 %v7596_v26, %v7554_v43  ;;  %v7779_v51 = vadd.f32 %v7772_v62, %v7771_v34 }
 0x4c4   :  { %v7633_v16 = vpop.f32.mrf.mxu0 }
 0x4c5   :  { %v7634_v3 = vadd.f32 %v7633_v16, %v7591_v38  ;;  %v9677_v38 = vld [vmem:[#allocation2 + $0x38] sm:$0xff] }
 0x4c6   :  { %v7676_v8 = vpop.f32.mrf.mxu1  ;;  %v7635_v13 = vpop.f32.mrf.mxu0 }
 0x4c7   :  { %v7636_v46 = vadd.f32 %v7635_v13, %v7593_v7  ;;  %v7677_v25 = vadd.f32 %v7676_v8, %v7634_v3 }
 0x4c8   :  { %v7678_v56 = vpop.f32.mrf.mxu1  ;;  %v7637_v61 = vpop.f32.mrf.mxu0 }
 0x4c9   :  { %v7638_v57 = vadd.f32 %v7637_v61, %v7595_v19  ;;  %v7679_v52 = vadd.f32 %v7678_v56, %v7636_v46  ;;  %v7784_v56 = vadd.f32 %v7776_v27, %v7775_v45 }
 0x4ca   :  { %v7680_v50 = vpop.f32.mrf.mxu1  ;;  %v7639_v5 = vpop.f32.mrf.mxu0 }
 0x4cb   :  { %v7640_v31 = vadd.f32 %v7639_v5, %v7597_v47  ;;  %v7681_v44 = vadd.f32 %v7680_v50, %v7638_v57 }
 0x4cc   :  { %v7682_v23 = vpop.f32.mrf.mxu1 }
 0x4cd   :  { %v7683_v16 = vadd.f32 %v7682_v23, %v7640_v31 }
 0x504   :  { %v7719_v22 = vpop.f32.mrf.mxu0 }
 0x505   :  { %v7720_v9 = vadd.f32 %v7719_v22, %v7677_v25 }
 0x506   :  { %v7762_v63 = vpop.f32.mrf.mxu1  ;;  %v7721_v29 = vpop.f32.mrf.mxu0 }
 0x507   :  { %v7763_v28 = vadd.f32 %v7762_v63, %v7720_v9  ;;  %v7722_v26 = vadd.f32 %v7721_v29, %v7679_v52 }
 0x508   :  { %v7764_v21 = vpop.f32.mrf.mxu1  ;;  %v7723_v18 = vpop.f32.mrf.mxu0 }
 0x509   :  { %v7773_v20 = vadd.f32 %v9673_v4, %v7763_v28  ;;  %v7765_v8 = vadd.f32 %v7764_v21, %v7722_v26  ;;  %v7724_v54 = vadd.f32 %v7723_v18, %v7681_v44 }
 0x50a   :  { %v7766_v53 = vpop.f32.mrf.mxu1  ;;  %v7725_v10 = vpop.f32.mrf.mxu0 }
 0x50b   :  { %v7767_v15 = vadd.f32 %v7766_v53, %v7724_v54  ;;  %v7726_v17 = vadd.f32 %v7725_v10, %v7683_v16  ;;  %v7774_v13 = vadd.f32 %v9675_v12, %v7765_v8  ;;  %v7780_v33 = vadd.f32 %v7779_v51, %v7773_v20 }
 0x50c   :  { %v7768_v42 = vpop.f32.mrf.mxu1 }
 0x50d   :  { %v7777_v49 = vadd.f32 %v9676_v14, %v7767_v15  ;;  %v7769_v48 = vadd.f32 %v7768_v42, %v7726_v17  ;;  %v7781_v32 = vadd.f32 %v7780_v33, %v7774_v13 }
 0x50f   :  { %v7778_v6 = vadd.f32 %v9677_v38, %v7769_v48  ;;  %7782 = vadd.xlane.f32.xlu0 %v7781_v32  ;;  %v7785_v30 = vadd.f32 %v7784_v56, %v7777_v49 }
 0x511   :  { %v7786_v39 = vadd.f32 %v7785_v30, %v7778_v6 }
 0x513   :  { %7787 = vadd.xlane.f32.xlu0 %v7786_v39 }
 0x598   :  { %v7783_v61 = vpop.xlane.xlu0 %7782 }
 0x599   :  { %v7790_v7 = vmul.f32 0.001953125, %v7783_v61 }
 0x59b   :  { %v7792_v43 = vsub.f32 %v7771_v34, %v7790_v7  ;;  %v7793_v3 = vsub.f32 %v7772_v62, %v7790_v7  ;;  %v7794_v50 = vsub.f32 %v7773_v20, %v7790_v7  ;;  %v7795_v2 = vsub.f32 %v7774_v13, %v7790_v7 }
 0x59c   :  { %v7788_v41 = vpop.xlane.xlu0 %7787 }
 0x59d   :  { %v7791_v35 = vmul.f32 0.001953125, %v7788_v41  ;;  %v7800_v19 = vmul.f32 %v7792_v43, %v7792_v43  ;;  %v7801_v46 = vmul.f32 %v7793_v3, %v7793_v3  ;;  %v7802_v36 = vmul.f32 %v7794_v50, %v7794_v50 }
 0x59e   :  { %v7803_v25 = vmul.f32 %v7795_v2, %v7795_v2 }
 0x59f   :  { %v7796_v11 = vsub.f32 %v7775_v45, %v7791_v35  ;;  %v7797_v55 = vsub.f32 %v7776_v27, %v7791_v35  ;;  %v7808_v5 = vadd.f32 %v7801_v46, %v7800_v19  ;;  %v7798_v47 = vsub.f32 %v7777_v49, %v7791_v35 }
 0x5a0   :  { %v7799_v23 = vsub.f32 %v7778_v6, %v7791_v35 }
 0x5a1   :  { %v7809_v57 = vadd.f32 %v7808_v5, %v7802_v36  ;;  %v7804_v59 = vmul.f32 %v7796_v11, %v7796_v11  ;;  %v7805_v0 = vmul.f32 %v7797_v55, %v7797_v55  ;;  %v7806_v22 = vmul.f32 %v7798_v47, %v7798_v47 }
 0x5a2   :  { %v7807_v62 = vmul.f32 %v7799_v23, %v7799_v23 }
 0x5a3   :  { %v7810_v60 = vadd.f32 %v7809_v57, %v7803_v25  ;;  %v7813_v52 = vadd.f32 %v7805_v0, %v7804_v59 }
 0x5a5   :  { %7811 = vadd.xlane.f32.xlu1 %v7810_v60  ;;  %v7814_v31 = vadd.f32 %v7813_v52, %v7806_v22 }
 0x5a7   :  { %v7815_v9 = vadd.f32 %v7814_v31, %v7807_v62 }
 0x5a9   :  { %7816 = vadd.xlane.f32.xlu1 %v7815_v9 }
 0x62e   :  { %v7812_v63 = vpop.xlane.xlu1 %7811 }
 0x62f   :  { %v7818_v58 = vmul.f32 0.001953125, %v7812_v63 }
 0x631   :  { %v7820_v34 = vadd.f32 1e-05, %v7818_v58 }
 0x632   :  { %v7817_v40 = vpop.xlane.xlu1 %7816 }
 0x633   :  { %9663 = vrsqrt.f32 %v7820_v34  ;;  %v7819_v24 = vmul.f32 0.001953125, %v7817_v40 }
 0x635   :  { %v7821_v29 = vadd.f32 1e-05, %v7819_v24 }
 0x637   :  { %9665 = vrsqrt.f32 %v7821_v29 }
 0x640   :  { %v9664_v44 = vpop.eup %9663 }
 0x641   :  { %v7824_v28 = vmul.f32 %v9664_v44, %v7792_v43  ;;  %v7825_v26 = vmul.f32 %v9664_v44, %v7793_v3  ;;  %v7826_v21 = vmul.f32 %v9664_v44, %v7794_v50  ;;  %v7827_v1 = vmul.f32 %v9664_v44, %v7795_v2 }
 0x643   :  { %7832 = vst [vmem:[#allocation11] sm:$0xff] %v7824_v28  ;;  %7833 = vst [vmem:[#allocation11 + $0x8] sm:$0xff] %v7825_v26 }
 0x644   :  { %7834 = vst [vmem:[#allocation11 + $0x10] sm:$0xff] %v7826_v21  ;;  %7835 = vst [vmem:[#allocation11 + $0x18] sm:$0xff] %v7827_v1  ;;  %v9666_v27 = vpop.eup %9665 }
 0x645   :  { %v7828_v18 = vmul.f32 %v9666_v27, %v7796_v11  ;;  %v7829_v51 = vmul.f32 %v9666_v27, %v7797_v55  ;;  %v7830_v16 = vmul.f32 %v9666_v27, %v7798_v47  ;;  %v7831_v4 = vmul.f32 %v9666_v27, %v7799_v23 }
 0x647   :  { %7836 = vst [vmem:[#allocation11 + $0x20] sm:$0xff] %v7828_v18  ;;  %7837 = vst [vmem:[#allocation11 + $0x28] sm:$0xff] %v7829_v51 }
 0x648   :  { %7838 = vst [vmem:[#allocation11 + $0x30] sm:$0xff] %v7830_v16  ;;  %7839 = vst [vmem:[#allocation11 + $0x38] sm:$0xff] %v7831_v4 }
 0x649   :  { %9789 = shalt.err (!%p9786_p1)
}
 0x64a   :  { %7851 = dma.vmem_to_hbm [thread:$0]  %s7846_s4, 1024, %s10166_s5, [#allocation4], %s9813_s9, %s9813_s9, %s9814_s10  }
 0x64b   :  { %9804 = dma.done.wait [#allocation4], 1024  }
 0x64c   :  { %9805 = vsyncadd [#allocation4], 4294966272 }
 0x64d   :  { %7855 = vsyncpa [#allocation3], 1 }
 0x64e   :  { %7856 = vsyncpa [#allocation6], 1 }
 0x64f   :  { %7857 = vsyncpa [#allocation9], 1 }
 0x650   :  { %7858 = vsyncpa [#allocation4], 1 }

</bundles_post_ra>
